<compile_context>
chip_gen: v6e
topology: v6e:2x2x1
jax: 0.10.0
libtpu: 0.0.40
codegen_flags: <defaults>
</compile_context>

<pallas_src>
import functools

import jax
import jax.numpy as jnp
from jax.experimental import pallas as pl
from jax.experimental.pallas import tpu as pltpu

LEAKY_SLOPE = 0.2
BN_EPS = 1e-5

# Tap order (dd, dh, dw), kd-major / kw-minor -- must match the weight reshape below.
_TAPS = [(dd, dh, dw) for dd in (-1, 0, 1) for dh in (-1, 0, 1) for dw in (-1, 0, 1)]


def _vmem_limit_bytes():
    """~3/4 of physical VMEM, capped at 96 MiB (128 MiB parts) / 48 MiB (v7x)."""
    cap = 128 * 1024 * 1024
    try:
        cap = int(pltpu.get_tpu_info().vmem_capacity_bytes)
    except Exception:
        pass
    return int(min(max(cap * 3 // 4, 16 * 1024 * 1024), 96 * 1024 * 1024))


def _tap_masks(D, H, W, dtype):
    """Precomputed (27, D*H*W) {0,1} masks: 1 where the 3x3x3 tap stays in-volume."""
    HW, M = H * W, D * H * W
    lane = jnp.arange(M, dtype=jnp.int32)
    w_i = lane % W
    h_i = (lane // W) % H
    d_i = lane // HW
    rows = []
    for dd, dh, dw in _TAPS:
        m = jnp.ones((M,), jnp.bool_)
        if dd == -1: m = m & (d_i >= 1)
        if dd == 1:  m = m & (d_i <= D - 2)
        if dh == -1: m = m & (h_i >= 1)
        if dh == 1:  m = m & (h_i <= H - 2)
        if dw == -1: m = m & (w_i >= 1)
        if dw == 1:  m = m & (w_i <= W - 2)
        rows.append(m)
    return jnp.stack(rows, axis=0).astype(dtype)


# ----------------------------------------------------------------------------
# Pallas conv kernel:
#   [f32 BN-affine + fused LeakyReLU (+residual) prologue]
#   -> K-chunked im2col into a double-buffered VMEM scratch -> accumulated MXU matmuls
#   -> bias -> (conv_raw, per-batch sum/sumsq stats[, activated input for residual])
# ----------------------------------------------------------------------------
def _make_conv_kernel(D, H, W, Cin, Cout, *, has_prologue, n_act, has_resid,
                      emit_act, use_bf16, taps_per_chunk, slope=LEAKY_SLOPE):
    M = D * H * W
    HW = H * W
    P = HW + W + 1                       # max |flat offset| of any 3x3x3 tap
    mm_dtype = jnp.bfloat16 if use_bf16 else jnp.float32
    n_chunks = (27 + taps_per_chunk - 1) // taps_per_chunk

    def kernel(*refs):
        i = 0
        x_ref = refs[i]; i += 1                       # (1, Cin, M) f32
        aff_ref = None
        if has_prologue:
            aff_ref = refs[i]; i += 1                 # (Cin, 2)  [scale, shift]
        r_ref = None
        if has_resid:
            r_ref = refs[i]; i += 1                   # (1, Cin, M) f32
        w_ref = refs[i]; i += 1                       # (Cout, 27*Cin)  mm_dtype
        b_ref = refs[i]; i += 1                       # (Cout, 1) f32
        m_ref = refs[i]; i += 1                       # (27, M) mm_dtype {0,1}
        o_ref = refs[i]; i += 1                       # (1, Cout, M) f32
        st_ref = refs[i]; i += 1                      # (1, Cout, 2) f32
        act_ref = None
        if emit_act:
            act_ref = refs[i]; i += 1                 # (1, Cin, M) f32
        pbuf_ref = refs[i]                            # (2, taps_per_chunk*Cin, M)

        # ---- prologue (all f32): previous layer's BN + fused LeakyReLU + residual ----
        x = x_ref[0]                                  # (Cin, M) f32
        if has_prologue:
            aff = aff_ref[...]
            x = x * aff[:, 0:1] + aff[:, 1:2]
            if n_act > 0:
                eff = slope ** n_act                  # LReLU^n fused into one select
                x = jnp.where(x >= 0.0, x, eff * x)
        if has_resid:
            x = x + r_ref[0]                          # residual add of ResBlockMid
        if emit_act:
            act_ref[0] = x                            # f32, needed later as residual

        # ---- early cast for the MXU operands (bf16 on v6e/v7x) ----
        x_mm = x.astype(mm_dtype)
        zpad = jnp.zeros((Cin, P), mm_dtype)
        xpad = jnp.concatenate([zpad, x_mm, zpad], axis=1)      # (Cin, M + 2P)

        # ---- K-chunked im2col + accumulated matmul ----
        acc = None
        for c in range(n_chunks):
            t0 = c * taps_per_chunk
            t1 = min(27, t0 + taps_per_chunk)
            slot = c % 2                              # double buffer: build c+1 while
            for t in range(t0, t1):                   # the MXU consumes chunk c
                dd, dh, dw = _TAPS[t]
                off = dd * HW + dh * W + dw
                win = xpad[:, P + off:P + off + M]    # (Cin, M) shifted window
                if (dd, dh, dw) != (0, 0, 0):
                    win = win * m_ref[t:t + 1, :]     # precomputed halo mask
                r0 = (t - t0) * Cin
                pbuf_ref[slot, r0:r0 + Cin, :] = win
            rows = (t1 - t0) * Cin
            part = jnp.dot(w_ref[:, t0 * Cin:t1 * Cin],
                           pbuf_ref[slot, 0:rows, :],
                           preferred_element_type=jnp.float32)
            acc = part if acc is None else acc + part

        y = acc + b_ref[...]                          # conv bias, f32 (Cout, M)
        o_ref[0] = y

        # BatchNorm batch statistics (per channel): sum and sum of squares.
        # NOTE: E[x^2]-E[x]^2 in f32; conv outputs are near zero-mean so cancellation
        # is benign at these sizes (see review); revisit if M-tiling is added.
        s = jnp.sum(y, axis=1, keepdims=True)                   # (Cout, 1)
        ss = jnp.sum(y * y, axis=1, keepdims=True)              # (Cout, 1)
        st_ref[0] = jnp.concatenate([s, ss], axis=1)            # (Cout, 2)

    return kernel


def conv3d_bn_stats(x, w, b, dims, masks, *, affine=None, resid=None, n_act=2,
                    emit_act=False, use_bf16=False, taps_per_chunk=8,
                    vmem_limit=None):
    """x: (N, Cin, D*H*W) f32; w: (3,3,3,Cin,Cout) DHWIO; b: (Cout,).

    Returns (conv_raw (N,Cout,M), stats (N,Cout,2)[, activated_input (N,Cin,M)]).
    """
    D, H, W = dims
    N, Cin, M = x.shape
    assert M == D * H * W
    Cout = w.shape[-1]
    K = 27 * Cin
    mm_dtype = jnp.bfloat16 if use_bf16 else jnp.float32
    # (kd, kh, kw, cin) flattened kd-major / cin-minor to match the tap ordering;
    # cast to the MXU operand dtype in the wrapper (review: pass weights in as bf16).
    w2d = jnp.transpose(w, (4, 0, 1, 2, 3)).reshape(Cout, K).astype(mm_dtype)
    b2 = b.reshape(Cout, 1).astype(jnp.float32)
    masks = masks.astype(mm_dtype)

    has_prologue = affine is not None
    has_resid = resid is not None
    kernel = _make_conv_kernel(D, H, W, Cin, Cout,
                               has_prologue=has_prologue, n_act=n_act,
                               has_resid=has_resid, emit_act=emit_act,
                               use_bf16=use_bf16, taps_per_chunk=taps_per_chunk)

    inputs = [x]
    in_specs = [pl.BlockSpec((1, Cin, M), lambda n: (n, 0, 0))]
    if has_prologue:
        inputs.append(affine)
        in_specs.append(pl.BlockSpec((Cin, 2), lambda n: (0, 0)))
    if has_resid:
        inputs.append(resid)
        in_specs.append(pl.BlockSpec((1, Cin, M), lambda n: (n, 0, 0)))
    inputs += [w2d, b2, masks]
    in_specs += [pl.BlockSpec((Cout, K), lambda n: (0, 0)),
                 pl.BlockSpec((Cout, 1), lambda n: (0, 0)),
                 pl.BlockSpec((27, M), lambda n: (0, 0))]

    out_shape = [jax.ShapeDtypeStruct((N, Cout, M), jnp.float32),
                 jax.ShapeDtypeStruct((N, Cout, 2), jnp.float32)]
    out_specs = [pl.BlockSpec((1, Cout, M), lambda n: (n, 0, 0)),
                 pl.BlockSpec((1, Cout, 2), lambda n: (n, 0, 0))]
    if emit_act:
        out_shape.append(jax.ShapeDtypeStruct((N, Cin, M), jnp.float32))
        out_specs.append(pl.BlockSpec((1, Cin, M), lambda n: (n, 0, 0)))

    if vmem_limit is None:
        vmem_limit = _vmem_limit_bytes()

    return pl.pallas_call(
        kernel,
        grid=(N,),
        in_specs=in_specs,
        out_specs=tuple(out_specs),
        out_shape=tuple(out_shape),
        scratch_shapes=[pltpu.VMEM((2, taps_per_chunk * Cin, M), mm_dtype)],
        compiler_params=pltpu.CompilerParams(
            dimension_semantics=("parallel",),
            vmem_limit_bytes=vmem_limit),
    )(*inputs)


# ----------------------------------------------------------------------------
# Glue: turn accumulated (sum, sumsq) into a per-channel BN affine (scale, shift)
# ----------------------------------------------------------------------------
def _bn_affine(stats, gamma, beta, count, eps=BN_EPS):
    s = jnp.sum(stats, axis=0)                     # (C, 2) over the batch axis
    mean = s[:, 0] / count
    var = jnp.maximum(s[:, 1] / count - mean * mean, 0.0)   # biased variance
    inv = jax.lax.rsqrt(var + eps)
    scale = gamma * inv
    shift = beta - mean * scale
    return jnp.stack([scale, shift], axis=1).astype(jnp.float32)   # (C, 2)


# ----------------------------------------------------------------------------
# Midblock forward (NCDHW in / NCDHW out)
# ----------------------------------------------------------------------------
def midblock_forward(z, params, *, use_bf16=False, taps_per_chunk=8):
    N, C, D, H, W = z.shape
    M = D * H * W
    dims = (D, H, W)
    count = float(N * M)
    x = z.reshape(N, C, M).astype(jnp.float32)     # contiguous, free reshape

    masks = _tap_masks(D, H, W, jnp.bfloat16 if use_bf16 else jnp.float32)
    conv = functools.partial(conv3d_bn_stats, dims=dims, masks=masks,
                             use_bf16=use_bf16, taps_per_chunk=taps_per_chunk)

    p0, p1, pf = params['res0'], params['res1'], params['final']

    # --- res0 ---------------------------------------------------------------
    y1, st1 = conv(x, p0['w1'], p0['b1'])
    a1 = _bn_affine(st1, p0['g1'], p0['be1'], count)
    # conv2's prologue computes a = LReLU^2(BN1(y1)) in VMEM and also emits it
    # (needed as the residual of res0).
    y2, st2, a_act = conv(y1, p0['w2'], p0['b2'], affine=a1, n_act=2, emit_act=True)
    a2 = _bn_affine(st2, p0['g2'], p0['be2'], count)

    # --- res1 (its conv1 prologue finishes res0: a + LReLU^2(BN2(y2))) -------
    y3, st3 = conv(y2, p1['w1'], p1['b1'], affine=a2, resid=a_act, n_act=2)
    a3 = _bn_affine(st3, p1['g1'], p1['be1'], count)
    y4, st4, c_act = conv(y3, p1['w2'], p1['b2'], affine=a3, n_act=2, emit_act=True)
    a4 = _bn_affine(st4, p1['g2'], p1['be2'], count)

    # --- conv_1_block conv (prologue finishes res1) --------------------------
    y5, st5 = conv(y4, pf['w'], pf['b'], affine=a4, resid=c_act, n_act=2)
    # BN stats of the nearest-upsampled tensor equal those of the pre-upsample
    # tensor (each value is replicated 4x), so the affine from y5's stats is exact.
    a5 = _bn_affine(st5, pf['g'], pf['be'], count)

    # --- final BN + LeakyReLU + nearest upsample (1,2,2): elementwise tail ---
    yb = y5.reshape(N, C, D, H, W)
    yb = yb * a5[:, 0].reshape(1, C, 1, 1, 1) + a5[:, 1].reshape(1, C, 1, 1, 1)
    yb = jnp.where(yb >= 0.0, yb, LEAKY_SLOPE * yb)
    out = jnp.broadcast_to(yb[:, :, :, :, None, :, None],
                           (N, C, D, H, 2, W, 2)).reshape(N, C, D, 2 * H, 2 * W)
    return out


# ----------------------------------------------------------------------------
# Parameter init (mimics PyTorch defaults, deterministic given the key)
# ----------------------------------------------------------------------------
def _init_conv(key, cin, cout):
    kw, kb = jax.random.split(key)
    bound = 1.0 / jnp.sqrt(jnp.float32(cin * 27))
    w = jax.random.uniform(kw, (3, 3, 3, cin, cout), jnp.float32, -bound, bound)
    b = jax.random.uniform(kb, (cout,), jnp.float32, -bound, bound)
    return w, b


def _init_resblock(key, c):
    k1, k2 = jax.random.split(key)
    w1, b1 = _init_conv(k1, c, c)
    w2, b2 = _init_conv(k2, c, c)
    ones = jnp.ones((c,), jnp.float32)
    zeros = jnp.zeros((c,), jnp.float32)
    return dict(w1=w1, b1=b1, g1=ones, be1=zeros,
                w2=w2, b2=b2, g2=ones, be2=zeros)


def init_midblock_params(key, gf_dim=16):
    c = gf_dim * 2
    k0, k1, kf = jax.random.split(key, 3)
    wf, bf = _init_conv(kf, c, c)
    return dict(res0=_init_resblock(k0, c),
                res1=_init_resblock(k1, c),
                final=dict(w=wf, b=bf,
                           g=jnp.ones((c,), jnp.float32),
                           be=jnp.zeros((c,), jnp.float32)))


# ----------------------------------------------------------------------------
# Pure-JAX reference (independent correctness check)
# ----------------------------------------------------------------------------
def _ref_conv(x, w, b):
    y = jax.lax.conv_general_dilated(
        x, w, window_strides=(1, 1, 1), padding='SAME',
        dimension_numbers=('NDHWC', 'DHWIO', 'NDHWC'),
        precision=jax.lax.Precision.HIGHEST)
    return y + b


def _ref_bn_act(x, gamma, beta, n_act, eps=BN_EPS, slope=LEAKY_SLOPE):
    mean = jnp.mean(x, axis=(0, 1, 2, 3), keepdims=True)
    var = jnp.mean((x - mean) ** 2, axis=(0, 1, 2, 3), keepdims=True)
    y = (x - mean) * jax.lax.rsqrt(var + eps) * gamma + beta
    for _ in range(n_act):
        y = jnp.where(y >= 0.0, y, slope * y)
    return y


def _ref_resblock(x, p):
    a = _ref_bn_act(_ref_conv(x, p['w1'], p['b1']), p['g1'], p['be1'], 2)
    b = _ref_bn_act(_ref_conv(a, p['w2'], p['b2']), p['g2'], p['be2'], 2)
    return a + b


def _ref_upsample(x):   # NDHWC, nearest, scale (1, 2, 2)
    N, D, H, W, C = x.shape
    x = jnp.broadcast_to(x[:, :, :, None, :, None, :], (N, D, H, 2, W, 2, C))
    return x.reshape(N, D, 2 * H, 2 * W, C)


def midblock_reference(z, params):
    x = jnp.transpose(z, (0, 2, 3, 4, 1)).astype(jnp.float32)
    x = _ref_resblock(x, params['res0'])
    x = _ref_resblock(x, params['res1'])
    pf = params['final']
    x = _ref_conv(x, pf['w'], pf['b'])
    x = _ref_upsample(x)
    x = _ref_bn_act(x, pf['g'], pf['be'], 1)
    return jnp.transpose(x, (0, 4, 1, 2, 3))


# ----------------------------------------------------------------------------
if __name__ == "__main__":
    gf_dim = 16
    N, C = 2, 2 * gf_dim
    D, H, W = 4, 8, 8                      # small latent volume; M = 256 (lane-dense)

    key = jax.random.PRNGKey(0)
    kz, kp = jax.random.split(key)
    z = jax.random.normal(kz, (N, C, D, H, W), jnp.float32)     # NCDHW
    params = init_midblock_params(kp, gf_dim=gf_dim)

    # f32-matmul path: strict check against the HIGHEST-precision reference.
    fwd_f32 = jax.jit(functools.partial(midblock_forward, use_bf16=False))
    out = jax.block_until_ready(fwd_f32(z, params))
    assert out.shape == (N, C, D, 2 * H, 2 * W), out.shape

    ref = jax.block_until_ready(jax.jit(midblock_reference)(z, params))
    err_f32 = float(jnp.max(jnp.abs(out - ref)))
    assert err_f32 < 2e-3, f"f32 max abs err too large: {err_f32}"

    # bf16-MXU path (v6e/v7x): f32 accumulation; bf16 operand rounding gives
    # ~1e-2-level deviations through 5 conv+BN layers, so check relative RMS.
    fwd_bf16 = jax.jit(functools.partial(midblock_forward, use_bf16=True))
    out_bf16 = jax.block_until_ready(fwd_bf16(z, params))
    rms_ref = float(jnp.sqrt(jnp.mean(ref * ref)))
    rms_err = float(jnp.sqrt(jnp.mean((out_bf16 - ref) ** 2)))
    assert rms_err < 0.05 * max(rms_ref, 1.0), (rms_err, rms_ref)

    print("KERNEL_OK")
</pallas_src>

<mosaic_0001>
module attributes {stable_mosaic.version = 11 : i64} {
  func.func @kernel(%arg0: i32, %arg1: memref<1x32x256xf32, #tpu.memory_space<vmem>>, %arg2: memref<32x2xf32, #tpu.memory_space<vmem>>, %arg3: memref<1x32x256xf32, #tpu.memory_space<vmem>>, %arg4: memref<32x864xf32, #tpu.memory_space<vmem>>, %arg5: memref<32x1xf32, #tpu.memory_space<vmem>>, %arg6: memref<27x256xf32, #tpu.memory_space<vmem>>, %arg7: memref<1x32x256xf32, #tpu.memory_space<vmem>>, %arg8: memref<1x32x2xf32, #tpu.memory_space<vmem>>, %arg9: memref<2x256x256xf32, #tpu.memory_space<vmem>>) attributes {dimension_semantics = [#tpu.dimension_semantics<parallel>], iteration_bounds = array<i64: 2>, scalar_prefetch = 0 : i64, scratch_operands = 1 : i64, tpu.core_type = #tpu.core_type<tc>, window_params = [{transform_indices = @transform_0, window_bounds = array<i64: 1, 32, 256>}, {pipeline_mode = #tpu.pipeline_mode<synchronous>, transform_indices = @transform_1, window_bounds = array<i64: 32, 2>}, {transform_indices = @transform_2, window_bounds = array<i64: 1, 32, 256>}, {pipeline_mode = #tpu.pipeline_mode<synchronous>, transform_indices = @transform_3, window_bounds = array<i64: 32, 864>}, {pipeline_mode = #tpu.pipeline_mode<synchronous>, transform_indices = @transform_4, window_bounds = array<i64: 32, 1>}, {pipeline_mode = #tpu.pipeline_mode<synchronous>, transform_indices = @transform_5, window_bounds = array<i64: 27, 256>}, {transform_indices = @transform_6, window_bounds = array<i64: 1, 32, 256>}, {transform_indices = @transform_7, window_bounds = array<i64: 1, 32, 2>}]} {
    %c0 = arith.constant 0 : index
    %c0_0 = arith.constant 0 : index
    %c0_1 = arith.constant 0 : index
    %0 = vector.load %arg1[%c0, %c0_0, %c0_1] : memref<1x32x256xf32, #tpu.memory_space<vmem>>, vector<1x32x256xf32>
    %1 = vector.shape_cast %0 : vector<1x32x256xf32> to vector<32x256xf32>
    %c0_2 = arith.constant 0 : index
    %c0_3 = arith.constant 0 : index
    %2 = vector.load %arg2[%c0_2, %c0_3] : memref<32x2xf32, #tpu.memory_space<vmem>>, vector<32x2xf32>
    %3 = vector.extract_strided_slice %2 {offsets = [0, 0], sizes = [32, 1], strides = [1, 1]} : vector<32x2xf32> to vector<32x1xf32>
    %4 = vector.broadcast %3 : vector<32x1xf32> to vector<32x256xf32>
    %5 = arith.mulf %1, %4 : vector<32x256xf32>
    %6 = vector.extract_strided_slice %2 {offsets = [0, 1], sizes = [32, 1], strides = [1, 1]} : vector<32x2xf32> to vector<32x1xf32>
    %7 = vector.broadcast %6 : vector<32x1xf32> to vector<32x256xf32>
    %8 = arith.addf %5, %7 : vector<32x256xf32>
    %cst = arith.constant 0.000000e+00 : f32
    %9 = vector.broadcast %cst : f32 to vector<32x256xf32>
    %10 = arith.cmpf oge, %8, %9 : vector<32x256xf32>
    %cst_4 = arith.constant 4.000000e-02 : f32
    %11 = vector.broadcast %cst_4 : f32 to vector<32x256xf32>
    %12 = arith.mulf %11, %8 : vector<32x256xf32>
    %13 = arith.select %10, %8, %12 : vector<32x256xi1>, vector<32x256xf32>
    %c0_5 = arith.constant 0 : index
    %c0_6 = arith.constant 0 : index
    %c0_7 = arith.constant 0 : index
    %14 = vector.load %arg3[%c0_5, %c0_6, %c0_7] : memref<1x32x256xf32, #tpu.memory_space<vmem>>, vector<1x32x256xf32>
    %15 = vector.shape_cast %14 : vector<1x32x256xf32> to vector<32x256xf32>
    %16 = arith.addf %13, %15 : vector<32x256xf32>
    %cst_8 = arith.constant 0.000000e+00 : f32
    %17 = vector.broadcast %cst_8 : f32 to vector<32x73xf32>
    %18 = tpu.concatenate %17, %16, %17 in 1 : vector<32x73xf32>, vector<32x256xf32>, vector<32x73xf32> -> vector<32x402xf32>
    %19 = vector.extract_strided_slice %18 {offsets = [0, 0], sizes = [32, 256], strides = [1, 1]} : vector<32x402xf32> to vector<32x256xf32>
    %c0_9 = arith.constant 0 : index
    %c0_10 = arith.constant 0 : index
    %20 = vector.load %arg6[%c0_9, %c0_10] : memref<27x256xf32, #tpu.memory_space<vmem>>, vector<1x256xf32>
    %21 = vector.broadcast %20 : vector<1x256xf32> to vector<32x256xf32>
    %22 = arith.mulf %19, %21 : vector<32x256xf32>
    %c0_11 = arith.constant 0 : index
    %c0_12 = arith.constant 0 : index
    %c0_13 = arith.constant 0 : index
    %23 = vector.load %arg9[%c0_11, %c0_12, %c0_13] : memref<2x256x256xf32, #tpu.memory_space<vmem>>, vector<1x32x256xf32>
    %24 = vector.shape_cast %23 : vector<1x32x256xf32> to vector<32x256xf32>
    %25 = vector.shape_cast %22 : vector<32x256xf32> to vector<1x32x256xf32>
    tpu.vector_store %arg9[%c0_11, %c0_12, %c0_13], %25 {strides = array<i32>} : memref<2x256x256xf32, #tpu.memory_space<vmem>>, vector<1x32x256xf32>,
    %26 = vector.extract_strided_slice %18 {offsets = [0, 1], sizes = [32, 256], strides = [1, 1]} : vector<32x402xf32> to vector<32x256xf32>
    %c1 = arith.constant 1 : index
    %c0_14 = arith.constant 0 : index
    %27 = vector.load %arg6[%c1, %c0_14] : memref<27x256xf32, #tpu.memory_space<vmem>>, vector<1x256xf32>
    %28 = vector.broadcast %27 : vector<1x256xf32> to vector<32x256xf32>
    %29 = arith.mulf %26, %28 : vector<32x256xf32>
    %c0_15 = arith.constant 0 : index
    %c32 = arith.constant 32 : index
    %c0_16 = arith.constant 0 : index
    %30 = vector.load %arg9[%c0_15, %c32, %c0_16] : memref<2x256x256xf32, #tpu.memory_space<vmem>>, vector<1x32x256xf32>
    %31 = vector.shape_cast %30 : vector<1x32x256xf32> to vector<32x256xf32>
    %32 = vector.shape_cast %29 : vector<32x256xf32> to vector<1x32x256xf32>
    tpu.vector_store %arg9[%c0_15, %c32, %c0_16], %32 {strides = array<i32>} : memref<2x256x256xf32, #tpu.memory_space<vmem>>, vector<1x32x256xf32>,
    %33 = vector.extract_strided_slice %18 {offsets = [0, 2], sizes = [32, 256], strides = [1, 1]} : vector<32x402xf32> to vector<32x256xf32>
    %c2 = arith.constant 2 : index
    %c0_17 = arith.constant 0 : index
    %34 = vector.load %arg6[%c2, %c0_17] : memref<27x256xf32, #tpu.memory_space<vmem>>, vector<1x256xf32>
    %35 = vector.broadcast %34 : vector<1x256xf32> to vector<32x256xf32>
    %36 = arith.mulf %33, %35 : vector<32x256xf32>
    %c0_18 = arith.constant 0 : index
    %c64 = arith.constant 64 : index
    %c0_19 = arith.constant 0 : index
    %37 = vector.load %arg9[%c0_18, %c64, %c0_19] : memref<2x256x256xf32, #tpu.memory_space<vmem>>, vector<1x32x256xf32>
    %38 = vector.shape_cast %37 : vector<1x32x256xf32> to vector<32x256xf32>
    %39 = vector.shape_cast %36 : vector<32x256xf32> to vector<1x32x256xf32>
    tpu.vector_store %arg9[%c0_18, %c64, %c0_19], %39 {strides = array<i32>} : memref<2x256x256xf32, #tpu.memory_space<vmem>>, vector<1x32x256xf32>,
    %40 = vector.extract_strided_slice %18 {offsets = [0, 8], sizes = [32, 256], strides = [1, 1]} : vector<32x402xf32> to vector<32x256xf32>
    %c3 = arith.constant 3 : index
    %c0_20 = arith.constant 0 : index
    %41 = vector.load %arg6[%c3, %c0_20] : memref<27x256xf32, #tpu.memory_space<vmem>>, vector<1x256xf32>
    %42 = vector.broadcast %41 : vector<1x256xf32> to vector<32x256xf32>
    %43 = arith.mulf %40, %42 : vector<32x256xf32>
    %c0_21 = arith.constant 0 : index
    %c96 = arith.constant 96 : index
    %c0_22 = arith.constant 0 : index
    %44 = vector.load %arg9[%c0_21, %c96, %c0_22] : memref<2x256x256xf32, #tpu.memory_space<vmem>>, vector<1x32x256xf32>
    %45 = vector.shape_cast %44 : vector<1x32x256xf32> to vector<32x256xf32>
    %46 = vector.shape_cast %43 : vector<32x256xf32> to vector<1x32x256xf32>
    tpu.vector_store %arg9[%c0_21, %c96, %c0_22], %46 {strides = array<i32>} : memref<2x256x256xf32, #tpu.memory_space<vmem>>, vector<1x32x256xf32>,
    %47 = vector.extract_strided_slice %18 {offsets = [0, 9], sizes = [32, 256], strides = [1, 1]} : vector<32x402xf32> to vector<32x256xf32>
    %c4 = arith.constant 4 : index
    %c0_23 = arith.constant 0 : index
    %48 = vector.load %arg6[%c4, %c0_23] : memref<27x256xf32, #tpu.memory_space<vmem>>, vector<1x256xf32>
    %49 = vector.broadcast %48 : vector<1x256xf32> to vector<32x256xf32>
    %50 = arith.mulf %47, %49 : vector<32x256xf32>
    %c0_24 = arith.constant 0 : index
    %c128 = arith.constant 128 : index
    %c0_25 = arith.constant 0 : index
    %51 = vector.load %arg9[%c0_24, %c128, %c0_25] : memref<2x256x256xf32, #tpu.memory_space<vmem>>, vector<1x32x256xf32>
    %52 = vector.shape_cast %51 : vector<1x32x256xf32> to vector<32x256xf32>
    %53 = vector.shape_cast %50 : vector<32x256xf32> to vector<1x32x256xf32>
    tpu.vector_store %arg9[%c0_24, %c128, %c0_25], %53 {strides = array<i32>} : memref<2x256x256xf32, #tpu.memory_space<vmem>>, vector<1x32x256xf32>,
    %54 = vector.extract_strided_slice %18 {offsets = [0, 10], sizes = [32, 256], strides = [1, 1]} : vector<32x402xf32> to vector<32x256xf32>
    %c5 = arith.constant 5 : index
    %c0_26 = arith.constant 0 : index
    %55 = vector.load %arg6[%c5, %c0_26] : memref<27x256xf32, #tpu.memory_space<vmem>>, vector<1x256xf32>
    %56 = vector.broadcast %55 : vector<1x256xf32> to vector<32x256xf32>
    %57 = arith.mulf %54, %56 : vector<32x256xf32>
    %c0_27 = arith.constant 0 : index
    %c160 = arith.constant 160 : index
    %c0_28 = arith.constant 0 : index
    %58 = vector.load %arg9[%c0_27, %c160, %c0_28] : memref<2x256x256xf32, #tpu.memory_space<vmem>>, vector<1x32x256xf32>
    %59 = vector.shape_cast %58 : vector<1x32x256xf32> to vector<32x256xf32>
    %60 = vector.shape_cast %57 : vector<32x256xf32> to vector<1x32x256xf32>
    tpu.vector_store %arg9[%c0_27, %c160, %c0_28], %60 {strides = array<i32>} : memref<2x256x256xf32, #tpu.memory_space<vmem>>, vector<1x32x256xf32>,
    %61 = vector.extract_strided_slice %18 {offsets = [0, 16], sizes = [32, 256], strides = [1, 1]} : vector<32x402xf32> to vector<32x256xf32>
    %c6 = arith.constant 6 : index
    %c0_29 = arith.constant 0 : index
    %62 = vector.load %arg6[%c6, %c0_29] : memref<27x256xf32, #tpu.memory_space<vmem>>, vector<1x256xf32>
    %63 = vector.broadcast %62 : vector<1x256xf32> to vector<32x256xf32>
    %64 = arith.mulf %61, %63 : vector<32x256xf32>
    %c0_30 = arith.constant 0 : index
    %c192 = arith.constant 192 : index
    %c0_31 = arith.constant 0 : index
    %65 = vector.load %arg9[%c0_30, %c192, %c0_31] : memref<2x256x256xf32, #tpu.memory_space<vmem>>, vector<1x32x256xf32>
    %66 = vector.shape_cast %65 : vector<1x32x256xf32> to vector<32x256xf32>
    %67 = vector.shape_cast %64 : vector<32x256xf32> to vector<1x32x256xf32>
    tpu.vector_store %arg9[%c0_30, %c192, %c0_31], %67 {strides = array<i32>} : memref<2x256x256xf32, #tpu.memory_space<vmem>>, vector<1x32x256xf32>,
    %68 = vector.extract_strided_slice %18 {offsets = [0, 17], sizes = [32, 256], strides = [1, 1]} : vector<32x402xf32> to vector<32x256xf32>
    %c7 = arith.constant 7 : index
    %c0_32 = arith.constant 0 : index
    %69 = vector.load %arg6[%c7, %c0_32] : memref<27x256xf32, #tpu.memory_space<vmem>>, vector<1x256xf32>
    %70 = vector.broadcast %69 : vector<1x256xf32> to vector<32x256xf32>
    %71 = arith.mulf %68, %70 : vector<32x256xf32>
    %c0_33 = arith.constant 0 : index
    %c224 = arith.constant 224 : index
    %c0_34 = arith.constant 0 : index
    %72 = vector.load %arg9[%c0_33, %c224, %c0_34] : memref<2x256x256xf32, #tpu.memory_space<vmem>>, vector<1x32x256xf32>
    %73 = vector.shape_cast %72 : vector<1x32x256xf32> to vector<32x256xf32>
    %74 = vector.shape_cast %71 : vector<32x256xf32> to vector<1x32x256xf32>
    tpu.vector_store %arg9[%c0_33, %c224, %c0_34], %74 {strides = array<i32>} : memref<2x256x256xf32, #tpu.memory_space<vmem>>, vector<1x32x256xf32>,
    %c0_35 = arith.constant 0 : index
    %c0_36 = arith.constant 0 : index
    %75 = vector.load %arg4[%c0_35, %c0_36] : memref<32x864xf32, #tpu.memory_space<vmem>>, vector<32x256xf32>
    %c0_37 = arith.constant 0 : index
    %c0_38 = arith.constant 0 : index
    %c0_39 = arith.constant 0 : index
    %76 = vector.load %arg9[%c0_37, %c0_38, %c0_39] : memref<2x256x256xf32, #tpu.memory_space<vmem>>, vector<1x256x256xf32>
    %77 = vector.shape_cast %76 : vector<1x256x256xf32> to vector<256x256xf32>
    %cst_40 = arith.constant dense<0.000000e+00> : vector<32x256xf32>
    %78 = tpu.matmul %75, %77, %cst_40 {dimension_numbers = #tpu.dot_dimension_numbers<[1], [0], [0], [1], [0, 0, 1, 1], [], []>} : vector<32x256xf32>, vector<256x256xf32>, vector<32x256xf32> -> vector<32x256xf32>
    %79 = vector.extract_strided_slice %18 {offsets = [0, 18], sizes = [32, 256], strides = [1, 1]} : vector<32x402xf32> to vector<32x256xf32>
    %c8 = arith.constant 8 : index
    %c0_41 = arith.constant 0 : index
    %80 = vector.load %arg6[%c8, %c0_41] : memref<27x256xf32, #tpu.memory_space<vmem>>, vector<1x256xf32>
    %81 = vector.broadcast %80 : vector<1x256xf32> to vector<32x256xf32>
    %82 = arith.mulf %79, %81 : vector<32x256xf32>
    %c1_42 = arith.constant 1 : index
    %c0_43 = arith.constant 0 : index
    %c0_44 = arith.constant 0 : index
    %83 = vector.load %arg9[%c1_42, %c0_43, %c0_44] : memref<2x256x256xf32, #tpu.memory_space<vmem>>, vector<1x32x256xf32>
    %84 = vector.shape_cast %83 : vector<1x32x256xf32> to vector<32x256xf32>
    %85 = vector.shape_cast %82 : vector<32x256xf32> to vector<1x32x256xf32>
    tpu.vector_store %arg9[%c1_42, %c0_43, %c0_44], %85 {strides = array<i32>} : memref<2x256x256xf32, #tpu.memory_space<vmem>>, vector<1x32x256xf32>,
    %86 = vector.extract_strided_slice %18 {offsets = [0, 64], sizes = [32, 256], strides = [1, 1]} : vector<32x402xf32> to vector<32x256xf32>
    %c9 = arith.constant 9 : index
    %c0_45 = arith.constant 0 : index
    %87 = vector.load %arg6[%c9, %c0_45] : memref<27x256xf32, #tpu.memory_space<vmem>>, vector<1x256xf32>
    %88 = vector.broadcast %87 : vector<1x256xf32> to vector<32x256xf32>
    %89 = arith.mulf %86, %88 : vector<32x256xf32>
    %c1_46 = arith.constant 1 : index
    %c32_47 = arith.constant 32 : index
    %c0_48 = arith.constant 0 : index
    %90 = vector.load %arg9[%c1_46, %c32_47, %c0_48] : memref<2x256x256xf32, #tpu.memory_space<vmem>>, vector<1x32x256xf32>
    %91 = vector.shape_cast %90 : vector<1x32x256xf32> to vector<32x256xf32>
    %92 = vector.shape_cast %89 : vector<32x256xf32> to vector<1x32x256xf32>
    tpu.vector_store %arg9[%c1_46, %c32_47, %c0_48], %92 {strides = array<i32>} : memref<2x256x256xf32, #tpu.memory_space<vmem>>, vector<1x32x256xf32>,
    %93 = vector.extract_strided_slice %18 {offsets = [0, 65], sizes = [32, 256], strides = [1, 1]} : vector<32x402xf32> to vector<32x256xf32>
    %c10 = arith.constant 10 : index
    %c0_49 = arith.constant 0 : index
    %94 = vector.load %arg6[%c10, %c0_49] : memref<27x256xf32, #tpu.memory_space<vmem>>, vector<1x256xf32>
    %95 = vector.broadcast %94 : vector<1x256xf32> to vector<32x256xf32>
    %96 = arith.mulf %93, %95 : vector<32x256xf32>
    %c1_50 = arith.constant 1 : index
    %c64_51 = arith.constant 64 : index
    %c0_52 = arith.constant 0 : index
    %97 = vector.load %arg9[%c1_50, %c64_51, %c0_52] : memref<2x256x256xf32, #tpu.memory_space<vmem>>, vector<1x32x256xf32>
    %98 = vector.shape_cast %97 : vector<1x32x256xf32> to vector<32x256xf32>
    %99 = vector.shape_cast %96 : vector<32x256xf32> to vector<1x32x256xf32>
    tpu.vector_store %arg9[%c1_50, %c64_51, %c0_52], %99 {strides = array<i32>} : memref<2x256x256xf32, #tpu.memory_space<vmem>>, vector<1x32x256xf32>,
    %100 = vector.extract_strided_slice %18 {offsets = [0, 66], sizes = [32, 256], strides = [1, 1]} : vector<32x402xf32> to vector<32x256xf32>
    %c11 = arith.constant 11 : index
    %c0_53 = arith.constant 0 : index
    %101 = vector.load %arg6[%c11, %c0_53] : memref<27x256xf32, #tpu.memory_space<vmem>>, vector<1x256xf32>
    %102 = vector.broadcast %101 : vector<1x256xf32> to vector<32x256xf32>
    %103 = arith.mulf %100, %102 : vector<32x256xf32>
    %c1_54 = arith.constant 1 : index
    %c96_55 = arith.constant 96 : index
    %c0_56 = arith.constant 0 : index
    %104 = vector.load %arg9[%c1_54, %c96_55, %c0_56] : memref<2x256x256xf32, #tpu.memory_space<vmem>>, vector<1x32x256xf32>
    %105 = vector.shape_cast %104 : vector<1x32x256xf32> to vector<32x256xf32>
    %106 = vector.shape_cast %103 : vector<32x256xf32> to vector<1x32x256xf32>
    tpu.vector_store %arg9[%c1_54, %c96_55, %c0_56], %106 {strides = array<i32>} : memref<2x256x256xf32, #tpu.memory_space<vmem>>, vector<1x32x256xf32>,
    %107 = vector.extract_strided_slice %18 {offsets = [0, 72], sizes = [32, 256], strides = [1, 1]} : vector<32x402xf32> to vector<32x256xf32>
    %c12 = arith.constant 12 : index
    %c0_57 = arith.constant 0 : index
    %108 = vector.load %arg6[%c12, %c0_57] : memref<27x256xf32, #tpu.memory_space<vmem>>, vector<1x256xf32>
    %109 = vector.broadcast %108 : vector<1x256xf32> to vector<32x256xf32>
    %110 = arith.mulf %107, %109 : vector<32x256xf32>
    %c1_58 = arith.constant 1 : index
    %c128_59 = arith.constant 128 : index
    %c0_60 = arith.constant 0 : index
    %111 = vector.load %arg9[%c1_58, %c128_59, %c0_60] : memref<2x256x256xf32, #tpu.memory_space<vmem>>, vector<1x32x256xf32>
    %112 = vector.shape_cast %111 : vector<1x32x256xf32> to vector<32x256xf32>
    %113 = vector.shape_cast %110 : vector<32x256xf32> to vector<1x32x256xf32>
    tpu.vector_store %arg9[%c1_58, %c128_59, %c0_60], %113 {strides = array<i32>} : memref<2x256x256xf32, #tpu.memory_space<vmem>>, vector<1x32x256xf32>,
    %114 = vector.extract_strided_slice %18 {offsets = [0, 73], sizes = [32, 256], strides = [1, 1]} : vector<32x402xf32> to vector<32x256xf32>
    %c1_61 = arith.constant 1 : index
    %c160_62 = arith.constant 160 : index
    %c0_63 = arith.constant 0 : index
    %115 = vector.load %arg9[%c1_61, %c160_62, %c0_63] : memref<2x256x256xf32, #tpu.memory_space<vmem>>, vector<1x32x256xf32>
    %116 = vector.shape_cast %115 : vector<1x32x256xf32> to vector<32x256xf32>
    %117 = vector.shape_cast %114 : vector<32x256xf32> to vector<1x32x256xf32>
    tpu.vector_store %arg9[%c1_61, %c160_62, %c0_63], %117 {strides = array<i32>} : memref<2x256x256xf32, #tpu.memory_space<vmem>>, vector<1x32x256xf32>,
    %118 = vector.extract_strided_slice %18 {offsets = [0, 74], sizes = [32, 256], strides = [1, 1]} : vector<32x402xf32> to vector<32x256xf32>
    %c14 = arith.constant 14 : index
    %c0_64 = arith.constant 0 : index
    %119 = vector.load %arg6[%c14, %c0_64] : memref<27x256xf32, #tpu.memory_space<vmem>>, vector<1x256xf32>
    %120 = vector.broadcast %119 : vector<1x256xf32> to vector<32x256xf32>
    %121 = arith.mulf %118, %120 : vector<32x256xf32>
    %c1_65 = arith.constant 1 : index
    %c192_66 = arith.constant 192 : index
    %c0_67 = arith.constant 0 : index
    %122 = vector.load %arg9[%c1_65, %c192_66, %c0_67] : memref<2x256x256xf32, #tpu.memory_space<vmem>>, vector<1x32x256xf32>
    %123 = vector.shape_cast %122 : vector<1x32x256xf32> to vector<32x256xf32>
    %124 = vector.shape_cast %121 : vector<32x256xf32> to vector<1x32x256xf32>
    tpu.vector_store %arg9[%c1_65, %c192_66, %c0_67], %124 {strides = array<i32>} : memref<2x256x256xf32, #tpu.memory_space<vmem>>, vector<1x32x256xf32>,
    %125 = vector.extract_strided_slice %18 {offsets = [0, 80], sizes = [32, 256], strides = [1, 1]} : vector<32x402xf32> to vector<32x256xf32>
    %c15 = arith.constant 15 : index
    %c0_68 = arith.constant 0 : index
    %126 = vector.load %arg6[%c15, %c0_68] : memref<27x256xf32, #tpu.memory_space<vmem>>, vector<1x256xf32>
    %127 = vector.broadcast %126 : vector<1x256xf32> to vector<32x256xf32>
    %128 = arith.mulf %125, %127 : vector<32x256xf32>
    %c1_69 = arith.constant 1 : index
    %c224_70 = arith.constant 224 : index
    %c0_71 = arith.constant 0 : index
    %129 = vector.load %arg9[%c1_69, %c224_70, %c0_71] : memref<2x256x256xf32, #tpu.memory_space<vmem>>, vector<1x32x256xf32>
    %130 = vector.shape_cast %129 : vector<1x32x256xf32> to vector<32x256xf32>
    %131 = vector.shape_cast %128 : vector<32x256xf32> to vector<1x32x256xf32>
    tpu.vector_store %arg9[%c1_69, %c224_70, %c0_71], %131 {strides = array<i32>} : memref<2x256x256xf32, #tpu.memory_space<vmem>>, vector<1x32x256xf32>,
    %c0_72 = arith.constant 0 : index
    %c256 = arith.constant 256 : index
    %132 = vector.load %arg4[%c0_72, %c256] : memref<32x864xf32, #tpu.memory_space<vmem>>, vector<32x256xf32>
    %c1_73 = arith.constant 1 : index
    %c0_74 = arith.constant 0 : index
    %c0_75 = arith.constant 0 : index
    %133 = vector.load %arg9[%c1_73, %c0_74, %c0_75] : memref<2x256x256xf32, #tpu.memory_space<vmem>>, vector<1x256x256xf32>
    %134 = vector.shape_cast %133 : vector<1x256x256xf32> to vector<256x256xf32>
    %cst_76 = arith.constant dense<0.000000e+00> : vector<32x256xf32>
    %135 = tpu.matmul %132, %134, %cst_76 {dimension_numbers = #tpu.dot_dimension_numbers<[1], [0], [0], [1], [0, 0, 1, 1], [], []>} : vector<32x256xf32>, vector<256x256xf32>, vector<32x256xf32> -> vector<32x256xf32>
    %136 = arith.addf %78, %135 : vector<32x256xf32>
    %137 = vector.extract_strided_slice %18 {offsets = [0, 81], sizes = [32, 256], strides = [1, 1]} : vector<32x402xf32> to vector<32x256xf32>
    %c16 = arith.constant 16 : index
    %c0_77 = arith.constant 0 : index
    %138 = vector.load %arg6[%c16, %c0_77] : memref<27x256xf32, #tpu.memory_space<vmem>>, vector<1x256xf32>
    %139 = vector.broadcast %138 : vector<1x256xf32> to vector<32x256xf32>
    %140 = arith.mulf %137, %139 : vector<32x256xf32>
    %c0_78 = arith.constant 0 : index
    %c0_79 = arith.constant 0 : index
    %c0_80 = arith.constant 0 : index
    %141 = vector.load %arg9[%c0_78, %c0_79, %c0_80] : memref<2x256x256xf32, #tpu.memory_space<vmem>>, vector<1x32x256xf32>
    %142 = vector.shape_cast %141 : vector<1x32x256xf32> to vector<32x256xf32>
    %143 = vector.shape_cast %140 : vector<32x256xf32> to vector<1x32x256xf32>
    tpu.vector_store %arg9[%c0_78, %c0_79, %c0_80], %143 {strides = array<i32>} : memref<2x256x256xf32, #tpu.memory_space<vmem>>, vector<1x32x256xf32>,
    %144 = vector.extract_strided_slice %18 {offsets = [0, 82], sizes = [32, 256], strides = [1, 1]} : vector<32x402xf32> to vector<32x256xf32>
    %c17 = arith.constant 17 : index
    %c0_81 = arith.constant 0 : index
    %145 = vector.load %arg6[%c17, %c0_81] : memref<27x256xf32, #tpu.memory_space<vmem>>, vector<1x256xf32>
    %146 = vector.broadcast %145 : vector<1x256xf32> to vector<32x256xf32>
    %147 = arith.mulf %144, %146 : vector<32x256xf32>
    %c0_82 = arith.constant 0 : index
    %c32_83 = arith.constant 32 : index
    %c0_84 = arith.constant 0 : index
    %148 = vector.load %arg9[%c0_82, %c32_83, %c0_84] : memref<2x256x256xf32, #tpu.memory_space<vmem>>, vector<1x32x256xf32>
    %149 = vector.shape_cast %148 : vector<1x32x256xf32> to vector<32x256xf32>
    %150 = vector.shape_cast %147 : vector<32x256xf32> to vector<1x32x256xf32>
    tpu.vector_store %arg9[%c0_82, %c32_83, %c0_84], %150 {strides = array<i32>} : memref<2x256x256xf32, #tpu.memory_space<vmem>>, vector<1x32x256xf32>,
    %151 = vector.extract_strided_slice %18 {offsets = [0, 128], sizes = [32, 256], strides = [1, 1]} : vector<32x402xf32> to vector<32x256xf32>
    %c18 = arith.constant 18 : index
    %c0_85 = arith.constant 0 : index
    %152 = vector.load %arg6[%c18, %c0_85] : memref<27x256xf32, #tpu.memory_space<vmem>>, vector<1x256xf32>
    %153 = vector.broadcast %152 : vector<1x256xf32> to vector<32x256xf32>
    %154 = arith.mulf %151, %153 : vector<32x256xf32>
    %c0_86 = arith.constant 0 : index
    %c64_87 = arith.constant 64 : index
    %c0_88 = arith.constant 0 : index
    %155 = vector.load %arg9[%c0_86, %c64_87, %c0_88] : memref<2x256x256xf32, #tpu.memory_space<vmem>>, vector<1x32x256xf32>
    %156 = vector.shape_cast %155 : vector<1x32x256xf32> to vector<32x256xf32>
    %157 = vector.shape_cast %154 : vector<32x256xf32> to vector<1x32x256xf32>
    tpu.vector_store %arg9[%c0_86, %c64_87, %c0_88], %157 {strides = array<i32>} : memref<2x256x256xf32, #tpu.memory_space<vmem>>, vector<1x32x256xf32>,
    %158 = vector.extract_strided_slice %18 {offsets = [0, 129], sizes = [32, 256], strides = [1, 1]} : vector<32x402xf32> to vector<32x256xf32>
    %c19 = arith.constant 19 : index
    %c0_89 = arith.constant 0 : index
    %159 = vector.load %arg6[%c19, %c0_89] : memref<27x256xf32, #tpu.memory_space<vmem>>, vector<1x256xf32>
    %160 = vector.broadcast %159 : vector<1x256xf32> to vector<32x256xf32>
    %161 = arith.mulf %158, %160 : vector<32x256xf32>
    %c0_90 = arith.constant 0 : index
    %c96_91 = arith.constant 96 : index
    %c0_92 = arith.constant 0 : index
    %162 = vector.load %arg9[%c0_90, %c96_91, %c0_92] : memref<2x256x256xf32, #tpu.memory_space<vmem>>, vector<1x32x256xf32>
    %163 = vector.shape_cast %162 : vector<1x32x256xf32> to vector<32x256xf32>
    %164 = vector.shape_cast %161 : vector<32x256xf32> to vector<1x32x256xf32>
    tpu.vector_store %arg9[%c0_90, %c96_91, %c0_92], %164 {strides = array<i32>} : memref<2x256x256xf32, #tpu.memory_space<vmem>>, vector<1x32x256xf32>,
    %165 = vector.extract_strided_slice %18 {offsets = [0, 130], sizes = [32, 256], strides = [1, 1]} : vector<32x402xf32> to vector<32x256xf32>
    %c20 = arith.constant 20 : index
    %c0_93 = arith.constant 0 : index
    %166 = vector.load %arg6[%c20, %c0_93] : memref<27x256xf32, #tpu.memory_space<vmem>>, vector<1x256xf32>
    %167 = vector.broadcast %166 : vector<1x256xf32> to vector<32x256xf32>
    %168 = arith.mulf %165, %167 : vector<32x256xf32>
    %c0_94 = arith.constant 0 : index
    %c128_95 = arith.constant 128 : index
    %c0_96 = arith.constant 0 : index
    %169 = vector.load %arg9[%c0_94, %c128_95, %c0_96] : memref<2x256x256xf32, #tpu.memory_space<vmem>>, vector<1x32x256xf32>
    %170 = vector.shape_cast %169 : vector<1x32x256xf32> to vector<32x256xf32>
    %171 = vector.shape_cast %168 : vector<32x256xf32> to vector<1x32x256xf32>
    tpu.vector_store %arg9[%c0_94, %c128_95, %c0_96], %171 {strides = array<i32>} : memref<2x256x256xf32, #tpu.memory_space<vmem>>, vector<1x32x256xf32>,
    %172 = vector.extract_strided_slice %18 {offsets = [0, 136], sizes = [32, 256], strides = [1, 1]} : vector<32x402xf32> to vector<32x256xf32>
    %c21 = arith.constant 21 : index
    %c0_97 = arith.constant 0 : index
    %173 = vector.load %arg6[%c21, %c0_97] : memref<27x256xf32, #tpu.memory_space<vmem>>, vector<1x256xf32>
    %174 = vector.broadcast %173 : vector<1x256xf32> to vector<32x256xf32>
    %175 = arith.mulf %172, %174 : vector<32x256xf32>
    %c0_98 = arith.constant 0 : index
    %c160_99 = arith.constant 160 : index
    %c0_100 = arith.constant 0 : index
    %176 = vector.load %arg9[%c0_98, %c160_99, %c0_100] : memref<2x256x256xf32, #tpu.memory_space<vmem>>, vector<1x32x256xf32>
    %177 = vector.shape_cast %176 : vector<1x32x256xf32> to vector<32x256xf32>
    %178 = vector.shape_cast %175 : vector<32x256xf32> to vector<1x32x256xf32>
    tpu.vector_store %arg9[%c0_98, %c160_99, %c0_100], %178 {strides = array<i32>} : memref<2x256x256xf32, #tpu.memory_space<vmem>>, vector<1x32x256xf32>,
    %179 = vector.extract_strided_slice %18 {offsets = [0, 137], sizes = [32, 256], strides = [1, 1]} : vector<32x402xf32> to vector<32x256xf32>
    %c22 = arith.constant 22 : index
    %c0_101 = arith.constant 0 : index
    %180 = vector.load %arg6[%c22, %c0_101] : memref<27x256xf32, #tpu.memory_space<vmem>>, vector<1x256xf32>
    %181 = vector.broadcast %180 : vector<1x256xf32> to vector<32x256xf32>
    %182 = arith.mulf %179, %181 : vector<32x256xf32>
    %c0_102 = arith.constant 0 : index
    %c192_103 = arith.constant 192 : index
    %c0_104 = arith.constant 0 : index
    %183 = vector.load %arg9[%c0_102, %c192_103, %c0_104] : memref<2x256x256xf32, #tpu.memory_space<vmem>>, vector<1x32x256xf32>
    %184 = vector.shape_cast %183 : vector<1x32x256xf32> to vector<32x256xf32>
    %185 = vector.shape_cast %182 : vector<32x256xf32> to vector<1x32x256xf32>
    tpu.vector_store %arg9[%c0_102, %c192_103, %c0_104], %185 {strides = array<i32>} : memref<2x256x256xf32, #tpu.memory_space<vmem>>, vector<1x32x256xf32>,
    %186 = vector.extract_strided_slice %18 {offsets = [0, 138], sizes = [32, 256], strides = [1, 1]} : vector<32x402xf32> to vector<32x256xf32>
    %c23 = arith.constant 23 : index
    %c0_105 = arith.constant 0 : index
    %187 = vector.load %arg6[%c23, %c0_105] : memref<27x256xf32, #tpu.memory_space<vmem>>, vector<1x256xf32>
    %188 = vector.broadcast %187 : vector<1x256xf32> to vector<32x256xf32>
    %189 = arith.mulf %186, %188 : vector<32x256xf32>
    %c0_106 = arith.constant 0 : index
    %c224_107 = arith.constant 224 : index
    %c0_108 = arith.constant 0 : index
    %190 = vector.load %arg9[%c0_106, %c224_107, %c0_108] : memref<2x256x256xf32, #tpu.memory_space<vmem>>, vector<1x32x256xf32>
    %191 = vector.shape_cast %190 : vector<1x32x256xf32> to vector<32x256xf32>
    %192 = vector.shape_cast %189 : vector<32x256xf32> to vector<1x32x256xf32>
    tpu.vector_store %arg9[%c0_106, %c224_107, %c0_108], %192 {strides = array<i32>} : memref<2x256x256xf32, #tpu.memory_space<vmem>>, vector<1x32x256xf32>,
    %c0_109 = arith.constant 0 : index
    %c512 = arith.constant 512 : index
    %193 = vector.load %arg4[%c0_109, %c512] : memref<32x864xf32, #tpu.memory_space<vmem>>, vector<32x256xf32>
    %c0_110 = arith.constant 0 : index
    %c0_111 = arith.constant 0 : index
    %c0_112 = arith.constant 0 : index
    %194 = vector.load %arg9[%c0_110, %c0_111, %c0_112] : memref<2x256x256xf32, #tpu.memory_space<vmem>>, vector<1x256x256xf32>
    %195 = vector.shape_cast %194 : vector<1x256x256xf32> to vector<256x256xf32>
    %cst_113 = arith.constant dense<0.000000e+00> : vector<32x256xf32>
    %196 = tpu.matmul %193, %195, %cst_113 {dimension_numbers = #tpu.dot_dimension_numbers<[1], [0], [0], [1], [0, 0, 1, 1], [], []>} : vector<32x256xf32>, vector<256x256xf32>, vector<32x256xf32> -> vector<32x256xf32>
    %197 = arith.addf %136, %196 : vector<32x256xf32>
    %198 = vector.extract_strided_slice %18 {offsets = [0, 144], sizes = [32, 256], strides = [1, 1]} : vector<32x402xf32> to vector<32x256xf32>
    %c24 = arith.constant 24 : index
    %c0_114 = arith.constant 0 : index
    %199 = vector.load %arg6[%c24, %c0_114] : memref<27x256xf32, #tpu.memory_space<vmem>>, vector<1x256xf32>
    %200 = vector.broadcast %199 : vector<1x256xf32> to vector<32x256xf32>
    %201 = arith.mulf %198, %200 : vector<32x256xf32>
    %c1_115 = arith.constant 1 : index
    %c0_116 = arith.constant 0 : index
    %c0_117 = arith.constant 0 : index
    %202 = vector.load %arg9[%c1_115, %c0_116, %c0_117] : memref<2x256x256xf32, #tpu.memory_space<vmem>>, vector<1x32x256xf32>
    %203 = vector.shape_cast %202 : vector<1x32x256xf32> to vector<32x256xf32>
    %204 = vector.shape_cast %201 : vector<32x256xf32> to vector<1x32x256xf32>
    tpu.vector_store %arg9[%c1_115, %c0_116, %c0_117], %204 {strides = array<i32>} : memref<2x256x256xf32, #tpu.memory_space<vmem>>, vector<1x32x256xf32>,
    %205 = vector.extract_strided_slice %18 {offsets = [0, 145], sizes = [32, 256], strides = [1, 1]} : vector<32x402xf32> to vector<32x256xf32>
    %c25 = arith.constant 25 : index
    %c0_118 = arith.constant 0 : index
    %206 = vector.load %arg6[%c25, %c0_118] : memref<27x256xf32, #tpu.memory_space<vmem>>, vector<1x256xf32>
    %207 = vector.broadcast %206 : vector<1x256xf32> to vector<32x256xf32>
    %208 = arith.mulf %205, %207 : vector<32x256xf32>
    %c1_119 = arith.constant 1 : index
    %c32_120 = arith.constant 32 : index
    %c0_121 = arith.constant 0 : index
    %209 = vector.load %arg9[%c1_119, %c32_120, %c0_121] : memref<2x256x256xf32, #tpu.memory_space<vmem>>, vector<1x32x256xf32>
    %210 = vector.shape_cast %209 : vector<1x32x256xf32> to vector<32x256xf32>
    %211 = vector.shape_cast %208 : vector<32x256xf32> to vector<1x32x256xf32>
    tpu.vector_store %arg9[%c1_119, %c32_120, %c0_121], %211 {strides = array<i32>} : memref<2x256x256xf32, #tpu.memory_space<vmem>>, vector<1x32x256xf32>,
    %212 = vector.extract_strided_slice %18 {offsets = [0, 146], sizes = [32, 256], strides = [1, 1]} : vector<32x402xf32> to vector<32x256xf32>
    %c26 = arith.constant 26 : index
    %c0_122 = arith.constant 0 : index
    %213 = vector.load %arg6[%c26, %c0_122] : memref<27x256xf32, #tpu.memory_space<vmem>>, vector<1x256xf32>
    %214 = vector.broadcast %213 : vector<1x256xf32> to vector<32x256xf32>
    %215 = arith.mulf %212, %214 : vector<32x256xf32>
    %c1_123 = arith.constant 1 : index
    %c64_124 = arith.constant 64 : index
    %c0_125 = arith.constant 0 : index
    %216 = vector.load %arg9[%c1_123, %c64_124, %c0_125] : memref<2x256x256xf32, #tpu.memory_space<vmem>>, vector<1x32x256xf32>
    %217 = vector.shape_cast %216 : vector<1x32x256xf32> to vector<32x256xf32>
    %218 = vector.shape_cast %215 : vector<32x256xf32> to vector<1x32x256xf32>
    tpu.vector_store %arg9[%c1_123, %c64_124, %c0_125], %218 {strides = array<i32>} : memref<2x256x256xf32, #tpu.memory_space<vmem>>, vector<1x32x256xf32>,
    %c0_126 = arith.constant 0 : index
    %c768 = arith.constant 768 : index
    %219 = vector.load %arg4[%c0_126, %c768] : memref<32x864xf32, #tpu.memory_space<vmem>>, vector<32x96xf32>
    %c1_127 = arith.constant 1 : index
    %c0_128 = arith.constant 0 : index
    %c0_129 = arith.constant 0 : index
    %220 = vector.load %arg9[%c1_127, %c0_128, %c0_129] : memref<2x256x256xf32, #tpu.memory_space<vmem>>, vector<1x96x256xf32>
    %221 = vector.shape_cast %220 : vector<1x96x256xf32> to vector<96x256xf32>
    %cst_130 = arith.constant dense<0.000000e+00> : vector<32x256xf32>
    %222 = tpu.matmul %219, %221, %cst_130 {dimension_numbers = #tpu.dot_dimension_numbers<[1], [0], [0], [1], [0, 0, 1, 1], [], []>} : vector<32x96xf32>, vector<96x256xf32>, vector<32x256xf32> -> vector<32x256xf32>
    %223 = arith.addf %197, %222 : vector<32x256xf32>
    %c0_131 = arith.constant 0 : index
    %c0_132 = arith.constant 0 : index
    %224 = vector.load %arg5[%c0_131, %c0_132] : memref<32x1xf32, #tpu.memory_space<vmem>>, vector<32x1xf32>
    %225 = vector.broadcast %224 : vector<32x1xf32> to vector<32x256xf32>
    %226 = arith.addf %223, %225 : vector<32x256xf32>
    %c0_133 = arith.constant 0 : index
    %c0_134 = arith.constant 0 : index
    %c0_135 = arith.constant 0 : index
    %227 = vector.load %arg7[%c0_133, %c0_134, %c0_135] : memref<1x32x256xf32, #tpu.memory_space<vmem>>, vector<1x32x256xf32>
    %228 = vector.shape_cast %227 : vector<1x32x256xf32> to vector<32x256xf32>
    %229 = vector.shape_cast %226 : vector<32x256xf32> to vector<1x32x256xf32>
    tpu.vector_store %arg7[%c0_133, %c0_134, %c0_135], %229 {strides = array<i32>} : memref<1x32x256xf32, #tpu.memory_space<vmem>>, vector<1x32x256xf32>,
    %cst_136 = arith.constant dense<0.000000e+00> : vector<32xf32>
    %230 = vector.multi_reduction <add>, %226, %cst_136 [1] : vector<32x256xf32> to vector<32xf32>
    %231 = vector.shape_cast %230 : vector<32xf32> to vector<32x1xf32>
    %232 = arith.mulf %226, %226 : vector<32x256xf32>
    %cst_137 = arith.constant dense<0.000000e+00> : vector<32xf32>
    %233 = vector.multi_reduction <add>, %232, %cst_137 [1] : vector<32x256xf32> to vector<32xf32>
    %234 = vector.shape_cast %233 : vector<32xf32> to vector<32x1xf32>
    %235 = tpu.concatenate %231, %234 in 1 : vector<32x1xf32>, vector<32x1xf32> -> vector<32x2xf32>
    %c0_138 = arith.constant 0 : index
    %c0_139 = arith.constant 0 : index
    %c0_140 = arith.constant 0 : index
    %236 = vector.load %arg8[%c0_138, %c0_139, %c0_140] : memref<1x32x2xf32, #tpu.memory_space<vmem>>, vector<1x32x2xf32>
    %237 = vector.shape_cast %236 : vector<1x32x2xf32> to vector<32x2xf32>
    %238 = vector.shape_cast %235 : vector<32x2xf32> to vector<1x32x2xf32>
    tpu.vector_store %arg8[%c0_138, %c0_139, %c0_140], %238 {strides = array<i32>} : memref<1x32x2xf32, #tpu.memory_space<vmem>>, vector<1x32x2xf32>,
    return
  }
  func.func @transform_0(%arg0: i32) -> (i32, i32, i32) {
    %c0_i32 = arith.constant 0 : i32
    %c0_i32_0 = arith.constant 0 : i32
    %c0_i32_1 = arith.constant 0 : i32
    return %arg0, %c0_i32, %c0_i32_0 : i32, i32, i32
  }
  func.func @transform_1(%arg0: i32) -> (i32, i32) {
    %c0_i32 = arith.constant 0 : i32
    %c0_i32_0 = arith.constant 0 : i32
    %c0_i32_1 = arith.constant 0 : i32
    return %c0_i32, %c0_i32_0 : i32, i32
  }
  func.func @transform_2(%arg0: i32) -> (i32, i32, i32) {
    %c0_i32 = arith.constant 0 : i32
    %c0_i32_0 = arith.constant 0 : i32
    %c0_i32_1 = arith.constant 0 : i32
    return %arg0, %c0_i32, %c0_i32_0 : i32, i32, i32
  }
  func.func @transform_3(%arg0: i32) -> (i32, i32) {
    %c0_i32 = arith.constant 0 : i32
    %c0_i32_0 = arith.constant 0 : i32
    %c0_i32_1 = arith.constant 0 : i32
    return %c0_i32, %c0_i32_0 : i32, i32
  }
  func.func @transform_4(%arg0: i32) -> (i32, i32) {
    %c0_i32 = arith.constant 0 : i32
    %c0_i32_0 = arith.constant 0 : i32
    %c0_i32_1 = arith.constant 0 : i32
    return %c0_i32, %c0_i32_0 : i32, i32
  }
  func.func @transform_5(%arg0: i32) -> (i32, i32) {
    %c0_i32 = arith.constant 0 : i32
    %c0_i32_0 = arith.constant 0 : i32
    %c0_i32_1 = arith.constant 0 : i32
    return %c0_i32, %c0_i32_0 : i32, i32
  }
  func.func @transform_6(%arg0: i32) -> (i32, i32, i32) {
    %c0_i32 = arith.constant 0 : i32
    %c0_i32_0 = arith.constant 0 : i32
    %c0_i32_1 = arith.constant 0 : i32
    return %arg0, %c0_i32, %c0_i32_0 : i32, i32, i32
  }
  func.func @transform_7(%arg0: i32) -> (i32, i32, i32) {
    %c0_i32 = arith.constant 0 : i32
    %c0_i32_0 = arith.constant 0 : i32
    %c0_i32_1 = arith.constant 0 : i32
    return %arg0, %c0_i32, %c0_i32_0 : i32, i32, i32
  }
}

module attributes {stable_mosaic.version = 11 : i64} {
  func.func @kernel(%arg0: i32, %arg1: memref<1x32x256xf32, #tpu.memory_space<vmem>>, %arg2: memref<32x864xf32, #tpu.memory_space<vmem>>, %arg3: memref<32x1xf32, #tpu.memory_space<vmem>>, %arg4: memref<27x256xf32, #tpu.memory_space<vmem>>, %arg5: memref<1x32x256xf32, #tpu.memory_space<vmem>>, %arg6: memref<1x32x2xf32, #tpu.memory_space<vmem>>, %arg7: memref<2x256x256xf32, #tpu.memory_space<vmem>>) attributes {dimension_semantics = [#tpu.dimension_semantics<parallel>], iteration_bounds = array<i64: 2>, scalar_prefetch = 0 : i64, scratch_operands = 1 : i64, tpu.core_type = #tpu.core_type<tc>, window_params = [{transform_indices = @transform_0, window_bounds = array<i64: 1, 32, 256>}, {pipeline_mode = #tpu.pipeline_mode<synchronous>, transform_indices = @transform_1, window_bounds = array<i64: 32, 864>}, {pipeline_mode = #tpu.pipeline_mode<synchronous>, transform_indices = @transform_2, window_bounds = array<i64: 32, 1>}, {pipeline_mode = #tpu.pipeline_mode<synchronous>, transform_indices = @transform_3, window_bounds = array<i64: 27, 256>}, {transform_indices = @transform_4, window_bounds = array<i64: 1, 32, 256>}, {transform_indices = @transform_5, window_bounds = array<i64: 1, 32, 2>}]} {
    %c0 = arith.constant 0 : index
    %c0_0 = arith.constant 0 : index
    %c0_1 = arith.constant 0 : index
    %0 = vector.load %arg1[%c0, %c0_0, %c0_1] : memref<1x32x256xf32, #tpu.memory_space<vmem>>, vector<1x32x256xf32>
    %1 = vector.shape_cast %0 : vector<1x32x256xf32> to vector<32x256xf32>
    %cst = arith.constant 0.000000e+00 : f32
    %2 = vector.broadcast %cst : f32 to vector<32x73xf32>
    %3 = tpu.concatenate %2, %1, %2 in 1 : vector<32x73xf32>, vector<32x256xf32>, vector<32x73xf32> -> vector<32x402xf32>
    %4 = vector.extract_strided_slice %3 {offsets = [0, 0], sizes = [32, 256], strides = [1, 1]} : vector<32x402xf32> to vector<32x256xf32>
    %c0_2 = arith.constant 0 : index
    %c0_3 = arith.constant 0 : index
    %5 = vector.load %arg4[%c0_2, %c0_3] : memref<27x256xf32, #tpu.memory_space<vmem>>, vector<1x256xf32>
    %6 = vector.broadcast %5 : vector<1x256xf32> to vector<32x256xf32>
    %7 = arith.mulf %4, %6 : vector<32x256xf32>
    %c0_4 = arith.constant 0 : index
    %c0_5 = arith.constant 0 : index
    %c0_6 = arith.constant 0 : index
    %8 = vector.load %arg7[%c0_4, %c0_5, %c0_6] : memref<2x256x256xf32, #tpu.memory_space<vmem>>, vector<1x32x256xf32>
    %9 = vector.shape_cast %8 : vector<1x32x256xf32> to vector<32x256xf32>
    %10 = vector.shape_cast %7 : vector<32x256xf32> to vector<1x32x256xf32>
    tpu.vector_store %arg7[%c0_4, %c0_5, %c0_6], %10 {strides = array<i32>} : memref<2x256x256xf32, #tpu.memory_space<vmem>>, vector<1x32x256xf32>,
    %11 = vector.extract_strided_slice %3 {offsets = [0, 1], sizes = [32, 256], strides = [1, 1]} : vector<32x402xf32> to vector<32x256xf32>
    %c1 = arith.constant 1 : index
    %c0_7 = arith.constant 0 : index
    %12 = vector.load %arg4[%c1, %c0_7] : memref<27x256xf32, #tpu.memory_space<vmem>>, vector<1x256xf32>
    %13 = vector.broadcast %12 : vector<1x256xf32> to vector<32x256xf32>
    %14 = arith.mulf %11, %13 : vector<32x256xf32>
    %c0_8 = arith.constant 0 : index
    %c32 = arith.constant 32 : index
    %c0_9 = arith.constant 0 : index
    %15 = vector.load %arg7[%c0_8, %c32, %c0_9] : memref<2x256x256xf32, #tpu.memory_space<vmem>>, vector<1x32x256xf32>
    %16 = vector.shape_cast %15 : vector<1x32x256xf32> to vector<32x256xf32>
    %17 = vector.shape_cast %14 : vector<32x256xf32> to vector<1x32x256xf32>
    tpu.vector_store %arg7[%c0_8, %c32, %c0_9], %17 {strides = array<i32>} : memref<2x256x256xf32, #tpu.memory_space<vmem>>, vector<1x32x256xf32>,
    %18 = vector.extract_strided_slice %3 {offsets = [0, 2], sizes = [32, 256], strides = [1, 1]} : vector<32x402xf32> to vector<32x256xf32>
    %c2 = arith.constant 2 : index
    %c0_10 = arith.constant 0 : index
    %19 = vector.load %arg4[%c2, %c0_10] : memref<27x256xf32, #tpu.memory_space<vmem>>, vector<1x256xf32>
    %20 = vector.broadcast %19 : vector<1x256xf32> to vector<32x256xf32>
    %21 = arith.mulf %18, %20 : vector<32x256xf32>
    %c0_11 = arith.constant 0 : index
    %c64 = arith.constant 64 : index
    %c0_12 = arith.constant 0 : index
    %22 = vector.load %arg7[%c0_11, %c64, %c0_12] : memref<2x256x256xf32, #tpu.memory_space<vmem>>, vector<1x32x256xf32>
    %23 = vector.shape_cast %22 : vector<1x32x256xf32> to vector<32x256xf32>
    %24 = vector.shape_cast %21 : vector<32x256xf32> to vector<1x32x256xf32>
    tpu.vector_store %arg7[%c0_11, %c64, %c0_12], %24 {strides = array<i32>} : memref<2x256x256xf32, #tpu.memory_space<vmem>>, vector<1x32x256xf32>,
    %25 = vector.extract_strided_slice %3 {offsets = [0, 8], sizes = [32, 256], strides = [1, 1]} : vector<32x402xf32> to vector<32x256xf32>
    %c3 = arith.constant 3 : index
    %c0_13 = arith.constant 0 : index
    %26 = vector.load %arg4[%c3, %c0_13] : memref<27x256xf32, #tpu.memory_space<vmem>>, vector<1x256xf32>
    %27 = vector.broadcast %26 : vector<1x256xf32> to vector<32x256xf32>
    %28 = arith.mulf %25, %27 : vector<32x256xf32>
    %c0_14 = arith.constant 0 : index
    %c96 = arith.constant 96 : index
    %c0_15 = arith.constant 0 : index
    %29 = vector.load %arg7[%c0_14, %c96, %c0_15] : memref<2x256x256xf32, #tpu.memory_space<vmem>>, vector<1x32x256xf32>
    %30 = vector.shape_cast %29 : vector<1x32x256xf32> to vector<32x256xf32>
    %31 = vector.shape_cast %28 : vector<32x256xf32> to vector<1x32x256xf32>
    tpu.vector_store %arg7[%c0_14, %c96, %c0_15], %31 {strides = array<i32>} : memref<2x256x256xf32, #tpu.memory_space<vmem>>, vector<1x32x256xf32>,
    %32 = vector.extract_strided_slice %3 {offsets = [0, 9], sizes = [32, 256], strides = [1, 1]} : vector<32x402xf32> to vector<32x256xf32>
    %c4 = arith.constant 4 : index
    %c0_16 = arith.constant 0 : index
    %33 = vector.load %arg4[%c4, %c0_16] : memref<27x256xf32, #tpu.memory_space<vmem>>, vector<1x256xf32>
    %34 = vector.broadcast %33 : vector<1x256xf32> to vector<32x256xf32>
    %35 = arith.mulf %32, %34 : vector<32x256xf32>
    %c0_17 = arith.constant 0 : index
    %c128 = arith.constant 128 : index
    %c0_18 = arith.constant 0 : index
    %36 = vector.load %arg7[%c0_17, %c128, %c0_18] : memref<2x256x256xf32, #tpu.memory_space<vmem>>, vector<1x32x256xf32>
    %37 = vector.shape_cast %36 : vector<1x32x256xf32> to vector<32x256xf32>
    %38 = vector.shape_cast %35 : vector<32x256xf32> to vector<1x32x256xf32>
    tpu.vector_store %arg7[%c0_17, %c128, %c0_18], %38 {strides = array<i32>} : memref<2x256x256xf32, #tpu.memory_space<vmem>>, vector<1x32x256xf32>,
    %39 = vector.extract_strided_slice %3 {offsets = [0, 10], sizes = [32, 256], strides = [1, 1]} : vector<32x402xf32> to vector<32x256xf32>
    %c5 = arith.constant 5 : index
    %c0_19 = arith.constant 0 : index
    %40 = vector.load %arg4[%c5, %c0_19] : memref<27x256xf32, #tpu.memory_space<vmem>>, vector<1x256xf32>
    %41 = vector.broadcast %40 : vector<1x256xf32> to vector<32x256xf32>
    %42 = arith.mulf %39, %41 : vector<32x256xf32>
    %c0_20 = arith.constant 0 : index
    %c160 = arith.constant 160 : index
    %c0_21 = arith.constant 0 : index
    %43 = vector.load %arg7[%c0_20, %c160, %c0_21] : memref<2x256x256xf32, #tpu.memory_space<vmem>>, vector<1x32x256xf32>
    %44 = vector.shape_cast %43 : vector<1x32x256xf32> to vector<32x256xf32>
    %45 = vector.shape_cast %42 : vector<32x256xf32> to vector<1x32x256xf32>
    tpu.vector_store %arg7[%c0_20, %c160, %c0_21], %45 {strides = array<i32>} : memref<2x256x256xf32, #tpu.memory_space<vmem>>, vector<1x32x256xf32>,
    %46 = vector.extract_strided_slice %3 {offsets = [0, 16], sizes = [32, 256], strides = [1, 1]} : vector<32x402xf32> to vector<32x256xf32>
    %c6 = arith.constant 6 : index
    %c0_22 = arith.constant 0 : index
    %47 = vector.load %arg4[%c6, %c0_22] : memref<27x256xf32, #tpu.memory_space<vmem>>, vector<1x256xf32>
    %48 = vector.broadcast %47 : vector<1x256xf32> to vector<32x256xf32>
    %49 = arith.mulf %46, %48 : vector<32x256xf32>
    %c0_23 = arith.constant 0 : index
    %c192 = arith.constant 192 : index
    %c0_24 = arith.constant 0 : index
    %50 = vector.load %arg7[%c0_23, %c192, %c0_24] : memref<2x256x256xf32, #tpu.memory_space<vmem>>, vector<1x32x256xf32>
    %51 = vector.shape_cast %50 : vector<1x32x256xf32> to vector<32x256xf32>
    %52 = vector.shape_cast %49 : vector<32x256xf32> to vector<1x32x256xf32>
    tpu.vector_store %arg7[%c0_23, %c192, %c0_24], %52 {strides = array<i32>} : memref<2x256x256xf32, #tpu.memory_space<vmem>>, vector<1x32x256xf32>,
    %53 = vector.extract_strided_slice %3 {offsets = [0, 17], sizes = [32, 256], strides = [1, 1]} : vector<32x402xf32> to vector<32x256xf32>
    %c7 = arith.constant 7 : index
    %c0_25 = arith.constant 0 : index
    %54 = vector.load %arg4[%c7, %c0_25] : memref<27x256xf32, #tpu.memory_space<vmem>>, vector<1x256xf32>
    %55 = vector.broadcast %54 : vector<1x256xf32> to vector<32x256xf32>
    %56 = arith.mulf %53, %55 : vector<32x256xf32>
    %c0_26 = arith.constant 0 : index
    %c224 = arith.constant 224 : index
    %c0_27 = arith.constant 0 : index
    %57 = vector.load %arg7[%c0_26, %c224, %c0_27] : memref<2x256x256xf32, #tpu.memory_space<vmem>>, vector<1x32x256xf32>
    %58 = vector.shape_cast %57 : vector<1x32x256xf32> to vector<32x256xf32>
    %59 = vector.shape_cast %56 : vector<32x256xf32> to vector<1x32x256xf32>
    tpu.vector_store %arg7[%c0_26, %c224, %c0_27], %59 {strides = array<i32>} : memref<2x256x256xf32, #tpu.memory_space<vmem>>, vector<1x32x256xf32>,
    %c0_28 = arith.constant 0 : index
    %c0_29 = arith.constant 0 : index
    %60 = vector.load %arg2[%c0_28, %c0_29] : memref<32x864xf32, #tpu.memory_space<vmem>>, vector<32x256xf32>
    %c0_30 = arith.constant 0 : index
    %c0_31 = arith.constant 0 : index
    %c0_32 = arith.constant 0 : index
    %61 = vector.load %arg7[%c0_30, %c0_31, %c0_32] : memref<2x256x256xf32, #tpu.memory_space<vmem>>, vector<1x256x256xf32>
    %62 = vector.shape_cast %61 : vector<1x256x256xf32> to vector<256x256xf32>
    %cst_33 = arith.constant dense<0.000000e+00> : vector<32x256xf32>
    %63 = tpu.matmul %60, %62, %cst_33 {dimension_numbers = #tpu.dot_dimension_numbers<[1], [0], [0], [1], [0, 0, 1, 1], [], []>} : vector<32x256xf32>, vector<256x256xf32>, vector<32x256xf32> -> vector<32x256xf32>
    %64 = vector.extract_strided_slice %3 {offsets = [0, 18], sizes = [32, 256], strides = [1, 1]} : vector<32x402xf32> to vector<32x256xf32>
    %c8 = arith.constant 8 : index
    %c0_34 = arith.constant 0 : index
    %65 = vector.load %arg4[%c8, %c0_34] : memref<27x256xf32, #tpu.memory_space<vmem>>, vector<1x256xf32>
    %66 = vector.broadcast %65 : vector<1x256xf32> to vector<32x256xf32>
    %67 = arith.mulf %64, %66 : vector<32x256xf32>
    %c1_35 = arith.constant 1 : index
    %c0_36 = arith.constant 0 : index
    %c0_37 = arith.constant 0 : index
    %68 = vector.load %arg7[%c1_35, %c0_36, %c0_37] : memref<2x256x256xf32, #tpu.memory_space<vmem>>, vector<1x32x256xf32>
    %69 = vector.shape_cast %68 : vector<1x32x256xf32> to vector<32x256xf32>
    %70 = vector.shape_cast %67 : vector<32x256xf32> to vector<1x32x256xf32>
    tpu.vector_store %arg7[%c1_35, %c0_36, %c0_37], %70 {strides = array<i32>} : memref<2x256x256xf32, #tpu.memory_space<vmem>>, vector<1x32x256xf32>,
    %71 = vector.extract_strided_slice %3 {offsets = [0, 64], sizes = [32, 256], strides = [1, 1]} : vector<32x402xf32> to vector<32x256xf32>
    %c9 = arith.constant 9 : index
    %c0_38 = arith.constant 0 : index
    %72 = vector.load %arg4[%c9, %c0_38] : memref<27x256xf32, #tpu.memory_space<vmem>>, vector<1x256xf32>
    %73 = vector.broadcast %72 : vector<1x256xf32> to vector<32x256xf32>
    %74 = arith.mulf %71, %73 : vector<32x256xf32>
    %c1_39 = arith.constant 1 : index
    %c32_40 = arith.constant 32 : index
    %c0_41 = arith.constant 0 : index
    %75 = vector.load %arg7[%c1_39, %c32_40, %c0_41] : memref<2x256x256xf32, #tpu.memory_space<vmem>>, vector<1x32x256xf32>
    %76 = vector.shape_cast %75 : vector<1x32x256xf32> to vector<32x256xf32>
    %77 = vector.shape_cast %74 : vector<32x256xf32> to vector<1x32x256xf32>
    tpu.vector_store %arg7[%c1_39, %c32_40, %c0_41], %77 {strides = array<i32>} : memref<2x256x256xf32, #tpu.memory_space<vmem>>, vector<1x32x256xf32>,
    %78 = vector.extract_strided_slice %3 {offsets = [0, 65], sizes = [32, 256], strides = [1, 1]} : vector<32x402xf32> to vector<32x256xf32>
    %c10 = arith.constant 10 : index
    %c0_42 = arith.constant 0 : index
    %79 = vector.load %arg4[%c10, %c0_42] : memref<27x256xf32, #tpu.memory_space<vmem>>, vector<1x256xf32>
    %80 = vector.broadcast %79 : vector<1x256xf32> to vector<32x256xf32>
    %81 = arith.mulf %78, %80 : vector<32x256xf32>
    %c1_43 = arith.constant 1 : index
    %c64_44 = arith.constant 64 : index
    %c0_45 = arith.constant 0 : index
    %82 = vector.load %arg7[%c1_43, %c64_44, %c0_45] : memref<2x256x256xf32, #tpu.memory_space<vmem>>, vector<1x32x256xf32>
    %83 = vector.shape_cast %82 : vector<1x32x256xf32> to vector<32x256xf32>
    %84 = vector.shape_cast %81 : vector<32x256xf32> to vector<1x32x256xf32>
    tpu.vector_store %arg7[%c1_43, %c64_44, %c0_45], %84 {strides = array<i32>} : memref<2x256x256xf32, #tpu.memory_space<vmem>>, vector<1x32x256xf32>,
    %85 = vector.extract_strided_slice %3 {offsets = [0, 66], sizes = [32, 256], strides = [1, 1]} : vector<32x402xf32> to vector<32x256xf32>
    %c11 = arith.constant 11 : index
    %c0_46 = arith.constant 0 : index
    %86 = vector.load %arg4[%c11, %c0_46] : memref<27x256xf32, #tpu.memory_space<vmem>>, vector<1x256xf32>
    %87 = vector.broadcast %86 : vector<1x256xf32> to vector<32x256xf32>
    %88 = arith.mulf %85, %87 : vector<32x256xf32>
    %c1_47 = arith.constant 1 : index
    %c96_48 = arith.constant 96 : index
    %c0_49 = arith.constant 0 : index
    %89 = vector.load %arg7[%c1_47, %c96_48, %c0_49] : memref<2x256x256xf32, #tpu.memory_space<vmem>>, vector<1x32x256xf32>
    %90 = vector.shape_cast %89 : vector<1x32x256xf32> to vector<32x256xf32>
    %91 = vector.shape_cast %88 : vector<32x256xf32> to vector<1x32x256xf32>
    tpu.vector_store %arg7[%c1_47, %c96_48, %c0_49], %91 {strides = array<i32>} : memref<2x256x256xf32, #tpu.memory_space<vmem>>, vector<1x32x256xf32>,
    %92 = vector.extract_strided_slice %3 {offsets = [0, 72], sizes = [32, 256], strides = [1, 1]} : vector<32x402xf32> to vector<32x256xf32>
    %c12 = arith.constant 12 : index
    %c0_50 = arith.constant 0 : index
    %93 = vector.load %arg4[%c12, %c0_50] : memref<27x256xf32, #tpu.memory_space<vmem>>, vector<1x256xf32>
    %94 = vector.broadcast %93 : vector<1x256xf32> to vector<32x256xf32>
    %95 = arith.mulf %92, %94 : vector<32x256xf32>
    %c1_51 = arith.constant 1 : index
    %c128_52 = arith.constant 128 : index
    %c0_53 = arith.constant 0 : index
    %96 = vector.load %arg7[%c1_51, %c128_52, %c0_53] : memref<2x256x256xf32, #tpu.memory_space<vmem>>, vector<1x32x256xf32>
    %97 = vector.shape_cast %96 : vector<1x32x256xf32> to vector<32x256xf32>
    %98 = vector.shape_cast %95 : vector<32x256xf32> to vector<1x32x256xf32>
    tpu.vector_store %arg7[%c1_51, %c128_52, %c0_53], %98 {strides = array<i32>} : memref<2x256x256xf32, #tpu.memory_space<vmem>>, vector<1x32x256xf32>,
    %99 = vector.extract_strided_slice %3 {offsets = [0, 73], sizes = [32, 256], strides = [1, 1]} : vector<32x402xf32> to vector<32x256xf32>
    %c1_54 = arith.constant 1 : index
    %c160_55 = arith.constant 160 : index
    %c0_56 = arith.constant 0 : index
    %100 = vector.load %arg7[%c1_54, %c160_55, %c0_56] : memref<2x256x256xf32, #tpu.memory_space<vmem>>, vector<1x32x256xf32>
    %101 = vector.shape_cast %100 : vector<1x32x256xf32> to vector<32x256xf32>
    %102 = vector.shape_cast %99 : vector<32x256xf32> to vector<1x32x256xf32>
    tpu.vector_store %arg7[%c1_54, %c160_55, %c0_56], %102 {strides = array<i32>} : memref<2x256x256xf32, #tpu.memory_space<vmem>>, vector<1x32x256xf32>,
    %103 = vector.extract_strided_slice %3 {offsets = [0, 74], sizes = [32, 256], strides = [1, 1]} : vector<32x402xf32> to vector<32x256xf32>
    %c14 = arith.constant 14 : index
    %c0_57 = arith.constant 0 : index
    %104 = vector.load %arg4[%c14, %c0_57] : memref<27x256xf32, #tpu.memory_space<vmem>>, vector<1x256xf32>
    %105 = vector.broadcast %104 : vector<1x256xf32> to vector<32x256xf32>
    %106 = arith.mulf %103, %105 : vector<32x256xf32>
    %c1_58 = arith.constant 1 : index
    %c192_59 = arith.constant 192 : index
    %c0_60 = arith.constant 0 : index
    %107 = vector.load %arg7[%c1_58, %c192_59, %c0_60] : memref<2x256x256xf32, #tpu.memory_space<vmem>>, vector<1x32x256xf32>
    %108 = vector.shape_cast %107 : vector<1x32x256xf32> to vector<32x256xf32>
    %109 = vector.shape_cast %106 : vector<32x256xf32> to vector<1x32x256xf32>
    tpu.vector_store %arg7[%c1_58, %c192_59, %c0_60], %109 {strides = array<i32>} : memref<2x256x256xf32, #tpu.memory_space<vmem>>, vector<1x32x256xf32>,
    %110 = vector.extract_strided_slice %3 {offsets = [0, 80], sizes = [32, 256], strides = [1, 1]} : vector<32x402xf32> to vector<32x256xf32>
    %c15 = arith.constant 15 : index
    %c0_61 = arith.constant 0 : index
    %111 = vector.load %arg4[%c15, %c0_61] : memref<27x256xf32, #tpu.memory_space<vmem>>, vector<1x256xf32>
    %112 = vector.broadcast %111 : vector<1x256xf32> to vector<32x256xf32>
    %113 = arith.mulf %110, %112 : vector<32x256xf32>
    %c1_62 = arith.constant 1 : index
    %c224_63 = arith.constant 224 : index
    %c0_64 = arith.constant 0 : index
    %114 = vector.load %arg7[%c1_62, %c224_63, %c0_64] : memref<2x256x256xf32, #tpu.memory_space<vmem>>, vector<1x32x256xf32>
    %115 = vector.shape_cast %114 : vector<1x32x256xf32> to vector<32x256xf32>
    %116 = vector.shape_cast %113 : vector<32x256xf32> to vector<1x32x256xf32>
    tpu.vector_store %arg7[%c1_62, %c224_63, %c0_64], %116 {strides = array<i32>} : memref<2x256x256xf32, #tpu.memory_space<vmem>>, vector<1x32x256xf32>,
    %c0_65 = arith.constant 0 : index
    %c256 = arith.constant 256 : index
    %117 = vector.load %arg2[%c0_65, %c256] : memref<32x864xf32, #tpu.memory_space<vmem>>, vector<32x256xf32>
    %c1_66 = arith.constant 1 : index
    %c0_67 = arith.constant 0 : index
    %c0_68 = arith.constant 0 : index
    %118 = vector.load %arg7[%c1_66, %c0_67, %c0_68] : memref<2x256x256xf32, #tpu.memory_space<vmem>>, vector<1x256x256xf32>
    %119 = vector.shape_cast %118 : vector<1x256x256xf32> to vector<256x256xf32>
    %cst_69 = arith.constant dense<0.000000e+00> : vector<32x256xf32>
    %120 = tpu.matmul %117, %119, %cst_69 {dimension_numbers = #tpu.dot_dimension_numbers<[1], [0], [0], [1], [0, 0, 1, 1], [], []>} : vector<32x256xf32>, vector<256x256xf32>, vector<32x256xf32> -> vector<32x256xf32>
    %121 = arith.addf %63, %120 : vector<32x256xf32>
    %122 = vector.extract_strided_slice %3 {offsets = [0, 81], sizes = [32, 256], strides = [1, 1]} : vector<32x402xf32> to vector<32x256xf32>
    %c16 = arith.constant 16 : index
    %c0_70 = arith.constant 0 : index
    %123 = vector.load %arg4[%c16, %c0_70] : memref<27x256xf32, #tpu.memory_space<vmem>>, vector<1x256xf32>
    %124 = vector.broadcast %123 : vector<1x256xf32> to vector<32x256xf32>
    %125 = arith.mulf %122, %124 : vector<32x256xf32>
    %c0_71 = arith.constant 0 : index
    %c0_72 = arith.constant 0 : index
    %c0_73 = arith.constant 0 : index
    %126 = vector.load %arg7[%c0_71, %c0_72, %c0_73] : memref<2x256x256xf32, #tpu.memory_space<vmem>>, vector<1x32x256xf32>
    %127 = vector.shape_cast %126 : vector<1x32x256xf32> to vector<32x256xf32>
    %128 = vector.shape_cast %125 : vector<32x256xf32> to vector<1x32x256xf32>
    tpu.vector_store %arg7[%c0_71, %c0_72, %c0_73], %128 {strides = array<i32>} : memref<2x256x256xf32, #tpu.memory_space<vmem>>, vector<1x32x256xf32>,
    %129 = vector.extract_strided_slice %3 {offsets = [0, 82], sizes = [32, 256], strides = [1, 1]} : vector<32x402xf32> to vector<32x256xf32>
    %c17 = arith.constant 17 : index
    %c0_74 = arith.constant 0 : index
    %130 = vector.load %arg4[%c17, %c0_74] : memref<27x256xf32, #tpu.memory_space<vmem>>, vector<1x256xf32>
    %131 = vector.broadcast %130 : vector<1x256xf32> to vector<32x256xf32>
    %132 = arith.mulf %129, %131 : vector<32x256xf32>
    %c0_75 = arith.constant 0 : index
    %c32_76 = arith.constant 32 : index
    %c0_77 = arith.constant 0 : index
    %133 = vector.load %arg7[%c0_75, %c32_76, %c0_77] : memref<2x256x256xf32, #tpu.memory_space<vmem>>, vector<1x32x256xf32>
    %134 = vector.shape_cast %133 : vector<1x32x256xf32> to vector<32x256xf32>
    %135 = vector.shape_cast %132 : vector<32x256xf32> to vector<1x32x256xf32>
    tpu.vector_store %arg7[%c0_75, %c32_76, %c0_77], %135 {strides = array<i32>} : memref<2x256x256xf32, #tpu.memory_space<vmem>>, vector<1x32x256xf32>,
    %136 = vector.extract_strided_slice %3 {offsets = [0, 128], sizes = [32, 256], strides = [1, 1]} : vector<32x402xf32> to vector<32x256xf32>
    %c18 = arith.constant 18 : index
    %c0_78 = arith.constant 0 : index
    %137 = vector.load %arg4[%c18, %c0_78] : memref<27x256xf32, #tpu.memory_space<vmem>>, vector<1x256xf32>
    %138 = vector.broadcast %137 : vector<1x256xf32> to vector<32x256xf32>
    %139 = arith.mulf %136, %138 : vector<32x256xf32>
    %c0_79 = arith.constant 0 : index
    %c64_80 = arith.constant 64 : index
    %c0_81 = arith.constant 0 : index
    %140 = vector.load %arg7[%c0_79, %c64_80, %c0_81] : memref<2x256x256xf32, #tpu.memory_space<vmem>>, vector<1x32x256xf32>
    %141 = vector.shape_cast %140 : vector<1x32x256xf32> to vector<32x256xf32>
    %142 = vector.shape_cast %139 : vector<32x256xf32> to vector<1x32x256xf32>
    tpu.vector_store %arg7[%c0_79, %c64_80, %c0_81], %142 {strides = array<i32>} : memref<2x256x256xf32, #tpu.memory_space<vmem>>, vector<1x32x256xf32>,
    %143 = vector.extract_strided_slice %3 {offsets = [0, 129], sizes = [32, 256], strides = [1, 1]} : vector<32x402xf32> to vector<32x256xf32>
    %c19 = arith.constant 19 : index
    %c0_82 = arith.constant 0 : index
    %144 = vector.load %arg4[%c19, %c0_82] : memref<27x256xf32, #tpu.memory_space<vmem>>, vector<1x256xf32>
    %145 = vector.broadcast %144 : vector<1x256xf32> to vector<32x256xf32>
    %146 = arith.mulf %143, %145 : vector<32x256xf32>
    %c0_83 = arith.constant 0 : index
    %c96_84 = arith.constant 96 : index
    %c0_85 = arith.constant 0 : index
    %147 = vector.load %arg7[%c0_83, %c96_84, %c0_85] : memref<2x256x256xf32, #tpu.memory_space<vmem>>, vector<1x32x256xf32>
    %148 = vector.shape_cast %147 : vector<1x32x256xf32> to vector<32x256xf32>
    %149 = vector.shape_cast %146 : vector<32x256xf32> to vector<1x32x256xf32>
    tpu.vector_store %arg7[%c0_83, %c96_84, %c0_85], %149 {strides = array<i32>} : memref<2x256x256xf32, #tpu.memory_space<vmem>>, vector<1x32x256xf32>,
    %150 = vector.extract_strided_slice %3 {offsets = [0, 130], sizes = [32, 256], strides = [1, 1]} : vector<32x402xf32> to vector<32x256xf32>
    %c20 = arith.constant 20 : index
    %c0_86 = arith.constant 0 : index
    %151 = vector.load %arg4[%c20, %c0_86] : memref<27x256xf32, #tpu.memory_space<vmem>>, vector<1x256xf32>
    %152 = vector.broadcast %151 : vector<1x256xf32> to vector<32x256xf32>
    %153 = arith.mulf %150, %152 : vector<32x256xf32>
    %c0_87 = arith.constant 0 : index
    %c128_88 = arith.constant 128 : index
    %c0_89 = arith.constant 0 : index
    %154 = vector.load %arg7[%c0_87, %c128_88, %c0_89] : memref<2x256x256xf32, #tpu.memory_space<vmem>>, vector<1x32x256xf32>
    %155 = vector.shape_cast %154 : vector<1x32x256xf32> to vector<32x256xf32>
    %156 = vector.shape_cast %153 : vector<32x256xf32> to vector<1x32x256xf32>
    tpu.vector_store %arg7[%c0_87, %c128_88, %c0_89], %156 {strides = array<i32>} : memref<2x256x256xf32, #tpu.memory_space<vmem>>, vector<1x32x256xf32>,
    %157 = vector.extract_strided_slice %3 {offsets = [0, 136], sizes = [32, 256], strides = [1, 1]} : vector<32x402xf32> to vector<32x256xf32>
    %c21 = arith.constant 21 : index
    %c0_90 = arith.constant 0 : index
    %158 = vector.load %arg4[%c21, %c0_90] : memref<27x256xf32, #tpu.memory_space<vmem>>, vector<1x256xf32>
    %159 = vector.broadcast %158 : vector<1x256xf32> to vector<32x256xf32>
    %160 = arith.mulf %157, %159 : vector<32x256xf32>
    %c0_91 = arith.constant 0 : index
    %c160_92 = arith.constant 160 : index
    %c0_93 = arith.constant 0 : index
    %161 = vector.load %arg7[%c0_91, %c160_92, %c0_93] : memref<2x256x256xf32, #tpu.memory_space<vmem>>, vector<1x32x256xf32>
    %162 = vector.shape_cast %161 : vector<1x32x256xf32> to vector<32x256xf32>
    %163 = vector.shape_cast %160 : vector<32x256xf32> to vector<1x32x256xf32>
    tpu.vector_store %arg7[%c0_91, %c160_92, %c0_93], %163 {strides = array<i32>} : memref<2x256x256xf32, #tpu.memory_space<vmem>>, vector<1x32x256xf32>,
    %164 = vector.extract_strided_slice %3 {offsets = [0, 137], sizes = [32, 256], strides = [1, 1]} : vector<32x402xf32> to vector<32x256xf32>
    %c22 = arith.constant 22 : index
    %c0_94 = arith.constant 0 : index
    %165 = vector.load %arg4[%c22, %c0_94] : memref<27x256xf32, #tpu.memory_space<vmem>>, vector<1x256xf32>
    %166 = vector.broadcast %165 : vector<1x256xf32> to vector<32x256xf32>
    %167 = arith.mulf %164, %166 : vector<32x256xf32>
    %c0_95 = arith.constant 0 : index
    %c192_96 = arith.constant 192 : index
    %c0_97 = arith.constant 0 : index
    %168 = vector.load %arg7[%c0_95, %c192_96, %c0_97] : memref<2x256x256xf32, #tpu.memory_space<vmem>>, vector<1x32x256xf32>
    %169 = vector.shape_cast %168 : vector<1x32x256xf32> to vector<32x256xf32>
    %170 = vector.shape_cast %167 : vector<32x256xf32> to vector<1x32x256xf32>
    tpu.vector_store %arg7[%c0_95, %c192_96, %c0_97], %170 {strides = array<i32>} : memref<2x256x256xf32, #tpu.memory_space<vmem>>, vector<1x32x256xf32>,
    %171 = vector.extract_strided_slice %3 {offsets = [0, 138], sizes = [32, 256], strides = [1, 1]} : vector<32x402xf32> to vector<32x256xf32>
    %c23 = arith.constant 23 : index
    %c0_98 = arith.constant 0 : index
    %172 = vector.load %arg4[%c23, %c0_98] : memref<27x256xf32, #tpu.memory_space<vmem>>, vector<1x256xf32>
    %173 = vector.broadcast %172 : vector<1x256xf32> to vector<32x256xf32>
    %174 = arith.mulf %171, %173 : vector<32x256xf32>
    %c0_99 = arith.constant 0 : index
    %c224_100 = arith.constant 224 : index
    %c0_101 = arith.constant 0 : index
    %175 = vector.load %arg7[%c0_99, %c224_100, %c0_101] : memref<2x256x256xf32, #tpu.memory_space<vmem>>, vector<1x32x256xf32>
    %176 = vector.shape_cast %175 : vector<1x32x256xf32> to vector<32x256xf32>
    %177 = vector.shape_cast %174 : vector<32x256xf32> to vector<1x32x256xf32>
    tpu.vector_store %arg7[%c0_99, %c224_100, %c0_101], %177 {strides = array<i32>} : memref<2x256x256xf32, #tpu.memory_space<vmem>>, vector<1x32x256xf32>,
    %c0_102 = arith.constant 0 : index
    %c512 = arith.constant 512 : index
    %178 = vector.load %arg2[%c0_102, %c512] : memref<32x864xf32, #tpu.memory_space<vmem>>, vector<32x256xf32>
    %c0_103 = arith.constant 0 : index
    %c0_104 = arith.constant 0 : index
    %c0_105 = arith.constant 0 : index
    %179 = vector.load %arg7[%c0_103, %c0_104, %c0_105] : memref<2x256x256xf32, #tpu.memory_space<vmem>>, vector<1x256x256xf32>
    %180 = vector.shape_cast %179 : vector<1x256x256xf32> to vector<256x256xf32>
    %cst_106 = arith.constant dense<0.000000e+00> : vector<32x256xf32>
    %181 = tpu.matmul %178, %180, %cst_106 {dimension_numbers = #tpu.dot_dimension_numbers<[1], [0], [0], [1], [0, 0, 1, 1], [], []>} : vector<32x256xf32>, vector<256x256xf32>, vector<32x256xf32> -> vector<32x256xf32>
    %182 = arith.addf %121, %181 : vector<32x256xf32>
    %183 = vector.extract_strided_slice %3 {offsets = [0, 144], sizes = [32, 256], strides = [1, 1]} : vector<32x402xf32> to vector<32x256xf32>
    %c24 = arith.constant 24 : index
    %c0_107 = arith.constant 0 : index
    %184 = vector.load %arg4[%c24, %c0_107] : memref<27x256xf32, #tpu.memory_space<vmem>>, vector<1x256xf32>
    %185 = vector.broadcast %184 : vector<1x256xf32> to vector<32x256xf32>
    %186 = arith.mulf %183, %185 : vector<32x256xf32>
    %c1_108 = arith.constant 1 : index
    %c0_109 = arith.constant 0 : index
    %c0_110 = arith.constant 0 : index
    %187 = vector.load %arg7[%c1_108, %c0_109, %c0_110] : memref<2x256x256xf32, #tpu.memory_space<vmem>>, vector<1x32x256xf32>
    %188 = vector.shape_cast %187 : vector<1x32x256xf32> to vector<32x256xf32>
    %189 = vector.shape_cast %186 : vector<32x256xf32> to vector<1x32x256xf32>
    tpu.vector_store %arg7[%c1_108, %c0_109, %c0_110], %189 {strides = array<i32>} : memref<2x256x256xf32, #tpu.memory_space<vmem>>, vector<1x32x256xf32>,
    %190 = vector.extract_strided_slice %3 {offsets = [0, 145], sizes = [32, 256], strides = [1, 1]} : vector<32x402xf32> to vector<32x256xf32>
    %c25 = arith.constant 25 : index
    %c0_111 = arith.constant 0 : index
    %191 = vector.load %arg4[%c25, %c0_111] : memref<27x256xf32, #tpu.memory_space<vmem>>, vector<1x256xf32>
    %192 = vector.broadcast %191 : vector<1x256xf32> to vector<32x256xf32>
    %193 = arith.mulf %190, %192 : vector<32x256xf32>
    %c1_112 = arith.constant 1 : index
    %c32_113 = arith.constant 32 : index
    %c0_114 = arith.constant 0 : index
    %194 = vector.load %arg7[%c1_112, %c32_113, %c0_114] : memref<2x256x256xf32, #tpu.memory_space<vmem>>, vector<1x32x256xf32>
    %195 = vector.shape_cast %194 : vector<1x32x256xf32> to vector<32x256xf32>
    %196 = vector.shape_cast %193 : vector<32x256xf32> to vector<1x32x256xf32>
    tpu.vector_store %arg7[%c1_112, %c32_113, %c0_114], %196 {strides = array<i32>} : memref<2x256x256xf32, #tpu.memory_space<vmem>>, vector<1x32x256xf32>,
    %197 = vector.extract_strided_slice %3 {offsets = [0, 146], sizes = [32, 256], strides = [1, 1]} : vector<32x402xf32> to vector<32x256xf32>
    %c26 = arith.constant 26 : index
    %c0_115 = arith.constant 0 : index
    %198 = vector.load %arg4[%c26, %c0_115] : memref<27x256xf32, #tpu.memory_space<vmem>>, vector<1x256xf32>
    %199 = vector.broadcast %198 : vector<1x256xf32> to vector<32x256xf32>
    %200 = arith.mulf %197, %199 : vector<32x256xf32>
    %c1_116 = arith.constant 1 : index
    %c64_117 = arith.constant 64 : index
    %c0_118 = arith.constant 0 : index
    %201 = vector.load %arg7[%c1_116, %c64_117, %c0_118] : memref<2x256x256xf32, #tpu.memory_space<vmem>>, vector<1x32x256xf32>
    %202 = vector.shape_cast %201 : vector<1x32x256xf32> to vector<32x256xf32>
    %203 = vector.shape_cast %200 : vector<32x256xf32> to vector<1x32x256xf32>
    tpu.vector_store %arg7[%c1_116, %c64_117, %c0_118], %203 {strides = array<i32>} : memref<2x256x256xf32, #tpu.memory_space<vmem>>, vector<1x32x256xf32>,
    %c0_119 = arith.constant 0 : index
    %c768 = arith.constant 768 : index
    %204 = vector.load %arg2[%c0_119, %c768] : memref<32x864xf32, #tpu.memory_space<vmem>>, vector<32x96xf32>
    %c1_120 = arith.constant 1 : index
    %c0_121 = arith.constant 0 : index
    %c0_122 = arith.constant 0 : index
    %205 = vector.load %arg7[%c1_120, %c0_121, %c0_122] : memref<2x256x256xf32, #tpu.memory_space<vmem>>, vector<1x96x256xf32>
    %206 = vector.shape_cast %205 : vector<1x96x256xf32> to vector<96x256xf32>
    %cst_123 = arith.constant dense<0.000000e+00> : vector<32x256xf32>
    %207 = tpu.matmul %204, %206, %cst_123 {dimension_numbers = #tpu.dot_dimension_numbers<[1], [0], [0], [1], [0, 0, 1, 1], [], []>} : vector<32x96xf32>, vector<96x256xf32>, vector<32x256xf32> -> vector<32x256xf32>
    %208 = arith.addf %182, %207 : vector<32x256xf32>
    %c0_124 = arith.constant 0 : index
    %c0_125 = arith.constant 0 : index
    %209 = vector.load %arg3[%c0_124, %c0_125] : memref<32x1xf32, #tpu.memory_space<vmem>>, vector<32x1xf32>
    %210 = vector.broadcast %209 : vector<32x1xf32> to vector<32x256xf32>
    %211 = arith.addf %208, %210 : vector<32x256xf32>
    %c0_126 = arith.constant 0 : index
    %c0_127 = arith.constant 0 : index
    %c0_128 = arith.constant 0 : index
    %212 = vector.load %arg5[%c0_126, %c0_127, %c0_128] : memref<1x32x256xf32, #tpu.memory_space<vmem>>, vector<1x32x256xf32>
    %213 = vector.shape_cast %212 : vector<1x32x256xf32> to vector<32x256xf32>
    %214 = vector.shape_cast %211 : vector<32x256xf32> to vector<1x32x256xf32>
    tpu.vector_store %arg5[%c0_126, %c0_127, %c0_128], %214 {strides = array<i32>} : memref<1x32x256xf32, #tpu.memory_space<vmem>>, vector<1x32x256xf32>,
    %cst_129 = arith.constant dense<0.000000e+00> : vector<32xf32>
    %215 = vector.multi_reduction <add>, %211, %cst_129 [1] : vector<32x256xf32> to vector<32xf32>
    %216 = vector.shape_cast %215 : vector<32xf32> to vector<32x1xf32>
    %217 = arith.mulf %211, %211 : vector<32x256xf32>
    %cst_130 = arith.constant dense<0.000000e+00> : vector<32xf32>
    %218 = vector.multi_reduction <add>, %217, %cst_130 [1] : vector<32x256xf32> to vector<32xf32>
    %219 = vector.shape_cast %218 : vector<32xf32> to vector<32x1xf32>
    %220 = tpu.concatenate %216, %219 in 1 : vector<32x1xf32>, vector<32x1xf32> -> vector<32x2xf32>
    %c0_131 = arith.constant 0 : index
    %c0_132 = arith.constant 0 : index
    %c0_133 = arith.constant 0 : index
    %221 = vector.load %arg6[%c0_131, %c0_132, %c0_133] : memref<1x32x2xf32, #tpu.memory_space<vmem>>, vector<1x32x2xf32>
    %222 = vector.shape_cast %221 : vector<1x32x2xf32> to vector<32x2xf32>
    %223 = vector.shape_cast %220 : vector<32x2xf32> to vector<1x32x2xf32>
    tpu.vector_store %arg6[%c0_131, %c0_132, %c0_133], %223 {strides = array<i32>} : memref<1x32x2xf32, #tpu.memory_space<vmem>>, vector<1x32x2xf32>,
    return
  }
  func.func @transform_0(%arg0: i32) -> (i32, i32, i32) {
    %c0_i32 = arith.constant 0 : i32
    %c0_i32_0 = arith.constant 0 : i32
    %c0_i32_1 = arith.constant 0 : i32
    return %arg0, %c0_i32, %c0_i32_0 : i32, i32, i32
  }
  func.func @transform_1(%arg0: i32) -> (i32, i32) {
    %c0_i32 = arith.constant 0 : i32
    %c0_i32_0 = arith.constant 0 : i32
    %c0_i32_1 = arith.constant 0 : i32
    return %c0_i32, %c0_i32_0 : i32, i32
  }
  func.func @transform_2(%arg0: i32) -> (i32, i32) {
    %c0_i32 = arith.constant 0 : i32
    %c0_i32_0 = arith.constant 0 : i32
    %c0_i32_1 = arith.constant 0 : i32
    return %c0_i32, %c0_i32_0 : i32, i32
  }
  func.func @transform_3(%arg0: i32) -> (i32, i32) {
    %c0_i32 = arith.constant 0 : i32
    %c0_i32_0 = arith.constant 0 : i32
    %c0_i32_1 = arith.constant 0 : i32
    return %c0_i32, %c0_i32_0 : i32, i32
  }
  func.func @transform_4(%arg0: i32) -> (i32, i32, i32) {
    %c0_i32 = arith.constant 0 : i32
    %c0_i32_0 = arith.constant 0 : i32
    %c0_i32_1 = arith.constant 0 : i32
    return %arg0, %c0_i32, %c0_i32_0 : i32, i32, i32
  }
  func.func @transform_5(%arg0: i32) -> (i32, i32, i32) {
    %c0_i32 = arith.constant 0 : i32
    %c0_i32_0 = arith.constant 0 : i32
    %c0_i32_1 = arith.constant 0 : i32
    return %arg0, %c0_i32, %c0_i32_0 : i32, i32, i32
  }
}

module attributes {stable_mosaic.version = 11 : i64} {
  func.func @kernel(%arg0: i32, %arg1: memref<1x32x256xf32, #tpu.memory_space<vmem>>, %arg2: memref<32x2xf32, #tpu.memory_space<vmem>>, %arg3: memref<32x864xf32, #tpu.memory_space<vmem>>, %arg4: memref<32x1xf32, #tpu.memory_space<vmem>>, %arg5: memref<27x256xf32, #tpu.memory_space<vmem>>, %arg6: memref<1x32x256xf32, #tpu.memory_space<vmem>>, %arg7: memref<1x32x2xf32, #tpu.memory_space<vmem>>, %arg8: memref<1x32x256xf32, #tpu.memory_space<vmem>>, %arg9: memref<2x256x256xf32, #tpu.memory_space<vmem>>) attributes {dimension_semantics = [#tpu.dimension_semantics<parallel>], iteration_bounds = array<i64: 2>, scalar_prefetch = 0 : i64, scratch_operands = 1 : i64, tpu.core_type = #tpu.core_type<tc>, window_params = [{transform_indices = @transform_0, window_bounds = array<i64: 1, 32, 256>}, {pipeline_mode = #tpu.pipeline_mode<synchronous>, transform_indices = @transform_1, window_bounds = array<i64: 32, 2>}, {pipeline_mode = #tpu.pipeline_mode<synchronous>, transform_indices = @transform_2, window_bounds = array<i64: 32, 864>}, {pipeline_mode = #tpu.pipeline_mode<synchronous>, transform_indices = @transform_3, window_bounds = array<i64: 32, 1>}, {pipeline_mode = #tpu.pipeline_mode<synchronous>, transform_indices = @transform_4, window_bounds = array<i64: 27, 256>}, {transform_indices = @transform_5, window_bounds = array<i64: 1, 32, 256>}, {transform_indices = @transform_6, window_bounds = array<i64: 1, 32, 2>}, {transform_indices = @transform_7, window_bounds = array<i64: 1, 32, 256>}]} {
    %c0 = arith.constant 0 : index
    %c0_0 = arith.constant 0 : index
    %c0_1 = arith.constant 0 : index
    %0 = vector.load %arg1[%c0, %c0_0, %c0_1] : memref<1x32x256xf32, #tpu.memory_space<vmem>>, vector<1x32x256xf32>
    %1 = vector.shape_cast %0 : vector<1x32x256xf32> to vector<32x256xf32>
    %c0_2 = arith.constant 0 : index
    %c0_3 = arith.constant 0 : index
    %2 = vector.load %arg2[%c0_2, %c0_3] : memref<32x2xf32, #tpu.memory_space<vmem>>, vector<32x2xf32>
    %3 = vector.extract_strided_slice %2 {offsets = [0, 0], sizes = [32, 1], strides = [1, 1]} : vector<32x2xf32> to vector<32x1xf32>
    %4 = vector.broadcast %3 : vector<32x1xf32> to vector<32x256xf32>
    %5 = arith.mulf %1, %4 : vector<32x256xf32>
    %6 = vector.extract_strided_slice %2 {offsets = [0, 1], sizes = [32, 1], strides = [1, 1]} : vector<32x2xf32> to vector<32x1xf32>
    %7 = vector.broadcast %6 : vector<32x1xf32> to vector<32x256xf32>
    %8 = arith.addf %5, %7 : vector<32x256xf32>
    %cst = arith.constant 0.000000e+00 : f32
    %9 = vector.broadcast %cst : f32 to vector<32x256xf32>
    %10 = arith.cmpf oge, %8, %9 : vector<32x256xf32>
    %cst_4 = arith.constant 4.000000e-02 : f32
    %11 = vector.broadcast %cst_4 : f32 to vector<32x256xf32>
    %12 = arith.mulf %11, %8 : vector<32x256xf32>
    %13 = arith.select %10, %8, %12 : vector<32x256xi1>, vector<32x256xf32>
    %c0_5 = arith.constant 0 : index
    %c0_6 = arith.constant 0 : index
    %c0_7 = arith.constant 0 : index
    %14 = vector.load %arg8[%c0_5, %c0_6, %c0_7] : memref<1x32x256xf32, #tpu.memory_space<vmem>>, vector<1x32x256xf32>
    %15 = vector.shape_cast %14 : vector<1x32x256xf32> to vector<32x256xf32>
    %16 = vector.shape_cast %13 : vector<32x256xf32> to vector<1x32x256xf32>
    tpu.vector_store %arg8[%c0_5, %c0_6, %c0_7], %16 {strides = array<i32>} : memref<1x32x256xf32, #tpu.memory_space<vmem>>, vector<1x32x256xf32>,
    %cst_8 = arith.constant 0.000000e+00 : f32
    %17 = vector.broadcast %cst_8 : f32 to vector<32x73xf32>
    %18 = tpu.concatenate %17, %13, %17 in 1 : vector<32x73xf32>, vector<32x256xf32>, vector<32x73xf32> -> vector<32x402xf32>
    %19 = vector.extract_strided_slice %18 {offsets = [0, 0], sizes = [32, 256], strides = [1, 1]} : vector<32x402xf32> to vector<32x256xf32>
    %c0_9 = arith.constant 0 : index
    %c0_10 = arith.constant 0 : index
    %20 = vector.load %arg5[%c0_9, %c0_10] : memref<27x256xf32, #tpu.memory_space<vmem>>, vector<1x256xf32>
    %21 = vector.broadcast %20 : vector<1x256xf32> to vector<32x256xf32>
    %22 = arith.mulf %19, %21 : vector<32x256xf32>
    %c0_11 = arith.constant 0 : index
    %c0_12 = arith.constant 0 : index
    %c0_13 = arith.constant 0 : index
    %23 = vector.load %arg9[%c0_11, %c0_12, %c0_13] : memref<2x256x256xf32, #tpu.memory_space<vmem>>, vector<1x32x256xf32>
    %24 = vector.shape_cast %23 : vector<1x32x256xf32> to vector<32x256xf32>
    %25 = vector.shape_cast %22 : vector<32x256xf32> to vector<1x32x256xf32>
    tpu.vector_store %arg9[%c0_11, %c0_12, %c0_13], %25 {strides = array<i32>} : memref<2x256x256xf32, #tpu.memory_space<vmem>>, vector<1x32x256xf32>,
    %26 = vector.extract_strided_slice %18 {offsets = [0, 1], sizes = [32, 256], strides = [1, 1]} : vector<32x402xf32> to vector<32x256xf32>
    %c1 = arith.constant 1 : index
    %c0_14 = arith.constant 0 : index
    %27 = vector.load %arg5[%c1, %c0_14] : memref<27x256xf32, #tpu.memory_space<vmem>>, vector<1x256xf32>
    %28 = vector.broadcast %27 : vector<1x256xf32> to vector<32x256xf32>
    %29 = arith.mulf %26, %28 : vector<32x256xf32>
    %c0_15 = arith.constant 0 : index
    %c32 = arith.constant 32 : index
    %c0_16 = arith.constant 0 : index
    %30 = vector.load %arg9[%c0_15, %c32, %c0_16] : memref<2x256x256xf32, #tpu.memory_space<vmem>>, vector<1x32x256xf32>
    %31 = vector.shape_cast %30 : vector<1x32x256xf32> to vector<32x256xf32>
    %32 = vector.shape_cast %29 : vector<32x256xf32> to vector<1x32x256xf32>
    tpu.vector_store %arg9[%c0_15, %c32, %c0_16], %32 {strides = array<i32>} : memref<2x256x256xf32, #tpu.memory_space<vmem>>, vector<1x32x256xf32>,
    %33 = vector.extract_strided_slice %18 {offsets = [0, 2], sizes = [32, 256], strides = [1, 1]} : vector<32x402xf32> to vector<32x256xf32>
    %c2 = arith.constant 2 : index
    %c0_17 = arith.constant 0 : index
    %34 = vector.load %arg5[%c2, %c0_17] : memref<27x256xf32, #tpu.memory_space<vmem>>, vector<1x256xf32>
    %35 = vector.broadcast %34 : vector<1x256xf32> to vector<32x256xf32>
    %36 = arith.mulf %33, %35 : vector<32x256xf32>
    %c0_18 = arith.constant 0 : index
    %c64 = arith.constant 64 : index
    %c0_19 = arith.constant 0 : index
    %37 = vector.load %arg9[%c0_18, %c64, %c0_19] : memref<2x256x256xf32, #tpu.memory_space<vmem>>, vector<1x32x256xf32>
    %38 = vector.shape_cast %37 : vector<1x32x256xf32> to vector<32x256xf32>
    %39 = vector.shape_cast %36 : vector<32x256xf32> to vector<1x32x256xf32>
    tpu.vector_store %arg9[%c0_18, %c64, %c0_19], %39 {strides = array<i32>} : memref<2x256x256xf32, #tpu.memory_space<vmem>>, vector<1x32x256xf32>,
    %40 = vector.extract_strided_slice %18 {offsets = [0, 8], sizes = [32, 256], strides = [1, 1]} : vector<32x402xf32> to vector<32x256xf32>
    %c3 = arith.constant 3 : index
    %c0_20 = arith.constant 0 : index
    %41 = vector.load %arg5[%c3, %c0_20] : memref<27x256xf32, #tpu.memory_space<vmem>>, vector<1x256xf32>
    %42 = vector.broadcast %41 : vector<1x256xf32> to vector<32x256xf32>
    %43 = arith.mulf %40, %42 : vector<32x256xf32>
    %c0_21 = arith.constant 0 : index
    %c96 = arith.constant 96 : index
    %c0_22 = arith.constant 0 : index
    %44 = vector.load %arg9[%c0_21, %c96, %c0_22] : memref<2x256x256xf32, #tpu.memory_space<vmem>>, vector<1x32x256xf32>
    %45 = vector.shape_cast %44 : vector<1x32x256xf32> to vector<32x256xf32>
    %46 = vector.shape_cast %43 : vector<32x256xf32> to vector<1x32x256xf32>
    tpu.vector_store %arg9[%c0_21, %c96, %c0_22], %46 {strides = array<i32>} : memref<2x256x256xf32, #tpu.memory_space<vmem>>, vector<1x32x256xf32>,
    %47 = vector.extract_strided_slice %18 {offsets = [0, 9], sizes = [32, 256], strides = [1, 1]} : vector<32x402xf32> to vector<32x256xf32>
    %c4 = arith.constant 4 : index
    %c0_23 = arith.constant 0 : index
    %48 = vector.load %arg5[%c4, %c0_23] : memref<27x256xf32, #tpu.memory_space<vmem>>, vector<1x256xf32>
    %49 = vector.broadcast %48 : vector<1x256xf32> to vector<32x256xf32>
    %50 = arith.mulf %47, %49 : vector<32x256xf32>
    %c0_24 = arith.constant 0 : index
    %c128 = arith.constant 128 : index
    %c0_25 = arith.constant 0 : index
    %51 = vector.load %arg9[%c0_24, %c128, %c0_25] : memref<2x256x256xf32, #tpu.memory_space<vmem>>, vector<1x32x256xf32>
    %52 = vector.shape_cast %51 : vector<1x32x256xf32> to vector<32x256xf32>
    %53 = vector.shape_cast %50 : vector<32x256xf32> to vector<1x32x256xf32>
    tpu.vector_store %arg9[%c0_24, %c128, %c0_25], %53 {strides = array<i32>} : memref<2x256x256xf32, #tpu.memory_space<vmem>>, vector<1x32x256xf32>,
    %54 = vector.extract_strided_slice %18 {offsets = [0, 10], sizes = [32, 256], strides = [1, 1]} : vector<32x402xf32> to vector<32x256xf32>
    %c5 = arith.constant 5 : index
    %c0_26 = arith.constant 0 : index
    %55 = vector.load %arg5[%c5, %c0_26] : memref<27x256xf32, #tpu.memory_space<vmem>>, vector<1x256xf32>
    %56 = vector.broadcast %55 : vector<1x256xf32> to vector<32x256xf32>
    %57 = arith.mulf %54, %56 : vector<32x256xf32>
    %c0_27 = arith.constant 0 : index
    %c160 = arith.constant 160 : index
    %c0_28 = arith.constant 0 : index
    %58 = vector.load %arg9[%c0_27, %c160, %c0_28] : memref<2x256x256xf32, #tpu.memory_space<vmem>>, vector<1x32x256xf32>
    %59 = vector.shape_cast %58 : vector<1x32x256xf32> to vector<32x256xf32>
    %60 = vector.shape_cast %57 : vector<32x256xf32> to vector<1x32x256xf32>
    tpu.vector_store %arg9[%c0_27, %c160, %c0_28], %60 {strides = array<i32>} : memref<2x256x256xf32, #tpu.memory_space<vmem>>, vector<1x32x256xf32>,
    %61 = vector.extract_strided_slice %18 {offsets = [0, 16], sizes = [32, 256], strides = [1, 1]} : vector<32x402xf32> to vector<32x256xf32>
    %c6 = arith.constant 6 : index
    %c0_29 = arith.constant 0 : index
    %62 = vector.load %arg5[%c6, %c0_29] : memref<27x256xf32, #tpu.memory_space<vmem>>, vector<1x256xf32>
    %63 = vector.broadcast %62 : vector<1x256xf32> to vector<32x256xf32>
    %64 = arith.mulf %61, %63 : vector<32x256xf32>
    %c0_30 = arith.constant 0 : index
    %c192 = arith.constant 192 : index
    %c0_31 = arith.constant 0 : index
    %65 = vector.load %arg9[%c0_30, %c192, %c0_31] : memref<2x256x256xf32, #tpu.memory_space<vmem>>, vector<1x32x256xf32>
    %66 = vector.shape_cast %65 : vector<1x32x256xf32> to vector<32x256xf32>
    %67 = vector.shape_cast %64 : vector<32x256xf32> to vector<1x32x256xf32>
    tpu.vector_store %arg9[%c0_30, %c192, %c0_31], %67 {strides = array<i32>} : memref<2x256x256xf32, #tpu.memory_space<vmem>>, vector<1x32x256xf32>,
    %68 = vector.extract_strided_slice %18 {offsets = [0, 17], sizes = [32, 256], strides = [1, 1]} : vector<32x402xf32> to vector<32x256xf32>
    %c7 = arith.constant 7 : index
    %c0_32 = arith.constant 0 : index
    %69 = vector.load %arg5[%c7, %c0_32] : memref<27x256xf32, #tpu.memory_space<vmem>>, vector<1x256xf32>
    %70 = vector.broadcast %69 : vector<1x256xf32> to vector<32x256xf32>
    %71 = arith.mulf %68, %70 : vector<32x256xf32>
    %c0_33 = arith.constant 0 : index
    %c224 = arith.constant 224 : index
    %c0_34 = arith.constant 0 : index
    %72 = vector.load %arg9[%c0_33, %c224, %c0_34] : memref<2x256x256xf32, #tpu.memory_space<vmem>>, vector<1x32x256xf32>
    %73 = vector.shape_cast %72 : vector<1x32x256xf32> to vector<32x256xf32>
    %74 = vector.shape_cast %71 : vector<32x256xf32> to vector<1x32x256xf32>
    tpu.vector_store %arg9[%c0_33, %c224, %c0_34], %74 {strides = array<i32>} : memref<2x256x256xf32, #tpu.memory_space<vmem>>, vector<1x32x256xf32>,
    %c0_35 = arith.constant 0 : index
    %c0_36 = arith.constant 0 : index
    %75 = vector.load %arg3[%c0_35, %c0_36] : memref<32x864xf32, #tpu.memory_space<vmem>>, vector<32x256xf32>
    %c0_37 = arith.constant 0 : index
    %c0_38 = arith.constant 0 : index
    %c0_39 = arith.constant 0 : index
    %76 = vector.load %arg9[%c0_37, %c0_38, %c0_39] : memref<2x256x256xf32, #tpu.memory_space<vmem>>, vector<1x256x256xf32>
    %77 = vector.shape_cast %76 : vector<1x256x256xf32> to vector<256x256xf32>
    %cst_40 = arith.constant dense<0.000000e+00> : vector<32x256xf32>
    %78 = tpu.matmul %75, %77, %cst_40 {dimension_numbers = #tpu.dot_dimension_numbers<[1], [0], [0], [1], [0, 0, 1, 1], [], []>} : vector<32x256xf32>, vector<256x256xf32>, vector<32x256xf32> -> vector<32x256xf32>
    %79 = vector.extract_strided_slice %18 {offsets = [0, 18], sizes = [32, 256], strides = [1, 1]} : vector<32x402xf32> to vector<32x256xf32>
    %c8 = arith.constant 8 : index
    %c0_41 = arith.constant 0 : index
    %80 = vector.load %arg5[%c8, %c0_41] : memref<27x256xf32, #tpu.memory_space<vmem>>, vector<1x256xf32>
    %81 = vector.broadcast %80 : vector<1x256xf32> to vector<32x256xf32>
    %82 = arith.mulf %79, %81 : vector<32x256xf32>
    %c1_42 = arith.constant 1 : index
    %c0_43 = arith.constant 0 : index
    %c0_44 = arith.constant 0 : index
    %83 = vector.load %arg9[%c1_42, %c0_43, %c0_44] : memref<2x256x256xf32, #tpu.memory_space<vmem>>, vector<1x32x256xf32>
    %84 = vector.shape_cast %83 : vector<1x32x256xf32> to vector<32x256xf32>
    %85 = vector.shape_cast %82 : vector<32x256xf32> to vector<1x32x256xf32>
    tpu.vector_store %arg9[%c1_42, %c0_43, %c0_44], %85 {strides = array<i32>} : memref<2x256x256xf32, #tpu.memory_space<vmem>>, vector<1x32x256xf32>,
    %86 = vector.extract_strided_slice %18 {offsets = [0, 64], sizes = [32, 256], strides = [1, 1]} : vector<32x402xf32> to vector<32x256xf32>
    %c9 = arith.constant 9 : index
    %c0_45 = arith.constant 0 : index
    %87 = vector.load %arg5[%c9, %c0_45] : memref<27x256xf32, #tpu.memory_space<vmem>>, vector<1x256xf32>
    %88 = vector.broadcast %87 : vector<1x256xf32> to vector<32x256xf32>
    %89 = arith.mulf %86, %88 : vector<32x256xf32>
    %c1_46 = arith.constant 1 : index
    %c32_47 = arith.constant 32 : index
    %c0_48 = arith.constant 0 : index
    %90 = vector.load %arg9[%c1_46, %c32_47, %c0_48] : memref<2x256x256xf32, #tpu.memory_space<vmem>>, vector<1x32x256xf32>
    %91 = vector.shape_cast %90 : vector<1x32x256xf32> to vector<32x256xf32>
    %92 = vector.shape_cast %89 : vector<32x256xf32> to vector<1x32x256xf32>
    tpu.vector_store %arg9[%c1_46, %c32_47, %c0_48], %92 {strides = array<i32>} : memref<2x256x256xf32, #tpu.memory_space<vmem>>, vector<1x32x256xf32>,
    %93 = vector.extract_strided_slice %18 {offsets = [0, 65], sizes = [32, 256], strides = [1, 1]} : vector<32x402xf32> to vector<32x256xf32>
    %c10 = arith.constant 10 : index
    %c0_49 = arith.constant 0 : index
    %94 = vector.load %arg5[%c10, %c0_49] : memref<27x256xf32, #tpu.memory_space<vmem>>, vector<1x256xf32>
    %95 = vector.broadcast %94 : vector<1x256xf32> to vector<32x256xf32>
    %96 = arith.mulf %93, %95 : vector<32x256xf32>
    %c1_50 = arith.constant 1 : index
    %c64_51 = arith.constant 64 : index
    %c0_52 = arith.constant 0 : index
    %97 = vector.load %arg9[%c1_50, %c64_51, %c0_52] : memref<2x256x256xf32, #tpu.memory_space<vmem>>, vector<1x32x256xf32>
    %98 = vector.shape_cast %97 : vector<1x32x256xf32> to vector<32x256xf32>
    %99 = vector.shape_cast %96 : vector<32x256xf32> to vector<1x32x256xf32>
    tpu.vector_store %arg9[%c1_50, %c64_51, %c0_52], %99 {strides = array<i32>} : memref<2x256x256xf32, #tpu.memory_space<vmem>>, vector<1x32x256xf32>,
    %100 = vector.extract_strided_slice %18 {offsets = [0, 66], sizes = [32, 256], strides = [1, 1]} : vector<32x402xf32> to vector<32x256xf32>
    %c11 = arith.constant 11 : index
    %c0_53 = arith.constant 0 : index
    %101 = vector.load %arg5[%c11, %c0_53] : memref<27x256xf32, #tpu.memory_space<vmem>>, vector<1x256xf32>
    %102 = vector.broadcast %101 : vector<1x256xf32> to vector<32x256xf32>
    %103 = arith.mulf %100, %102 : vector<32x256xf32>
    %c1_54 = arith.constant 1 : index
    %c96_55 = arith.constant 96 : index
    %c0_56 = arith.constant 0 : index
    %104 = vector.load %arg9[%c1_54, %c96_55, %c0_56] : memref<2x256x256xf32, #tpu.memory_space<vmem>>, vector<1x32x256xf32>
    %105 = vector.shape_cast %104 : vector<1x32x256xf32> to vector<32x256xf32>
    %106 = vector.shape_cast %103 : vector<32x256xf32> to vector<1x32x256xf32>
    tpu.vector_store %arg9[%c1_54, %c96_55, %c0_56], %106 {strides = array<i32>} : memref<2x256x256xf32, #tpu.memory_space<vmem>>, vector<1x32x256xf32>,
    %107 = vector.extract_strided_slice %18 {offsets = [0, 72], sizes = [32, 256], strides = [1, 1]} : vector<32x402xf32> to vector<32x256xf32>
    %c12 = arith.constant 12 : index
    %c0_57 = arith.constant 0 : index
    %108 = vector.load %arg5[%c12, %c0_57] : memref<27x256xf32, #tpu.memory_space<vmem>>, vector<1x256xf32>
    %109 = vector.broadcast %108 : vector<1x256xf32> to vector<32x256xf32>
    %110 = arith.mulf %107, %109 : vector<32x256xf32>
    %c1_58 = arith.constant 1 : index
    %c128_59 = arith.constant 128 : index
    %c0_60 = arith.constant 0 : index
    %111 = vector.load %arg9[%c1_58, %c128_59, %c0_60] : memref<2x256x256xf32, #tpu.memory_space<vmem>>, vector<1x32x256xf32>
    %112 = vector.shape_cast %111 : vector<1x32x256xf32> to vector<32x256xf32>
    %113 = vector.shape_cast %110 : vector<32x256xf32> to vector<1x32x256xf32>
    tpu.vector_store %arg9[%c1_58, %c128_59, %c0_60], %113 {strides = array<i32>} : memref<2x256x256xf32, #tpu.memory_space<vmem>>, vector<1x32x256xf32>,
    %114 = vector.extract_strided_slice %18 {offsets = [0, 73], sizes = [32, 256], strides = [1, 1]} : vector<32x402xf32> to vector<32x256xf32>
    %c1_61 = arith.constant 1 : index
    %c160_62 = arith.constant 160 : index
    %c0_63 = arith.constant 0 : index
    %115 = vector.load %arg9[%c1_61, %c160_62, %c0_63] : memref<2x256x256xf32, #tpu.memory_space<vmem>>, vector<1x32x256xf32>
    %116 = vector.shape_cast %115 : vector<1x32x256xf32> to vector<32x256xf32>
    %117 = vector.shape_cast %114 : vector<32x256xf32> to vector<1x32x256xf32>
    tpu.vector_store %arg9[%c1_61, %c160_62, %c0_63], %117 {strides = array<i32>} : memref<2x256x256xf32, #tpu.memory_space<vmem>>, vector<1x32x256xf32>,
    %118 = vector.extract_strided_slice %18 {offsets = [0, 74], sizes = [32, 256], strides = [1, 1]} : vector<32x402xf32> to vector<32x256xf32>
    %c14 = arith.constant 14 : index
    %c0_64 = arith.constant 0 : index
    %119 = vector.load %arg5[%c14, %c0_64] : memref<27x256xf32, #tpu.memory_space<vmem>>, vector<1x256xf32>
    %120 = vector.broadcast %119 : vector<1x256xf32> to vector<32x256xf32>
    %121 = arith.mulf %118, %120 : vector<32x256xf32>
    %c1_65 = arith.constant 1 : index
    %c192_66 = arith.constant 192 : index
    %c0_67 = arith.constant 0 : index
    %122 = vector.load %arg9[%c1_65, %c192_66, %c0_67] : memref<2x256x256xf32, #tpu.memory_space<vmem>>, vector<1x32x256xf32>
    %123 = vector.shape_cast %122 : vector<1x32x256xf32> to vector<32x256xf32>
    %124 = vector.shape_cast %121 : vector<32x256xf32> to vector<1x32x256xf32>
    tpu.vector_store %arg9[%c1_65, %c192_66, %c0_67], %124 {strides = array<i32>} : memref<2x256x256xf32, #tpu.memory_space<vmem>>, vector<1x32x256xf32>,
    %125 = vector.extract_strided_slice %18 {offsets = [0, 80], sizes = [32, 256], strides = [1, 1]} : vector<32x402xf32> to vector<32x256xf32>
    %c15 = arith.constant 15 : index
    %c0_68 = arith.constant 0 : index
    %126 = vector.load %arg5[%c15, %c0_68] : memref<27x256xf32, #tpu.memory_space<vmem>>, vector<1x256xf32>
    %127 = vector.broadcast %126 : vector<1x256xf32> to vector<32x256xf32>
    %128 = arith.mulf %125, %127 : vector<32x256xf32>
    %c1_69 = arith.constant 1 : index
    %c224_70 = arith.constant 224 : index
    %c0_71 = arith.constant 0 : index
    %129 = vector.load %arg9[%c1_69, %c224_70, %c0_71] : memref<2x256x256xf32, #tpu.memory_space<vmem>>, vector<1x32x256xf32>
    %130 = vector.shape_cast %129 : vector<1x32x256xf32> to vector<32x256xf32>
    %131 = vector.shape_cast %128 : vector<32x256xf32> to vector<1x32x256xf32>
    tpu.vector_store %arg9[%c1_69, %c224_70, %c0_71], %131 {strides = array<i32>} : memref<2x256x256xf32, #tpu.memory_space<vmem>>, vector<1x32x256xf32>,
    %c0_72 = arith.constant 0 : index
    %c256 = arith.constant 256 : index
    %132 = vector.load %arg3[%c0_72, %c256] : memref<32x864xf32, #tpu.memory_space<vmem>>, vector<32x256xf32>
    %c1_73 = arith.constant 1 : index
    %c0_74 = arith.constant 0 : index
    %c0_75 = arith.constant 0 : index
    %133 = vector.load %arg9[%c1_73, %c0_74, %c0_75] : memref<2x256x256xf32, #tpu.memory_space<vmem>>, vector<1x256x256xf32>
    %134 = vector.shape_cast %133 : vector<1x256x256xf32> to vector<256x256xf32>
    %cst_76 = arith.constant dense<0.000000e+00> : vector<32x256xf32>
    %135 = tpu.matmul %132, %134, %cst_76 {dimension_numbers = #tpu.dot_dimension_numbers<[1], [0], [0], [1], [0, 0, 1, 1], [], []>} : vector<32x256xf32>, vector<256x256xf32>, vector<32x256xf32> -> vector<32x256xf32>
    %136 = arith.addf %78, %135 : vector<32x256xf32>
    %137 = vector.extract_strided_slice %18 {offsets = [0, 81], sizes = [32, 256], strides = [1, 1]} : vector<32x402xf32> to vector<32x256xf32>
    %c16 = arith.constant 16 : index
    %c0_77 = arith.constant 0 : index
    %138 = vector.load %arg5[%c16, %c0_77] : memref<27x256xf32, #tpu.memory_space<vmem>>, vector<1x256xf32>
    %139 = vector.broadcast %138 : vector<1x256xf32> to vector<32x256xf32>
    %140 = arith.mulf %137, %139 : vector<32x256xf32>
    %c0_78 = arith.constant 0 : index
    %c0_79 = arith.constant 0 : index
    %c0_80 = arith.constant 0 : index
    %141 = vector.load %arg9[%c0_78, %c0_79, %c0_80] : memref<2x256x256xf32, #tpu.memory_space<vmem>>, vector<1x32x256xf32>
    %142 = vector.shape_cast %141 : vector<1x32x256xf32> to vector<32x256xf32>
    %143 = vector.shape_cast %140 : vector<32x256xf32> to vector<1x32x256xf32>
    tpu.vector_store %arg9[%c0_78, %c0_79, %c0_80], %143 {strides = array<i32>} : memref<2x256x256xf32, #tpu.memory_space<vmem>>, vector<1x32x256xf32>,
    %144 = vector.extract_strided_slice %18 {offsets = [0, 82], sizes = [32, 256], strides = [1, 1]} : vector<32x402xf32> to vector<32x256xf32>
    %c17 = arith.constant 17 : index
    %c0_81 = arith.constant 0 : index
    %145 = vector.load %arg5[%c17, %c0_81] : memref<27x256xf32, #tpu.memory_space<vmem>>, vector<1x256xf32>
    %146 = vector.broadcast %145 : vector<1x256xf32> to vector<32x256xf32>
    %147 = arith.mulf %144, %146 : vector<32x256xf32>
    %c0_82 = arith.constant 0 : index
    %c32_83 = arith.constant 32 : index
    %c0_84 = arith.constant 0 : index
    %148 = vector.load %arg9[%c0_82, %c32_83, %c0_84] : memref<2x256x256xf32, #tpu.memory_space<vmem>>, vector<1x32x256xf32>
    %149 = vector.shape_cast %148 : vector<1x32x256xf32> to vector<32x256xf32>
    %150 = vector.shape_cast %147 : vector<32x256xf32> to vector<1x32x256xf32>
    tpu.vector_store %arg9[%c0_82, %c32_83, %c0_84], %150 {strides = array<i32>} : memref<2x256x256xf32, #tpu.memory_space<vmem>>, vector<1x32x256xf32>,
    %151 = vector.extract_strided_slice %18 {offsets = [0, 128], sizes = [32, 256], strides = [1, 1]} : vector<32x402xf32> to vector<32x256xf32>
    %c18 = arith.constant 18 : index
    %c0_85 = arith.constant 0 : index
    %152 = vector.load %arg5[%c18, %c0_85] : memref<27x256xf32, #tpu.memory_space<vmem>>, vector<1x256xf32>
    %153 = vector.broadcast %152 : vector<1x256xf32> to vector<32x256xf32>
    %154 = arith.mulf %151, %153 : vector<32x256xf32>
    %c0_86 = arith.constant 0 : index
    %c64_87 = arith.constant 64 : index
    %c0_88 = arith.constant 0 : index
    %155 = vector.load %arg9[%c0_86, %c64_87, %c0_88] : memref<2x256x256xf32, #tpu.memory_space<vmem>>, vector<1x32x256xf32>
    %156 = vector.shape_cast %155 : vector<1x32x256xf32> to vector<32x256xf32>
    %157 = vector.shape_cast %154 : vector<32x256xf32> to vector<1x32x256xf32>
    tpu.vector_store %arg9[%c0_86, %c64_87, %c0_88], %157 {strides = array<i32>} : memref<2x256x256xf32, #tpu.memory_space<vmem>>, vector<1x32x256xf32>,
    %158 = vector.extract_strided_slice %18 {offsets = [0, 129], sizes = [32, 256], strides = [1, 1]} : vector<32x402xf32> to vector<32x256xf32>
    %c19 = arith.constant 19 : index
    %c0_89 = arith.constant 0 : index
    %159 = vector.load %arg5[%c19, %c0_89] : memref<27x256xf32, #tpu.memory_space<vmem>>, vector<1x256xf32>
    %160 = vector.broadcast %159 : vector<1x256xf32> to vector<32x256xf32>
    %161 = arith.mulf %158, %160 : vector<32x256xf32>
    %c0_90 = arith.constant 0 : index
    %c96_91 = arith.constant 96 : index
    %c0_92 = arith.constant 0 : index
    %162 = vector.load %arg9[%c0_90, %c96_91, %c0_92] : memref<2x256x256xf32, #tpu.memory_space<vmem>>, vector<1x32x256xf32>
    %163 = vector.shape_cast %162 : vector<1x32x256xf32> to vector<32x256xf32>
    %164 = vector.shape_cast %161 : vector<32x256xf32> to vector<1x32x256xf32>
    tpu.vector_store %arg9[%c0_90, %c96_91, %c0_92], %164 {strides = array<i32>} : memref<2x256x256xf32, #tpu.memory_space<vmem>>, vector<1x32x256xf32>,
    %165 = vector.extract_strided_slice %18 {offsets = [0, 130], sizes = [32, 256], strides = [1, 1]} : vector<32x402xf32> to vector<32x256xf32>
    %c20 = arith.constant 20 : index
    %c0_93 = arith.constant 0 : index
    %166 = vector.load %arg5[%c20, %c0_93] : memref<27x256xf32, #tpu.memory_space<vmem>>, vector<1x256xf32>
    %167 = vector.broadcast %166 : vector<1x256xf32> to vector<32x256xf32>
    %168 = arith.mulf %165, %167 : vector<32x256xf32>
    %c0_94 = arith.constant 0 : index
    %c128_95 = arith.constant 128 : index
    %c0_96 = arith.constant 0 : index
    %169 = vector.load %arg9[%c0_94, %c128_95, %c0_96] : memref<2x256x256xf32, #tpu.memory_space<vmem>>, vector<1x32x256xf32>
    %170 = vector.shape_cast %169 : vector<1x32x256xf32> to vector<32x256xf32>
    %171 = vector.shape_cast %168 : vector<32x256xf32> to vector<1x32x256xf32>
    tpu.vector_store %arg9[%c0_94, %c128_95, %c0_96], %171 {strides = array<i32>} : memref<2x256x256xf32, #tpu.memory_space<vmem>>, vector<1x32x256xf32>,
    %172 = vector.extract_strided_slice %18 {offsets = [0, 136], sizes = [32, 256], strides = [1, 1]} : vector<32x402xf32> to vector<32x256xf32>
    %c21 = arith.constant 21 : index
    %c0_97 = arith.constant 0 : index
    %173 = vector.load %arg5[%c21, %c0_97] : memref<27x256xf32, #tpu.memory_space<vmem>>, vector<1x256xf32>
    %174 = vector.broadcast %173 : vector<1x256xf32> to vector<32x256xf32>
    %175 = arith.mulf %172, %174 : vector<32x256xf32>
    %c0_98 = arith.constant 0 : index
    %c160_99 = arith.constant 160 : index
    %c0_100 = arith.constant 0 : index
    %176 = vector.load %arg9[%c0_98, %c160_99, %c0_100] : memref<2x256x256xf32, #tpu.memory_space<vmem>>, vector<1x32x256xf32>
    %177 = vector.shape_cast %176 : vector<1x32x256xf32> to vector<32x256xf32>
    %178 = vector.shape_cast %175 : vector<32x256xf32> to vector<1x32x256xf32>
    tpu.vector_store %arg9[%c0_98, %c160_99, %c0_100], %178 {strides = array<i32>} : memref<2x256x256xf32, #tpu.memory_space<vmem>>, vector<1x32x256xf32>,
    %179 = vector.extract_strided_slice %18 {offsets = [0, 137], sizes = [32, 256], strides = [1, 1]} : vector<32x402xf32> to vector<32x256xf32>
    %c22 = arith.constant 22 : index
    %c0_101 = arith.constant 0 : index
    %180 = vector.load %arg5[%c22, %c0_101] : memref<27x256xf32, #tpu.memory_space<vmem>>, vector<1x256xf32>
    %181 = vector.broadcast %180 : vector<1x256xf32> to vector<32x256xf32>
    %182 = arith.mulf %179, %181 : vector<32x256xf32>
    %c0_102 = arith.constant 0 : index
    %c192_103 = arith.constant 192 : index
    %c0_104 = arith.constant 0 : index
    %183 = vector.load %arg9[%c0_102, %c192_103, %c0_104] : memref<2x256x256xf32, #tpu.memory_space<vmem>>, vector<1x32x256xf32>
    %184 = vector.shape_cast %183 : vector<1x32x256xf32> to vector<32x256xf32>
    %185 = vector.shape_cast %182 : vector<32x256xf32> to vector<1x32x256xf32>
    tpu.vector_store %arg9[%c0_102, %c192_103, %c0_104], %185 {strides = array<i32>} : memref<2x256x256xf32, #tpu.memory_space<vmem>>, vector<1x32x256xf32>,
    %186 = vector.extract_strided_slice %18 {offsets = [0, 138], sizes = [32, 256], strides = [1, 1]} : vector<32x402xf32> to vector<32x256xf32>
    %c23 = arith.constant 23 : index
    %c0_105 = arith.constant 0 : index
    %187 = vector.load %arg5[%c23, %c0_105] : memref<27x256xf32, #tpu.memory_space<vmem>>, vector<1x256xf32>
    %188 = vector.broadcast %187 : vector<1x256xf32> to vector<32x256xf32>
    %189 = arith.mulf %186, %188 : vector<32x256xf32>
    %c0_106 = arith.constant 0 : index
    %c224_107 = arith.constant 224 : index
    %c0_108 = arith.constant 0 : index
    %190 = vector.load %arg9[%c0_106, %c224_107, %c0_108] : memref<2x256x256xf32, #tpu.memory_space<vmem>>, vector<1x32x256xf32>
    %191 = vector.shape_cast %190 : vector<1x32x256xf32> to vector<32x256xf32>
    %192 = vector.shape_cast %189 : vector<32x256xf32> to vector<1x32x256xf32>
    tpu.vector_store %arg9[%c0_106, %c224_107, %c0_108], %192 {strides = array<i32>} : memref<2x256x256xf32, #tpu.memory_space<vmem>>, vector<1x32x256xf32>,
    %c0_109 = arith.constant 0 : index
    %c512 = arith.constant 512 : index
    %193 = vector.load %arg3[%c0_109, %c512] : memref<32x864xf32, #tpu.memory_space<vmem>>, vector<32x256xf32>
    %c0_110 = arith.constant 0 : index
    %c0_111 = arith.constant 0 : index
    %c0_112 = arith.constant 0 : index
    %194 = vector.load %arg9[%c0_110, %c0_111, %c0_112] : memref<2x256x256xf32, #tpu.memory_space<vmem>>, vector<1x256x256xf32>
    %195 = vector.shape_cast %194 : vector<1x256x256xf32> to vector<256x256xf32>
    %cst_113 = arith.constant dense<0.000000e+00> : vector<32x256xf32>
    %196 = tpu.matmul %193, %195, %cst_113 {dimension_numbers = #tpu.dot_dimension_numbers<[1], [0], [0], [1], [0, 0, 1, 1], [], []>} : vector<32x256xf32>, vector<256x256xf32>, vector<32x256xf32> -> vector<32x256xf32>
    %197 = arith.addf %136, %196 : vector<32x256xf32>
    %198 = vector.extract_strided_slice %18 {offsets = [0, 144], sizes = [32, 256], strides = [1, 1]} : vector<32x402xf32> to vector<32x256xf32>
    %c24 = arith.constant 24 : index
    %c0_114 = arith.constant 0 : index
    %199 = vector.load %arg5[%c24, %c0_114] : memref<27x256xf32, #tpu.memory_space<vmem>>, vector<1x256xf32>
    %200 = vector.broadcast %199 : vector<1x256xf32> to vector<32x256xf32>
    %201 = arith.mulf %198, %200 : vector<32x256xf32>
    %c1_115 = arith.constant 1 : index
    %c0_116 = arith.constant 0 : index
    %c0_117 = arith.constant 0 : index
    %202 = vector.load %arg9[%c1_115, %c0_116, %c0_117] : memref<2x256x256xf32, #tpu.memory_space<vmem>>, vector<1x32x256xf32>
    %203 = vector.shape_cast %202 : vector<1x32x256xf32> to vector<32x256xf32>
    %204 = vector.shape_cast %201 : vector<32x256xf32> to vector<1x32x256xf32>
    tpu.vector_store %arg9[%c1_115, %c0_116, %c0_117], %204 {strides = array<i32>} : memref<2x256x256xf32, #tpu.memory_space<vmem>>, vector<1x32x256xf32>,
    %205 = vector.extract_strided_slice %18 {offsets = [0, 145], sizes = [32, 256], strides = [1, 1]} : vector<32x402xf32> to vector<32x256xf32>
    %c25 = arith.constant 25 : index
    %c0_118 = arith.constant 0 : index
    %206 = vector.load %arg5[%c25, %c0_118] : memref<27x256xf32, #tpu.memory_space<vmem>>, vector<1x256xf32>
    %207 = vector.broadcast %206 : vector<1x256xf32> to vector<32x256xf32>
    %208 = arith.mulf %205, %207 : vector<32x256xf32>
    %c1_119 = arith.constant 1 : index
    %c32_120 = arith.constant 32 : index
    %c0_121 = arith.constant 0 : index
    %209 = vector.load %arg9[%c1_119, %c32_120, %c0_121] : memref<2x256x256xf32, #tpu.memory_space<vmem>>, vector<1x32x256xf32>
    %210 = vector.shape_cast %209 : vector<1x32x256xf32> to vector<32x256xf32>
    %211 = vector.shape_cast %208 : vector<32x256xf32> to vector<1x32x256xf32>
    tpu.vector_store %arg9[%c1_119, %c32_120, %c0_121], %211 {strides = array<i32>} : memref<2x256x256xf32, #tpu.memory_space<vmem>>, vector<1x32x256xf32>,
    %212 = vector.extract_strided_slice %18 {offsets = [0, 146], sizes = [32, 256], strides = [1, 1]} : vector<32x402xf32> to vector<32x256xf32>
    %c26 = arith.constant 26 : index
    %c0_122 = arith.constant 0 : index
    %213 = vector.load %arg5[%c26, %c0_122] : memref<27x256xf32, #tpu.memory_space<vmem>>, vector<1x256xf32>
    %214 = vector.broadcast %213 : vector<1x256xf32> to vector<32x256xf32>
    %215 = arith.mulf %212, %214 : vector<32x256xf32>
    %c1_123 = arith.constant 1 : index
    %c64_124 = arith.constant 64 : index
    %c0_125 = arith.constant 0 : index
    %216 = vector.load %arg9[%c1_123, %c64_124, %c0_125] : memref<2x256x256xf32, #tpu.memory_space<vmem>>, vector<1x32x256xf32>
    %217 = vector.shape_cast %216 : vector<1x32x256xf32> to vector<32x256xf32>
    %218 = vector.shape_cast %215 : vector<32x256xf32> to vector<1x32x256xf32>
    tpu.vector_store %arg9[%c1_123, %c64_124, %c0_125], %218 {strides = array<i32>} : memref<2x256x256xf32, #tpu.memory_space<vmem>>, vector<1x32x256xf32>,
    %c0_126 = arith.constant 0 : index
    %c768 = arith.constant 768 : index
    %219 = vector.load %arg3[%c0_126, %c768] : memref<32x864xf32, #tpu.memory_space<vmem>>, vector<32x96xf32>
    %c1_127 = arith.constant 1 : index
    %c0_128 = arith.constant 0 : index
    %c0_129 = arith.constant 0 : index
    %220 = vector.load %arg9[%c1_127, %c0_128, %c0_129] : memref<2x256x256xf32, #tpu.memory_space<vmem>>, vector<1x96x256xf32>
    %221 = vector.shape_cast %220 : vector<1x96x256xf32> to vector<96x256xf32>
    %cst_130 = arith.constant dense<0.000000e+00> : vector<32x256xf32>
    %222 = tpu.matmul %219, %221, %cst_130 {dimension_numbers = #tpu.dot_dimension_numbers<[1], [0], [0], [1], [0, 0, 1, 1], [], []>} : vector<32x96xf32>, vector<96x256xf32>, vector<32x256xf32> -> vector<32x256xf32>
    %223 = arith.addf %197, %222 : vector<32x256xf32>
    %c0_131 = arith.constant 0 : index
    %c0_132 = arith.constant 0 : index
    %224 = vector.load %arg4[%c0_131, %c0_132] : memref<32x1xf32, #tpu.memory_space<vmem>>, vector<32x1xf32>
    %225 = vector.broadcast %224 : vector<32x1xf32> to vector<32x256xf32>
    %226 = arith.addf %223, %225 : vector<32x256xf32>
    %c0_133 = arith.constant 0 : index
    %c0_134 = arith.constant 0 : index
    %c0_135 = arith.constant 0 : index
    %227 = vector.load %arg6[%c0_133, %c0_134, %c0_135] : memref<1x32x256xf32, #tpu.memory_space<vmem>>, vector<1x32x256xf32>
    %228 = vector.shape_cast %227 : vector<1x32x256xf32> to vector<32x256xf32>
    %229 = vector.shape_cast %226 : vector<32x256xf32> to vector<1x32x256xf32>
    tpu.vector_store %arg6[%c0_133, %c0_134, %c0_135], %229 {strides = array<i32>} : memref<1x32x256xf32, #tpu.memory_space<vmem>>, vector<1x32x256xf32>,
    %cst_136 = arith.constant dense<0.000000e+00> : vector<32xf32>
    %230 = vector.multi_reduction <add>, %226, %cst_136 [1] : vector<32x256xf32> to vector<32xf32>
    %231 = vector.shape_cast %230 : vector<32xf32> to vector<32x1xf32>
    %232 = arith.mulf %226, %226 : vector<32x256xf32>
    %cst_137 = arith.constant dense<0.000000e+00> : vector<32xf32>
    %233 = vector.multi_reduction <add>, %232, %cst_137 [1] : vector<32x256xf32> to vector<32xf32>
    %234 = vector.shape_cast %233 : vector<32xf32> to vector<32x1xf32>
    %235 = tpu.concatenate %231, %234 in 1 : vector<32x1xf32>, vector<32x1xf32> -> vector<32x2xf32>
    %c0_138 = arith.constant 0 : index
    %c0_139 = arith.constant 0 : index
    %c0_140 = arith.constant 0 : index
    %236 = vector.load %arg7[%c0_138, %c0_139, %c0_140] : memref<1x32x2xf32, #tpu.memory_space<vmem>>, vector<1x32x2xf32>
    %237 = vector.shape_cast %236 : vector<1x32x2xf32> to vector<32x2xf32>
    %238 = vector.shape_cast %235 : vector<32x2xf32> to vector<1x32x2xf32>
    tpu.vector_store %arg7[%c0_138, %c0_139, %c0_140], %238 {strides = array<i32>} : memref<1x32x2xf32, #tpu.memory_space<vmem>>, vector<1x32x2xf32>,
    return
  }
  func.func @transform_0(%arg0: i32) -> (i32, i32, i32) {
    %c0_i32 = arith.constant 0 : i32
    %c0_i32_0 = arith.constant 0 : i32
    %c0_i32_1 = arith.constant 0 : i32
    return %arg0, %c0_i32, %c0_i32_0 : i32, i32, i32
  }
  func.func @transform_1(%arg0: i32) -> (i32, i32) {
    %c0_i32 = arith.constant 0 : i32
    %c0_i32_0 = arith.constant 0 : i32
    %c0_i32_1 = arith.constant 0 : i32
    return %c0_i32, %c0_i32_0 : i32, i32
  }
  func.func @transform_2(%arg0: i32) -> (i32, i32) {
    %c0_i32 = arith.constant 0 : i32
    %c0_i32_0 = arith.constant 0 : i32
    %c0_i32_1 = arith.constant 0 : i32
    return %c0_i32, %c0_i32_0 : i32, i32
  }
  func.func @transform_3(%arg0: i32) -> (i32, i32) {
    %c0_i32 = arith.constant 0 : i32
    %c0_i32_0 = arith.constant 0 : i32
    %c0_i32_1 = arith.constant 0 : i32
    return %c0_i32, %c0_i32_0 : i32, i32
  }
  func.func @transform_4(%arg0: i32) -> (i32, i32) {
    %c0_i32 = arith.constant 0 : i32
    %c0_i32_0 = arith.constant 0 : i32
    %c0_i32_1 = arith.constant 0 : i32
    return %c0_i32, %c0_i32_0 : i32, i32
  }
  func.func @transform_5(%arg0: i32) -> (i32, i32, i32) {
    %c0_i32 = arith.constant 0 : i32
    %c0_i32_0 = arith.constant 0 : i32
    %c0_i32_1 = arith.constant 0 : i32
    return %arg0, %c0_i32, %c0_i32_0 : i32, i32, i32
  }
  func.func @transform_6(%arg0: i32) -> (i32, i32, i32) {
    %c0_i32 = arith.constant 0 : i32
    %c0_i32_0 = arith.constant 0 : i32
    %c0_i32_1 = arith.constant 0 : i32
    return %arg0, %c0_i32, %c0_i32_0 : i32, i32, i32
  }
  func.func @transform_7(%arg0: i32) -> (i32, i32, i32) {
    %c0_i32 = arith.constant 0 : i32
    %c0_i32_0 = arith.constant 0 : i32
    %c0_i32_1 = arith.constant 0 : i32
    return %arg0, %c0_i32, %c0_i32_0 : i32, i32, i32
  }
}

</mosaic_0001>

<bundles_post_ra>
// kernel: midblock_forward.7
= control target key start
LH: loop header
LB: loop body
LE: loop exit
PB: predicated region body
PF: predicated region fallthrough
CT: control target
= control target key end

     0   :  { %s3689_s24 = smov 0   ;;  %s5438_s0 = inlined_call_operand.vmem [shape: f32[2,32,256], index: 0, kind: input, shape index: {}]   ;;  %s5439_s1 = inlined_call_operand.vmem [shape: f32[32,2], index: 1, kind: input, shape index: {}]   ;;  %s5440_s2 = inlined_call_operand.vmem [shape: f32[2,32,256], index: 2, kind: input, shape index: {}]   ;;  %s5441_s3 = inlined_call_operand.vmem [shape: f32[32,864], index: 3, kind: input, shape index: {}]   ;;  %s5442_s4 = inlined_call_operand.vmem [shape: f32[32,1], index: 4, kind: input, shape index: {}]   ;;  %s5443_s5 = inlined_call_operand.vmem [shape: f32[27,256], index: 5, kind: input, shape index: {}]   ;;  %s5444_s6 = inlined_call_operand.vmem [shape: f32[2,32,256], index: 6, kind: output, shape index: {0}]   ;;  %s5445_s7 = inlined_call_operand.vmem [shape: f32[2,32,2], index: 7, kind: output, shape index: {1}]  }
   0x1 LB: > { %s3508_s25 = sadd.s32 4294967295, %s3611_s24   ;;  %p3512_p0 = scmp.ge.s32.totalorder %s3611_s24, 1  ;;  %s3611_s24 = sphi %s3689_s24, %s18_s24  }
   0x2   : > { %p250_p1 = scmp.lt.s32.totalorder %s3611_s24, 3 }
   0x4   : > { %p251_p2 = pnand %p3512_p0, %p250_p1 }
   0x6   : > { %254 = sbr.rel (%p251_p2) target bundleno = 1343 (0x53f), region = 44 }
   0xb   : > { %v322_v0 = vld [vmem:[%s5439_s1 + $0x10] sm:$0xff]  ;;  %v320_v1 = vld [vmem:[%s5439_s1] sm:$0xff]  ;;  %v3613_v2 = vmov 1   ;;  %v3614_v3 = vmov 0   ;;  %v323_v4 = vld [vmem:[%s5439_s1 + $0x18] sm:$0xff]  ;;  %v467_v5 = vlaneseq  ;;  %s3615_s15 = smov 1  }
   0xc   : > { %3601 = vset.pattern.permute.xlu0 %v3613_v2  ;;  %3600 = vset.pattern.permute.xlu1 %v3614_v3  ;;  %v321_v7 = vld [vmem:[%s5439_s1 + $0x8] sm:$0xff]  ;;  %s3616_s18 = smov 2   ;;  %s3617_s21 = smov 8   ;;  %v3531_v28 = vld [vmem:[%s5443_s5 + $0x13] ss:$8 sm:$0x3] }
   0xd   : > { %336 = vperm.xlu1 %3600, %v322_v0   ;;  %353 = vperm.xlu0 %3601, %v320_v1   ;;  %v468_v6 = vshrl.u32 %v467_v5, 7  ;;  %v3521_v10 = vld [vmem:[%s5443_s5 + $0x1] ss:$8 sm:$0x3]  ;;  %s3618_s26 = smov 9   ;;  %s3619_s29 = smov 10  }
   0xe   : > { %v3522_v13 = vld [vmem:[%s5443_s5 + $0x2] ss:$8 sm:$0x3]  ;;  %v3523_v16 = vld [vmem:[%s5443_s5 + $0x3] ss:$8 sm:$0x3] }
   0xf   : > { %v3709_v8 = vsub.s32 1, %v468_v6  ;;  %v3711_v9 = vsub.s32 0, %v468_v6  ;;  %v3524_v19 = vld [vmem:[%s5443_s5 + $0x4] ss:$8 sm:$0x3]  ;;  %s3620_s9 = smov 16  }
  0x10   : > { %v3525_v22 = vld [vmem:[%s5443_s5 + $0x5] ss:$8 sm:$0x3]  ;;  %v3526_v25 = vld [vmem:[%s5443_s5 + $0x6] ss:$8 sm:$0x3] }
  0x11   : > { %341 = vperm.xlu1 %3600, %v323_v4   ;;  %365 = vperm.xlu0 %3601, %v323_v4   ;;  %v503_v11 = vrot.slane %v3521_v10, %v3709_v8  ;;  %v499_v12 = vrot.slane %v3521_v10, %v3711_v9  ;;  %v596_v14 = vrot.slane %v3522_v13, %v3709_v8  ;;  %v3530_v31 = vld [vmem:[%s5443_s5 + $0x12] ss:$8 sm:$0x3]  ;;  %s3621_s12 = smov 66   ;;  %s3622_s16 = smov 65   ;;  %vm440_vm8 = vcmask 596992  }
  0x12   : > { %v592_v15 = vrot.slane %v3522_v13, %v3711_v9  ;;  %v689_v17 = vrot.slane %v3523_v16, %v3709_v8  ;;  %v685_v18 = vrot.slane %v3523_v16, %v3711_v9  ;;  %v782_v20 = vrot.slane %v3524_v19, %v3709_v8  ;;  %v3529_v34 = vld [vmem:[%s5443_s5 + $0x11] ss:$8 sm:$0x3]  ;;  %v3528_v37 = vld [vmem:[%s5443_s5 + $0x10] ss:$8 sm:$0x3] }
  0x13   : > { %v778_v21 = vrot.slane %v3524_v19, %v3711_v9  ;;  %v875_v23 = vrot.slane %v3525_v22, %v3709_v8  ;;  %v871_v24 = vrot.slane %v3525_v22, %v3711_v9  ;;  %v968_v26 = vrot.slane %v3526_v25, %v3709_v8  ;;  %v3527_v38 = vld [vmem:[%s5443_s5 + $0x7] ss:$8 sm:$0x3]  ;;  %s3623_s23 = smov 64   ;;  %s3624_s27 = smov 18  }
  0x14   : > { %v964_v27 = vrot.slane %v3526_v25, %v3711_v9  ;;  %v1501_v29 = vrot.slane %v3531_v28, %v3711_v9  ;;  %v1505_v30 = vrot.slane %v3531_v28, %v3709_v8  ;;  %v1408_v32 = vrot.slane %v3530_v31, %v3711_v9  ;;  %s3625_s28 = smov 17   ;;  %v3534_v43 = vld [vmem:[%s5443_s5 + $0x17] ss:$8 sm:$0x3]  ;;  %s3628_s17 = smov 72  }
  0x15   : > { %3602 = vset.pattern.permute.xlu1 %v3613_v2  ;;  %3603 = vset.pattern.permute.xlu0 %v3614_v3  ;;  %v1412_v33 = vrot.slane %v3530_v31, %v3709_v8  ;;  %v1316_v35 = vrot.slane %v3529_v34, %v3711_v9  ;;  %v1320_v36 = vrot.slane %v3529_v34, %v3709_v8  ;;  %v3533_v46 = vld [vmem:[%s5443_s5 + $0x16] ss:$8 sm:$0x3]  ;;  %v3532_v49 = vld [vmem:[%s5443_s5 + $0x14] ss:$8 sm:$0x3] }
  0x16   : > { %357 = vperm.xlu1 %3602, %v321_v7   ;;  %326 = vperm.xlu0 %3603, %v320_v1   ;;  %v1222_v39 = vrot.slane %v3528_v37, %v3711_v9  ;;  %v1057_v40 = vrot.slane %v3527_v38, %v3711_v9  ;;  %v1061_v41 = vrot.slane %v3527_v38, %v3709_v8  ;;  %p292_p3 = scmp.lt.s32.totalorder %s3508_s25, 1  ;;  %vm508_vm9 = vcmask 7168   ;;  %s3630_s13 = smov 127  }
  0x17   : > { %v1226_v42 = vrot.slane %v3528_v37, %v3709_v8  ;;  %v1841_v44 = vrot.slane %v3534_v43, %v3709_v8  ;;  %v1837_v45 = vrot.slane %v3534_v43, %v3711_v9  ;;  %v1748_v47 = vrot.slane %v3533_v46, %v3709_v8  ;;  %s3631_s14 = smov 126   ;;  %s3634_s20 = smov 118  }
  0x18   : > { %v1744_v48 = vrot.slane %v3533_v46, %v3711_v9  ;;  %v1598_v50 = vrot.slane %v3532_v49, %v3709_v8  ;;  %v1594_v51 = vrot.slane %v3532_v49, %v3711_v9  ;;  %s5519_s25 = smov (!%p292_p3, %s3508_s25), 1  ;;  %vm601_vm10 = vcmask 15360   ;;  %s3635_s22 = smov 112  }
  0x19   : > { %s3808_s19 = sshll.u32 %s5519_s25, 6  ;;  %vm694_vm11 = vcmask 64512   ;;  %vm787_vm12 = vcmask 72704   ;;  %vm880_vm13 = vcmask 80896   ;;  %vm973_vm14 = vcmask 130048   ;;  %s3637_s8 = smov 62  }
  0x1a   : > { %361 = vperm.xlu1 %3602, %v322_v0   ;;  %331 = vperm.xlu0 %3603, %v321_v7   ;;  %s296_s30 = scalar_lea.vmem %s5438_s0, %s3808_s19  ;;  %s3818_s11 = scalar_lea.vmem %s5440_s2, %s3808_s19  ;;  %vm1066_vm15 = vcmask 138240  }
  0x1b   : > { %v312_v56 = vld [vmem:[%s296_s30] sm:$0xff]  ;;  %v313_v57 = vld [vmem:[%s296_s30 + $0x8] sm:$0xff]  ;;  %v318_v62 = vld [vmem:[%s296_s30 + $0x30] sm:$0xff]  ;;  %s3641_s10 = smov 81  }
  0x1c   : > { %v316_v58 = vld [vmem:[%s296_s30 + $0x20] sm:$0xff]  ;;  %v317_v59 = vld [vmem:[%s296_s30 + $0x28] sm:$0xff]  ;;  %v319_v63 = vld [vmem:[%s296_s30 + $0x38] sm:$0xff] }
  0x1d   : > { %v314_v2 = vld [vmem:[%s296_s30 + $0x10] sm:$0xff]  ;;  %v400_v19 = vld [vmem:[%s3818_s11] sm:$0xff]  ;;  %v403_v31 = vld [vmem:[%s3818_s11 + $0x18] sm:$0xff] }
  0x1e   : > { %506 = vrot.lane.b32.xlu0 %v503_v11, %s3615_s15  ;;  %504 = vrot.lane.b32.xlu1 %v499_v12, %s3615_s15  ;;  %v405_v43 = vld [vmem:[%s3818_s11 + $0x28] sm:$0xff]  ;;  %v407_v49 = vld [vmem:[%s3818_s11 + $0x38] sm:$0xff] }
  0x1f   : > { %3604 = vset.pattern.permute.xlu1 %v3614_v3  ;;  %v315_v3 = vld [vmem:[%s296_s30 + $0x18] sm:$0xff]  ;;  %s3636_s30 = smov 111  }
  0x22   : > { %599 = vrot.lane.b32.xlu0 %v596_v14, %s3616_s18  ;;  %597 = vrot.lane.b32.xlu1 %v592_v15, %s3616_s18 }
  0x26   : > { %692 = vrot.lane.b32.xlu0 %v689_v17, %s3617_s21  ;;  %690 = vrot.lane.b32.xlu1 %v685_v18, %s3617_s21  ;;  %v401_v18 = vld [vmem:[%s3818_s11 + $0x8] sm:$0xff] }
  0x2a   : > { %785 = vrot.lane.b32.xlu0 %v782_v20, %s3618_s26  ;;  %783 = vrot.lane.b32.xlu1 %v778_v21, %s3618_s26 }
  0x2e   : > { %878 = vrot.lane.b32.xlu0 %v875_v23, %s3619_s29  ;;  %876 = vrot.lane.b32.xlu1 %v871_v24, %s3619_s29 }
  0x32   : > { %971 = vrot.lane.b32.xlu0 %v968_v26, %s3620_s9  ;;  %969 = vrot.lane.b32.xlu1 %v964_v27, %s3620_s9 }
  0x36   : > { %1506 = vrot.lane.b32.xlu0 %v1501_v29, %s3621_s12  ;;  %1508 = vrot.lane.b32.xlu1 %v1505_v30, %s3621_s12  ;;  %s3626_s12 = smov 80  }
  0x3a   : > { %1413 = vrot.lane.b32.xlu0 %v1408_v32, %s3622_s16  ;;  %1415 = vrot.lane.b32.xlu1 %v1412_v33, %s3622_s16  ;;  %s3627_s16 = smov 74  }
  0x3e   : > { %1321 = vrot.lane.b32.xlu0 %v1316_v35, %s3623_s23  ;;  %1323 = vrot.lane.b32.xlu1 %v1320_v36, %s3623_s23  ;;  %v402_v35 = vld [vmem:[%s3818_s11 + $0x10] sm:$0xff] }
  0x42   : > { %1227 = vrot.lane.b32.xlu0 %v1222_v39, %s3624_s27  ;;  %1062 = vrot.lane.b32.xlu1 %v1057_v40, %s3625_s28 }
  0x46   : > { %1064 = vrot.lane.b32.xlu0 %v1061_v41, %s3625_s28  ;;  %1229 = vrot.lane.b32.xlu1 %v1226_v42, %s3624_s27 }
  0x4a   : > { %1844 = vrot.lane.b32.xlu1 %v1841_v44, %s3626_s12  ;;  %1842 = vrot.lane.b32.xlu0 %v1837_v45, %s3626_s12  ;;  %s3629_s12 = smov 73   ;;  %v404_v45 = vld [vmem:[%s3818_s11 + $0x20] sm:$0xff] }
  0x4e   : > { %1751 = vrot.lane.b32.xlu1 %v1748_v47, %s3627_s16  ;;  %1749 = vrot.lane.b32.xlu0 %v1744_v48, %s3627_s16  ;;  %s3632_s16 = smov 120  }
  0x52   : > { %1601 = vrot.lane.b32.xlu1 %v1598_v50, %s3628_s17  ;;  %1599 = vrot.lane.b32.xlu0 %v1594_v51, %s3628_s17  ;;  %v406_v51 = vld [vmem:[%s3818_s11 + $0x30] sm:$0xff]  ;;  %s3633_s17 = smov 119   ;;  %s3642_s11 = smov 48  }
  0x88   : > { %v337_v52 = vpop.permute.xlu1 %336  ;;  %v354_v53 = vpop.permute.xlu0 %353 }
  0x89   : > { %v348_v4 = vmul.f32 %v337_v52, %v316_v58  ;;  %v349_v5 = vmul.f32 %v337_v52, %v317_v59 }
  0x8c   : > { %v342_v54 = vpop.permute.xlu1 %341  ;;  %v366_v55 = vpop.permute.xlu0 %365 }
  0x8d   : > { %v350_v10 = vmul.f32 %v342_v54, %v318_v62  ;;  %v351_v11 = vmul.f32 %v342_v54, %v319_v63 }
  0x8f   : > { %v374_v24 = vadd.f32 %v366_v55, %v350_v10  ;;  %v375_v32 = vadd.f32 %v366_v55, %v351_v11 }
  0x91   : > { %v358_v60 = vpop.permute.xlu1 %357  ;;  %v327_v61 = vpop.permute.xlu0 %326  ;;  %v390_v40 = vmul.f32 0.04, %v374_v24  ;;  %v391_v41 = vmul.f32 0.04, %v375_v32  ;;  %vm383_vm6 = vcmp.ge.f32.partialorder %v375_v32, 0.0  ;;  %vm382_vm7 = vcmp.ge.f32.partialorder %v374_v24, 0.0 }
  0x92   : > { %v344_v0 = vmul.f32 %v327_v61, %v312_v56  ;;  %v345_v1 = vmul.f32 %v327_v61, %v313_v57 }
  0x93   : > { %v399_v48 = vsel %vm383_vm6, %v375_v32, %v391_v41  ;;  %v398_v50 = vsel %vm382_vm7, %v374_v24, %v390_v40  ;;  %vm1231_vm6 = vcmask 146432   ;;  %vm1846_vm7 = vcmask 654336  }
  0x94   : > { %v368_v6 = vadd.f32 %v354_v53, %v344_v0  ;;  %v369_v7 = vadd.f32 %v354_v53, %v345_v1  ;;  %v415_v52 = vadd.f32 %v407_v49, %v399_v48  ;;  %v414_v53 = vadd.f32 %v406_v51, %v398_v50 }
  0x95   : > { %v362_v12 = vpop.permute.xlu1 %361  ;;  %v332_v13 = vpop.permute.xlu0 %331 }
  0x96   : > { %v372_v14 = vadd.f32 %v362_v12, %v348_v4  ;;  %v373_v15 = vadd.f32 %v362_v12, %v349_v5  ;;  %v346_v16 = vmul.f32 %v332_v13, %v314_v2  ;;  %v347_v17 = vmul.f32 %v332_v13, %v315_v3 }
  0x97   : > { %vm377_vm0 = vcmp.ge.f32.partialorder %v369_v7, 0.0  ;;  %v385_v20 = vmul.f32 0.04, %v369_v7  ;;  %vm376_vm1 = vcmp.ge.f32.partialorder %v368_v6, 0.0  ;;  %v384_v21 = vmul.f32 0.04, %v368_v6 }
  0x98   : > { %v370_v22 = vadd.f32 %v358_v60, %v346_v16  ;;  %v371_v23 = vadd.f32 %v358_v60, %v347_v17  ;;  %v388_v25 = vmul.f32 0.04, %v372_v14  ;;  %v389_v33 = vmul.f32 0.04, %v373_v15 }
  0x99   : > { %v393_v26 = vsel %vm377_vm0, %v369_v7, %v385_v20  ;;  %v392_v27 = vsel %vm376_vm1, %v368_v6, %v384_v21  ;;  %vm381_vm4 = vcmp.ge.f32.partialorder %v373_v15, 0.0  ;;  %vm380_vm5 = vcmp.ge.f32.partialorder %v372_v14, 0.0  ;;  %v3828_v54 = vpop.permute.xlu0 %506  ;;  %v3830_v55 = vpop.permute.xlu1 %504 }
  0x9a   : > { %v409_v28 = vadd.f32 %v401_v18, %v393_v26  ;;  %v408_v29 = vadd.f32 %v400_v19, %v392_v27  ;;  %vm379_vm2 = vcmp.ge.f32.partialorder %v371_v23, 0.0  ;;  %v387_v30 = vmul.f32 0.04, %v371_v23 }
  0x9b   : > { %vm378_vm3 = vcmp.ge.f32.partialorder %v370_v22, 0.0  ;;  %v386_v34 = vmul.f32 0.04, %v370_v22  ;;  %v397_v42 = vsel %vm381_vm4, %v373_v15, %v389_v33  ;;  %v396_v44 = vsel %vm380_vm5, %v372_v14, %v388_v25 }
  0x9c   : > { %426 = vrot.lane.b32.xlu0 %v409_v28, %s3629_s12  ;;  %424 = vrot.lane.b32.xlu1 %v408_v29, %s3629_s12  ;;  %v395_v36 = vsel %vm379_vm2, %v371_v23, %v387_v30  ;;  %v413_v46 = vadd.f32 %v405_v43, %v397_v42  ;;  %v412_v47 = vadd.f32 %v404_v45, %v396_v44  ;;  %vm1510_vm0 = vcmask 539648  }
  0x9d   : > { %v411_v37 = vadd.f32 %v403_v31, %v395_v36  ;;  %v394_v38 = vsel %vm378_vm3, %v370_v22, %v386_v34  ;;  %v3832_v56 = vpop.permute.xlu0 %599  ;;  %v3834_v57 = vpop.permute.xlu1 %597  ;;  %v509_v24 = vsel %vm508_vm9, %v3830_v55, %v3828_v54  ;;  %vm747_vm1 = vcmask 982016  }
  0x9e   : > { %v410_v39 = vadd.f32 %v402_v35, %v394_v38  ;;  %vm1417_vm2 = vcmask 531456   ;;  %vm654_vm3 = vcmask 1031168   ;;  %vm561_vm4 = vcmask 1039360  }
  0x9f   : > { %vm1325_vm5 = vcmask 523264  }
  0xa0   : > { %430 = vrot.lane.b32.xlu0 %v411_v37, %s3629_s12  ;;  %428 = vrot.lane.b32.xlu1 %v410_v39, %s3629_s12 }
  0xa1   : > { %v3836_v58 = vpop.permute.xlu0 %692  ;;  %v3838_v59 = vpop.permute.xlu1 %690 }
  0xa4   : > { %434 = vrot.lane.b32.xlu0 %v413_v46, %s3629_s12  ;;  %432 = vrot.lane.b32.xlu1 %v412_v47, %s3629_s12 }
  0xa5   : > { %v3840_v60 = vpop.permute.xlu0 %785  ;;  %v3842_v61 = vpop.permute.xlu1 %783 }
  0xa8   : > { %438 = vrot.lane.b32.xlu0 %v415_v52, %s3629_s12  ;;  %436 = vrot.lane.b32.xlu1 %v414_v53, %s3629_s12  ;;  %v602_v53 = vsel %vm601_vm10, %v3834_v57, %v3832_v56  ;;  %s3640_s12 = smov 110  }
  0xa9   : > { %v3844_v62 = vpop.permute.xlu0 %878  ;;  %v3846_v63 = vpop.permute.xlu1 %876 }
  0xad   : > { %v3848_v0 = vpop.permute.xlu0 %971  ;;  %v3850_v1 = vpop.permute.xlu1 %969 }
  0xb1   : > { %v3852_v2 = vpop.permute.xlu0 %1506  ;;  %v3854_v3 = vpop.permute.xlu1 %1508 }
  0xb5   : > { %v3856_v4 = vpop.permute.xlu0 %1413  ;;  %v3858_v5 = vpop.permute.xlu1 %1415 }
  0xb9   : > { %v3860_v6 = vpop.permute.xlu0 %1321  ;;  %v3862_v7 = vpop.permute.xlu1 %1323 }
  0xbd   : > { %v3864_v10 = vpop.permute.xlu0 %1227  ;;  %v3866_v11 = vpop.permute.xlu1 %1062 }
  0xbe   : > { %5462 = vst [vmem:[#allocation3_spill] sm:$0xff] %v3864_v10 }
  0xc1   : > { %v3868_v12 = vpop.permute.xlu0 %1064  ;;  %v3870_v13 = vpop.permute.xlu1 %1229 }
  0xc2   : > { %5463 = vst [vmem:[#allocation4_spill] sm:$0xff] %v3868_v12  ;;  %5464 = vst [vmem:[#allocation5_spill] sm:$0xff] %v3870_v13 }
  0xc5   : > { %v3872_v14 = vpop.permute.xlu1 %1844  ;;  %v3874_v15 = vpop.permute.xlu0 %1842 }
  0xc6   : > { %5465 = vst [vmem:[#allocation6_spill] sm:$0xff] %v3872_v14  ;;  %5466 = vst [vmem:[#allocation7_spill] sm:$0xff] %v3874_v15 }
  0xc9   : > { %v3876_v16 = vpop.permute.xlu1 %1751  ;;  %v3878_v17 = vpop.permute.xlu0 %1749 }
  0xca   : > { %5467 = vst [vmem:[#allocation8_spill] sm:$0xff] %v3876_v16  ;;  %5468 = vst [vmem:[#allocation9_spill] sm:$0xff] %v3878_v17 }
  0xcd   : > { %v3880_v18 = vpop.permute.xlu1 %1601  ;;  %v3882_v19 = vpop.permute.xlu0 %1599 }
  0xce   : > { %5469 = vst [vmem:[#allocation10_spill] sm:$0xff] %v3880_v18  ;;  %5470 = vst [vmem:[#allocation11_spill] sm:$0xff] %v3882_v19 }
 0x10e   : > { %v427_v20 = vpop.permute.xlu0 %426  ;;  %v425_v21 = vpop.permute.xlu1 %424 }
 0x10f   : > { %v3885_v22 = vsel %vm440_vm8, %v425_v21, %v427_v20  ;;  %v3888_v23 = vsel %vm440_vm8, 0.0, %v425_v21  ;;  %v3897_v27 = vsel %vm440_vm8, %v427_v20, 0.0 }
 0x110   : > { %v513_v25 = vmul.f32 %v3830_v55, %v3888_v23  ;;  %v514_v26 = vmul.f32 %v509_v24, %v3885_v22  ;;  %v515_v31 = vmul.f32 %v3828_v54, %v3897_v27  ;;  %v606_v20 = vmul.f32 %v3834_v57, %v3888_v23 }
 0x111   : > { %v608_v21 = vmul.f32 %v3832_v56, %v3897_v27 }
 0x112   : > { %v431_v28 = vpop.permute.xlu0 %430  ;;  %537 = vrot.lane.b32.xlu1 %v513_v25, %s3630_s13  ;;  %539 = vrot.lane.b32.xlu0 %v514_v26, %s3630_s13  ;;  %v429_v29 = vpop.permute.xlu1 %428 }
 0x113   : > { %v3902_v30 = vsel %vm440_vm8, 0.0, %v429_v29  ;;  %v3909_v33 = vsel %vm440_vm8, %v431_v28, 0.0  ;;  %v3912_v34 = vsel %vm440_vm8, %v429_v29, %v431_v28 }
 0x114   : > { %v516_v32 = vmul.f32 %v3830_v55, %v3902_v30  ;;  %v518_v37 = vmul.f32 %v3828_v54, %v3909_v33  ;;  %v517_v38 = vmul.f32 %v509_v24, %v3912_v34  ;;  %v610_v25 = vmul.f32 %v602_v53, %v3912_v34 }
 0x115   : > { %v1520_v15 = vmul.f32 %v3854_v3, %v3909_v33 }
 0x116   : > { %v435_v35 = vpop.permute.xlu0 %434  ;;  %541 = vrot.lane.b32.xlu1 %v515_v31, %s3630_s13  ;;  %543 = vrot.lane.b32.xlu0 %v516_v32, %s3630_s13  ;;  %v433_v36 = vpop.permute.xlu1 %432 }
 0x117   : > { %v3920_v39 = vsel %vm440_vm8, %v433_v36, %v435_v35  ;;  %v3923_v40 = vsel %vm440_vm8, 0.0, %v433_v36  ;;  %v3931_v44 = vsel %vm440_vm8, %v435_v35, 0.0 }
 0x118   : > { %v519_v42 = vmul.f32 %v3830_v55, %v3923_v40  ;;  %v520_v43 = vmul.f32 %v509_v24, %v3920_v39  ;;  %v521_v47 = vmul.f32 %v3828_v54, %v3931_v44  ;;  %v613_v26 = vmul.f32 %v602_v53, %v3920_v39 }
 0x119   : > { %v612_v28 = vmul.f32 %v3834_v57, %v3923_v40  ;;  %v614_v31 = vmul.f32 %v3832_v56, %v3931_v44 }
 0x11a   : > { %547 = vrot.lane.b32.xlu0 %v518_v37, %s3630_s13  ;;  %545 = vrot.lane.b32.xlu1 %v517_v38, %s3630_s13  ;;  %v437_v41 = vpop.permute.xlu1 %436  ;;  %v439_v46 = vpop.permute.xlu0 %438  ;;  %v699_v37 = vmul.f32 %v3838_v59, %v3888_v23  ;;  %v701_v38 = vmul.f32 %v3836_v58, %v3897_v27 }
 0x11b   : > { %v3934_v45 = vsel %vm440_vm8, 0.0, %v437_v41  ;;  %v3943_v49 = vsel %vm440_vm8, %v439_v46, 0.0  ;;  %v3946_v50 = vsel %vm440_vm8, %v437_v41, %v439_v46  ;;  %v704_v41 = vmul.f32 %v3836_v58, %v3909_v33 }
 0x11c   : > { %v522_v48 = vmul.f32 %v3830_v55, %v3934_v45  ;;  %v524_v51 = vmul.f32 %v3828_v54, %v3943_v49  ;;  %v523_v52 = vmul.f32 %v509_v24, %v3946_v50  ;;  %v607_v55 = vmul.f32 %v602_v53, %v3885_v22 }
 0x11d   : > { %v609_v54 = vmul.f32 %v3834_v57, %v3902_v30  ;;  %v611_v24 = vmul.f32 %v3832_v56, %v3909_v33  ;;  %v615_v29 = vmul.f32 %v3834_v57, %v3934_v45  ;;  %v617_v32 = vmul.f32 %v3832_v56, %v3943_v49 }
 0x11e   : > { %549 = vrot.lane.b32.xlu1 %v519_v42, %s3630_s13  ;;  %551 = vrot.lane.b32.xlu0 %v520_v43, %s3630_s13  ;;  %v616_v35 = vmul.f32 %v602_v53, %v3946_v50  ;;  %v695_v57 = vsel %vm694_vm11, %v3838_v59, %v3836_v58  ;;  %v702_v56 = vmul.f32 %v3838_v59, %v3902_v30  ;;  %vm1563_vm8 = vcmask 506880  }
 0x11f   : > { %v700_v36 = vmul.f32 %v695_v57, %v3885_v22  ;;  %v703_v42 = vmul.f32 %v695_v57, %v3912_v34  ;;  %v706_v43 = vmul.f32 %v695_v57, %v3920_v39  ;;  %v705_v46 = vmul.f32 %v3838_v59, %v3923_v40 }
 0x122   : > { %553 = vrot.lane.b32.xlu1 %v521_v47, %s3630_s13  ;;  %555 = vrot.lane.b32.xlu0 %v522_v48, %s3630_s13  ;;  %v708_v47 = vmul.f32 %v3838_v59, %v3934_v45  ;;  %v707_v48 = vmul.f32 %v3836_v58, %v3931_v44  ;;  %v788_v59 = vsel %vm787_vm12, %v3842_v61, %v3840_v60 }
 0x123   : > { %v793_v53 = vmul.f32 %v788_v59, %v3885_v22 }
 0x126   : > { %559 = vrot.lane.b32.xlu0 %v524_v51, %s3630_s13  ;;  %557 = vrot.lane.b32.xlu1 %v523_v52, %s3630_s13  ;;  %v710_v51 = vmul.f32 %v3836_v58, %v3943_v49  ;;  %v709_v52 = vmul.f32 %v695_v57, %v3946_v50  ;;  %v795_v58 = vmul.f32 %v3842_v61, %v3902_v30 }
 0x127   : > { %v887_v57 = vmul.f32 %v3844_v62, %v3897_v27 }
 0x12a   : > { %632 = vrot.lane.b32.xlu0 %v607_v55, %s3631_s14  ;;  %630 = vrot.lane.b32.xlu1 %v606_v20, %s3631_s14  ;;  %v792_v55 = vmul.f32 %v3842_v61, %v3888_v23  ;;  %v794_v20 = vmul.f32 %v3840_v60, %v3897_v27 }
 0x12e   : > { %636 = vrot.lane.b32.xlu0 %v609_v54, %s3631_s14  ;;  %634 = vrot.lane.b32.xlu1 %v608_v21, %s3631_s14  ;;  %v797_v54 = vmul.f32 %v3840_v60, %v3909_v33  ;;  %v796_v21 = vmul.f32 %v788_v59, %v3912_v34 }
 0x132   : > { %640 = vrot.lane.b32.xlu0 %v611_v24, %s3631_s14  ;;  %638 = vrot.lane.b32.xlu1 %v610_v25, %s3631_s14  ;;  %v799_v24 = vmul.f32 %v788_v59, %v3920_v39  ;;  %v798_v25 = vmul.f32 %v3842_v61, %v3923_v40 }
 0x136   : > { %644 = vrot.lane.b32.xlu0 %v613_v26, %s3631_s14  ;;  %642 = vrot.lane.b32.xlu1 %v612_v28, %s3631_s14  ;;  %v801_v26 = vmul.f32 %v3842_v61, %v3934_v45  ;;  %v800_v28 = vmul.f32 %v3840_v60, %v3931_v44  ;;  %v881_v61 = vsel %vm880_vm13, %v3846_v63, %v3844_v62 }
 0x13a   : > { %648 = vrot.lane.b32.xlu0 %v615_v29, %s3631_s14  ;;  %646 = vrot.lane.b32.xlu1 %v614_v31, %s3631_s14  ;;  %v803_v29 = vmul.f32 %v3840_v60, %v3943_v49  ;;  %v802_v31 = vmul.f32 %v788_v59, %v3946_v50  ;;  %v888_v60 = vmul.f32 %v3846_v63, %v3902_v30 }
 0x13e   : > { %652 = vrot.lane.b32.xlu0 %v617_v32, %s3631_s14  ;;  %650 = vrot.lane.b32.xlu1 %v616_v35, %s3631_s14  ;;  %v886_v32 = vmul.f32 %v881_v61, %v3885_v22  ;;  %v885_v35 = vmul.f32 %v3846_v63, %v3888_v23 }
 0x142   : > { %725 = vrot.lane.b32.xlu0 %v700_v36, %s3632_s16  ;;  %723 = vrot.lane.b32.xlu1 %v699_v37, %s3632_s16  ;;  %v890_v36 = vmul.f32 %v3844_v62, %v3909_v33  ;;  %v889_v37 = vmul.f32 %v881_v61, %v3912_v34 }
 0x146   : > { %729 = vrot.lane.b32.xlu0 %v702_v56, %s3632_s16  ;;  %727 = vrot.lane.b32.xlu1 %v701_v38, %s3632_s16  ;;  %v892_v56 = vmul.f32 %v881_v61, %v3920_v39  ;;  %v891_v38 = vmul.f32 %v3846_v63, %v3923_v40 }
 0x14a   : > { %733 = vrot.lane.b32.xlu0 %v704_v41, %s3632_s16  ;;  %731 = vrot.lane.b32.xlu1 %v703_v42, %s3632_s16  ;;  %v894_v41 = vmul.f32 %v3846_v63, %v3934_v45  ;;  %v893_v42 = vmul.f32 %v3844_v62, %v3931_v44  ;;  %v974_v63 = vsel %vm973_vm14, %v3850_v1, %v3848_v0 }
 0x14b   : > { %v979_v59 = vmul.f32 %v974_v63, %v3885_v22 }
 0x14e   : > { %737 = vrot.lane.b32.xlu0 %v706_v43, %s3632_s16  ;;  %735 = vrot.lane.b32.xlu1 %v705_v46, %s3632_s16 }
 0x152   : > { %741 = vrot.lane.b32.xlu0 %v708_v47, %s3632_s16  ;;  %739 = vrot.lane.b32.xlu1 %v707_v48, %s3632_s16  ;;  %v896_v47 = vmul.f32 %v3844_v62, %v3943_v49  ;;  %v895_v48 = vmul.f32 %v881_v61, %v3946_v50  ;;  %v978_v62 = vmul.f32 %v3850_v1, %v3888_v23 }
 0x156   : > { %745 = vrot.lane.b32.xlu0 %v710_v51, %s3632_s16  ;;  %743 = vrot.lane.b32.xlu1 %v709_v52, %s3632_s16 }
 0x15a   : > { %818 = vrot.lane.b32.xlu0 %v793_v53, %s3633_s17  ;;  %816 = vrot.lane.b32.xlu1 %v792_v55, %s3633_s17 }
 0x15e   : > { %822 = vrot.lane.b32.xlu0 %v795_v58, %s3633_s17  ;;  %820 = vrot.lane.b32.xlu1 %v794_v20, %s3633_s17  ;;  %v981_v58 = vmul.f32 %v3850_v1, %v3902_v30  ;;  %v980_v20 = vmul.f32 %v3848_v0, %v3897_v27 }
 0x162   : > { %826 = vrot.lane.b32.xlu0 %v797_v54, %s3633_s17  ;;  %824 = vrot.lane.b32.xlu1 %v796_v21, %s3633_s17 }
 0x166   : > { %830 = vrot.lane.b32.xlu0 %v799_v24, %s3633_s17  ;;  %828 = vrot.lane.b32.xlu1 %v798_v25, %s3633_s17  ;;  %v983_v24 = vmul.f32 %v3848_v0, %v3909_v33  ;;  %v982_v25 = vmul.f32 %v974_v63, %v3912_v34 }
 0x16a   : > { %834 = vrot.lane.b32.xlu0 %v801_v26, %s3633_s17  ;;  %832 = vrot.lane.b32.xlu1 %v800_v28, %s3633_s17 }
 0x16e   : > { %838 = vrot.lane.b32.xlu0 %v803_v29, %s3633_s17  ;;  %836 = vrot.lane.b32.xlu1 %v802_v31, %s3633_s17  ;;  %v985_v29 = vmul.f32 %v974_v63, %v3920_v39  ;;  %v984_v31 = vmul.f32 %v3850_v1, %v3923_v40 }
 0x172   : > { %911 = vrot.lane.b32.xlu0 %v886_v32, %s3634_s20  ;;  %909 = vrot.lane.b32.xlu1 %v885_v35, %s3634_s20  ;;  %v987_v35 = vmul.f32 %v3850_v1, %v3934_v45  ;;  %v4161_v1 = vsel %vm1066_vm15, %v3866_v11, %v3868_v12 }
 0x173   : > { %5471 = vst [vmem:[#allocation12_spill] sm:$0xff] %v4161_v1 }
 0x176   : > { %915 = vrot.lane.b32.xlu0 %v888_v60, %s3634_s20  ;;  %913 = vrot.lane.b32.xlu1 %v887_v57, %s3634_s20  ;;  %v986_v60 = vmul.f32 %v3848_v0, %v3931_v44 }
 0x17a   : > { %919 = vrot.lane.b32.xlu0 %v890_v36, %s3634_s20  ;;  %917 = vrot.lane.b32.xlu1 %v889_v37, %s3634_s20  ;;  %v989_v37 = vmul.f32 %v3848_v0, %v3943_v49  ;;  %v1071_v0 = vmul.f32 %v3866_v11, %v3888_v23 }
 0x17e   : > { %923 = vrot.lane.b32.xlu0 %v892_v56, %s3634_s20  ;;  %921 = vrot.lane.b32.xlu1 %v891_v38, %s3634_s20  ;;  %v988_v56 = vmul.f32 %v974_v63, %v3946_v50  ;;  %v1074_v63 = vmul.f32 %v3866_v11, %v3902_v30 }
 0x182   : > { %927 = vrot.lane.b32.xlu0 %v894_v41, %s3634_s20  ;;  %925 = vrot.lane.b32.xlu1 %v893_v42, %s3634_s20  ;;  %v1072_v42 = vmul.f32 %v4161_v1, %v3885_v22 }
 0x184   : > { %v4090_v43 = vpop.permute.xlu0 %539  ;;  %v4092_v46 = vpop.permute.xlu1 %537 }
 0x186   : > { %931 = vrot.lane.b32.xlu0 %v896_v47, %s3634_s20  ;;  %929 = vrot.lane.b32.xlu1 %v895_v48, %s3634_s20 }
 0x188   : > { %v4102_v51 = vpop.permute.xlu0 %543  ;;  %v4104_v52 = vpop.permute.xlu1 %541 }
 0x18a   : > { %1004 = vrot.lane.b32.xlu0 %v979_v59, %s3635_s22  ;;  %1002 = vrot.lane.b32.xlu1 %v978_v62, %s3635_s22  ;;  %v1073_v59 = vmul.f32 %v3868_v12, %v3897_v27 }
 0x18c   : > { %v4111_v53 = vpop.permute.xlu0 %547  ;;  %v4113_v55 = vpop.permute.xlu1 %545 }
 0x18e   : > { %1008 = vrot.lane.b32.xlu0 %v981_v58, %s3635_s22  ;;  %1006 = vrot.lane.b32.xlu1 %v980_v20, %s3635_s22  ;;  %v1076_v20 = vmul.f32 %v3868_v12, %v3909_v33 }
 0x190   : > { %v4121_v54 = vpop.permute.xlu0 %551  ;;  %v4123_v21 = vpop.permute.xlu1 %549 }
 0x192   : > { %1012 = vrot.lane.b32.xlu0 %v983_v24, %s3635_s22  ;;  %1010 = vrot.lane.b32.xlu1 %v982_v25, %s3635_s22  ;;  %v1075_v24 = vmul.f32 %v4161_v1, %v3912_v34 }
 0x194   : > { %v4130_v26 = vpop.permute.xlu0 %555  ;;  %v4132_v28 = vpop.permute.xlu1 %553 }
 0x196   : > { %1016 = vrot.lane.b32.xlu0 %v985_v29, %s3635_s22  ;;  %1014 = vrot.lane.b32.xlu1 %v984_v31, %s3635_s22  ;;  %v1078_v31 = vmul.f32 %v4161_v1, %v3920_v39 }
 0x198   : > { %v4139_v61 = vpop.permute.xlu0 %559  ;;  %v4141_v32 = vpop.permute.xlu1 %557 }
 0x19a   : > { %1020 = vrot.lane.b32.xlu0 %v987_v35, %s3635_s22  ;;  %1018 = vrot.lane.b32.xlu1 %v986_v60, %s3635_s22  ;;  %v1077_v35 = vmul.f32 %v3866_v11, %v3923_v40 }
 0x19c   : > { %v4149_v57 = vpop.permute.xlu0 %632  ;;  %v4151_v36 = vpop.permute.xlu1 %630 }
 0x19e   : > { %1024 = vrot.lane.b32.xlu0 %v989_v37, %s3635_s22  ;;  %1022 = vrot.lane.b32.xlu1 %v988_v56, %s3635_s22  ;;  %v1080_v56 = vmul.f32 %v3866_v11, %v3934_v45 }
 0x1a0   : > { %v4163_v38 = vpop.permute.xlu0 %636  ;;  %v4165_v41 = vpop.permute.xlu1 %634 }
 0x1a2   : > { %1097 = vrot.lane.b32.xlu0 %v1072_v42, %s3636_s30  ;;  %1095 = vrot.lane.b32.xlu1 %v1071_v0, %s3636_s30  ;;  %v1079_v42 = vmul.f32 %v3868_v12, %v3931_v44  ;;  %v1511_v0 = vsel %vm1510_vm0, %v3852_v2, %v3854_v3  ;;  %vm1753_vm0 = vcmask 605184  }
 0x1a3   : > { %v1525_v11 = vmul.f32 %v1511_v0, %v3946_v50  ;;  %v1519_v14 = vmul.f32 %v1511_v0, %v3912_v34 }
 0x1a4   : > { %v4173_v47 = vpop.permute.xlu0 %640  ;;  %v4175_v48 = vpop.permute.xlu1 %638 }
 0x1a6   : > { %1101 = vrot.lane.b32.xlu0 %v1074_v63, %s3636_s30  ;;  %1099 = vrot.lane.b32.xlu1 %v1073_v59, %s3636_s30 }
 0x1a8   : > { %v4183_v62 = vpop.permute.xlu0 %644  ;;  %v4185_v58 = vpop.permute.xlu1 %642 }
 0x1aa   : > { %1105 = vrot.lane.b32.xlu0 %v1076_v20, %s3636_s30  ;;  %1103 = vrot.lane.b32.xlu1 %v1075_v24, %s3636_s30  ;;  %v1526_v20 = vmul.f32 %v3854_v3, %v3943_v49 }
 0x1ac   : > { %v4193_v25 = vpop.permute.xlu0 %648  ;;  %v4195_v29 = vpop.permute.xlu1 %646 }
 0x1ae   : > { %1109 = vrot.lane.b32.xlu0 %v1078_v31, %s3636_s30  ;;  %1107 = vrot.lane.b32.xlu1 %v1077_v35, %s3636_s30  ;;  %v1522_v35 = vmul.f32 %v1511_v0, %v3920_v39 }
 0x1b0   : > { %v4203_v60 = vpop.permute.xlu0 %652  ;;  %v4205_v37 = vpop.permute.xlu1 %650 }
 0x1b2   : > { %1113 = vrot.lane.b32.xlu0 %v1080_v56, %s3636_s30  ;;  %1111 = vrot.lane.b32.xlu1 %v1079_v42, %s3636_s30  ;;  %v1524_v56 = vmul.f32 %v3852_v2, %v3934_v45  ;;  %v3538_v42 = vld [vmem:[%s5443_s5 + $0x23] ss:$8 sm:$0x3] }
 0x1b4   : > { %v4215_v63 = vpop.permute.xlu0 %725  ;;  %v4217_v59 = vpop.permute.xlu1 %723 }
 0x1b6   : > { %1561 = vrot.lane.b32.xlu0 %v1526_v20, %s3637_s8  ;;  %1559 = vrot.lane.b32.xlu1 %v1525_v11, %s3637_s8  ;;  %v1521_v20 = vmul.f32 %v3852_v2, %v3923_v40  ;;  %v1523_v11 = vmul.f32 %v3854_v3, %v3931_v44 }
 0x1b8   : > { %v730_v24 = vpop.permute.xlu0 %729  ;;  %v728_v31 = vpop.permute.xlu1 %727 }
 0x1ba   : > { %1553 = vrot.lane.b32.xlu0 %v1522_v35, %s3637_s8  ;;  %1557 = vrot.lane.b32.xlu1 %v1524_v56, %s3637_s8  ;;  %v2399_v35 = vrot.slane %v3538_v42, %v3709_v8  ;;  %v2395_v56 = vrot.slane %v3538_v42, %v3711_v9  ;;  %v1516_v42 = vmul.f32 %v1511_v0, %v3885_v22 }
 0x1bb   : > { %v1515_v0 = vmul.f32 %v3852_v2, %v3888_v23 }
 0x1bc   : > { %v734_v12 = vpop.permute.xlu0 %733  ;;  %v732_v1 = vpop.permute.xlu1 %731 }
 0x1be   : > { %1551 = vrot.lane.b32.xlu0 %v1521_v20, %s3637_s8  ;;  %1555 = vrot.lane.b32.xlu1 %v1523_v11, %s3637_s8 }
 0x1c0   : > { %v738_v19 = vpop.permute.xlu0 %737  ;;  %v736_v18 = vpop.permute.xlu1 %735 }
 0x1c2   : > { %2402 = vrot.lane.b32.xlu0 %v2399_v35, %s3615_s15  ;;  %2400 = vrot.lane.b32.xlu1 %v2395_v56, %s3615_s15  ;;  %v1518_v35 = vmul.f32 %v3852_v2, %v3902_v30  ;;  %v749_v2 = vsel %vm747_vm1, %v4215_v63, %v728_v31  ;;  %s3638_s15 = smov 63   ;;  %v661_v31 = vsel %vm654_vm3, %v4193_v25, %v4205_v37 }
 0x1c3   : > { %v658_v25 = vsel %vm654_vm3, %v4175_v48, %v4173_v47  ;;  %v655_v47 = vsel %vm654_vm3, %v4151_v36, %v4149_v57  ;;  %v567_v36 = vsel %vm561_vm4, %v4121_v54, %v4132_v28  ;;  %v565_v28 = vsel %vm561_vm4, %v4113_v55, %v4111_v53 }
 0x1c4   : > { %v742_v17 = vpop.permute.xlu0 %741  ;;  %v740_v16 = vpop.permute.xlu1 %739 }
 0x1c6   : > { %1549 = vrot.lane.b32.xlu0 %v1520_v15, %s3637_s8  ;;  %1547 = vrot.lane.b32.xlu1 %v1519_v14, %s3637_s8  ;;  %v753_v14 = vsel %vm747_vm1, %v738_v19, %v740_v16  ;;  %v750_v16 = vsel %vm747_vm1, %v730_v24, %v732_v1  ;;  %v662_v24 = vsel %vm654_vm3, %v4205_v37, %v4203_v60 }
 0x1c7   : > { %v659_v60 = vsel %vm654_vm3, %v4185_v58, %v4183_v62 }
 0x1c8   : > { %v746_v20 = vpop.permute.xlu0 %745  ;;  %v744_v11 = vpop.permute.xlu1 %743 }
 0x1c9   : > { %v755_v56 = vsel %vm747_vm1, %v744_v11, %v746_v20  ;;  %v754_v10 = vsel %vm747_vm1, %v742_v17, %v744_v11  ;;  %v752_v20 = vsel %vm747_vm1, %v736_v18, %v738_v19  ;;  %v1517_v17 = vmul.f32 %v3854_v3, %v3897_v27 }
 0x1ca   : > { %1541 = vrot.lane.b32.xlu0 %v1516_v42, %s3637_s8  ;;  %1545 = vrot.lane.b32.xlu1 %v1518_v35, %s3637_s8  ;;  %v1433_v3 = vmul.f32 %v3858_v5, %v3943_v49  ;;  %v1418_v19 = vsel %vm1417_vm2, %v3856_v4, %v3858_v5  ;;  %vm1470_vm2 = vcmask 515072  }
 0x1cb   : > { %2085 = vmatprep.subr.mxu1 %v755_v56  ;;  %v1429_v35 = vmul.f32 %v1418_v19, %v3920_v39  ;;  %v1431_v56 = vmul.f32 %v3856_v4, %v3934_v45  ;;  %v1423_v53 = vmul.f32 %v1418_v19, %v3885_v22 }
 0x1cc   : > { %2086 = vmatpush1.msra.mxu1 %v754_v10  ;;  %v4254_v15 = vpop.permute.xlu0 %818  ;;  %v4257_v13 = vpop.permute.xlu1 %816  ;;  %v751_v10 = vsel %vm747_vm1, %v732_v1, %v734_v12  ;;  %v748_v12 = vsel %vm747_vm1, %v4217_v59, %v4215_v63  ;;  %v1432_v1 = vmul.f32 %v1418_v19, %v3946_v50  ;;  %v660_v59 = vsel %vm654_vm3, %v4183_v62, %v4195_v29 }
 0x1cd   : > { %5472 = vst [vmem:[#allocation13_spill] sm:$0xff] %v4254_v15  ;;  %5473 = vst [vmem:[#allocation14_spill] sm:$0xff] %v4257_v13  ;;  %2087 = vmatprep.subr.mxu1 %v753_v14  ;;  %v657_v29 = vsel %vm654_vm3, %v4163_v38, %v4175_v48  ;;  %v656_v62 = vsel %vm654_vm3, %v4149_v57, %v4165_v41  ;;  %v1428_v14 = vmul.f32 %v3856_v4, %v3923_v40  ;;  %v5493_v13 = vld [vmem:[#allocation7_spill] sm:$0xff] }
 0x1ce   : > { %2088 = vmatpush1.msra.mxu1 %v752_v20  ;;  %1539 = vrot.lane.b32.xlu0 %v1515_v0, %s3637_s8  ;;  %v1430_v38 = vmul.f32 %v3858_v5, %v3931_v44  ;;  %v569_v41 = vsel %vm561_vm4, %v4141_v32, %v4139_v61  ;;  %v568_v48 = vsel %vm561_vm4, %v4130_v26, %v4141_v32  ;;  %v465_v61 = vld [vmem:[%s5443_s5] ss:$8 sm:$0x3] }
 0x1cf   : > { %1543 = vrot.lane.b32.xlu1 %v1517_v17, %s3637_s8  ;;  %2089 = vmatprep.subr.mxu1 %v751_v10  ;;  %v1427_v20 = vmul.f32 %v3858_v5, %v3909_v33  ;;  %v566_v26 = vsel %vm561_vm4, %v4123_v21, %v4121_v54  ;;  %v1426_v32 = vmul.f32 %v1418_v19, %v3912_v34 }
 0x1d0   : > { %2090 = vmatpush1.msra.mxu1 %v750_v16  ;;  %v4268_v11 = vpop.permute.xlu0 %822  ;;  %v4272_v18 = vpop.permute.xlu1 %820  ;;  %v564_v17 = vsel %vm561_vm4, %v4102_v51, %v4113_v55  ;;  %v474_v10 = vrot.slane %v465_v61, %v3709_v8  ;;  %v563_v21 = vsel %vm561_vm4, %v4090_v43, %v4104_v52  ;;  %v562_v51 = vsel %vm561_vm4, %v4092_v46, %v4090_v43 }
 0x1d1   : > { %5474 = vst [vmem:[#allocation15_spill] sm:$0xff] %v4268_v11  ;;  %5475 = vst [vmem:[#allocation16_spill] sm:$0xff] %v4272_v18  ;;  %2091 = vmatprep.subr.mxu1 %v749_v2  ;;  %v470_v2 = vrot.slane %v465_v61, %v3711_v9  ;;  %v1425_v55 = vmul.f32 %v3856_v4, %v3902_v30  ;;  %v1422_v46 = vmul.f32 %v3856_v4, %v3888_v23 }
 0x1d2   : > { %2092 = vmatpush1.msra.mxu1 %v748_v12  ;;  %1468 = vrot.lane.b32.xlu0 %v1433_v3, %s3638_s15  ;;  %v484_v3 = vmul.f32 %v474_v10, %v3946_v50  ;;  %v482_v19 = vmul.f32 %v474_v10, %v3920_v39  ;;  %v1338_v61 = vmul.f32 %v3862_v7, %v3931_v44 }
 0x1d3   : > { %1466 = vrot.lane.b32.xlu1 %v1432_v1, %s3638_s15  ;;  %2093 = vmatprep.subr.mxu1 %v662_v24  ;;  %v483_v52 = vmul.f32 %v470_v2, %v3934_v45  ;;  %v481_v43 = vmul.f32 %v470_v2, %v3923_v40  ;;  %v1424_v24 = vmul.f32 %v3858_v5, %v3897_v27 }
 0x1d4   : > { %2094 = vmatpush1.msra.mxu1 %v661_v31  ;;  %v4290_v63 = vpop.permute.xlu0 %826  ;;  %v4295_v42 = vpop.permute.xlu1 %824  ;;  %v480_v31 = vmul.f32 %v474_v10, %v3912_v34  ;;  %v477_v5 = vmul.f32 %v470_v2, %v3888_v23  ;;  %v1860_v18 = vmul.f32 %v5493_v13, %v3934_v45 }
 0x1d5   : > { %5476 = vst [vmem:[#allocation17_spill] sm:$0xff] %v4290_v63  ;;  %5477 = vst [vmem:[#allocation18_spill] sm:$0xff] %v4295_v42  ;;  %2095 = vmatprep.subr.mxu1 %v660_v59  ;;  %v479_v59 = vmul.f32 %v470_v2, %v3902_v30  ;;  %v1857_v42 = vmul.f32 %v5493_v13, %v3923_v40 }
 0x1d6   : > { %2096 = vmatpush1.msra.mxu1 %v659_v60  ;;  %1460 = vrot.lane.b32.xlu0 %v1429_v35, %s3638_s15  ;;  %v478_v35 = vmul.f32 %v474_v10, %v3885_v22 }
 0x1d7   : > { %1464 = vrot.lane.b32.xlu1 %v1431_v56, %s3638_s15  ;;  %2097 = vmatprep.subr.mxu1 %v658_v25  ;;  %v1341_v56 = vmul.f32 %v3862_v7, %v3943_v49  ;;  %v1326_v25 = vsel %vm1325_vm5, %v3860_v6, %v3862_v7 }
 0x1d8   : > { %2098 = vmatpush1.msra.mxu1 %v657_v29  ;;  %v4311_v37 = vpop.permute.xlu0 %830  ;;  %v4316_v58 = vpop.permute.xlu1 %828  ;;  %v1340_v29 = vmul.f32 %v1326_v25, %v3946_v50  ;;  %v1334_v2 = vmul.f32 %v1326_v25, %v3912_v34 }
 0x1d9   : > { %5478 = vst [vmem:[#allocation19_spill] sm:$0xff] %v4311_v37  ;;  %5479 = vst [vmem:[#allocation20_spill] sm:$0xff] %v4316_v58  ;;  %2099 = vmatprep.subr.mxu1 %v656_v62 }
 0x1da   : > { %2100 = vmatpush1.msra.mxu1 %v655_v47  ;;  %1458 = vrot.lane.b32.xlu0 %v1428_v14, %s3638_s15  ;;  %v1337_v47 = vmul.f32 %v1326_v25, %v3920_v39 }
 0x1db   : > { %1462 = vrot.lane.b32.xlu1 %v1430_v38, %s3638_s15  ;;  %2101 = vmatprep.subr.mxu1 %v569_v41  ;;  %v1339_v38 = vmul.f32 %v3860_v6, %v3934_v45  ;;  %v3536_v41 = vld [vmem:[%s5443_s5 + $0x21] ss:$8 sm:$0x3] }
 0x1dc   : > { %2102 = vmatpush1.msra.mxu1 %v568_v48  ;;  %v4333_v57 = vpop.permute.xlu0 %834  ;;  %v4338_v0 = vpop.permute.xlu1 %832 }
 0x1dd   : > { %5480 = vst [vmem:[#allocation21_spill] sm:$0xff] %v4333_v57  ;;  %5481 = vst [vmem:[#allocation22_spill] sm:$0xff] %v4338_v0  ;;  %2103 = vmatprep.subr.mxu1 %v567_v36 }
 0x1de   : > { %2104 = vmatpush1.msra.mxu1 %v566_v26  ;;  %1456 = vrot.lane.b32.xlu0 %v1427_v20, %s3638_s15  ;;  %v1336_v20 = vmul.f32 %v3860_v6, %v3923_v40  ;;  %v2277_v26 = vrot.slane %v3536_v41, %v3709_v8 }
 0x1df   : > { %1454 = vrot.lane.b32.xlu1 %v1426_v32, %s3638_s15  ;;  %2105 = vmatprep.subr.mxu1 %v565_v28  ;;  %v2273_v32 = vrot.slane %v3536_v41, %v3711_v9  ;;  %v3535_v41 = vld [vmem:[%s5443_s5 + $0x20] ss:$8 sm:$0x3] }
 0x1e0   : > { %2106 = vmatpush1.msra.mxu1 %v564_v17  ;;  %v4358_v54 = vpop.permute.xlu0 %838  ;;  %v4363_v16 = vpop.permute.xlu1 %836 }
 0x1e1   : > { %5482 = vst [vmem:[#allocation23_spill] sm:$0xff] %v4358_v54  ;;  %5483 = vst [vmem:[#allocation24_spill] sm:$0xff] %v4363_v16  ;;  %2107 = vmatprep.subr.mxu1 %v563_v21 }
 0x1e2   : > { %2108 = vmatpush1.msra.mxu1 %v562_v51  ;;  %1448 = vrot.lane.b32.xlu0 %v1423_v53, %s3638_s15  ;;  %v1335_v53 = vmul.f32 %v3862_v7, %v3909_v33 }
 0x1e3   : > { %1452 = vrot.lane.b32.xlu1 %v1425_v55, %s3638_s15  ;;  %2109 = vmatprep.subr.mxu1 %v484_v3  ;;  %v1331_v3 = vmul.f32 %v1326_v25, %v3885_v22 }
 0x1e4   : > { %2110 = vmatpush1.msra.mxu1 %v483_v52  ;;  %v4377_v12 = vpop.permute.xlu0 %911  ;;  %v4379_v1 = vpop.permute.xlu1 %909  ;;  %v1333_v52 = vmul.f32 %v3860_v6, %v3902_v30 }
 0x1e5   : > { %5484 = vst [vmem:[#allocation25_spill] sm:$0xff] %v4377_v12  ;;  %5485 = vst [vmem:[#allocation26_spill] sm:$0xff] %v4379_v1  ;;  %2111 = vmatprep.subr.mxu1 %v482_v19 }
 0x1e6   : > { %2112 = vmatpush1.msra.mxu1 %v481_v43  ;;  %1446 = vrot.lane.b32.xlu0 %v1422_v46, %s3638_s15  ;;  %v1330_v46 = vmul.f32 %v3860_v6, %v3888_v23 }
 0x1e7   : > { %1450 = vrot.lane.b32.xlu1 %v1424_v24, %s3638_s15  ;;  %2113 = vmatprep.subr.mxu1 %v480_v31  ;;  %s3639_s15 = smov 82   ;;  %v1332_v24 = vmul.f32 %v3862_v7, %v3897_v27 }
 0x1e8   : > { %2114 = vmatpush1.msra.mxu1 %v479_v59  ;;  %v4391_v60 = vpop.permute.xlu0 %915  ;;  %v4393_v4 = vpop.permute.xlu1 %913 }
 0x1e9   : > { %5486 = vst [vmem:[#allocation27_spill] sm:$0xff] %v4391_v60  ;;  %5487 = vst [vmem:[#allocation28_spill] sm:$0xff] %v4393_v4  ;;  %2115 = vmatprep.subr.mxu1 %v478_v35  ;;  %v5490_v35 = vld [vmem:[#allocation5_spill] sm:$0xff] }
 0x1ea   : > { %2116 = vmatpush1.msra.mxu1 %v477_v5  ;;  %1376 = vrot.lane.b32.xlu0 %v1341_v56, %s3623_s23  ;;  %v1247_v5 = vmul.f32 %v5490_v35, %v3943_v49  ;;  %v5491_v56 = vld [vmem:[#allocation3_spill] sm:$0xff] }
 0x1eb   : > { %1374 = vrot.lane.b32.xlu1 %v1340_v29, %s3623_s23  ;;  %v1232_v25 = vsel %vm1231_vm6, %v5491_v56, %v5490_v35 }
 0x1ec   : > { %v4404_v62 = vpop.permute.xlu0 %919  ;;  %v4406_v14 = vpop.permute.xlu1 %917  ;;  %v1246_v6 = vmul.f32 %v1232_v25, %v3946_v50 }
 0x1ed   : > { %5488 = vst [vmem:[#allocation29_spill] sm:$0xff] %v4404_v62  ;;  %5489 = vst [vmem:[#allocation30_spill] sm:$0xff] %v4406_v14 }
 0x1ee   : > { %1368 = vrot.lane.b32.xlu0 %v1337_v47, %s3623_s23  ;;  %v1243_v47 = vmul.f32 %v1232_v25, %v3920_v39 }
 0x1ef   : > { %1372 = vrot.lane.b32.xlu1 %v1339_v38, %s3623_s23  ;;  %v1245_v38 = vmul.f32 %v5491_v56, %v3934_v45 }
 0x1f0   : > { %v4416_v48 = vpop.permute.xlu0 %923  ;;  %v4418_v36 = vpop.permute.xlu1 %921 }
 0x1f2   : > { %1366 = vrot.lane.b32.xlu0 %v1336_v20, %s3623_s23 }
 0x1f3   : > { %1370 = vrot.lane.b32.xlu1 %v1338_v61, %s3623_s23 }
 0x1f4   : > { %v4428_v28 = vpop.permute.xlu0 %927  ;;  %v4430_v17 = vpop.permute.xlu1 %925 }
 0x1f6   : > { %2280 = vrot.lane.b32.xlu0 %v2277_v26, %s3639_s15  ;;  %v1242_v26 = vmul.f32 %v5491_v56, %v3923_v40 }
 0x1f7   : > { %2278 = vrot.lane.b32.xlu1 %v2273_v32, %s3639_s15  ;;  %v1244_v32 = vmul.f32 %v5490_v35, %v3931_v44 }
 0x1f8   : > { %v4432_v10 = vpop.permute.xlu0 %931  ;;  %v4434_v21 = vpop.permute.xlu1 %929 }
 0x1fa   : > { %1364 = vrot.lane.b32.xlu0 %v1335_v53, %s3623_s23  ;;  %v2184_v53 = vrot.slane %v3535_v41, %v3709_v8 }
 0x1fb   : > { %1362 = vrot.lane.b32.xlu1 %v1334_v2, %s3623_s23  ;;  %v2180_v2 = vrot.slane %v3535_v41, %v3711_v9  ;;  %v1237_v41 = vmul.f32 %v1232_v25, %v3885_v22 }
 0x1fc   : > { %v4441_v51 = vpop.permute.xlu0 %1004  ;;  %v4443_v55 = vpop.permute.xlu1 %1002 }
 0x1fe   : > { %1356 = vrot.lane.b32.xlu0 %v1331_v3, %s3623_s23 }
 0x1ff   : > { %1360 = vrot.lane.b32.xlu1 %v1333_v52, %s3623_s23 }
 0x200   : > { %v4450_v19 = vpop.permute.xlu0 %1008  ;;  %v4452_v43 = vpop.permute.xlu1 %1006 }
 0x202   : > { %1354 = vrot.lane.b32.xlu0 %v1330_v46, %s3623_s23 }
 0x203   : > { %1358 = vrot.lane.b32.xlu1 %v1332_v24, %s3623_s23 }
 0x204   : > { %v4460_v31 = vpop.permute.xlu0 %1012  ;;  %v4462_v59 = vpop.permute.xlu1 %1010 }
 0x206   : > { %1282 = vrot.lane.b32.xlu0 %v1247_v5, %s3640_s12  ;;  %v1241_v5 = vmul.f32 %v5490_v35, %v3909_v33 }
 0x207   : > { %1280 = vrot.lane.b32.xlu1 %v1246_v6, %s3640_s12  ;;  %v1240_v6 = vmul.f32 %v1232_v25, %v3912_v34 }
 0x208   : > { %v4472_v7 = vpop.permute.xlu0 %1016  ;;  %v4474_v29 = vpop.permute.xlu1 %1014 }
 0x20a   : > { %1274 = vrot.lane.b32.xlu0 %v1243_v47, %s3640_s12 }
 0x20b   : > { %1278 = vrot.lane.b32.xlu1 %v1245_v38, %s3640_s12 }
 0x20c   : > { %v4484_v20 = vpop.permute.xlu0 %1020  ;;  %v4486_v61 = vpop.permute.xlu1 %1018 }
 0x20e   : > { %1272 = vrot.lane.b32.xlu0 %v1242_v26, %s3640_s12  ;;  %v1239_v26 = vmul.f32 %v5491_v56, %v3902_v30 }
 0x20f   : > { %1276 = vrot.lane.b32.xlu1 %v1244_v32, %s3640_s12 }
 0x210   : > { %v4496_v3 = vpop.permute.xlu0 %1024  ;;  %v4498_v52 = vpop.permute.xlu1 %1022 }
 0x212   : > { %2187 = vrot.lane.b32.xlu0 %v2184_v53, %s3641_s10 }
 0x213   : > { %2185 = vrot.lane.b32.xlu1 %v2180_v2, %s3641_s10  ;;  %v1236_v2 = vmul.f32 %v5491_v56, %v3888_v23 }
 0x214   : > { %v4500_v46 = vpop.permute.xlu0 %1097  ;;  %v4502_v24 = vpop.permute.xlu1 %1095 }
 0x216   : > { %1270 = vrot.lane.b32.xlu0 %v1241_v5, %s3640_s12  ;;  %v1238_v5 = vmul.f32 %v5490_v35, %v3897_v27 }
 0x217   : > { %1268 = vrot.lane.b32.xlu1 %v1240_v6, %s3640_s12 }
 0x218   : > { %v4509_v47 = vpop.permute.xlu0 %1101  ;;  %v4511_v38 = vpop.permute.xlu1 %1099 }
 0x21a   : > { %1262 = vrot.lane.b32.xlu0 %v1237_v41, %s3640_s12  ;;  %v5492_v41 = vld [vmem:[#allocation6_spill] sm:$0xff] }
 0x21b   : > { %1266 = vrot.lane.b32.xlu1 %v1239_v26, %s3640_s12  ;;  %v1862_v26 = vmul.f32 %v5492_v41, %v3943_v49  ;;  %v1847_v15 = vsel %vm1846_vm7, %v5493_v13, %v5492_v41  ;;  %v1859_v63 = vmul.f32 %v5492_v41, %v3931_v44  ;;  %vm1284_vm7 = vcmask 900096  }
 0x21c   : > { %v4518_v32 = vpop.permute.xlu0 %1105  ;;  %v4520_v53 = vpop.permute.xlu1 %1103  ;;  %v1861_v56 = vmul.f32 %v1847_v15, %v3946_v50 }
 0x21e   : > { %1260 = vrot.lane.b32.xlu0 %v1236_v2, %s3640_s12 }
 0x21f   : > { %1264 = vrot.lane.b32.xlu1 %v1238_v5, %s3640_s12  ;;  %v1858_v5 = vmul.f32 %v1847_v15, %v3920_v39 }
 0x220   : > { %v4528_v25 = vpop.permute.xlu0 %1109  ;;  %v4530_v6 = vpop.permute.xlu1 %1107 }
 0x222   : > { %1897 = vrot.lane.b32.xlu0 %v1862_v26, %s3642_s11  ;;  %v3542_v26 = vld [vmem:[%s5443_s5 + $0x27] ss:$8 sm:$0x3] }
 0x223   : > { %1895 = vrot.lane.b32.xlu1 %v1861_v56, %s3642_s11 }
 0x224   : > { %v4539_v35 = vpop.permute.xlu0 %1113  ;;  %v4541_v2 = vpop.permute.xlu1 %1111 }
 0x226   : > { %1889 = vrot.lane.b32.xlu0 %v1858_v5, %s3642_s11  ;;  %v2715_v5 = vrot.slane %v3542_v26, %v3709_v8 }
 0x227   : > { %1893 = vrot.lane.b32.xlu1 %v1860_v18, %s3642_s11  ;;  %v2711_v18 = vrot.slane %v3542_v26, %v3711_v9 }
 0x228   : > { %v1562_v11 = vpop.permute.xlu0 %1561  ;;  %v1560_v56 = vpop.permute.xlu1 %1559 }
 0x229   : > { %v1571_v58 = vsel %vm1563_vm8, %v1560_v56, %v1562_v11 }
 0x22a   : > { %1887 = vrot.lane.b32.xlu0 %v1857_v42, %s3642_s11  ;;  %1996 = vmatprep.subr.mxu0 %v1571_v58  ;;  %v1856_v42 = vmul.f32 %v5492_v41, %v3909_v33  ;;  %v1855_v58 = vmul.f32 %v1847_v15, %v3912_v34 }
 0x22b   : > { %1891 = vrot.lane.b32.xlu1 %v1859_v63, %s3642_s11 }
 0x22c   : > { %v1554_v37 = vpop.permute.xlu0 %1553  ;;  %v1558_v0 = vpop.permute.xlu1 %1557 }
 0x22d   : > { %v1570_v57 = vsel %vm1563_vm8, %v1558_v0, %v1560_v56  ;;  %v1852_v56 = vmul.f32 %v1847_v15, %v3885_v22 }
 0x22e   : > { %2718 = vrot.lane.b32.xlu0 %v2715_v5, %s3619_s29  ;;  %1997 = vmatpush1.msra.mxu0 %v1570_v57  ;;  %v1854_v5 = vmul.f32 %v5493_v13, %v3902_v30 }
 0x22f   : > { %2716 = vrot.lane.b32.xlu1 %v2711_v18, %s3619_s29  ;;  %v1851_v18 = vmul.f32 %v5493_v13, %v3888_v23  ;;  %s3643_s29 = smov 54  }
 0x230   : > { %v1552_v16 = vpop.permute.xlu0 %1551  ;;  %v1556_v11 = vpop.permute.xlu1 %1555 }
 0x231   : > { %v1569_v63 = vsel %vm1563_vm8, %v1554_v37, %v1556_v11  ;;  %v1568_v26 = vsel %vm1563_vm8, %v1552_v16, %v1554_v37  ;;  %v1853_v11 = vmul.f32 %v5492_v41, %v3897_v27 }
 0x232   : > { %1885 = vrot.lane.b32.xlu0 %v1856_v42, %s3642_s11  ;;  %1998 = vmatprep.subr.mxu0 %v1569_v63  ;;  %v5494_v63 = vld [vmem:[#allocation8_spill] sm:$0xff] }
 0x233   : > { %1883 = vrot.lane.b32.xlu1 %v1855_v58, %s3642_s11  ;;  %1999 = vmatpush1.msra.mxu0 %v1568_v26  ;;  %v1769_v26 = vmul.f32 %v5494_v63, %v3943_v49 }
 0x234   : > { %v4570_v57 = vpop.permute.xlu0 %2402  ;;  %v4572_v0 = vpop.permute.xlu1 %2400 }
 0x236   : > { %1877 = vrot.lane.b32.xlu0 %v1852_v56, %s3642_s11  ;;  %v5495_v56 = vld [vmem:[#allocation9_spill] sm:$0xff] }
 0x237   : > { %1881 = vrot.lane.b32.xlu1 %v1854_v5, %s3642_s11  ;;  %v1754_v5 = vsel %vm1753_vm0, %v5495_v56, %v5494_v63  ;;  %vm2282_vm0 = vcmask 670720  }
 0x238   : > { %v1550_v37 = vpop.permute.xlu0 %1549  ;;  %v1548_v16 = vpop.permute.xlu1 %1547  ;;  %v1768_v13 = vmul.f32 %v1754_v5, %v3946_v50 }
 0x239   : > { %v1567_v42 = vsel %vm1563_vm8, %v1548_v16, %v1550_v37 }
 0x23a   : > { %1875 = vrot.lane.b32.xlu0 %v1851_v18, %s3642_s11  ;;  %2000 = vmatprep.subr.mxu0 %v1567_v42  ;;  %v1765_v18 = vmul.f32 %v1754_v5, %v3920_v39  ;;  %v1767_v42 = vmul.f32 %v5495_v56, %v3934_v45 }
 0x23b   : > { %1879 = vrot.lane.b32.xlu1 %v1853_v11, %s3642_s11 }
 0x23c   : > { %v1542_v15 = vpop.permute.xlu0 %1541  ;;  %v1546_v58 = vpop.permute.xlu1 %1545 }
 0x23d   : > { %v1566_v41 = vsel %vm1563_vm8, %v1546_v58, %v1548_v16  ;;  %v3541_v16 = vld [vmem:[%s5443_s5 + $0x26] ss:$8 sm:$0x3] }
 0x23e   : > { %1804 = vrot.lane.b32.xlu0 %v1769_v26, %s3643_s29  ;;  %2001 = vmatpush1.msra.mxu0 %v1566_v41  ;;  %v1764_v26 = vmul.f32 %v5495_v56, %v3923_v40  ;;  %v1766_v41 = vmul.f32 %v5494_v63, %v3931_v44 }
 0x23f   : > { %1802 = vrot.lane.b32.xlu1 %v1768_v13, %s3643_s29 }
 0x240   : > { %v1540_v37 = vpop.permute.xlu0 %1539 }
 0x241   : > { %v1544_v11 = vpop.permute.xlu1 %1543  ;;  %v1564_v54 = vsel %vm1563_vm8, %v1540_v37, %v1542_v15  ;;  %v2632_v37 = vrot.slane %v3541_v16, %v3711_v9 }
 0x242   : > { %1796 = vrot.lane.b32.xlu0 %v1765_v18, %s3643_s29  ;;  %v1565_v1 = vsel %vm1563_vm8, %v1542_v15, %v1544_v11  ;;  %vm1603_vm8 = vcmask 588800  }
 0x243   : > { %1800 = vrot.lane.b32.xlu1 %v1767_v42, %s3643_s29  ;;  %2002 = vmatprep.subr.mxu0 %v1565_v1  ;;  %v2636_v1 = vrot.slane %v3541_v16, %v3709_v8  ;;  %v3545_v42 = vld [vmem:[%s5443_s5 + $0x32] ss:$8 sm:$0x3]  ;;  %v1762_v16 = vmul.f32 %v1754_v5, %v3912_v34 }
 0x244   : > { %2003 = vmatpush1.msra.mxu0 %v1564_v54  ;;  %v1469_v58 = vpop.permute.xlu0 %1468 }
 0x245   : > { %v1467_v13 = vpop.permute.xlu1 %1466 }
 0x246   : > { %1794 = vrot.lane.b32.xlu0 %v1764_v26, %s3643_s29  ;;  %v1478_v15 = vsel %vm1470_vm2, %v1467_v13, %v1469_v58  ;;  %v1763_v26 = vmul.f32 %v5494_v63, %v3909_v33 }
 0x247   : > { %1798 = vrot.lane.b32.xlu1 %v1766_v41, %s3643_s29  ;;  %2004 = vmatprep.subr.mxu0 %v1478_v15 }
 0x248   : > { %v1461_v54 = vpop.permute.xlu0 %1460 }
 0x249   : > { %v1465_v18 = vpop.permute.xlu1 %1464 }
 0x24a   : > { %2639 = vrot.lane.b32.xlu0 %v2636_v1, %s3618_s26  ;;  %v1477_v11 = vsel %vm1470_vm2, %v1465_v18, %v1467_v13  ;;  %v3117_v1 = vrot.slane %v3545_v42, %v3711_v9 }
 0x24b   : > { %2637 = vrot.lane.b32.xlu1 %v2632_v37, %s3618_s26  ;;  %2005 = vmatpush1.msra.mxu0 %v1477_v11  ;;  %v1761_v11 = vmul.f32 %v5495_v56, %v3902_v30  ;;  %s3644_s26 = smov 55  }
 0x24c   : > { %v1459_v58 = vpop.permute.xlu0 %1458 }
 0x24d   : > { %v1463_v41 = vpop.permute.xlu1 %1462  ;;  %v1475_v15 = vsel %vm1470_vm2, %v1459_v58, %v1461_v54 }
 0x24e   : > { %1792 = vrot.lane.b32.xlu0 %v1763_v26, %s3643_s29  ;;  %v1476_v13 = vsel %vm1470_vm2, %v1461_v54, %v1463_v41  ;;  %v3121_v54 = vrot.slane %v3545_v42, %v3709_v8  ;;  %v1759_v26 = vmul.f32 %v1754_v5, %v3885_v22 }
 0x24f   : > { %1790 = vrot.lane.b32.xlu1 %v1762_v16, %s3643_s29  ;;  %2006 = vmatprep.subr.mxu0 %v1476_v13  ;;  %v1758_v13 = vmul.f32 %v5495_v56, %v3888_v23 }
 0x250   : > { %2007 = vmatpush1.msra.mxu0 %v1475_v15  ;;  %v1457_v37 = vpop.permute.xlu0 %1456 }
 0x251   : > { %v1455_v18 = vpop.permute.xlu1 %1454 }
 0x252   : > { %3122 = vrot.lane.b32.xlu0 %v3117_v1, %s3624_s27  ;;  %v1474_v12 = vsel %vm1470_vm2, %v1455_v18, %v1457_v37 }
 0x253   : > { %1788 = vrot.lane.b32.xlu1 %v1761_v11, %s3643_s29  ;;  %2008 = vmatprep.subr.mxu0 %v1474_v12  ;;  %v1760_v12 = vmul.f32 %v5494_v63, %v3897_v27 }
 0x254   : > { %v1449_v58 = vpop.permute.xlu0 %1448 }
 0x255   : > { %v1453_v41 = vpop.permute.xlu1 %1452 }
 0x256   : > { %1784 = vrot.lane.b32.xlu0 %v1759_v26, %s3643_s29  ;;  %v1473_v16 = vsel %vm1470_vm2, %v1453_v41, %v1455_v18 }
 0x257   : > { %3124 = vrot.lane.b32.xlu1 %v3121_v54, %s3624_s27  ;;  %2009 = vmatpush1.msra.mxu0 %v1473_v16 }
 0x258   : > { %v1447_v15 = vpop.permute.xlu0 %1446 }
 0x259   : > { %v1451_v1 = vpop.permute.xlu1 %1450  ;;  %v1471_v42 = vsel %vm1470_vm2, %v1447_v15, %v1449_v58 }
 0x25a   : > { %1782 = vrot.lane.b32.xlu0 %v1758_v13, %s3643_s29  ;;  %v1472_v5 = vsel %vm1470_vm2, %v1449_v58, %v1451_v1  ;;  %v3540_v58 = vld [vmem:[%s5443_s5 + $0x25] ss:$8 sm:$0x3]  ;;  %vm1806_vm2 = vcmask 441344  }
 0x25b   : > { %1786 = vrot.lane.b32.xlu1 %v1760_v12, %s3643_s29  ;;  %2010 = vmatprep.subr.mxu0 %v1472_v5  ;;  %v2557_v13 = vrot.slane %v3540_v58, %v3709_v8  ;;  %v2553_v1 = vrot.slane %v3540_v58, %v3711_v9  ;;  %v3544_v5 = vld [vmem:[%s5443_s5 + $0x31] ss:$8 sm:$0x3] }
 0x25c   : > { %2011 = vmatpush1.msra.mxu0 %v1471_v42  ;;  %v1377_v37 = vpop.permute.xlu0 %1376 }
 0x25d   : > { %v1375_v18 = vpop.permute.xlu1 %1374 }
 0x25e   : > { %1711 = vrot.lane.b32.xlu0 %v3943_v49, %s3644_s26  ;;  %v1385_v56 = vsel %vm1325_vm5, %v1375_v18, %v1377_v37 }
 0x25f   : > { %1709 = vrot.lane.b32.xlu1 %v3946_v50, %s3644_s26  ;;  %2012 = vmatprep.subr.mxu0 %v1385_v56 }
 0x260   : > { %v1369_v63 = vpop.permute.xlu0 %1368 }
 0x261   : > { %v1373_v11 = vpop.permute.xlu1 %1372 }
 0x262   : > { %1703 = vrot.lane.b32.xlu0 %v3920_v39, %s3644_s26  ;;  %v1384_v54 = vsel %vm1325_vm5, %v1373_v11, %v1375_v18 }
 0x263   : > { %1707 = vrot.lane.b32.xlu1 %v3934_v45, %s3644_s26  ;;  %2013 = vmatpush1.msra.mxu0 %v1384_v54 }
 0x264   : > { %v1367_v26 = vpop.permute.xlu0 %1366 }
 0x265   : > { %v1371_v41 = vpop.permute.xlu1 %1370  ;;  %v1382_v16 = vsel %vm1325_vm5, %v1367_v26, %v1369_v63  ;;  %v3042_v26 = vrot.slane %v3544_v5, %v3709_v8 }
 0x266   : > { %1701 = vrot.lane.b32.xlu0 %v3923_v40, %s3644_s26  ;;  %v1383_v15 = vsel %vm1325_vm5, %v1369_v63, %v1371_v41  ;;  %v3038_v63 = vrot.slane %v3544_v5, %v3711_v9 }
 0x267   : > { %1705 = vrot.lane.b32.xlu1 %v3931_v44, %s3644_s26  ;;  %2014 = vmatprep.subr.mxu0 %v1383_v15 }
 0x268   : > { %2015 = vmatpush1.msra.mxu0 %v1382_v16  ;;  %v4666_v12 = vpop.permute.xlu0 %2280 }
 0x269   : > { %v4668_v42 = vpop.permute.xlu1 %2278 }
 0x26a   : > { %2560 = vrot.lane.b32.xlu0 %v2557_v13, %s3617_s21 }
 0x26b   : > { %2558 = vrot.lane.b32.xlu1 %v2553_v1, %s3617_s21  ;;  %s3645_s21 = smov 56  }
 0x26c   : > { %v1365_v37 = vpop.permute.xlu0 %1364 }
 0x26d   : > { %v1363_v18 = vpop.permute.xlu1 %1362 }
 0x26e   : > { %1699 = vrot.lane.b32.xlu0 %v3909_v33, %s3644_s26  ;;  %v1381_v56 = vsel %vm1325_vm5, %v1363_v18, %v1365_v37 }
 0x26f   : > { %1697 = vrot.lane.b32.xlu1 %v3912_v34, %s3644_s26  ;;  %2016 = vmatprep.subr.mxu0 %v1381_v56  ;;  %v5496_v56 = vld [vmem:[#allocation10_spill] sm:$0xff] }
 0x270   : > { %v1357_v11 = vpop.permute.xlu0 %1356 }
 0x271   : > { %v1361_v54 = vpop.permute.xlu1 %1360 }
 0x272   : > { %3043 = vrot.lane.b32.xlu0 %v3038_v63, %s3625_s28  ;;  %v1380_v58 = vsel %vm1325_vm5, %v1361_v54, %v1363_v18  ;;  %v1619_v63 = vmul.f32 %v5496_v56, %v3943_v49 }
 0x273   : > { %1695 = vrot.lane.b32.xlu1 %v3902_v30, %s3644_s26  ;;  %2017 = vmatpush1.msra.mxu0 %v1380_v58 }
 0x274   : > { %v1355_v41 = vpop.permute.xlu0 %1354 }
 0x275   : > { %v1359_v16 = vpop.permute.xlu1 %1358  ;;  %v1378_v15 = vsel %vm1325_vm5, %v1355_v41, %v1357_v11 }
 0x276   : > { %1691 = vrot.lane.b32.xlu0 %v3885_v22, %s3644_s26  ;;  %v1379_v13 = vsel %vm1325_vm5, %v1357_v11, %v1359_v16  ;;  %v5497_v11 = vld [vmem:[#allocation11_spill] sm:$0xff]  ;;  %vm1899_vm5 = vcmask 392192  }
 0x277   : > { %3045 = vrot.lane.b32.xlu1 %v3042_v26, %s3625_s28  ;;  %2018 = vmatprep.subr.mxu0 %v1379_v13  ;;  %v1604_v54 = vsel %vm1603_vm8, %v5497_v11, %v5496_v56  ;;  %v1611_v60 = vmul.f32 %v5497_v11, %v3902_v30  ;;  %vm2189_vm8 = vcmask 662528  }
 0x278   : > { %2019 = vmatpush1.msra.mxu0 %v1378_v15  ;;  %v1283_v1 = vpop.permute.xlu0 %1282  ;;  %v1618_v26 = vmul.f32 %v1604_v54, %v3946_v50  ;;  %v1615_v15 = vmul.f32 %v1604_v54, %v3920_v39 }
 0x279   : > { %v1281_v37 = vpop.permute.xlu1 %1280 }
 0x27a   : > { %1689 = vrot.lane.b32.xlu0 %v3888_v23, %s3644_s26  ;;  %v1292_v5 = vsel %vm1284_vm7, %v1281_v37, %v1283_v1  ;;  %v1617_v1 = vmul.f32 %v5497_v11, %v3934_v45 }
 0x27b   : > { %1693 = vrot.lane.b32.xlu1 %v3897_v27, %s3644_s26  ;;  %2020 = vmatprep.subr.mxu0 %v1292_v5 }
 0x27c   : > { %v1275_v18 = vpop.permute.xlu0 %1274 }
 0x27d   : > { %v1279_v58 = vpop.permute.xlu1 %1278 }
 0x27e   : > { %1654 = vrot.lane.b32.xlu0 %v1619_v63, %s3645_s21  ;;  %v1291_v41 = vsel %vm1284_vm7, %v1279_v58, %v1281_v37  ;;  %v3539_v37 = vld [vmem:[%s5443_s5 + $0x24] ss:$8 sm:$0x3]  ;;  %v1614_v58 = vmul.f32 %v5497_v11, %v3923_v40 }
 0x27f   : > { %1652 = vrot.lane.b32.xlu1 %v1618_v26, %s3645_s21  ;;  %2021 = vmatpush1.msra.mxu0 %v1291_v41  ;;  %v1616_v41 = vmul.f32 %v5496_v56, %v3931_v44 }
 0x280   : > { %v1273_v16 = vpop.permute.xlu0 %1272 }
 0x281   : > { %v1277_v13 = vpop.permute.xlu1 %1276  ;;  %v1289_v5 = vsel %vm1284_vm7, %v1273_v16, %v1275_v18 }
 0x282   : > { %1646 = vrot.lane.b32.xlu0 %v1615_v15, %s3645_s21  ;;  %v1290_v4 = vsel %vm1284_vm7, %v1275_v18, %v1277_v13  ;;  %v2478_v18 = vrot.slane %v3539_v37, %v3709_v8 }
 0x283   : > { %1650 = vrot.lane.b32.xlu1 %v1617_v1, %s3645_s21  ;;  %2022 = vmatprep.subr.mxu0 %v1290_v4  ;;  %v2474_v4 = vrot.slane %v3539_v37, %v3711_v9  ;;  %v3543_v1 = vld [vmem:[%s5443_s5 + $0x30] ss:$8 sm:$0x3]  ;;  %v1612_v37 = vmul.f32 %v1604_v54, %v3912_v34 }
 0x284   : > { %2023 = vmatpush1.msra.mxu0 %v1289_v5  ;;  %v4714_v63 = vpop.permute.xlu0 %2187 }
 0x285   : > { %v4718_v26 = vpop.permute.xlu1 %2185 }
 0x286   : > { %1644 = vrot.lane.b32.xlu0 %v1614_v58, %s3645_s21  ;;  %v1613_v58 = vmul.f32 %v5496_v56, %v3909_v33 }
 0x287   : > { %1648 = vrot.lane.b32.xlu1 %v1616_v41, %s3645_s21 }
 0x288   : > { %v1271_v16 = vpop.permute.xlu0 %1270 }
 0x289   : > { %v1269_v15 = vpop.permute.xlu1 %1268 }
 0x28a   : > { %2481 = vrot.lane.b32.xlu0 %v2478_v18, %s3616_s18  ;;  %v1288_v13 = vsel %vm1284_vm7, %v1269_v15, %v1271_v16  ;;  %v2959_v16 = vrot.slane %v3543_v1, %v3711_v9 }
 0x28b   : > { %2479 = vrot.lane.b32.xlu1 %v2474_v4, %s3616_s18  ;;  %2024 = vmatprep.subr.mxu0 %v1288_v13 }
 0x28c   : > { %v1263_v5 = vpop.permute.xlu0 %1262 }
 0x28d   : > { %v1267_v41 = vpop.permute.xlu1 %1266 }
 0x28e   : > { %1642 = vrot.lane.b32.xlu0 %v1613_v58, %s3645_s21  ;;  %v1287_v18 = vsel %vm1284_vm7, %v1267_v41, %v1269_v15  ;;  %v2963_v15 = vrot.slane %v3543_v1, %v3709_v8  ;;  %v1609_v41 = vmul.f32 %v1604_v54, %v3885_v22  ;;  %v1610_v54 = vmul.f32 %v5496_v56, %v3897_v27 }
 0x28f   : > { %1640 = vrot.lane.b32.xlu1 %v1612_v37, %s3645_s21  ;;  %2025 = vmatpush1.msra.mxu0 %v1287_v18  ;;  %v2404_v1 = vsel %vm508_vm9, %v4572_v0, %v4570_v57 }
 0x290   : > { %v1261_v4 = vpop.permute.xlu0 %1260 }
 0x291   : > { %v1265_v13 = vpop.permute.xlu1 %1264  ;;  %v1285_v14 = vsel %vm1284_vm7, %v1261_v4, %v1263_v5 }
 0x292   : > { %2964 = vrot.lane.b32.xlu0 %v2959_v16, %s3620_s9  ;;  %v1286_v62 = vsel %vm1284_vm7, %v1263_v5, %v1265_v13  ;;  %v1925_v16 = vld [vmem:[%s5441_s3 + $0x18] sm:$0xff]  ;;  %v2416_v13 = vmul.f32 %v2404_v1, %v3943_v49 }
 0x293   : > { %1638 = vrot.lane.b32.xlu1 %v1611_v60, %s3645_s21  ;;  %2026 = vmatprep.subr.mxu0 %v1286_v62  ;;  %v1608_v62 = vmul.f32 %v5497_v11, %v3888_v23  ;;  %v2410_v11 = vmul.f32 0.0, %v4570_v57  ;;  %v2415_v57 = vmul.f32 %v4572_v0, %v3946_v50 }
 0x294   : > { %2027 = vmatpush1.msra.mxu0 %v1285_v14  ;;  %v1898_v58 = vpop.permute.xlu0 %1897  ;;  %2060 = vmatprep.mubr.f32.mxu0 %v1925_v16 }
 0x295   : > { %v1896_v37 = vpop.permute.xlu1 %1895 }
 0x296   : > { %1634 = vrot.lane.b32.xlu0 %v1609_v41, %s3645_s21  ;;  %v1907_v18 = vsel %vm1899_vm5, %v1896_v37, %v1898_v58 }
 0x297   : > { %2966 = vrot.lane.b32.xlu1 %v2963_v15, %s3620_s9  ;;  %2028 = vmatprep.subr.mxu0 %v1907_v18  ;;  %s3646_s9 = smov 46  }
 0x298   : > { %v1890_v60 = vpop.permute.xlu0 %1889 }
 0x299   : > { %v1894_v14 = vpop.permute.xlu1 %1893 }
 0x29a   : > { %1632 = vrot.lane.b32.xlu0 %v1608_v62, %s3645_s21  ;;  %v1906_v5 = vsel %vm1899_vm5, %v1894_v14, %v1896_v37  ;;  %v2414_v37 = vmul.f32 %v2404_v1, %v3931_v44  ;;  %v2413_v14 = vmul.f32 %v4572_v0, %v3920_v39 }
 0x29b   : > { %1636 = vrot.lane.b32.xlu1 %v1610_v54, %s3645_s21  ;;  %2029 = vmatpush2.msra.mxu0 %v1906_v5 }
 0x29c   : > { %v1888_v4 = vpop.permute.xlu0 %1887 }
 0x29d   : > { %v1892_v15 = vpop.permute.xlu1 %1891  ;;  %v1904_v58 = vsel %vm1899_vm5, %v1888_v4, %v1890_v60  ;;  %v2409_v4 = vmul.f32 %v2404_v1, %v3897_v27 }
 0x29e   : > { %2442 = vrot.lane.b32.xlu0 %v2416_v13, %s3630_s13  ;;  %v1905_v56 = vsel %vm1899_vm5, %v1890_v60, %v1892_v15  ;;  %v2412_v60 = vmul.f32 %v2404_v1, %v3909_v33  ;;  %v2408_v1 = vmul.f32 %v4572_v0, %v3885_v22 }
 0x29f   : > { %2430 = vrot.lane.b32.xlu1 %v2410_v11, %s3630_s13  ;;  %2030 = vmatprep.subr.mxu0 %v1905_v56  ;;  %v2411_v11 = vmul.f32 %v4572_v0, %v3912_v34  ;;  %v5498_v56 = vld [vmem:[#allocation12_spill] sm:$0xff] }
 0x2a0   : > { %2031 = vmatpush2.msra.mxu0 %v1904_v58  ;;  %v4769_v41 = vpop.permute.xlu0 %2718  ;;  %v5499_v0 = vld [vmem:[#allocation4_spill] sm:$0xff] }
 0x2a1   : > { %v4772_v18 = vpop.permute.xlu1 %2716 }
 0x2a2   : > { %2438 = vrot.lane.b32.xlu0 %v2414_v37, %s3630_s13  ;;  %v1081_v37 = vmul.f32 %v5498_v56, %v3946_v50  ;;  %v2298_v56 = vmul.f32 %v4666_v12, %v3943_v49 }
 0x2a3   : > { %2440 = vrot.lane.b32.xlu1 %v2415_v57, %s3630_s13 }
 0x2a4   : > { %v1886_v16 = vpop.permute.xlu0 %1885 }
 0x2a5   : > { %v1884_v62 = vpop.permute.xlu1 %1883 }
 0x2a6   : > { %2434 = vrot.lane.b32.xlu0 %v2412_v60, %s3630_s13  ;;  %v1903_v54 = vsel %vm1899_vm5, %v1884_v62, %v1886_v16  ;;  %v2283_v60 = vsel %vm2282_vm0, %v4668_v42, %v4666_v12  ;;  %vm2242_vm0 = vcmask 384000  }
 0x2a7   : > { %2436 = vrot.lane.b32.xlu1 %v2413_v14, %s3630_s13  ;;  %2032 = vmatprep.subr.mxu0 %v1903_v54  ;;  %v2297_v54 = vmul.f32 %v2283_v60, %v3946_v50 }
 0x2a8   : > { %v1878_v5 = vpop.permute.xlu0 %1877 }
 0x2a9   : > { %v1882_v13 = vpop.permute.xlu1 %1881 }
 0x2aa   : > { %2428 = vrot.lane.b32.xlu0 %v2409_v4, %s3630_s13  ;;  %v1902_v15 = vsel %vm1899_vm5, %v1882_v13, %v1884_v62  ;;  %v1082_v13 = vmul.f32 %v5499_v0, %v3943_v49  ;;  %v2291_v0 = vmul.f32 %v2283_v60, %v3912_v34 }
 0x2ab   : > { %2432 = vrot.lane.b32.xlu1 %v2411_v11, %s3630_s13  ;;  %2033 = vmatpush2.msra.mxu0 %v1902_v15  ;;  %v2296_v15 = vmul.f32 %v4668_v42, %v3934_v45 }
 0x2ac   : > { %v1876_v58 = vpop.permute.xlu0 %1875 }
 0x2ad   : > { %v1880_v57 = vpop.permute.xlu1 %1879  ;;  %v1900_v16 = vsel %vm1899_vm5, %v1876_v58, %v1878_v5 }
 0x2ae   : > { %1115 = vrot.lane.b32.xlu0 %v1081_v37, %s3636_s30  ;;  %v1901_v62 = vsel %vm1899_vm5, %v1878_v5, %v1880_v57  ;;  %vm1713_vm5 = vcmask 449536  }
 0x2af   : > { %2426 = vrot.lane.b32.xlu1 %v2408_v1, %s3630_s13  ;;  %2034 = vmatprep.subr.mxu0 %v1901_v62  ;;  %v2295_v1 = vmul.f32 %v4666_v12, %v3931_v44  ;;  %v2294_v62 = vmul.f32 %v2283_v60, %v3920_v39  ;;  %s3647_s13 = smov 47  }
 0x2b0   : > { %2035 = vmatpush2.msra.mxu0 %v1900_v16  ;;  %v1805_v14 = vpop.permute.xlu0 %1804 }
 0x2b1   : > { %v1803_v4 = vpop.permute.xlu1 %1802 }
 0x2b2   : > { %2331 = vrot.lane.b32.xlu0 %v2297_v54, %s3646_s9  ;;  %v1814_v11 = vsel %vm1806_vm2, %v1803_v4, %v1805_v14 }
 0x2b3   : > { %1117 = vrot.lane.b32.xlu1 %v1082_v13, %s3636_s30  ;;  %2036 = vmatprep.subr.mxu0 %v1814_v11  ;;  %v2293_v11 = vmul.f32 %v4668_v42, %v3923_v40 }
 0x2b4   : > { %v1797_v5 = vpop.permute.xlu0 %1796 }
 0x2b5   : > { %v1801_v58 = vpop.permute.xlu1 %1800 }
 0x2b6   : > { %2329 = vrot.lane.b32.xlu0 %v2296_v15, %s3646_s9  ;;  %v1813_v37 = vsel %vm1806_vm2, %v1801_v58, %v1803_v4 }
 0x2b7   : > { %2333 = vrot.lane.b32.xlu1 %v2298_v56, %s3646_s9  ;;  %2037 = vmatpush2.msra.mxu0 %v1813_v37  ;;  %v2292_v56 = vmul.f32 %v4666_v12, %v3909_v33 }
 0x2b8   : > { %v1795_v57 = vpop.permute.xlu0 %1794 }
 0x2b9   : > { %v1799_v16 = vpop.permute.xlu1 %1798  ;;  %v1811_v14 = vsel %vm1806_vm2, %v1795_v57, %v1797_v5 }
 0x2ba   : > { %2327 = vrot.lane.b32.xlu0 %v2295_v1, %s3646_s9  ;;  %v1812_v54 = vsel %vm1806_vm2, %v1797_v5, %v1799_v16  ;;  %v2290_v5 = vmul.f32 %v4668_v42, %v3902_v30  ;;  %v2289_v1 = vmul.f32 %v4666_v12, %v3897_v27  ;;  %v2287_v12 = vmul.f32 %v4668_v42, %v3888_v23 }
 0x2bb   : > { %2325 = vrot.lane.b32.xlu1 %v2294_v62, %s3646_s9  ;;  %2038 = vmatprep.subr.mxu0 %v1812_v54  ;;  %v2288_v62 = vmul.f32 %v2283_v60, %v3885_v22 }
 0x2bc   : > { %2039 = vmatpush2.msra.mxu0 %v1811_v14  ;;  %v4820_v4 = vpop.permute.xlu0 %2639  ;;  %v2190_v14 = vsel %vm2189_vm8, %v4718_v26, %v4714_v63 }
 0x2bd   : > { %v4823_v13 = vpop.permute.xlu1 %2637 }
 0x2be   : > { %2319 = vrot.lane.b32.xlu0 %v2291_v0, %s3646_s9 }
 0x2bf   : > { %2323 = vrot.lane.b32.xlu1 %v2293_v11, %s3646_s9  ;;  %v2204_v11 = vmul.f32 %v2190_v14, %v3946_v50 }
 0x2c0   : > { %v1793_v15 = vpop.permute.xlu0 %1792 }
 0x2c1   : > { %v1791_v58 = vpop.permute.xlu1 %1790 }
 0x2c2   : > { %2317 = vrot.lane.b32.xlu0 %v2290_v5, %s3646_s9  ;;  %v1810_v37 = vsel %vm1806_vm2, %v1791_v58, %v1793_v15  ;;  %v2203_v5 = vmul.f32 %v4718_v26, %v3934_v45 }
 0x2c3   : > { %2321 = vrot.lane.b32.xlu1 %v2292_v56, %s3646_s9  ;;  %2040 = vmatprep.subr.mxu0 %v1810_v37  ;;  %v2205_v56 = vmul.f32 %v4714_v63, %v3943_v49 }
 0x2c4   : > { %v4836_v57 = vpop.permute.xlu0 %3122 }
 0x2c5   : > { %v1789_v16 = vpop.permute.xlu1 %1788 }
 0x2c6   : > { %2315 = vrot.lane.b32.xlu0 %v2289_v1, %s3646_s9  ;;  %v1809_v54 = vsel %vm1806_vm2, %v1789_v16, %v1791_v58  ;;  %v2202_v16 = vmul.f32 %v4714_v63, %v3931_v44 }
 0x2c7   : > { %2313 = vrot.lane.b32.xlu1 %v2288_v62, %s3646_s9  ;;  %2041 = vmatpush2.msra.mxu0 %v1809_v54  ;;  %v2201_v62 = vmul.f32 %v2190_v14, %v3920_v39 }
 0x2c8   : > { %v1785_v0 = vpop.permute.xlu0 %1784 }
 0x2c9   : > { %v4847_v15 = vpop.permute.xlu1 %3124 }
 0x2ca   : > { %2238 = vrot.lane.b32.xlu0 %v2204_v11, %s3647_s13  ;;  %v2198_v11 = vmul.f32 %v2190_v14, %v3912_v34 }
 0x2cb   : > { %2311 = vrot.lane.b32.xlu1 %v2287_v12, %s3646_s9 }
 0x2cc   : > { %v1783_v60 = vpop.permute.xlu0 %1782 }
 0x2cd   : > { %v1787_v58 = vpop.permute.xlu1 %1786  ;;  %v1807_v37 = vsel %vm1806_vm2, %v1783_v60, %v1785_v0  ;;  %v2200_v60 = vmul.f32 %v4718_v26, %v3923_v40 }
 0x2ce   : > { %2236 = vrot.lane.b32.xlu0 %v2203_v5, %s3647_s13  ;;  %v1808_v1 = vsel %vm1806_vm2, %v1785_v0, %v1787_v58 }
 0x2cf   : > { %2240 = vrot.lane.b32.xlu1 %v2205_v56, %s3647_s13  ;;  %2042 = vmatprep.subr.mxu0 %v1808_v1  ;;  %v2197_v56 = vmul.f32 %v4718_v26, %v3902_v30  ;;  %v2199_v1 = vmul.f32 %v4714_v63, %v3909_v33 }
 0x2d0   : > { %2043 = vmatpush2.msra.mxu0 %v1807_v37  ;;  %v1712_v42 = vpop.permute.xlu0 %1711 }
 0x2d1   : > { %v1710_v45 = vpop.permute.xlu1 %1709 }
 0x2d2   : > { %2234 = vrot.lane.b32.xlu0 %v2202_v16, %s3647_s13  ;;  %v1721_v54 = vsel %vm1713_vm5, %v1710_v45, %v1712_v42 }
 0x2d3   : > { %2232 = vrot.lane.b32.xlu1 %v2201_v62, %s3647_s13  ;;  %2044 = vmatprep.subr.mxu0 %v1721_v54  ;;  %v2195_v62 = vmul.f32 %v2190_v14, %v3885_v22  ;;  %v2726_v54 = vmul.f32 0.0, %v4769_v41 }
 0x2d4   : > { %v1704_v0 = vpop.permute.xlu0 %1703 }
 0x2d5   : > { %v1708_v12 = vpop.permute.xlu1 %1707 }
 0x2d6   : > { %2226 = vrot.lane.b32.xlu0 %v2198_v11, %s3647_s13  ;;  %v1720_v5 = vsel %vm1713_vm5, %v1708_v12, %v1710_v45  ;;  %v2196_v45 = vmul.f32 %v4714_v63, %v3897_v27  ;;  %v2194_v12 = vmul.f32 %v4718_v26, %v3888_v23  ;;  %v2720_v63 = vsel %vm880_vm13, %v4772_v18, %v4769_v41 }
 0x2d7   : > { %2230 = vrot.lane.b32.xlu1 %v2200_v60, %s3647_s13  ;;  %2045 = vmatpush2.msra.mxu0 %v1720_v5  ;;  %v2731_v5 = vmul.f32 %v4772_v18, %v3946_v50  ;;  %v2729_v41 = vmul.f32 %v4772_v18, %v3920_v39  ;;  %vm1656_vm13 = vcmask 457728  }
 0x2d8   : > { %v1702_v58 = vpop.permute.xlu0 %1701 }
 0x2d9   : > { %v1706_v37 = vpop.permute.xlu1 %1705  ;;  %v1718_v42 = vsel %vm1713_vm5, %v1702_v58, %v1704_v0 }
 0x2da   : > { %2224 = vrot.lane.b32.xlu0 %v2197_v56, %s3647_s13  ;;  %v1719_v40 = vsel %vm1713_vm5, %v1704_v0, %v1706_v37  ;;  %v2732_v56 = vmul.f32 %v2720_v63, %v3943_v49 }
 0x2db   : > { %2228 = vrot.lane.b32.xlu1 %v2199_v1, %s3647_s13  ;;  %2046 = vmatprep.subr.mxu0 %v1719_v40  ;;  %v2730_v1 = vmul.f32 %v2720_v63, %v3931_v44  ;;  %v2727_v40 = vmul.f32 %v4772_v18, %v3912_v34 }
 0x2dc   : > { %2047 = vmatpush2.msra.mxu0 %v1718_v42  ;;  %v4881_v16 = vpop.permute.xlu0 %2560 }
 0x2dd   : > { %v4885_v30 = vpop.permute.xlu1 %2558 }
 0x2de   : > { %2222 = vrot.lane.b32.xlu0 %v2196_v45, %s3647_s13 }
 0x2df   : > { %2220 = vrot.lane.b32.xlu1 %v2195_v62, %s3647_s13  ;;  %v2728_v62 = vmul.f32 %v2720_v63, %v3909_v33 }
 0x2e0   : > { %v1700_v0 = vpop.permute.xlu0 %1699 }
 0x2e1   : > { %v1698_v11 = vpop.permute.xlu1 %1697 }
 0x2e2   : > { %2746 = vrot.lane.b32.xlu0 %v2726_v54, %s3634_s20  ;;  %v1717_v60 = vsel %vm1713_vm5, %v1698_v11, %v1700_v0 }
 0x2e3   : > { %2218 = vrot.lane.b32.xlu1 %v2194_v12, %s3647_s13  ;;  %2048 = vmatprep.subr.mxu0 %v1717_v60  ;;  %v2724_v12 = vmul.f32 %v4772_v18, %v3885_v22 }
 0x2e4   : > { %v4899_v14 = vpop.permute.xlu0 %3043 }
 0x2e5   : > { %v1696_v58 = vpop.permute.xlu1 %1695 }
 0x2e6   : > { %2756 = vrot.lane.b32.xlu0 %v2731_v5, %s3634_s20  ;;  %v1716_v23 = vsel %vm1713_vm5, %v1696_v58, %v1698_v11  ;;  %v2725_v5 = vmul.f32 %v2720_v63, %v3897_v27  ;;  %v2641_v58 = vsel %vm787_vm12, %v4823_v13, %v4820_v4  ;;  %vm2335_vm12 = vcmask 375808  }
 0x2e7   : > { %2758 = vrot.lane.b32.xlu1 %v2732_v56, %s3634_s20  ;;  %2049 = vmatpush2.msra.mxu0 %v1716_v23 }
 0x2e8   : > { %v1692_v26 = vpop.permute.xlu0 %1691 }
 0x2e9   : > { %v4909_v37 = vpop.permute.xlu1 %3045 }
 0x2ea   : > { %2752 = vrot.lane.b32.xlu0 %v2729_v41, %s3634_s20  ;;  %v2647_v41 = vmul.f32 0.0, %v4820_v4  ;;  %v4942_v4 = vsel %vm1231_vm6, %v4836_v57, %v4847_v15  ;;  %vm840_vm6 = vcmask 973824  }
 0x2eb   : > { %2754 = vrot.lane.b32.xlu1 %v2730_v1, %s3634_s20  ;;  %v1145_v1 = vld [vmem:[%s5441_s3 + $0x8] sm:$0xff] }
 0x2ec   : > { %v1690_v42 = vpop.permute.xlu0 %1689  ;;  %2149 = vmatprep.mubr.f32.mxu1 %v1145_v1 }
 0x2ed   : > { %v1694_v45 = vpop.permute.xlu1 %1693  ;;  %v1714_v54 = vsel %vm1713_vm5, %v1690_v42, %v1692_v26 }
 0x2ee   : > { %2748 = vrot.lane.b32.xlu0 %v2727_v40, %s3634_s20  ;;  %v1715_v0 = vsel %vm1713_vm5, %v1692_v26, %v1694_v45  ;;  %v2653_v26 = vmul.f32 %v2641_v58, %v3943_v49  ;;  %v2651_v40 = vmul.f32 %v2641_v58, %v3931_v44 }
 0x2ef   : > { %2750 = vrot.lane.b32.xlu1 %v2728_v62, %s3634_s20  ;;  %2050 = vmatprep.subr.mxu0 %v1715_v0  ;;  %v2652_v62 = vmul.f32 %v4823_v13, %v3946_v50 }
 0x2f0   : > { %2051 = vmatpush2.msra.mxu0 %v1714_v54  ;;  %v1655_v11 = vpop.permute.xlu0 %1654 }
 0x2f1   : > { %v1653_v60 = vpop.permute.xlu1 %1652 }
 0x2f2   : > { %2742 = vrot.lane.b32.xlu0 %v2724_v12, %s3634_s20  ;;  %v1664_v56 = vsel %vm1656_vm13, %v1653_v60, %v1655_v11  ;;  %v3138_v12 = vmul.f32 %v4942_v4, %v3943_v49 }
 0x2f3   : > { %2744 = vrot.lane.b32.xlu1 %v2725_v5, %s3634_s20  ;;  %2052 = vmatprep.subr.mxu0 %v1664_v56 }
 0x2f4   : > { %v1647_v23 = vpop.permute.xlu0 %1646 }
 0x2f5   : > { %v1651_v18 = vpop.permute.xlu1 %1650 }
 0x2f6   : > { %2679 = vrot.lane.b32.xlu0 %v2653_v26, %s3633_s17  ;;  %v1663_v63 = vsel %vm1656_vm13, %v1651_v18, %v1653_v60  ;;  %v3132_v60 = vmul.f32 0.0, %v4847_v15 }
 0x2f7   : > { %2667 = vrot.lane.b32.xlu1 %v2647_v41, %s3633_s17  ;;  %2053 = vmatpush2.msra.mxu0 %v1663_v63  ;;  %v2650_v41 = vmul.f32 %v4823_v13, %v3920_v39  ;;  %v3136_v63 = vmul.f32 %v4942_v4, %v3931_v44 }
 0x2f8   : > { %v1645_v42 = vpop.permute.xlu0 %1644 }
 0x2f9   : > { %v1649_v45 = vpop.permute.xlu1 %1648  ;;  %v1661_v54 = vsel %vm1656_vm13, %v1645_v42, %v1647_v23  ;;  %v2649_v42 = vmul.f32 %v2641_v58, %v3909_v33 }
 0x2fa   : > { %2675 = vrot.lane.b32.xlu0 %v2651_v40, %s3633_s17  ;;  %v1662_v0 = vsel %vm1656_vm13, %v1647_v23, %v1649_v45  ;;  %v3137_v23 = vmul.f32 %v4836_v57, %v3946_v50 }
 0x2fb   : > { %2677 = vrot.lane.b32.xlu1 %v2652_v62, %s3633_s17  ;;  %2054 = vmatprep.subr.mxu0 %v1662_v0  ;;  %v3135_v62 = vmul.f32 %v4836_v57, %v3920_v39  ;;  %v2648_v0 = vmul.f32 %v4823_v13, %v3912_v34 }
 0x2fc   : > { %2055 = vmatpush2.msra.mxu0 %v1661_v54  ;;  %v4950_v11 = vpop.permute.xlu0 %2481 }
 0x2fd   : > { %v4955_v5 = vpop.permute.xlu1 %2479 }
 0x2fe   : > { %3164 = vrot.lane.b32.xlu0 %v3138_v12, %s3640_s12 }
 0x2ff   : > { %3152 = vrot.lane.b32.xlu1 %v3132_v60, %s3640_s12  ;;  %v3134_v60 = vmul.f32 %v4942_v4, %v3909_v33 }
 0x300   : > { %v1643_v56 = vpop.permute.xlu0 %1642 }
 0x301   : > { %v1641_v26 = vpop.permute.xlu1 %1640 }
 0x302   : > { %3162 = vrot.lane.b32.xlu0 %v3137_v23, %s3640_s12  ;;  %v1660_v18 = vsel %vm1656_vm13, %v1641_v26, %v1643_v56  ;;  %v2646_v23 = vmul.f32 %v2641_v58, %v3897_v27  ;;  %v2645_v58 = vmul.f32 %v4823_v13, %v3885_v22 }
 0x303   : > { %2673 = vrot.lane.b32.xlu1 %v2650_v41, %s3633_s17  ;;  %2056 = vmatprep.subr.mxu0 %v1660_v18  ;;  %v1924_v18 = vld [vmem:[%s5441_s3 + $0x10] sm:$0xff] }
 0x304   : > { %v4966_v15 = vpop.permute.xlu0 %2964 }
 0x305   : > { %v1639_v1 = vpop.permute.xlu1 %1638 }
 0x306   : > { %3160 = vrot.lane.b32.xlu0 %v3136_v63, %s3640_s12  ;;  %v1659_v40 = vsel %vm1656_vm13, %v1639_v1, %v1641_v26  ;;  %v3133_v1 = vmul.f32 %v4836_v57, %v3912_v34 }
 0x307   : > { %2671 = vrot.lane.b32.xlu1 %v2649_v42, %s3633_s17  ;;  %2057 = vmatpush2.msra.mxu0 %v1659_v40  ;;  %v4999_v40 = vsel %vm694_vm11, %v4885_v30, %v4881_v16  ;;  %vm1119_vm11 = vcmask 908288  }
 0x308   : > { %v1635_v45 = vpop.permute.xlu0 %1634 }
 0x309   : > { %v4976_v54 = vpop.permute.xlu1 %2966 }
 0x30a   : > { %3158 = vrot.lane.b32.xlu0 %v3135_v62, %s3640_s12 }
 0x30b   : > { %2669 = vrot.lane.b32.xlu1 %v2648_v0, %s3633_s17  ;;  %v2574_v0 = vmul.f32 %v4999_v40, %v3943_v49 }
 0x30c   : > { %v1633_v12 = vpop.permute.xlu0 %1632 }
 0x30d   : > { %v1637_v56 = vpop.permute.xlu1 %1636  ;;  %v1657_v26 = vsel %vm1656_vm13, %v1633_v12, %v1635_v45  ;;  %v2568_v12 = vmul.f32 0.0, %v4881_v16 }
 0x30e   : > { %3156 = vrot.lane.b32.xlu0 %v3134_v60, %s3640_s12  ;;  %v1658_v41 = vsel %vm1656_vm13, %v1635_v45, %v1637_v56 }
 0x30f   : > { %2665 = vrot.lane.b32.xlu1 %v2646_v23, %s3633_s17  ;;  %2058 = vmatprep.subr.mxu0 %v1658_v41 }
 0x310   : > { %2059 = vmatpush2.msra.mxu0 %v1657_v26  ;;  %v2443_v63 = vpop.permute.xlu0 %2442  ;;  %v2573_v26 = vmul.f32 %v4885_v30, %v3946_v50 }
 0x311   : > { %v2431_v42 = vpop.permute.xlu1 %2430  ;;  %2061 = vmatmul.mubr.f32.vlgmr.msra.gmra.mxu0 %v1924_v18  ;;  %v3131_v18 = vmul.f32 %v4942_v4, %v3897_v27 }
 0x312   : > { %3154 = vrot.lane.b32.xlu0 %v3133_v1, %s3640_s12  ;;  %v2451_v45 = vsel %vm561_vm4, %v2443_v63, %v2431_v42 }
 0x313   : > { %2663 = vrot.lane.b32.xlu1 %v2645_v58, %s3633_s17  ;;  %2856 = vmatprep.subr.mxu0 %v2451_v45  ;;  %v2572_v58 = vmul.f32 %v4999_v40, %v3931_v44  ;;  %v5024_v45 = vsel %vm1066_vm15, %v4899_v14, %v4909_v37  ;;  %vm1026_vm15 = vcmask 916480  }
 0x314   : > { %v2439_v62 = vpop.permute.xlu0 %2438 }
 0x315   : > { %v2441_v13 = vpop.permute.xlu1 %2440  ;;  %v2449_v60 = vsel %vm561_vm4, %v2439_v62, %v2431_v42 }
 0x316   : > { %v2450_v56 = vsel %vm561_vm4, %v2441_v13, %v2443_v63  ;;  %2600 = vrot.lane.b32.xlu0 %v2574_v0, %s3632_s16  ;;  %v3130_v0 = vmul.f32 %v4836_v57, %v3885_v22 }
 0x317   : > { %2588 = vrot.lane.b32.xlu1 %v2568_v12, %s3632_s16  ;;  %2857 = vmatpush1.msra.mxu0 %v2450_v56  ;;  %v3537_v12 = vld [vmem:[%s5443_s5 + $0x22] ss:$8 sm:$0x3]  ;;  %v3059_v56 = vmul.f32 %v5024_v45, %v3943_v49 }
 0x318   : > { %2858 = vmatprep.subr.mxu0 %v2449_v60  ;;  %v2435_v23 = vpop.permute.xlu0 %2434  ;;  %v2370_v57 = vrot.slane %v3537_v12, %v3709_v8 }
 0x319   : > { %v2437_v41 = vpop.permute.xlu1 %2436  ;;  %v2447_v16 = vsel %vm561_vm4, %v2435_v23, %v2431_v42 }
 0x31a   : > { %v2448_v1 = vsel %vm561_vm4, %v2437_v41, %v2439_v62  ;;  %2598 = vrot.lane.b32.xlu0 %v2573_v26, %s3632_s16  ;;  %v2366_v41 = vrot.slane %v3537_v12, %v3711_v9  ;;  %v2378_v8 = vmul.f32 %v2370_v57, %v3931_v44 }
 0x31b   : > { %3150 = vrot.lane.b32.xlu1 %v3131_v18, %s3640_s12  ;;  %2859 = vmatpush1.msra.mxu0 %v2448_v1 }
 0x31c   : > { %2860 = vmatprep.subr.mxu0 %v2447_v16  ;;  %v2429_v63 = vpop.permute.xlu0 %2428  ;;  %v2379_v16 = vmul.f32 %v2366_v41, %v3946_v50 }
 0x31d   : > { %v2433_v4 = vpop.permute.xlu1 %2432  ;;  %v2445_v62 = vsel %vm561_vm4, %v2429_v63, %v2431_v42  ;;  %v3053_v42 = vmul.f32 0.0, %v4909_v37  ;;  %v3058_v37 = vmul.f32 %v4899_v14, %v3946_v50 }
 0x31e   : > { %v2446_v13 = vsel %vm561_vm4, %v2433_v4, %v2435_v23  ;;  %2596 = vrot.lane.b32.xlu0 %v2572_v58, %s3632_s16  ;;  %v2380_v23 = vmul.f32 %v2370_v57, %v3943_v49  ;;  %v2377_v4 = vmul.f32 %v2366_v41, %v3920_v39 }
 0x31f   : > { %3148 = vrot.lane.b32.xlu1 %v3130_v0, %s3640_s12  ;;  %2861 = vmatpush1.msra.mxu0 %v2446_v13  ;;  %v1125_v13 = vsel %vm1119_vm11, %v4528_v25, %v4541_v2  ;;  %v1123_v2 = vsel %vm1119_vm11, %v4520_v53, %v4518_v32  ;;  %v1120_v32 = vsel %vm1119_vm11, %v4502_v24, %v4500_v46  ;;  %s5413_s12 = scalar_lea.vmem %s5444_s6, %s3808_s19  ;;  %s3555_s19 = sshll.u32 %s5519_s25, 5 }
 0x320   : > { %2862 = vmatprep.subr.mxu0 %v2445_v62  ;;  %v1116_v60 = vpop.permute.xlu0 %1115  ;;  %v2376_v62 = vmul.f32 %v2370_v57, %v3909_v33  ;;  %s311_s10 = scalar_lea.vmem %s5445_s7, %s3555_s19 }
 0x321   : > { %v2427_v26 = vpop.permute.xlu1 %2426  ;;  %v1126_v0 = vsel %vm1119_vm11, %v4539_v35, %v1116_v60  ;;  %v2374_v35 = vmul.f32 %v2370_v57, %v3897_v27 }
 0x322   : > { %v2444_v18 = vsel %vm561_vm4, %v2427_v26, %v2429_v63  ;;  %3085 = vrot.lane.b32.xlu0 %v3059_v56, %s3636_s30  ;;  %v2571_v63 = vmul.f32 %v4885_v30, %v3920_v39  ;;  %v2375_v56 = vmul.f32 %v2366_v41, %v3912_v34  ;;  %v1124_v26 = vsel %vm1119_vm11, %v4530_v6, %v4528_v25 }
 0x323   : > { %3073 = vrot.lane.b32.xlu1 %v3053_v42, %s3636_s30  ;;  %2863 = vmatpush1.msra.mxu0 %v2444_v18  ;;  %v3057_v18 = vmul.f32 %v5024_v45, %v3931_v44  ;;  %v1122_v6 = vsel %vm1119_vm11, %v4509_v47, %v4520_v53  ;;  %v3056_v47 = vmul.f32 %v4899_v14, %v3920_v39  ;;  %vm933_vm4 = vcmask 965632  }
 0x324   : > { %2864 = vmatprep.subr.mxu0 %v2380_v23  ;;  %v2332_v1 = vpop.permute.xlu0 %2331  ;;  %v2373_v23 = vmul.f32 %v2366_v41, %v3885_v22  ;;  %v2569_v41 = vmul.f32 %v4885_v30, %v3912_v34 }
 0x325   : > { %2865 = vmatpush1.msra.mxu0 %v2379_v16  ;;  %v1118_v9 = vpop.permute.xlu1 %1117  ;;  %v1121_v16 = vsel %vm1119_vm11, %v4500_v46, %v4511_v38  ;;  %v1034_v46 = vsel %vm1026_vm15, %v4498_v52, %v4496_v3  ;;  %v1033_v38 = vsel %vm1026_vm15, %v4484_v20, %v4498_v52  ;;  %v1031_v3 = vsel %vm1026_vm15, %v4474_v29, %v4472_v7 }
 0x326   : > { %2866 = vmatprep.subr.mxu0 %v2378_v8  ;;  %3083 = vrot.lane.b32.xlu0 %v3058_v37, %s3636_s30  ;;  %v1127_v58 = vsel %vm1119_vm11, %v1116_v60, %v1118_v9  ;;  %v2570_v60 = vmul.f32 %v4999_v40, %v3909_v33  ;;  %v1032_v9 = vsel %vm1026_vm15, %v4472_v7, %v4486_v61 }
 0x327   : > { %2594 = vrot.lane.b32.xlu1 %v2571_v63, %s3632_s16  ;;  %2117 = vmatprep.subr.mxu1 %v1127_v58  ;;  %v2567_v58 = vmul.f32 %v4999_v40, %v3897_v27  ;;  %v1030_v20 = vsel %vm1026_vm15, %v4462_v59, %v4460_v31  ;;  %v1029_v52 = vsel %vm1026_vm15, %v4450_v19, %v4462_v59 }
 0x328   : > { %2867 = vmatpush1.msra.mxu0 %v2377_v4  ;;  %2118 = vmatpush2.msra.mxu1 %v1126_v0  ;;  %v2330_v12 = vpop.permute.xlu0 %2329  ;;  %v3055_v4 = vmul.f32 %v5024_v45, %v3909_v33  ;;  %v1028_v29 = vsel %vm1026_vm15, %v4441_v51, %v4452_v43  ;;  %v2566_v40 = vmul.f32 %v4885_v30, %v3885_v22 }
 0x329   : > { %2868 = vmatprep.subr.mxu0 %v2376_v62  ;;  %2119 = vmatprep.subr.mxu1 %v1125_v13  ;;  %v2334_v42 = vpop.permute.xlu1 %2333  ;;  %v2342_v37 = vsel %vm2335_vm12, %v2330_v12, %v2332_v1  ;;  %v1027_v62 = vsel %vm1026_vm15, %v4443_v55, %v4441_v51  ;;  %v3054_v19 = vmul.f32 %v4899_v14, %v3912_v34  ;;  %v2489_v12 = vmul.f32 0.0, %v4950_v11 }
 0x32a   : > { %2869 = vmatpush1.msra.mxu0 %v2375_v56  ;;  %2120 = vmatpush2.msra.mxu1 %v1124_v26  ;;  %v2343_v25 = vsel %vm2335_vm12, %v2332_v1, %v2334_v42  ;;  %v941_v43 = vsel %vm933_vm4, %v4434_v21, %v4432_v10  ;;  %v5137_v30 = vsel %vm601_vm10, %v4955_v5, %v4950_v11 }
 0x32b   : > { %2870 = vmatprep.subr.mxu0 %v2374_v35  ;;  %2592 = vrot.lane.b32.xlu1 %v2570_v60, %s3632_s16  ;;  %v940_v51 = vsel %vm933_vm4, %v4428_v28, %v4434_v21  ;;  %v939_v10 = vsel %vm933_vm4, %v4416_v48, %v4430_v17  ;;  %v938_v56 = vsel %vm933_vm4, %v4418_v36, %v4416_v48  ;;  %v5500_v28 = vld [vmem:[#allocation29_spill] sm:$0xff]  ;;  %v5501_v21 = vld [vmem:[#allocation30_spill] sm:$0xff]  ;;  %v5502_v17 = vld [vmem:[#allocation27_spill] sm:$0xff] }
 0x32c   : > { %3081 = vrot.lane.b32.xlu0 %v3057_v18, %s3636_s30  ;;  %2121 = vmatprep.subr.mxu1 %v1123_v2  ;;  %v2328_v57 = vpop.permute.xlu0 %2327  ;;  %v2495_v42 = vmul.f32 %v5137_v30, %v3943_v49  ;;  %v937_v11 = vsel %vm933_vm4, %v5501_v21, %v5500_v28  ;;  %v936_v35 = vsel %vm933_vm4, %v5502_v17, %v5501_v21  ;;  %v5503_v36 = vld [vmem:[#allocation28_spill] sm:$0xff]  ;;  %v5504_v60 = vld [vmem:[#allocation25_spill] sm:$0xff]  ;;  %v1146_v21 = vld [vmem:[%s5441_s3 + $0x38] sm:$0xff] }
 0x32d   : > { %2871 = vmatpush1.msra.mxu0 %v2373_v23  ;;  %2122 = vmatpush2.msra.mxu1 %v1122_v6  ;;  %v2326_v8 = vpop.permute.xlu1 %2325  ;;  %v935_v18 = vsel %vm933_vm4, %v5504_v60, %v5503_v36  ;;  %v3052_v23 = vmul.f32 %v5024_v45, %v3897_v27  ;;  %v5508_v45 = vld [vmem:[#allocation21_spill] sm:$0xff]  ;;  %v2492_v28 = vmul.f32 %v4955_v5, %v3920_v39  ;;  %v1149_v17 = vld [vmem:[%s5441_s3 + $0x78] sm:$0xff] }
 0x32e   : > { %2872 = vmatprep.subr.mxu0 %v2343_v25  ;;  %2123 = vmatprep.subr.mxu1 %v1121_v16  ;;  %v2341_v53 = vsel %vm2335_vm12, %v2326_v8, %v2328_v57  ;;  %v5505_v25 = vld [vmem:[#allocation26_spill] sm:$0xff]  ;;  %v2494_v57 = vmul.f32 %v4955_v5, %v3946_v50  ;;  %v5506_v16 = vld [vmem:[#allocation23_spill] sm:$0xff] }
 0x32f   : > { %2873 = vmatpush1.msra.mxu0 %v2342_v37  ;;  %2124 = vmatpush2.msra.mxu1 %v1120_v32  ;;  %v934_v6 = vsel %vm933_vm4, %v5505_v25, %v5504_v60  ;;  %v1931_v25 = vld [vmem:[%s5441_s3 + $0xc0] sm:$0xff] }
 0x330   : > { %2590 = vrot.lane.b32.xlu1 %v2569_v41, %s3632_s16  ;;  %3079 = vrot.lane.b32.xlu0 %v3056_v47, %s3636_s30  ;;  %v2320_v24 = vpop.permute.xlu0 %2319 }
 0x331   : > { %2125 = vmatprep.subr.mxu1 %v1034_v46  ;;  %2874 = vmatprep.subr.mxu0 %v2341_v53  ;;  %v2324_v1 = vpop.permute.xlu1 %2323  ;;  %v5509_v53 = vld [vmem:[#allocation22_spill] sm:$0xff]  ;;  %v5510_v46 = vld [vmem:[#allocation19_spill] sm:$0xff] }
 0x332   : > { %2126 = vmatpush2.msra.mxu1 %v1033_v38  ;;  %v2340_v63 = vsel %vm2335_vm12, %v2324_v1, %v2326_v8  ;;  %v5507_v8 = vld [vmem:[#allocation24_spill] sm:$0xff]  ;;  %v3051_v38 = vmul.f32 %v4899_v14, %v3885_v22  ;;  %v5512_v14 = vld [vmem:[#allocation17_spill] sm:$0xff] }
 0x333   : > { %2127 = vmatprep.subr.mxu1 %v1032_v9  ;;  %2875 = vmatpush1.msra.mxu0 %v2340_v63  ;;  %v848_v32 = vsel %vm840_vm6, %v5507_v8, %v5506_v16  ;;  %v847_v37 = vsel %vm840_vm6, %v5508_v45, %v5507_v8  ;;  %v5511_v63 = vld [vmem:[#allocation20_spill] sm:$0xff]  ;;  %v2490_v16 = vmul.f32 %v4955_v5, %v3912_v34 }
 0x334   : > { %2128 = vmatpush2.msra.mxu1 %v1031_v3  ;;  %2586 = vrot.lane.b32.xlu1 %v2567_v58, %s3632_s16  ;;  %v2318_v61 = vpop.permute.xlu0 %2317  ;;  %v845_v58 = vsel %vm840_vm6, %v5511_v63, %v5510_v46  ;;  %v2493_v3 = vmul.f32 %v5137_v30, %v3931_v44  ;;  %v1150_v45 = vld [vmem:[%s5441_s3 + $0xa8] sm:$0xff] }
 0x335   : > { %3077 = vrot.lane.b32.xlu0 %v3055_v4, %s3636_s30  ;;  %2129 = vmatprep.subr.mxu1 %v1030_v20  ;;  %v2322_v7 = vpop.permute.xlu1 %2321  ;;  %v2338_v31 = vsel %vm2335_vm12, %v2318_v61, %v2320_v24  ;;  %v5195_v4 = vsel %vm973_vm14, %v4966_v15, %v4976_v54  ;;  %v5513_v20 = vld [vmem:[#allocation18_spill] sm:$0xff]  ;;  %vm3218_vm14 = vcmask 785408  }
 0x336   : > { %2130 = vmatpush2.msra.mxu1 %v1029_v52  ;;  %v2339_v0 = vsel %vm2335_vm12, %v2320_v24, %v2322_v7  ;;  %v846_v24 = vsel %vm840_vm6, %v5510_v46, %v5509_v53  ;;  %v844_v61 = vsel %vm840_vm6, %v5513_v20, %v5512_v14  ;;  %v5514_v7 = vld [vmem:[#allocation15_spill] sm:$0xff] }
 0x337   : > { %2131 = vmatprep.subr.mxu1 %v1028_v29  ;;  %2876 = vmatprep.subr.mxu0 %v2339_v0  ;;  %v843_v29 = vsel %vm840_vm6, %v5514_v7, %v5513_v20  ;;  %v2974_v0 = vmul.f32 0.0, %v4976_v54  ;;  %v2980_v54 = vmul.f32 %v5195_v4, %v3943_v49  ;;  %v1926_v49 = vld [vmem:[%s5441_s3 + $0x48] sm:$0xff] }
 0x338   : > { %2132 = vmatpush2.msra.mxu1 %v1027_v62  ;;  %2584 = vrot.lane.b32.xlu1 %v2566_v40, %s3632_s16  ;;  %v2316_v59 = vpop.permute.xlu0 %2315  ;;  %v5516_v62 = vld [vmem:[#allocation13_spill] sm:$0xff] }
 0x339   : > { %3075 = vrot.lane.b32.xlu0 %v3054_v19, %s3636_s30  ;;  %2133 = vmatprep.subr.mxu1 %v941_v43  ;;  %v2314_v55 = vpop.permute.xlu1 %2313 }
 0x33a   : > { %2134 = vmatpush2.msra.mxu1 %v940_v51  ;;  %2877 = vmatpush1.msra.mxu0 %v2338_v31  ;;  %v2337_v13 = vsel %vm2335_vm12, %v2314_v55, %v2316_v59  ;;  %v5515_v31 = vld [vmem:[#allocation16_spill] sm:$0xff]  ;;  %v1144_v59 = vld [vmem:[%s5441_s3] sm:$0xff]  ;;  %v5517_v51 = vld [vmem:[#allocation14_spill] sm:$0xff] }
 0x33b   : > { %2135 = vmatprep.subr.mxu1 %v939_v10  ;;  %2878 = vmatprep.subr.mxu0 %v2337_v13  ;;  %v842_v19 = vsel %vm840_vm6, %v5516_v62, %v5515_v31  ;;  %v1147_v10 = vld [vmem:[%s5441_s3 + $0x40] sm:$0xff] }
 0x33c   : > { %2136 = vmatpush2.msra.mxu1 %v938_v56  ;;  %2509 = vrot.lane.b32.xlu1 %v2489_v12, %s3631_s14  ;;  %v2239_v26 = vpop.permute.xlu0 %2238  ;;  %v1927_v12 = vld [vmem:[%s5441_s3 + $0x50] sm:$0xff] }
 0x33d   : > { %2521 = vrot.lane.b32.xlu0 %v2495_v42, %s3631_s14  ;;  %2137 = vmatprep.subr.mxu1 %v937_v11  ;;  %v2312_v48 = vpop.permute.xlu1 %2311  ;;  %v2979_v11 = vmul.f32 %v4966_v15, %v3946_v50  ;;  %v2491_v50 = vmul.f32 %v5137_v30, %v3909_v33 }
 0x33e   : > { %2138 = vmatpush2.msra.mxu1 %v936_v35  ;;  %v2336_v2 = vsel %vm2335_vm12, %v2312_v48, %v2314_v55  ;;  %v841_v55 = vsel %vm840_vm6, %v5517_v51, %v5516_v62  ;;  %2066 = vmatprep.mubr.f32.mxu0 %v1927_v12 }
 0x33f   : > { %2139 = vmatprep.subr.mxu1 %v935_v18  ;;  %2879 = vmatpush1.msra.mxu0 %v2336_v2  ;;  %v1928_v18 = vld [vmem:[%s5441_s3 + $0x80] sm:$0xff]  ;;  %v2978_v2 = vmul.f32 %v5195_v4, %v3931_v44 }
 0x340   : > { %2140 = vmatpush2.msra.mxu1 %v934_v6  ;;  %3071 = vrot.lane.b32.xlu1 %v3052_v23, %s3636_s30  ;;  %v2237_v41 = vpop.permute.xlu0 %2236  ;;  %v1148_v23 = vld [vmem:[%s5441_s3 + $0x70] sm:$0xff] }
 0x341   : > { %2519 = vrot.lane.b32.xlu0 %v2494_v57, %s3631_s14  ;;  %2141 = vmatprep.subr.mxu1 %v848_v32  ;;  %v2241_v47 = vpop.permute.xlu1 %2240  ;;  %v2249_v9 = vsel %vm2242_vm0, %v2237_v41, %v2239_v26  ;;  %v1151_v57 = vld [vmem:[%s5441_s3 + $0xb0] sm:$0xff]  ;;  %v1930_v32 = vld [vmem:[%s5441_s3 + $0xb8] sm:$0xff]  ;;  %v2977_v41 = vmul.f32 %v4966_v15, %v3920_v39  ;;  %v2488_v39 = vmul.f32 %v5137_v30, %v3897_v27 }
 0x342   : > { %2142 = vmatpush2.msra.mxu1 %v847_v37  ;;  %v2250_v1 = vsel %vm2242_vm0, %v2239_v26, %v2241_v47  ;;  %v1929_v26 = vld [vmem:[%s5441_s3 + $0x88] sm:$0xff]  ;;  %2067 = vmatmul.mubr.f32.gmra.mxu0 %v1926_v49  ;;  %v2487_v30 = vmul.f32 %v4955_v5, %v3885_v22 }
 0x343   : > { %2143 = vmatprep.subr.mxu1 %v846_v24  ;;  %2880 = vmatprep.subr.mxu0 %v2250_v1  ;;  %v2785_v37 = vld [vmem:[%s5441_s3 + $0x28] sm:$0xff]  ;;  %v2976_v24 = vmul.f32 %v5195_v4, %v3909_v33  ;;  %v2975_v33 = vmul.f32 %v4966_v15, %v3912_v34 }
 0x344   : > { %2144 = vmatpush2.msra.mxu1 %v845_v58  ;;  %3069 = vrot.lane.b32.xlu1 %v3051_v38, %s3636_s30  ;;  %v2235_v52 = vpop.permute.xlu0 %2234  ;;  %v3648_v38 = vmov 0.0  }
 0x345   : > { %2517 = vrot.lane.b32.xlu0 %v2493_v3, %s3631_s14  ;;  %2145 = vmatprep.subr.mxu1 %v844_v61  ;;  %v2233_v40 = vpop.permute.xlu1 %2232  ;;  %v2973_v61 = vmul.f32 %v5195_v4, %v3897_v27 }
 0x346   : > { %2146 = vmatpush2.msra.mxu1 %v843_v29  ;;  %2881 = vmatpush1.msra.mxu0 %v2249_v9  ;;  %v2248_v43 = vsel %vm2242_vm0, %v2233_v40, %v2235_v52  ;;  %v2972_v52 = vmul.f32 %v4966_v15, %v3885_v22  ;;  %v3328_v22 = vld [vmem:[%s5442_s4] sm:$0xff] }
 0x347   : > { %2147 = vmatprep.subr.mxu1 %v842_v19  ;;  %2882 = vmatprep.subr.mxu0 %v2248_v43 }
 0x348   : > { %2148 = vmatpush2.msra.mxu1 %v841_v55  ;;  %2994 = vrot.lane.b32.xlu1 %v2974_v0, %s3635_s22  ;;  %v2227_v13 = vpop.permute.xlu0 %2226  ;;  %v3330_v0 = vld [vmem:[%s5442_s4 + $0x10] sm:$0xff] }
 0x349   : > { %3006 = vrot.lane.b32.xlu0 %v2980_v54, %s3635_s22  ;;  %v2231_v56 = vpop.permute.xlu1 %2230  ;;  %2150 = vmatmul.mubr.f32.vlgmr.msra.gmra.mxu1 %v1144_v59  ;;  %v3331_v59 = vld [vmem:[%s5442_s4 + $0x18] sm:$0xff] }
 0x34a   : > { %v2247_v42 = vsel %vm2242_vm0, %v2231_v56, %v2233_v40  ;;  %2155 = vmatprep.mubr.f32.mxu1 %v1147_v10  ;;  %2072 = vmatprep.mubr.f32.mxu0 %v1929_v26  ;;  %v3329_v40 = vld [vmem:[%s5442_s4 + $0x8] sm:$0xff] }
 0x34b   : > { %2883 = vmatpush1.msra.mxu0 %v2247_v42 }
 0x34c   : > { %2515 = vrot.lane.b32.xlu1 %v2492_v28, %s3631_s14  ;;  %v2225_v35 = vpop.permute.xlu0 %2224  ;;  %2073 = vmatmul.mubr.f32.gmra.mxu0 %v1928_v18 }
 0x34d   : > { %3004 = vrot.lane.b32.xlu0 %v2979_v11, %s3635_s22  ;;  %v2245_v48 = vsel %vm2242_vm0, %v2225_v35, %v2227_v13  ;;  %v2229_v36 = vpop.permute.xlu1 %2228  ;;  %2156 = vmatmul.mubr.f32.gmra.mxu1 %v1146_v21 }
 0x34e   : > { %v2246_v60 = vsel %vm2242_vm0, %v2227_v13, %v2229_v36  ;;  %2161 = vmatprep.mubr.f32.mxu1 %v1149_v17  ;;  %2078 = vmatprep.mubr.f32.mxu0 %v1931_v25 }
 0x34f   : > { %2884 = vmatprep.subr.mxu0 %v2246_v60 }
 0x350   : > { %2513 = vrot.lane.b32.xlu1 %v2491_v50, %s3631_s14  ;;  %2885 = vmatpush1.msra.mxu0 %v2245_v48  ;;  %v2223_v6 = vpop.permute.xlu0 %2222 }
 0x351   : > { %3002 = vrot.lane.b32.xlu0 %v2978_v2, %s3635_s22  ;;  %v2221_v44 = vpop.permute.xlu1 %2220  ;;  %2162 = vmatmul.mubr.f32.gmra.mxu1 %v1148_v23 }
 0x352   : > { %v2244_v8 = vsel %vm2242_vm0, %v2221_v44, %v2223_v6  ;;  %2167 = vmatprep.mubr.f32.mxu1 %v1151_v57  ;;  %2079 = vmatmul.mubr.f32.gmra.mxu0 %v1930_v32 }
 0x353   : > { %2886 = vmatprep.subr.mxu0 %v2244_v8  ;;  %2920 = vmatprep.mubr.f32.mxu0 %v2785_v37 }
 0x354   : > { %2511 = vrot.lane.b32.xlu1 %v2490_v16, %s3631_s14  ;;  %v2747_v47 = vpop.permute.xlu0 %2746 }
 0x355   : > { %3000 = vrot.lane.b32.xlu0 %v2977_v41, %s3635_s22  ;;  %v2219_v53 = vpop.permute.xlu1 %2218  ;;  %2168 = vmatmul.mubr.f32.gmra.mxu1 %v1150_v45 }
 0x356   : > { %v2243_v46 = vsel %vm2242_vm0, %v2219_v53, %v2221_v44  ;;  %3295 = vmatprep.mubr.f32.mxu1 %v3648_v38 }
 0x357   : > { %2887 = vmatpush1.msra.mxu0 %v2243_v46 }
 0x358   : > { %2507 = vrot.lane.b32.xlu1 %v2488_v39, %s3631_s14  ;;  %v2757_v1 = vpop.permute.xlu0 %2756 }
 0x359   : > { %2998 = vrot.lane.b32.xlu0 %v2976_v24, %s3635_s22  ;;  %v2759_v9 = vpop.permute.xlu1 %2758 }
 0x35a   : > { %v2766_v63 = vsel %vm933_vm4, %v2757_v1, %v2759_v9  ;;  %v2767_v58 = vsel %vm933_vm4, %v2759_v9, %v2747_v47 }
 0x35b   : > { %2888 = vmatprep.subr.mxu0 %v2767_v58 }
 0x35c   : > { %2505 = vrot.lane.b32.xlu1 %v2487_v30, %s3631_s14  ;;  %2889 = vmatpush2.msra.mxu0 %v2766_v63  ;;  %v2753_v3 = vpop.permute.xlu0 %2752 }
 0x35d   : > { %2996 = vrot.lane.b32.xlu0 %v2975_v33, %s3635_s22  ;;  %v2755_v14 = vpop.permute.xlu1 %2754 }
 0x35e   : > { %v2764_v20 = vsel %vm933_vm4, %v2753_v3, %v2755_v14  ;;  %v2765_v5 = vsel %vm933_vm4, %v2755_v14, %v2747_v47 }
 0x35f   : > { %2890 = vmatprep.subr.mxu0 %v2765_v5 }
 0x360   : > { %2992 = vrot.lane.b32.xlu1 %v2973_v61, %s3635_s22  ;;  %2891 = vmatpush2.msra.mxu0 %v2764_v20  ;;  %v2749_v34 = vpop.permute.xlu0 %2748 }
 0x361   : > { %2990 = vrot.lane.b32.xlu0 %v2972_v52, %s3635_s22  ;;  %v2751_v7 = vpop.permute.xlu1 %2750 }
 0x362   : > { %v2762_v29 = vsel %vm933_vm4, %v2749_v34, %v2751_v7  ;;  %v2763_v27 = vsel %vm933_vm4, %v2751_v7, %v2747_v47 }
 0x363   : > { %2892 = vmatprep.subr.mxu0 %v2763_v27 }
 0x364   : > { %2893 = vmatpush2.msra.mxu0 %v2762_v29  ;;  %v2743_v15 = vpop.permute.xlu0 %2742  ;;  %3334 = vperm.xlu1 %3604, %v3328_v22  }
 0x365   : > { %3339 = vperm.xlu0 %3603, %v3329_v40   ;;  %v2745_v4 = vpop.permute.xlu1 %2744 }
 0x366   : > { %v2760_v31 = vsel %vm933_vm4, %v2743_v15, %v2745_v4  ;;  %v2761_v62 = vsel %vm933_vm4, %v2745_v4, %v2747_v47 }
 0x367   : > { %2894 = vmatprep.subr.mxu0 %v2761_v62 }
 0x368   : > { %2895 = vmatpush2.msra.mxu0 %v2760_v31  ;;  %v2680_v19 = vpop.permute.xlu0 %2679  ;;  %3344 = vperm.xlu1 %3604, %v3330_v0  }
 0x369   : > { %v2668_v43 = vpop.permute.xlu1 %2667 }
 0x36a   : > { %v2688_v51 = vsel %vm840_vm6, %v2680_v19, %v2668_v43 }
 0x36b   : > { %2896 = vmatprep.subr.mxu0 %v2688_v51 }
 0x36c   : > { %v2676_v55 = vpop.permute.xlu0 %2675  ;;  %3349 = vperm.xlu1 %3604, %v3331_v59  }
 0x36d   : > { %v2678_v54 = vpop.permute.xlu1 %2677  ;;  %v2686_v12 = vsel %vm840_vm6, %v2676_v55, %v2668_v43 }
 0x36e   : > { %v2687_v10 = vsel %vm840_vm6, %v2678_v54, %v2680_v19 }
 0x36f   : > { %2897 = vmatpush2.msra.mxu0 %v2687_v10 }
 0x370   : > { %2898 = vmatprep.subr.mxu0 %v2686_v12  ;;  %v3165_v13 = vpop.permute.xlu0 %3164 }
 0x371   : > { %v3153_v56 = vpop.permute.xlu1 %3152 }
 0x372   : > { %v3173_v49 = vsel %vm1284_vm7, %v3165_v13, %v3153_v56 }
 0x373   : > { %3239 = vmatprep.subr.mxu1 %v3173_v49 }
 0x374   : > { %v3163_v42 = vpop.permute.xlu0 %3162 }
 0x375   : > { %v3172_v28 = vsel %vm1284_vm7, %v3163_v42, %v3165_v13  ;;  %v2674_v21 = vpop.permute.xlu1 %2673 }
 0x376   : > { %v2685_v11 = vsel %vm840_vm6, %v2674_v21, %v2676_v55  ;;  %3240 = vmatpush1.msra.mxu1 %v3172_v28 }
 0x377   : > { %2899 = vmatpush2.msra.mxu0 %v2685_v11 }
 0x378   : > { %v3161_v26 = vpop.permute.xlu0 %3160 }
 0x379   : > { %v2672_v17 = vpop.permute.xlu1 %2671  ;;  %v3171_v35 = vsel %vm1284_vm7, %v3161_v26, %v3153_v56 }
 0x37a   : > { %v2684_v48 = vsel %vm840_vm6, %v2672_v17, %v2668_v43  ;;  %3241 = vmatprep.subr.mxu1 %v3171_v35 }
 0x37b   : > { %2900 = vmatprep.subr.mxu0 %v2684_v48 }
 0x37c   : > { %v3159_v36 = vpop.permute.xlu0 %3158 }
 0x37d   : > { %v3170_v50 = vsel %vm1284_vm7, %v3159_v36, %v3161_v26  ;;  %v2670_v60 = vpop.permute.xlu1 %2669 }
 0x37e   : > { %v2683_v18 = vsel %vm840_vm6, %v2670_v60, %v2672_v17  ;;  %3242 = vmatpush1.msra.mxu1 %v3170_v50 }
 0x37f   : > { %2901 = vmatpush2.msra.mxu0 %v2683_v18 }
 0x380   : > { %v3157_v2 = vpop.permute.xlu0 %3156 }
 0x381   : > { %v2666_v23 = vpop.permute.xlu1 %2665  ;;  %v3169_v25 = vsel %vm1284_vm7, %v3157_v2, %v3153_v56 }
 0x382   : > { %v2682_v6 = vsel %vm840_vm6, %v2666_v23, %v2668_v43  ;;  %3243 = vmatprep.subr.mxu1 %v3169_v25 }
 0x383   : > { %2902 = vmatprep.subr.mxu0 %v2682_v6 }
 0x384   : > { %v3155_v57 = vpop.permute.xlu0 %3154 }
 0x385   : > { %v3168_v44 = vsel %vm1284_vm7, %v3155_v57, %v3157_v2  ;;  %v2664_v16 = vpop.permute.xlu1 %2663 }
 0x386   : > { %v2681_v8 = vsel %vm840_vm6, %v2664_v16, %v2666_v23  ;;  %3244 = vmatpush1.msra.mxu1 %v3168_v44 }
 0x387   : > { %2903 = vmatpush2.msra.mxu0 %v2681_v8 }
 0x388   : > { %v2601_v32 = vpop.permute.xlu0 %2600 }
 0x389   : > { %v2589_v41 = vpop.permute.xlu1 %2588 }
 0x38a   : > { %v2609_v45 = vsel %vm747_vm1, %v2601_v32, %v2589_v41 }
 0x38b   : > { %2904 = vmatprep.subr.mxu0 %v2609_v45  ;;  %v2784_v45 = vld [vmem:[%s5441_s3 + $0x20] sm:$0xff] }
 0x38c   : > { %v2599_v37 = vpop.permute.xlu0 %2598 }
 0x38d   : > { %v2608_v47 = vsel %vm747_vm1, %v2599_v37, %v2601_v32  ;;  %v3151_v53 = vpop.permute.xlu1 %3150 }
 0x38e   : > { %2905 = vmatpush2.msra.mxu0 %v2608_v47  ;;  %v3167_v46 = vsel %vm1284_vm7, %v3151_v53, %v3153_v56 }
 0x38f   : > { %3245 = vmatprep.subr.mxu1 %v3167_v46 }
 0x390   : > { %v2597_v39 = vpop.permute.xlu0 %2596 }
 0x391   : > { %v3149_v24 = vpop.permute.xlu1 %3148  ;;  %v2607_v1 = vsel %vm747_vm1, %v2597_v39, %v2589_v41 }
 0x392   : > { %v3166_v9 = vsel %vm1284_vm7, %v3149_v24, %v3151_v53  ;;  %2906 = vmatprep.subr.mxu0 %v2607_v1  ;;  %v2787_v53 = vld [vmem:[%s5441_s3 + $0x60] sm:$0xff]  ;;  %v2786_v24 = vld [vmem:[%s5441_s3 + $0x58] sm:$0xff] }
 0x393   : > { %3246 = vmatpush1.msra.mxu1 %v3166_v9 }
 0x394   : > { %v3086_v63 = vpop.permute.xlu0 %3085 }
 0x395   : > { %v3074_v30 = vpop.permute.xlu1 %3073 }
 0x396   : > { %v3094_v58 = vsel %vm1119_vm11, %v3086_v63, %v3074_v30 }
 0x397   : > { %3247 = vmatprep.subr.mxu1 %v3094_v58 }
 0x398   : > { %v3084_v33 = vpop.permute.xlu0 %3083 }
 0x399   : > { %v3093_v3 = vsel %vm1119_vm11, %v3084_v33, %v3086_v63  ;;  %v2595_v14 = vpop.permute.xlu1 %2594  ;;  %v3190_v63 = vld [vmem:[%s5441_s3 + $0x30] sm:$0xff] }
 0x39a   : > { %v2606_v20 = vsel %vm747_vm1, %v2595_v14, %v2597_v39  ;;  %3248 = vmatpush1.msra.mxu1 %v3093_v3  ;;  %v2788_v33 = vld [vmem:[%s5441_s3 + $0x90] sm:$0xff]  ;;  %v3191_v3 = vld [vmem:[%s5441_s3 + $0x68] sm:$0xff] }
 0x39b   : > { %2907 = vmatpush2.msra.mxu0 %v2606_v20  ;;  %v2791_v14 = vld [vmem:[%s5441_s3 + $0xd0] sm:$0xff]  ;;  %v2790_v20 = vld [vmem:[%s5441_s3 + $0xc8] sm:$0xff] }
 0x39d   : > { %v2593_v61 = vpop.permute.xlu1 %2592 }
 0x39e   : > { %v3082_v5 = vpop.permute.xlu0 %3081  ;;  %v2605_v52 = vsel %vm747_vm1, %v2593_v61, %v2589_v41 }
 0x39f   : > { %2908 = vmatprep.subr.mxu0 %v2605_v52  ;;  %v3092_v34 = vsel %vm1119_vm11, %v3082_v5, %v3074_v30 }
 0x3a0   : > { %3249 = vmatprep.subr.mxu1 %v3092_v34 }
 0x3a2   : > { %v3080_v7 = vpop.permute.xlu0 %3079  ;;  %v2591_v29 = vpop.permute.xlu1 %2590 }
 0x3a3   : > { %v3091_v40 = vsel %vm1119_vm11, %v3080_v7, %v3082_v5  ;;  %v2604_v27 = vsel %vm747_vm1, %v2591_v29, %v2593_v61  ;;  %v3192_v61 = vld [vmem:[%s5441_s3 + $0xa0] sm:$0xff]  ;;  %v3193_v5 = vld [vmem:[%s5441_s3 + $0xd8] sm:$0xff] }
 0x3a4   : > { %2909 = vmatpush2.msra.mxu0 %v2604_v27  ;;  %3250 = vmatpush1.msra.mxu1 %v3091_v40 }
 0x3a6   : > { %v2587_v22 = vpop.permute.xlu1 %2586 }
 0x3a7   : > { %v3078_v15 = vpop.permute.xlu0 %3077  ;;  %v2603_v4 = vsel %vm747_vm1, %v2587_v22, %v2589_v41 }
 0x3a8   : > { %2910 = vmatprep.subr.mxu0 %v2603_v4  ;;  %v3090_v0 = vsel %vm1119_vm11, %v3078_v15, %v3074_v30 }
 0x3a9   : > { %3251 = vmatprep.subr.mxu1 %v3090_v0 }
 0x3aa   : > { %v2585_v31 = vpop.permute.xlu1 %2584 }
 0x3ab   : > { %v3076_v62 = vpop.permute.xlu0 %3075  ;;  %v2602_v19 = vsel %vm747_vm1, %v2585_v31, %v2587_v22 }
 0x3ac   : > { %v3089_v43 = vsel %vm1119_vm11, %v3076_v62, %v3078_v15  ;;  %2911 = vmatpush2.msra.mxu0 %v2602_v19 }
 0x3ad   : > { %3252 = vmatpush1.msra.mxu1 %v3089_v43 }
 0x3ae   : > { %v2510_v59 = vpop.permute.xlu1 %2509 }
 0x3af   : > { %v2522_v51 = vpop.permute.xlu0 %2521 }
 0x3b0   : > { %v2530_v55 = vsel %vm654_vm3, %v2522_v51, %v2510_v59 }
 0x3b1   : > { %2912 = vmatprep.subr.mxu0 %v2530_v55 }
 0x3b2   : > { %v3072_v54 = vpop.permute.xlu1 %3071 }
 0x3b3   : > { %v2520_v12 = vpop.permute.xlu0 %2519  ;;  %v3088_v10 = vsel %vm1119_vm11, %v3072_v54, %v3074_v30  ;;  %v2789_v30 = vld [vmem:[%s5441_s3 + $0x98] sm:$0xff] }
 0x3b4   : > { %v2529_v13 = vsel %vm654_vm3, %v2520_v12, %v2522_v51  ;;  %3253 = vmatprep.subr.mxu1 %v3088_v10 }
 0x3b5   : > { %2913 = vmatpush2.msra.mxu0 %v2529_v13 }
 0x3b6   : > { %v3070_v56 = vpop.permute.xlu1 %3069 }
 0x3b7   : > { %v2518_v49 = vpop.permute.xlu0 %2517  ;;  %v3087_v42 = vsel %vm1119_vm11, %v3070_v56, %v3072_v54 }
 0x3b8   : > { %v2528_v28 = vsel %vm654_vm3, %v2518_v49, %v2510_v59  ;;  %3254 = vmatpush1.msra.mxu1 %v3087_v42 }
 0x3b9   : > { %2914 = vmatprep.subr.mxu0 %v2528_v28 }
 0x3ba   : > { %v2995_v21 = vpop.permute.xlu1 %2994 }
 0x3bb   : > { %v3007_v11 = vpop.permute.xlu0 %3006 }
 0x3bc   : > { %v3015_v26 = vsel %vm1026_vm15, %v3007_v11, %v2995_v21 }
 0x3bd   : > { %3255 = vmatprep.subr.mxu1 %v3015_v26 }
 0x3be   : > { %v2516_v17 = vpop.permute.xlu1 %2515 }
 0x3bf   : > { %v3005_v35 = vpop.permute.xlu0 %3004  ;;  %v2527_v48 = vsel %vm654_vm3, %v2516_v17, %v2518_v49 }
 0x3c0   : > { %v3014_v36 = vsel %vm1026_vm15, %v3005_v35, %v3007_v11  ;;  %2915 = vmatpush2.msra.mxu0 %v2527_v48 }
 0x3c1   : > { %3256 = vmatpush1.msra.mxu1 %v3014_v36 }
 0x3c2   : > { %v2514_v50 = vpop.permute.xlu1 %2513 }
 0x3c3   : > { %v3003_v60 = vpop.permute.xlu0 %3002  ;;  %v2526_v18 = vsel %vm654_vm3, %v2514_v50, %v2510_v59 }
 0x3c4   : > { %2916 = vmatprep.subr.mxu0 %v2526_v18  ;;  %v3013_v2 = vsel %vm1026_vm15, %v3003_v60, %v2995_v21 }
 0x3c5   : > { %3257 = vmatprep.subr.mxu1 %v3013_v2 }
 0x3c6   : > { %v2512_v23 = vpop.permute.xlu1 %2511 }
 0x3c7   : > { %v3001_v25 = vpop.permute.xlu0 %3000  ;;  %v2525_v6 = vsel %vm654_vm3, %v2512_v23, %v2514_v50 }
 0x3c8   : > { %v3012_v57 = vsel %vm1026_vm15, %v3001_v25, %v3003_v60  ;;  %2917 = vmatpush2.msra.mxu0 %v2525_v6 }
 0x3c9   : > { %3258 = vmatpush1.msra.mxu1 %v3012_v57 }
 0x3ca   : > { %v2508_v44 = vpop.permute.xlu1 %2507 }
 0x3cb   : > { %v2999_v16 = vpop.permute.xlu0 %2998  ;;  %v2524_v8 = vsel %vm654_vm3, %v2508_v44, %v2510_v59 }
 0x3cc   : > { %2918 = vmatprep.subr.mxu0 %v2524_v8  ;;  %v3011_v32 = vsel %vm1026_vm15, %v2999_v16, %v2995_v21 }
 0x3cd   : > { %3259 = vmatprep.subr.mxu1 %v3011_v32 }
 0x3ce   : > { %v2506_v41 = vpop.permute.xlu1 %2505 }
 0x3cf   : > { %v2997_v37 = vpop.permute.xlu0 %2996  ;;  %v2523_v47 = vsel %vm654_vm3, %v2506_v41, %v2508_v44 }
 0x3d0   : > { %v3010_v46 = vsel %vm1026_vm15, %v2997_v37, %v2999_v16  ;;  %2919 = vmatpush2.msra.mxu0 %v2523_v47 }
 0x3d1   : > { %3260 = vmatpush1.msra.mxu1 %v3010_v46  ;;  %2921 = vmatmul.mubr.f32.vlgmr.msra.gmra.mxu0 %v2784_v45  ;;  %v2062_v52 = vpop.f32.mrf.mxu0 }
 0x3d2   : > { %v2993_v39 = vpop.permute.xlu1 %2992  ;;  %2926 = vmatprep.mubr.f32.mxu0 %v2787_v53 }
 0x3d3   : > { %v2991_v1 = vpop.permute.xlu0 %2990  ;;  %v3009_v9 = vsel %vm1026_vm15, %v2993_v39, %v2995_v21  ;;  %v2064_v34 = vpop.f32.mrf.mxu0 }
 0x3d4   : > { %v3008_v58 = vsel %vm1026_vm15, %v2991_v1, %v2993_v39  ;;  %3261 = vmatprep.subr.mxu1 %v3009_v9 }
 0x3d5   : > { %2927 = vmatmul.mubr.f32.gmra.mxu0 %v2786_v24  ;;  %3262 = vmatpush1.msra.mxu1 %v3008_v58 }
 0x3d6   : > { %3546 = vmatmul.mubr.msk.f32.vlgmr.msra.gmra.mxu1 %vm3218_vm14, %v3190_v63  ;;  %2932 = vmatprep.mubr.f32.mxu0 %v2789_v30 }
 0x3d7   : > { %3301 = vmatprep.mubr.f32.mxu1 %v3648_v38 }
 0x3d9   : > { %2933 = vmatmul.mubr.f32.gmra.mxu0 %v2788_v33 }
 0x3da   : > { %3547 = vmatmul.mubr.msk.f32.gmra.mxu1 %vm3218_vm14, %v3191_v3  ;;  %2938 = vmatprep.mubr.f32.mxu0 %v2791_v14 }
 0x3db   : > { %3307 = vmatprep.mubr.f32.mxu1 %v3648_v38 }
 0x3dd   : > { %2939 = vmatmul.mubr.f32.gmra.mxu0 %v2790_v20 }
 0x3de   : > { %3548 = vmatmul.mubr.msk.f32.gmra.mxu1 %vm3218_vm14, %v3192_v61 }
 0x3df   : > { %3313 = vmatprep.mubr.f32.mxu1 %v3648_v38  ;;  %v3335_v11 = vpop.permute.xlu1 %3334 }
 0x3e0   : > { %v3340_v57 = vpop.permute.xlu0 %3339 }
 0x3e2   : > { %3549 = vmatmul.mubr.msk.f32.gmra.mxu1 %vm3218_vm14, %v3193_v5 }
 0x3e3   : > { %v3345_v47 = vpop.permute.xlu1 %3344 }
 0x402   : > { %v2068_v7 = vpop.f32.mrf.mxu0 }
 0x404   : > { %v2070_v40 = vpop.f32.mrf.mxu0 }
 0x409   : > { %v2151_v29 = vpop.f32.mrf.mxu1 }
 0x40a   : > { %v2152_v51 = vadd.f32 %v2151_v29, %v2062_v52  ;;  %v3350_v29 = vpop.permute.xlu1 %3349 }
 0x40b   : > { %v2153_v27 = vpop.f32.mrf.mxu1 }
 0x40c   : > { %v2074_v15 = vpop.f32.mrf.mxu0  ;;  %v2154_v12 = vadd.f32 %v2153_v27, %v2064_v34 }
 0x40d   : > { %v2157_v22 = vpop.f32.mrf.mxu1 }
 0x40e   : > { %v2076_v0 = vpop.f32.mrf.mxu0  ;;  %v2158_v49 = vadd.f32 %v2157_v22, %v2068_v7 }
 0x40f   : > { %v2159_v4 = vpop.f32.mrf.mxu1 }
 0x410   : > { %v2160_v17 = vadd.f32 %v2159_v4, %v2070_v40 }
 0x411   : > { %v2163_v31 = vpop.f32.mrf.mxu1 }
 0x412   : > { %v2080_v62 = vpop.f32.mrf.mxu0  ;;  %v2164_v18 = vadd.f32 %v2163_v31, %v2074_v15 }
 0x413   : > { %v2165_v38 = vpop.f32.mrf.mxu1 }
 0x414   : > { %v2082_v19 = vpop.f32.mrf.mxu0  ;;  %v2166_v44 = vadd.f32 %v2165_v38, %v2076_v0 }
 0x415   : > { %v2169_v43 = vpop.f32.mrf.mxu1 }
 0x416   : > { %v2170_v46 = vadd.f32 %v2169_v43, %v2080_v62 }
 0x417   : > { %v2171_v54 = vpop.f32.mrf.mxu1 }
 0x418   : > { %v2172_v9 = vadd.f32 %v2171_v54, %v2082_v19 }
 0x491   : > { %v2922_v59 = vpop.f32.mrf.mxu0 }
 0x492   : > { %v2945_v10 = vadd.f32 %v2922_v59, %v2152_v51 }
 0x493   : > { %v2924_v55 = vpop.f32.mrf.mxu0 }
 0x494   : > { %v2946_v42 = vadd.f32 %v2924_v55, %v2154_v12 }
 0x495   : > { %v2928_v13 = vpop.f32.mrf.mxu0 }
 0x496   : > { %v3297_v56 = vpop.f32.mrf.mxu1  ;;  %v2947_v35 = vadd.f32 %v2928_v13, %v2158_v49 }
 0x497   : > { %v3320_v28 = vadd.f32 %v3297_v56, %v2945_v10  ;;  %v2930_v21 = vpop.f32.mrf.mxu0 }
 0x498   : > { %v3299_v26 = vpop.f32.mrf.mxu1  ;;  %v2948_v2 = vadd.f32 %v2930_v21, %v2160_v17 }
 0x499   : > { %v3352_v48 = vadd.f32 %v3335_v11, %v3320_v28  ;;  %v3321_v36 = vadd.f32 %v3299_v26, %v2946_v42  ;;  %v2934_v50 = vpop.f32.mrf.mxu0 }
 0x49a   : > { %v3303_v60 = vpop.f32.mrf.mxu1  ;;  %v2949_v8 = vadd.f32 %v2934_v50, %v2164_v18 }
 0x49b   : > { %3360 = vst [vmem:[%s5413_s12] sm:$0xff] %v3352_v48  ;;  %v3353_v23 = vadd.f32 %v3335_v11, %v3321_v36  ;;  %v3322_v25 = vadd.f32 %v3303_v60, %v2947_v35  ;;  %v2936_v6 = vpop.f32.mrf.mxu0  ;;  %v3380_v5 = vmul.f32 %v3352_v48, %v3352_v48 }
 0x49c   : > { %v3305_v16 = vpop.f32.mrf.mxu1  ;;  %v2950_v39 = vadd.f32 %v2936_v6, %v2166_v44 }
 0x49d   : > { %3361 = vst [vmem:[%s5413_s12 + $0x8] sm:$0xff] %v3353_v23  ;;  %v3354_v32 = vadd.f32 %v3340_v57, %v3322_v25  ;;  %v3323_v41 = vadd.f32 %v3305_v16, %v2948_v2  ;;  %v2940_v45 = vpop.f32.mrf.mxu0  ;;  %v3368_v37 = vadd.f32 %v3353_v23, %v3352_v48  ;;  %v3381_v58 = vmul.f32 %v3353_v23, %v3353_v23 }
 0x49e   : > { %v3309_v53 = vpop.f32.mrf.mxu1  ;;  %v2951_v33 = vadd.f32 %v2940_v45, %v2170_v46 }
 0x49f   : > { %3362 = vst [vmem:[%s5413_s12 + $0x10] sm:$0xff] %v3354_v32  ;;  %v3355_v24 = vadd.f32 %v3340_v57, %v3323_v41  ;;  %v3324_v1 = vadd.f32 %v3309_v53, %v2949_v8  ;;  %3369 = vadd.xlane.f32.xlu0 %v3368_v37  ;;  %v2942_v63 = vpop.f32.mrf.mxu0  ;;  %v3388_v27 = vadd.f32 %v3381_v58, %v3380_v5 }
 0x4a0   : > { %v3311_v30 = vpop.f32.mrf.mxu1  ;;  %v2952_v52 = vadd.f32 %v2942_v63, %v2172_v9  ;;  %v3382_v59 = vmul.f32 %v3354_v32, %v3354_v32 }
 0x4a1   : > { %3363 = vst [vmem:[%s5413_s12 + $0x18] sm:$0xff] %v3355_v24  ;;  %v3356_v3 = vadd.f32 %v3345_v47, %v3324_v1  ;;  %v3325_v14 = vadd.f32 %v3311_v30, %v2950_v39  ;;  %v3371_v20 = vadd.f32 %v3355_v24, %v3354_v32  ;;  %v3383_v43 = vmul.f32 %v3355_v24, %v3355_v24 }
 0x4a2   : > { %v3315_v61 = vpop.f32.mrf.mxu1 }
 0x4a3   : > { %3364 = vst [vmem:[%s5413_s12 + $0x20] sm:$0xff] %v3356_v3  ;;  %v3357_v34 = vadd.f32 %v3345_v47, %v3325_v14  ;;  %v3326_v7 = vadd.f32 %v3315_v61, %v2951_v33  ;;  %3372 = vadd.xlane.f32.xlu1 %v3371_v20  ;;  %v3384_v62 = vmul.f32 %v3356_v3, %v3356_v3 }
 0x4a4   : > { %v3317_v40 = vpop.f32.mrf.mxu1  ;;  %v3391_v51 = vadd.f32 %v3383_v43, %v3382_v59 }
 0x4a5   : > { %3365 = vst [vmem:[%s5413_s12 + $0x28] sm:$0xff] %v3357_v34  ;;  %v3358_v22 = vadd.f32 %v3350_v29, %v3326_v7  ;;  %v3327_v15 = vadd.f32 %v3317_v40, %v2952_v52  ;;  %v3374_v4 = vadd.f32 %v3357_v34, %v3356_v3  ;;  %v3385_v0 = vmul.f32 %v3357_v34, %v3357_v34 }
 0x4a7   : > { %3366 = vst [vmem:[%s5413_s12 + $0x30] sm:$0xff] %v3358_v22  ;;  %v3359_v31 = vadd.f32 %v3350_v29, %v3327_v15  ;;  %3389 = vadd.xlane.f32.xlu1 %v3388_v27  ;;  %3375 = vadd.xlane.f32.xlu0 %v3374_v4  ;;  %v3394_v38 = vadd.f32 %v3385_v0, %v3384_v62 }
 0x4a8   : > { %v3386_v54 = vmul.f32 %v3358_v22, %v3358_v22 }
 0x4a9   : > { %3367 = vst [vmem:[%s5413_s12 + $0x38] sm:$0xff] %v3359_v31  ;;  %v3377_v19 = vadd.f32 %v3359_v31, %v3358_v22  ;;  %v3387_v55 = vmul.f32 %v3359_v31, %v3359_v31 }
 0x4ab   : > { %3395 = vadd.xlane.f32.xlu1 %v3394_v38  ;;  %3378 = vadd.xlane.f32.xlu0 %v3377_v19  ;;  %v3397_v12 = vadd.f32 %v3387_v55, %v3386_v54 }
 0x4af   : > { %3392 = vadd.xlane.f32.xlu0 %v3391_v51 }
 0x4b3   : > { %3398 = vadd.xlane.f32.xlu0 %v3397_v12 }
 0x528   : > { %v3370_v10 = vpop.xlane.xlu0 %3369 }
 0x52c   : > { %v3373_v13 = vpop.xlane.xlu1 %3372 }
 0x530   : > { %v3376_v56 = vpop.xlane.xlu0 %3375  ;;  %v3390_v49 = vpop.xlane.xlu1 %3389 }
 0x531   : > { %v3400_v42 = vsel %vm508_vm9, %v3370_v10, %v3390_v49 }
 0x532   : > { %3404 = vst.msk [vmem:[%s311_s10] sm:$0xff] %vm601_vm10, %v3400_v42 }
 0x534   : > { %v3379_v28 = vpop.xlane.xlu0 %3378  ;;  %v3396_v21 = vpop.xlane.xlu1 %3395 }
 0x535   : > { %v3402_v11 = vsel %vm508_vm9, %v3376_v56, %v3396_v21 }
 0x536   : > { %3406 = vst.msk [vmem:[%s311_s10 + $0x10] sm:$0xff] %vm601_vm10, %v3402_v11 }
 0x538   : > { %v3393_v26 = vpop.xlane.xlu0 %3392 }
 0x539   : > { %v3401_v17 = vsel %vm508_vm9, %v3373_v13, %v3393_v26 }
 0x53a   : > { %3405 = vst.msk [vmem:[%s311_s10 + $0x8] sm:$0xff] %vm601_vm10, %v3401_v17 }
 0x53c   : > { %v3399_v35 = vpop.xlane.xlu0 %3398 }
 0x53d   : > { %v3403_v48 = vsel %vm508_vm9, %v3379_v28, %v3399_v35 }
 0x53e   : > { %3407 = vst.msk [vmem:[%s311_s10 + $0x18] sm:$0xff] %vm601_vm10, %v3403_v48 }
 0x53f PF: > { %s18_s24 = sadd.s32 1, %s3611_s24  }
 0x540   : > { %p15_p4 = scmp.ge.s32.totalorder %s18_s24, 4  }
 0x542   :  { %17 = sbr.rel (!%p15_p4) target bundleno = 1 (0x1), region = 115 }

// kernel: midblock_forward.6
= control target key start
LH: loop header
LB: loop body
LE: loop exit
PB: predicated region body
PF: predicated region fallthrough
CT: control target
= control target key end

     0   :  { %s3694_s24 = smov 0   ;;  %s5443_s0 = inlined_call_operand.vmem [shape: f32[2,32,256], index: 0, kind: input, shape index: {}]   ;;  %s5444_s1 = inlined_call_operand.vmem [shape: f32[32,2], index: 1, kind: input, shape index: {}]   ;;  %s5445_s2 = inlined_call_operand.vmem [shape: f32[32,864], index: 2, kind: input, shape index: {}]   ;;  %s5446_s3 = inlined_call_operand.vmem [shape: f32[32,1], index: 3, kind: input, shape index: {}]   ;;  %s5447_s4 = inlined_call_operand.vmem [shape: f32[27,256], index: 4, kind: input, shape index: {}]   ;;  %s5448_s5 = inlined_call_operand.vmem [shape: f32[2,32,256], index: 5, kind: output, shape index: {0}]   ;;  %s5449_s6 = inlined_call_operand.vmem [shape: f32[2,32,2], index: 6, kind: output, shape index: {1}]   ;;  %s5450_s7 = inlined_call_operand.vmem [shape: f32[2,32,256], index: 7, kind: output, shape index: {2}]  }
   0x1 LB: > { %s3513_s25 = sadd.s32 4294967295, %s3616_s24   ;;  %p3517_p0 = scmp.ge.s32.totalorder %s3616_s24, 1  ;;  %s3616_s24 = sphi %s3694_s24, %s18_s24  }
   0x2   : > { %p242_p1 = scmp.lt.s32.totalorder %s3616_s24, 3 }
   0x4   : > { %p243_p2 = pnand %p3517_p0, %p242_p1 }
   0x6   : > { %246 = sbr.rel (%p243_p2) target bundleno = 1341 (0x53d), region = 40 }
   0xb   : > { %v314_v0 = vld [vmem:[%s5444_s1 + $0x10] sm:$0xff]  ;;  %v312_v1 = vld [vmem:[%s5444_s1] sm:$0xff]  ;;  %v3618_v2 = vmov 1   ;;  %v3619_v3 = vmov 0   ;;  %v315_v4 = vld [vmem:[%s5444_s1 + $0x18] sm:$0xff]  ;;  %v451_v5 = vlaneseq  ;;  %s3620_s15 = smov 1  }
   0xc   : > { %3606 = vset.pattern.permute.xlu0 %v3618_v2  ;;  %3605 = vset.pattern.permute.xlu1 %v3619_v3  ;;  %v313_v7 = vld [vmem:[%s5444_s1 + $0x8] sm:$0xff]  ;;  %s3621_s18 = smov 2   ;;  %s3622_s21 = smov 8   ;;  %v3536_v28 = vld [vmem:[%s5447_s4 + $0x13] ss:$8 sm:$0x3] }
   0xd   : > { %328 = vperm.xlu1 %3605, %v314_v0   ;;  %345 = vperm.xlu0 %3606, %v312_v1   ;;  %v452_v6 = vshrl.u32 %v451_v5, 7  ;;  %v3526_v10 = vld [vmem:[%s5447_s4 + $0x1] ss:$8 sm:$0x3]  ;;  %s3623_s26 = smov 9   ;;  %s3624_s29 = smov 10  }
   0xe   : > { %v3527_v13 = vld [vmem:[%s5447_s4 + $0x2] ss:$8 sm:$0x3]  ;;  %v3528_v16 = vld [vmem:[%s5447_s4 + $0x3] ss:$8 sm:$0x3] }
   0xf   : > { %v3714_v8 = vsub.s32 1, %v452_v6  ;;  %v3716_v9 = vsub.s32 0, %v452_v6  ;;  %v3529_v19 = vld [vmem:[%s5447_s4 + $0x4] ss:$8 sm:$0x3]  ;;  %s3625_s9 = smov 16  }
  0x10   : > { %v3530_v22 = vld [vmem:[%s5447_s4 + $0x5] ss:$8 sm:$0x3]  ;;  %v3531_v25 = vld [vmem:[%s5447_s4 + $0x6] ss:$8 sm:$0x3] }
  0x11   : > { %333 = vperm.xlu1 %3605, %v315_v4   ;;  %357 = vperm.xlu0 %3606, %v315_v4   ;;  %v487_v11 = vrot.slane %v3526_v10, %v3714_v8  ;;  %v483_v12 = vrot.slane %v3526_v10, %v3716_v9  ;;  %v580_v14 = vrot.slane %v3527_v13, %v3714_v8  ;;  %v3535_v31 = vld [vmem:[%s5447_s4 + $0x12] ss:$8 sm:$0x3]  ;;  %s3626_s12 = smov 66   ;;  %s3627_s16 = smov 65   ;;  %vm424_vm8 = vcmask 596992  }
  0x12   : > { %v576_v15 = vrot.slane %v3527_v13, %v3716_v9  ;;  %v673_v17 = vrot.slane %v3528_v16, %v3714_v8  ;;  %v669_v18 = vrot.slane %v3528_v16, %v3716_v9  ;;  %v766_v20 = vrot.slane %v3529_v19, %v3714_v8  ;;  %v3534_v34 = vld [vmem:[%s5447_s4 + $0x11] ss:$8 sm:$0x3]  ;;  %v3533_v37 = vld [vmem:[%s5447_s4 + $0x10] ss:$8 sm:$0x3] }
  0x13   : > { %v762_v21 = vrot.slane %v3529_v19, %v3716_v9  ;;  %v859_v23 = vrot.slane %v3530_v22, %v3714_v8  ;;  %v855_v24 = vrot.slane %v3530_v22, %v3716_v9  ;;  %v952_v26 = vrot.slane %v3531_v25, %v3714_v8  ;;  %v3532_v38 = vld [vmem:[%s5447_s4 + $0x7] ss:$8 sm:$0x3]  ;;  %s3628_s23 = smov 64   ;;  %s3629_s27 = smov 18  }
  0x14   : > { %v948_v27 = vrot.slane %v3531_v25, %v3716_v9  ;;  %v1485_v29 = vrot.slane %v3536_v28, %v3716_v9  ;;  %v1489_v30 = vrot.slane %v3536_v28, %v3714_v8  ;;  %v1392_v32 = vrot.slane %v3535_v31, %v3716_v9  ;;  %s3630_s28 = smov 17   ;;  %v3539_v43 = vld [vmem:[%s5447_s4 + $0x17] ss:$8 sm:$0x3]  ;;  %s3633_s17 = smov 72  }
  0x15   : > { %3607 = vset.pattern.permute.xlu1 %v3618_v2  ;;  %3608 = vset.pattern.permute.xlu0 %v3619_v3  ;;  %v1396_v33 = vrot.slane %v3535_v31, %v3714_v8  ;;  %v1300_v35 = vrot.slane %v3534_v34, %v3716_v9  ;;  %v1304_v36 = vrot.slane %v3534_v34, %v3714_v8  ;;  %v3538_v46 = vld [vmem:[%s5447_s4 + $0x16] ss:$8 sm:$0x3]  ;;  %v3537_v49 = vld [vmem:[%s5447_s4 + $0x14] ss:$8 sm:$0x3] }
  0x16   : > { %349 = vperm.xlu1 %3607, %v313_v7   ;;  %318 = vperm.xlu0 %3608, %v312_v1   ;;  %v1206_v39 = vrot.slane %v3533_v37, %v3716_v9  ;;  %v1041_v40 = vrot.slane %v3532_v38, %v3716_v9  ;;  %v1045_v41 = vrot.slane %v3532_v38, %v3714_v8  ;;  %p284_p3 = scmp.lt.s32.totalorder %s3513_s25, 1  ;;  %vm492_vm9 = vcmask 7168   ;;  %s3635_s13 = smov 127  }
  0x17   : > { %v1210_v42 = vrot.slane %v3533_v37, %v3714_v8  ;;  %v1825_v44 = vrot.slane %v3539_v43, %v3714_v8  ;;  %v1821_v45 = vrot.slane %v3539_v43, %v3716_v9  ;;  %v1732_v47 = vrot.slane %v3538_v46, %v3714_v8  ;;  %s3636_s14 = smov 126   ;;  %s3639_s20 = smov 118  }
  0x18   : > { %v1728_v48 = vrot.slane %v3538_v46, %v3716_v9  ;;  %v1582_v50 = vrot.slane %v3537_v49, %v3714_v8  ;;  %v1578_v51 = vrot.slane %v3537_v49, %v3716_v9  ;;  %s5524_s25 = smov (!%p284_p3, %s3513_s25), 1  ;;  %vm585_vm10 = vcmask 15360   ;;  %s3640_s22 = smov 112  }
  0x19   : > { %s3813_s19 = sshll.u32 %s5524_s25, 6  ;;  %vm678_vm11 = vcmask 64512   ;;  %vm771_vm12 = vcmask 72704   ;;  %vm864_vm13 = vcmask 80896   ;;  %vm957_vm14 = vcmask 130048   ;;  %s3642_s8 = smov 62  }
  0x1a   : > { %353 = vperm.xlu1 %3607, %v314_v0   ;;  %323 = vperm.xlu0 %3608, %v313_v7   ;;  %s288_s30 = scalar_lea.vmem %s5443_s0, %s3813_s19  ;;  %s3823_s11 = scalar_lea.vmem %s5450_s7, %s3813_s19  ;;  %vm1050_vm15 = vcmask 138240  }
  0x1b   : > { %v310_v54 = vld [vmem:[%s288_s30 + $0x30] sm:$0xff]  ;;  %v311_v55 = vld [vmem:[%s288_s30 + $0x38] sm:$0xff]  ;;  %v304_v62 = vld [vmem:[%s288_s30] sm:$0xff]  ;;  %s3646_s10 = smov 81  }
  0x1c   : > { %v305_v63 = vld [vmem:[%s288_s30 + $0x8] sm:$0xff]  ;;  %v308_v0 = vld [vmem:[%s288_s30 + $0x20] sm:$0xff]  ;;  %v306_v10 = vld [vmem:[%s288_s30 + $0x10] sm:$0xff] }
  0x1d   : > { %v309_v1 = vld [vmem:[%s288_s30 + $0x28] sm:$0xff] }
  0x1e   : > { %490 = vrot.lane.b32.xlu0 %v487_v11, %s3620_s15  ;;  %488 = vrot.lane.b32.xlu1 %v483_v12, %s3620_s15  ;;  %v307_v11 = vld [vmem:[%s288_s30 + $0x18] sm:$0xff]  ;;  %s3641_s30 = smov 111  }
  0x1f   : > { %3609 = vset.pattern.permute.xlu1 %v3619_v3 }
  0x22   : > { %583 = vrot.lane.b32.xlu0 %v580_v14, %s3621_s18  ;;  %581 = vrot.lane.b32.xlu1 %v576_v15, %s3621_s18 }
  0x26   : > { %676 = vrot.lane.b32.xlu0 %v673_v17, %s3622_s21  ;;  %674 = vrot.lane.b32.xlu1 %v669_v18, %s3622_s21 }
  0x2a   : > { %769 = vrot.lane.b32.xlu0 %v766_v20, %s3623_s26  ;;  %767 = vrot.lane.b32.xlu1 %v762_v21, %s3623_s26 }
  0x2e   : > { %862 = vrot.lane.b32.xlu0 %v859_v23, %s3624_s29  ;;  %860 = vrot.lane.b32.xlu1 %v855_v24, %s3624_s29 }
  0x32   : > { %955 = vrot.lane.b32.xlu0 %v952_v26, %s3625_s9  ;;  %953 = vrot.lane.b32.xlu1 %v948_v27, %s3625_s9 }
  0x36   : > { %1490 = vrot.lane.b32.xlu0 %v1485_v29, %s3626_s12  ;;  %1492 = vrot.lane.b32.xlu1 %v1489_v30, %s3626_s12  ;;  %s3631_s12 = smov 80  }
  0x3a   : > { %1397 = vrot.lane.b32.xlu0 %v1392_v32, %s3627_s16  ;;  %1399 = vrot.lane.b32.xlu1 %v1396_v33, %s3627_s16  ;;  %s3632_s16 = smov 74  }
  0x3e   : > { %1305 = vrot.lane.b32.xlu0 %v1300_v35, %s3628_s23  ;;  %1307 = vrot.lane.b32.xlu1 %v1304_v36, %s3628_s23 }
  0x42   : > { %1211 = vrot.lane.b32.xlu0 %v1206_v39, %s3629_s27  ;;  %1046 = vrot.lane.b32.xlu1 %v1041_v40, %s3630_s28 }
  0x46   : > { %1048 = vrot.lane.b32.xlu0 %v1045_v41, %s3630_s28  ;;  %1213 = vrot.lane.b32.xlu1 %v1210_v42, %s3629_s27 }
  0x4a   : > { %1828 = vrot.lane.b32.xlu1 %v1825_v44, %s3631_s12  ;;  %1826 = vrot.lane.b32.xlu0 %v1821_v45, %s3631_s12  ;;  %s3634_s12 = smov 73  }
  0x4e   : > { %1735 = vrot.lane.b32.xlu1 %v1732_v47, %s3632_s16  ;;  %1733 = vrot.lane.b32.xlu0 %v1728_v48, %s3632_s16  ;;  %s3637_s16 = smov 120  }
  0x52   : > { %1585 = vrot.lane.b32.xlu1 %v1582_v50, %s3633_s17  ;;  %1583 = vrot.lane.b32.xlu0 %v1578_v51, %s3633_s17  ;;  %s3638_s17 = smov 119  }
  0x88   : > { %v329_v52 = vpop.permute.xlu1 %328  ;;  %v346_v53 = vpop.permute.xlu0 %345 }
  0x89   : > { %v340_v14 = vmul.f32 %v329_v52, %v308_v0  ;;  %v341_v15 = vmul.f32 %v329_v52, %v309_v1 }
  0x8c   : > { %v334_v56 = vpop.permute.xlu1 %333  ;;  %v358_v57 = vpop.permute.xlu0 %357 }
  0x8d   : > { %v342_v58 = vmul.f32 %v334_v56, %v310_v54  ;;  %v343_v59 = vmul.f32 %v334_v56, %v311_v55 }
  0x8f   : > { %v366_v60 = vadd.f32 %v358_v57, %v342_v58  ;;  %v367_v61 = vadd.f32 %v358_v57, %v343_v59 }
  0x91   : > { %v350_v2 = vpop.permute.xlu1 %349  ;;  %v319_v3 = vpop.permute.xlu0 %318  ;;  %vm375_vm0 = vcmp.ge.f32.partialorder %v367_v61, 0.0  ;;  %v383_v4 = vmul.f32 0.04, %v367_v61  ;;  %vm374_vm1 = vcmp.ge.f32.partialorder %v366_v60, 0.0  ;;  %v382_v5 = vmul.f32 0.04, %v366_v60 }
  0x92   : > { %v336_v6 = vmul.f32 %v319_v3, %v304_v62  ;;  %v337_v7 = vmul.f32 %v319_v3, %v305_v63 }
  0x93   : > { %v391_v12 = vsel %vm375_vm0, %v367_v61, %v383_v4  ;;  %v390_v13 = vsel %vm374_vm1, %v366_v60, %v382_v5  ;;  %vm1494_vm0 = vcmask 539648   ;;  %vm731_vm1 = vcmask 982016  }
  0x94   : > { %v360_v16 = vadd.f32 %v346_v53, %v336_v6  ;;  %v361_v17 = vadd.f32 %v346_v53, %v337_v7  ;;  %399 = vst [vmem:[%s3823_s11 + $0x38] sm:$0xff] %v391_v12  ;;  %398 = vst [vmem:[%s3823_s11 + $0x30] sm:$0xff] %v390_v13 }
  0x95   : > { %v354_v18 = vpop.permute.xlu1 %353  ;;  %v324_v19 = vpop.permute.xlu0 %323 }
  0x96   : > { %v364_v20 = vadd.f32 %v354_v18, %v340_v14  ;;  %v365_v21 = vadd.f32 %v354_v18, %v341_v15  ;;  %v338_v22 = vmul.f32 %v324_v19, %v306_v10  ;;  %v339_v23 = vmul.f32 %v324_v19, %v307_v11 }
  0x97   : > { %vm369_vm2 = vcmp.ge.f32.partialorder %v361_v17, 0.0  ;;  %v377_v24 = vmul.f32 0.04, %v361_v17  ;;  %vm368_vm3 = vcmp.ge.f32.partialorder %v360_v16, 0.0  ;;  %v376_v25 = vmul.f32 0.04, %v360_v16 }
  0x98   : > { %v362_v26 = vadd.f32 %v350_v2, %v338_v22  ;;  %v363_v27 = vadd.f32 %v350_v2, %v339_v23  ;;  %vm373_vm4 = vcmp.ge.f32.partialorder %v365_v21, 0.0  ;;  %v381_v28 = vmul.f32 0.04, %v365_v21 }
  0x99   : > { %v385_v29 = vsel %vm369_vm2, %v361_v17, %v377_v24  ;;  %v384_v30 = vsel %vm368_vm3, %v360_v16, %v376_v25  ;;  %vm372_vm5 = vcmp.ge.f32.partialorder %v364_v20, 0.0  ;;  %v380_v31 = vmul.f32 0.04, %v364_v20  ;;  %v3833_v38 = vpop.permute.xlu0 %490  ;;  %v3835_v39 = vpop.permute.xlu1 %488 }
  0x9a   : > { %410 = vrot.lane.b32.xlu0 %v385_v29, %s3634_s12  ;;  %393 = vst [vmem:[%s3823_s11 + $0x8] sm:$0xff] %v385_v29  ;;  %408 = vrot.lane.b32.xlu1 %v384_v30, %s3634_s12  ;;  %392 = vst [vmem:[%s3823_s11] sm:$0xff] %v384_v30  ;;  %vm371_vm6 = vcmp.ge.f32.partialorder %v363_v27, 0.0  ;;  %v379_v32 = vmul.f32 0.04, %v363_v27  ;;  %vm370_vm7 = vcmp.ge.f32.partialorder %v362_v26, 0.0  ;;  %v389_v34 = vsel %vm373_vm4, %v365_v21, %v381_v28 }
  0x9b   : > { %v378_v33 = vmul.f32 0.04, %v362_v26  ;;  %v388_v35 = vsel %vm372_vm5, %v364_v20, %v380_v31  ;;  %397 = vst [vmem:[%s3823_s11 + $0x28] sm:$0xff] %v389_v34  ;;  %v493_v6 = vsel %vm492_vm9, %v3835_v39, %v3833_v38  ;;  %vm1401_vm2 = vcmask 531456  }
  0x9c   : > { %v387_v36 = vsel %vm371_vm6, %v363_v27, %v379_v32  ;;  %396 = vst [vmem:[%s3823_s11 + $0x20] sm:$0xff] %v388_v35  ;;  %vm638_vm3 = vcmask 1031168   ;;  %vm545_vm4 = vcmask 1039360   ;;  %vm1309_vm5 = vcmask 523264  }
  0x9d   : > { %v386_v37 = vsel %vm370_vm7, %v362_v26, %v378_v33  ;;  %395 = vst [vmem:[%s3823_s11 + $0x18] sm:$0xff] %v387_v36  ;;  %v3837_v40 = vpop.permute.xlu0 %583  ;;  %v3839_v41 = vpop.permute.xlu1 %581  ;;  %vm1215_vm6 = vcmask 146432   ;;  %vm1830_vm7 = vcmask 654336  }
  0x9e   : > { %394 = vst [vmem:[%s3823_s11 + $0x10] sm:$0xff] %v386_v37  ;;  %414 = vrot.lane.b32.xlu0 %v387_v36, %s3634_s12  ;;  %412 = vrot.lane.b32.xlu1 %v386_v37, %s3634_s12  ;;  %v586_v37 = vsel %vm585_vm10, %v3839_v41, %v3837_v40  ;;  %s3647_s11 = smov 48  }
  0xa1   : > { %v3841_v42 = vpop.permute.xlu0 %676  ;;  %v3843_v43 = vpop.permute.xlu1 %674 }
  0xa2   : > { %418 = vrot.lane.b32.xlu0 %v389_v34, %s3634_s12  ;;  %416 = vrot.lane.b32.xlu1 %v388_v35, %s3634_s12 }
  0xa5   : > { %v3845_v44 = vpop.permute.xlu0 %769  ;;  %v3847_v45 = vpop.permute.xlu1 %767 }
  0xa6   : > { %422 = vrot.lane.b32.xlu0 %v391_v12, %s3634_s12  ;;  %420 = vrot.lane.b32.xlu1 %v390_v13, %s3634_s12  ;;  %s3645_s12 = smov 110  }
  0xa9   : > { %v3849_v46 = vpop.permute.xlu0 %862  ;;  %v3851_v47 = vpop.permute.xlu1 %860 }
  0xad   : > { %v3853_v48 = vpop.permute.xlu0 %955  ;;  %v3855_v49 = vpop.permute.xlu1 %953 }
  0xb1   : > { %v3857_v50 = vpop.permute.xlu0 %1490  ;;  %v3859_v51 = vpop.permute.xlu1 %1492 }
  0xb5   : > { %v3861_v52 = vpop.permute.xlu0 %1397  ;;  %v3863_v53 = vpop.permute.xlu1 %1399 }
  0xb9   : > { %v3865_v54 = vpop.permute.xlu0 %1305  ;;  %v3867_v55 = vpop.permute.xlu1 %1307 }
  0xbd   : > { %v3869_v56 = vpop.permute.xlu0 %1211  ;;  %v3871_v57 = vpop.permute.xlu1 %1046 }
  0xbe   : > { %5467 = vst [vmem:[#allocation3_spill] sm:$0xff] %v3869_v56 }
  0xc1   : > { %v3873_v58 = vpop.permute.xlu0 %1048  ;;  %v3875_v59 = vpop.permute.xlu1 %1213 }
  0xc2   : > { %5468 = vst [vmem:[#allocation4_spill] sm:$0xff] %v3873_v58  ;;  %5469 = vst [vmem:[#allocation5_spill] sm:$0xff] %v3875_v59 }
  0xc5   : > { %v3877_v60 = vpop.permute.xlu1 %1828  ;;  %v3879_v61 = vpop.permute.xlu0 %1826 }
  0xc6   : > { %5470 = vst [vmem:[#allocation6_spill] sm:$0xff] %v3877_v60  ;;  %5471 = vst [vmem:[#allocation7_spill] sm:$0xff] %v3879_v61 }
  0xc9   : > { %v3881_v62 = vpop.permute.xlu1 %1735  ;;  %v3883_v63 = vpop.permute.xlu0 %1733 }
  0xca   : > { %5472 = vst [vmem:[#allocation8_spill] sm:$0xff] %v3881_v62  ;;  %5473 = vst [vmem:[#allocation9_spill] sm:$0xff] %v3883_v63 }
  0xcd   : > { %v3885_v0 = vpop.permute.xlu1 %1585  ;;  %v3887_v1 = vpop.permute.xlu0 %1583 }
  0xce   : > { %5474 = vst [vmem:[#allocation10_spill] sm:$0xff] %v3885_v0  ;;  %5475 = vst [vmem:[#allocation11_spill] sm:$0xff] %v3887_v1 }
 0x10c   : > { %v411_v2 = vpop.permute.xlu0 %410  ;;  %v409_v3 = vpop.permute.xlu1 %408 }
 0x10d   : > { %v3890_v4 = vsel %vm424_vm8, %v409_v3, %v411_v2  ;;  %v3893_v5 = vsel %vm424_vm8, 0.0, %v409_v3  ;;  %v3902_v11 = vsel %vm424_vm8, %v411_v2, 0.0 }
 0x10e   : > { %v497_v7 = vmul.f32 %v3835_v39, %v3893_v5  ;;  %v498_v10 = vmul.f32 %v493_v6, %v3890_v4  ;;  %v499_v15 = vmul.f32 %v3833_v38, %v3902_v11  ;;  %v590_v2 = vmul.f32 %v3839_v41, %v3893_v5 }
 0x10f   : > { %v592_v3 = vmul.f32 %v3837_v40, %v3902_v11 }
 0x110   : > { %v415_v12 = vpop.permute.xlu0 %414  ;;  %521 = vrot.lane.b32.xlu1 %v497_v7, %s3635_s13  ;;  %523 = vrot.lane.b32.xlu0 %v498_v10, %s3635_s13  ;;  %v413_v13 = vpop.permute.xlu1 %412 }
 0x111   : > { %v3907_v14 = vsel %vm424_vm8, 0.0, %v413_v13  ;;  %v3914_v17 = vsel %vm424_vm8, %v415_v12, 0.0  ;;  %v3917_v18 = vsel %vm424_vm8, %v413_v13, %v415_v12 }
 0x112   : > { %v500_v16 = vmul.f32 %v3835_v39, %v3907_v14  ;;  %v502_v21 = vmul.f32 %v3833_v38, %v3914_v17  ;;  %v501_v22 = vmul.f32 %v493_v6, %v3917_v18  ;;  %v594_v7 = vmul.f32 %v586_v37, %v3917_v18 }
 0x113   : > { %v1504_v61 = vmul.f32 %v3859_v51, %v3914_v17 }
 0x114   : > { %v419_v19 = vpop.permute.xlu0 %418  ;;  %525 = vrot.lane.b32.xlu1 %v499_v15, %s3635_s13  ;;  %527 = vrot.lane.b32.xlu0 %v500_v16, %s3635_s13  ;;  %v417_v20 = vpop.permute.xlu1 %416 }
 0x115   : > { %v3925_v23 = vsel %vm424_vm8, %v417_v20, %v419_v19  ;;  %v3928_v24 = vsel %vm424_vm8, 0.0, %v417_v20  ;;  %v3936_v28 = vsel %vm424_vm8, %v419_v19, 0.0 }
 0x116   : > { %v503_v26 = vmul.f32 %v3835_v39, %v3928_v24  ;;  %v504_v27 = vmul.f32 %v493_v6, %v3925_v23  ;;  %v505_v31 = vmul.f32 %v3833_v38, %v3936_v28  ;;  %v597_v10 = vmul.f32 %v586_v37, %v3925_v23 }
 0x117   : > { %v596_v12 = vmul.f32 %v3839_v41, %v3928_v24  ;;  %v598_v15 = vmul.f32 %v3837_v40, %v3936_v28 }
 0x118   : > { %531 = vrot.lane.b32.xlu0 %v502_v21, %s3635_s13  ;;  %529 = vrot.lane.b32.xlu1 %v501_v22, %s3635_s13  ;;  %v421_v25 = vpop.permute.xlu1 %420  ;;  %v423_v30 = vpop.permute.xlu0 %422  ;;  %v683_v21 = vmul.f32 %v3843_v43, %v3893_v5  ;;  %v685_v22 = vmul.f32 %v3841_v42, %v3902_v11 }
 0x119   : > { %v3939_v29 = vsel %vm424_vm8, 0.0, %v421_v25  ;;  %v3948_v33 = vsel %vm424_vm8, %v423_v30, 0.0  ;;  %v3951_v34 = vsel %vm424_vm8, %v421_v25, %v423_v30  ;;  %v688_v25 = vmul.f32 %v3841_v42, %v3914_v17 }
 0x11a   : > { %v506_v32 = vmul.f32 %v3835_v39, %v3939_v29  ;;  %v508_v35 = vmul.f32 %v3833_v38, %v3948_v33  ;;  %v507_v36 = vmul.f32 %v493_v6, %v3951_v34  ;;  %v591_v39 = vmul.f32 %v586_v37, %v3890_v4 }
 0x11b   : > { %v593_v38 = vmul.f32 %v3839_v41, %v3907_v14  ;;  %v595_v6 = vmul.f32 %v3837_v40, %v3914_v17  ;;  %v599_v13 = vmul.f32 %v3839_v41, %v3939_v29  ;;  %v601_v16 = vmul.f32 %v3837_v40, %v3948_v33 }
 0x11c   : > { %533 = vrot.lane.b32.xlu1 %v503_v26, %s3635_s13  ;;  %535 = vrot.lane.b32.xlu0 %v504_v27, %s3635_s13  ;;  %v600_v19 = vmul.f32 %v586_v37, %v3951_v34  ;;  %v679_v41 = vsel %vm678_vm11, %v3843_v43, %v3841_v42  ;;  %v686_v40 = vmul.f32 %v3843_v43, %v3907_v14  ;;  %vm1547_vm8 = vcmask 506880  }
 0x11d   : > { %v684_v20 = vmul.f32 %v679_v41, %v3890_v4  ;;  %v687_v26 = vmul.f32 %v679_v41, %v3917_v18  ;;  %v690_v27 = vmul.f32 %v679_v41, %v3925_v23  ;;  %v689_v30 = vmul.f32 %v3843_v43, %v3928_v24 }
 0x120   : > { %537 = vrot.lane.b32.xlu1 %v505_v31, %s3635_s13  ;;  %539 = vrot.lane.b32.xlu0 %v506_v32, %s3635_s13  ;;  %v692_v31 = vmul.f32 %v3843_v43, %v3939_v29  ;;  %v691_v32 = vmul.f32 %v3841_v42, %v3936_v28  ;;  %v772_v43 = vsel %vm771_vm12, %v3847_v45, %v3845_v44 }
 0x121   : > { %v777_v37 = vmul.f32 %v772_v43, %v3890_v4 }
 0x124   : > { %543 = vrot.lane.b32.xlu0 %v508_v35, %s3635_s13  ;;  %541 = vrot.lane.b32.xlu1 %v507_v36, %s3635_s13  ;;  %v694_v35 = vmul.f32 %v3841_v42, %v3948_v33  ;;  %v693_v36 = vmul.f32 %v679_v41, %v3951_v34  ;;  %v779_v42 = vmul.f32 %v3847_v45, %v3907_v14 }
 0x125   : > { %v871_v41 = vmul.f32 %v3849_v46, %v3902_v11 }
 0x128   : > { %616 = vrot.lane.b32.xlu0 %v591_v39, %s3636_s14  ;;  %614 = vrot.lane.b32.xlu1 %v590_v2, %s3636_s14  ;;  %v776_v39 = vmul.f32 %v3847_v45, %v3893_v5  ;;  %v778_v2 = vmul.f32 %v3845_v44, %v3902_v11 }
 0x12c   : > { %620 = vrot.lane.b32.xlu0 %v593_v38, %s3636_s14  ;;  %618 = vrot.lane.b32.xlu1 %v592_v3, %s3636_s14  ;;  %v781_v38 = vmul.f32 %v3845_v44, %v3914_v17  ;;  %v780_v3 = vmul.f32 %v772_v43, %v3917_v18 }
 0x130   : > { %624 = vrot.lane.b32.xlu0 %v595_v6, %s3636_s14  ;;  %622 = vrot.lane.b32.xlu1 %v594_v7, %s3636_s14  ;;  %v783_v6 = vmul.f32 %v772_v43, %v3925_v23  ;;  %v782_v7 = vmul.f32 %v3847_v45, %v3928_v24 }
 0x134   : > { %628 = vrot.lane.b32.xlu0 %v597_v10, %s3636_s14  ;;  %626 = vrot.lane.b32.xlu1 %v596_v12, %s3636_s14  ;;  %v785_v10 = vmul.f32 %v3847_v45, %v3939_v29  ;;  %v784_v12 = vmul.f32 %v3845_v44, %v3936_v28  ;;  %v865_v45 = vsel %vm864_vm13, %v3851_v47, %v3849_v46 }
 0x138   : > { %632 = vrot.lane.b32.xlu0 %v599_v13, %s3636_s14  ;;  %630 = vrot.lane.b32.xlu1 %v598_v15, %s3636_s14  ;;  %v787_v13 = vmul.f32 %v3845_v44, %v3948_v33  ;;  %v786_v15 = vmul.f32 %v772_v43, %v3951_v34  ;;  %v872_v44 = vmul.f32 %v3851_v47, %v3907_v14 }
 0x13c   : > { %636 = vrot.lane.b32.xlu0 %v601_v16, %s3636_s14  ;;  %634 = vrot.lane.b32.xlu1 %v600_v19, %s3636_s14  ;;  %v870_v16 = vmul.f32 %v865_v45, %v3890_v4  ;;  %v869_v19 = vmul.f32 %v3851_v47, %v3893_v5 }
 0x140   : > { %709 = vrot.lane.b32.xlu0 %v684_v20, %s3637_s16  ;;  %707 = vrot.lane.b32.xlu1 %v683_v21, %s3637_s16  ;;  %v874_v20 = vmul.f32 %v3849_v46, %v3914_v17  ;;  %v873_v21 = vmul.f32 %v865_v45, %v3917_v18 }
 0x144   : > { %713 = vrot.lane.b32.xlu0 %v686_v40, %s3637_s16  ;;  %711 = vrot.lane.b32.xlu1 %v685_v22, %s3637_s16  ;;  %v876_v40 = vmul.f32 %v865_v45, %v3925_v23  ;;  %v875_v22 = vmul.f32 %v3851_v47, %v3928_v24 }
 0x148   : > { %717 = vrot.lane.b32.xlu0 %v688_v25, %s3637_s16  ;;  %715 = vrot.lane.b32.xlu1 %v687_v26, %s3637_s16  ;;  %v878_v25 = vmul.f32 %v3851_v47, %v3939_v29  ;;  %v877_v26 = vmul.f32 %v3849_v46, %v3936_v28  ;;  %v958_v47 = vsel %vm957_vm14, %v3855_v49, %v3853_v48 }
 0x149   : > { %v963_v43 = vmul.f32 %v958_v47, %v3890_v4 }
 0x14c   : > { %721 = vrot.lane.b32.xlu0 %v690_v27, %s3637_s16  ;;  %719 = vrot.lane.b32.xlu1 %v689_v30, %s3637_s16 }
 0x150   : > { %725 = vrot.lane.b32.xlu0 %v692_v31, %s3637_s16  ;;  %723 = vrot.lane.b32.xlu1 %v691_v32, %s3637_s16  ;;  %v880_v31 = vmul.f32 %v3849_v46, %v3948_v33  ;;  %v879_v32 = vmul.f32 %v865_v45, %v3951_v34  ;;  %v962_v46 = vmul.f32 %v3855_v49, %v3893_v5 }
 0x154   : > { %729 = vrot.lane.b32.xlu0 %v694_v35, %s3637_s16  ;;  %727 = vrot.lane.b32.xlu1 %v693_v36, %s3637_s16 }
 0x158   : > { %802 = vrot.lane.b32.xlu0 %v777_v37, %s3638_s17  ;;  %800 = vrot.lane.b32.xlu1 %v776_v39, %s3638_s17 }
 0x15c   : > { %806 = vrot.lane.b32.xlu0 %v779_v42, %s3638_s17  ;;  %804 = vrot.lane.b32.xlu1 %v778_v2, %s3638_s17  ;;  %v965_v42 = vmul.f32 %v3855_v49, %v3907_v14  ;;  %v964_v2 = vmul.f32 %v3853_v48, %v3902_v11 }
 0x160   : > { %810 = vrot.lane.b32.xlu0 %v781_v38, %s3638_s17  ;;  %808 = vrot.lane.b32.xlu1 %v780_v3, %s3638_s17 }
 0x164   : > { %814 = vrot.lane.b32.xlu0 %v783_v6, %s3638_s17  ;;  %812 = vrot.lane.b32.xlu1 %v782_v7, %s3638_s17  ;;  %v967_v6 = vmul.f32 %v3853_v48, %v3914_v17  ;;  %v966_v7 = vmul.f32 %v958_v47, %v3917_v18 }
 0x168   : > { %818 = vrot.lane.b32.xlu0 %v785_v10, %s3638_s17  ;;  %816 = vrot.lane.b32.xlu1 %v784_v12, %s3638_s17 }
 0x16c   : > { %822 = vrot.lane.b32.xlu0 %v787_v13, %s3638_s17  ;;  %820 = vrot.lane.b32.xlu1 %v786_v15, %s3638_s17  ;;  %v969_v13 = vmul.f32 %v958_v47, %v3925_v23  ;;  %v968_v15 = vmul.f32 %v3855_v49, %v3928_v24 }
 0x170   : > { %895 = vrot.lane.b32.xlu0 %v870_v16, %s3639_s20  ;;  %893 = vrot.lane.b32.xlu1 %v869_v19, %s3639_s20  ;;  %v971_v19 = vmul.f32 %v3855_v49, %v3939_v29  ;;  %v4166_v49 = vsel %vm1050_vm15, %v3871_v57, %v3873_v58 }
 0x171   : > { %5476 = vst [vmem:[#allocation12_spill] sm:$0xff] %v4166_v49 }
 0x174   : > { %899 = vrot.lane.b32.xlu0 %v872_v44, %s3639_s20  ;;  %897 = vrot.lane.b32.xlu1 %v871_v41, %s3639_s20  ;;  %v970_v44 = vmul.f32 %v3853_v48, %v3936_v28 }
 0x178   : > { %903 = vrot.lane.b32.xlu0 %v874_v20, %s3639_s20  ;;  %901 = vrot.lane.b32.xlu1 %v873_v21, %s3639_s20  ;;  %v973_v21 = vmul.f32 %v3853_v48, %v3948_v33  ;;  %v1055_v48 = vmul.f32 %v3871_v57, %v3893_v5 }
 0x17c   : > { %907 = vrot.lane.b32.xlu0 %v876_v40, %s3639_s20  ;;  %905 = vrot.lane.b32.xlu1 %v875_v22, %s3639_s20  ;;  %v972_v40 = vmul.f32 %v958_v47, %v3951_v34  ;;  %v1058_v47 = vmul.f32 %v3871_v57, %v3907_v14 }
 0x180   : > { %911 = vrot.lane.b32.xlu0 %v878_v25, %s3639_s20  ;;  %909 = vrot.lane.b32.xlu1 %v877_v26, %s3639_s20  ;;  %v1056_v26 = vmul.f32 %v4166_v49, %v3890_v4 }
 0x182   : > { %v4095_v27 = vpop.permute.xlu0 %523  ;;  %v4097_v30 = vpop.permute.xlu1 %521 }
 0x184   : > { %915 = vrot.lane.b32.xlu0 %v880_v31, %s3639_s20  ;;  %913 = vrot.lane.b32.xlu1 %v879_v32, %s3639_s20 }
 0x186   : > { %v4107_v35 = vpop.permute.xlu0 %527  ;;  %v4109_v36 = vpop.permute.xlu1 %525 }
 0x188   : > { %988 = vrot.lane.b32.xlu0 %v963_v43, %s3640_s22  ;;  %986 = vrot.lane.b32.xlu1 %v962_v46, %s3640_s22  ;;  %v1057_v43 = vmul.f32 %v3873_v58, %v3902_v11 }
 0x18a   : > { %v4116_v37 = vpop.permute.xlu0 %531  ;;  %v4118_v39 = vpop.permute.xlu1 %529 }
 0x18c   : > { %992 = vrot.lane.b32.xlu0 %v965_v42, %s3640_s22  ;;  %990 = vrot.lane.b32.xlu1 %v964_v2, %s3640_s22  ;;  %v1060_v2 = vmul.f32 %v3873_v58, %v3914_v17 }
 0x18e   : > { %v4126_v38 = vpop.permute.xlu0 %535  ;;  %v4128_v3 = vpop.permute.xlu1 %533 }
 0x190   : > { %996 = vrot.lane.b32.xlu0 %v967_v6, %s3640_s22  ;;  %994 = vrot.lane.b32.xlu1 %v966_v7, %s3640_s22  ;;  %v1059_v6 = vmul.f32 %v4166_v49, %v3917_v18 }
 0x192   : > { %v4135_v10 = vpop.permute.xlu0 %539  ;;  %v4137_v12 = vpop.permute.xlu1 %537 }
 0x194   : > { %1000 = vrot.lane.b32.xlu0 %v969_v13, %s3640_s22  ;;  %998 = vrot.lane.b32.xlu1 %v968_v15, %s3640_s22  ;;  %v1062_v15 = vmul.f32 %v4166_v49, %v3925_v23 }
 0x196   : > { %v4144_v45 = vpop.permute.xlu0 %543  ;;  %v4146_v16 = vpop.permute.xlu1 %541 }
 0x198   : > { %1004 = vrot.lane.b32.xlu0 %v971_v19, %s3640_s22  ;;  %1002 = vrot.lane.b32.xlu1 %v970_v44, %s3640_s22  ;;  %v1061_v19 = vmul.f32 %v3871_v57, %v3928_v24 }
 0x19a   : > { %v4154_v41 = vpop.permute.xlu0 %616  ;;  %v4156_v20 = vpop.permute.xlu1 %614 }
 0x19c   : > { %1008 = vrot.lane.b32.xlu0 %v973_v21, %s3640_s22  ;;  %1006 = vrot.lane.b32.xlu1 %v972_v40, %s3640_s22  ;;  %v1064_v40 = vmul.f32 %v3871_v57, %v3939_v29 }
 0x19e   : > { %v4168_v22 = vpop.permute.xlu0 %620  ;;  %v4170_v25 = vpop.permute.xlu1 %618 }
 0x1a0   : > { %1081 = vrot.lane.b32.xlu0 %v1056_v26, %s3641_s30  ;;  %1079 = vrot.lane.b32.xlu1 %v1055_v48, %s3641_s30  ;;  %v1063_v26 = vmul.f32 %v3873_v58, %v3936_v28  ;;  %v1495_v48 = vsel %vm1494_vm0, %v3857_v50, %v3859_v51  ;;  %vm1737_vm0 = vcmask 605184  }
 0x1a1   : > { %v1509_v57 = vmul.f32 %v1495_v48, %v3951_v34  ;;  %v1503_v60 = vmul.f32 %v1495_v48, %v3917_v18 }
 0x1a2   : > { %v4178_v31 = vpop.permute.xlu0 %624  ;;  %v4180_v32 = vpop.permute.xlu1 %622 }
 0x1a4   : > { %1085 = vrot.lane.b32.xlu0 %v1058_v47, %s3641_s30  ;;  %1083 = vrot.lane.b32.xlu1 %v1057_v43, %s3641_s30 }
 0x1a6   : > { %v4188_v46 = vpop.permute.xlu0 %628  ;;  %v4190_v42 = vpop.permute.xlu1 %626 }
 0x1a8   : > { %1089 = vrot.lane.b32.xlu0 %v1060_v2, %s3641_s30  ;;  %1087 = vrot.lane.b32.xlu1 %v1059_v6, %s3641_s30  ;;  %v1510_v2 = vmul.f32 %v3859_v51, %v3948_v33 }
 0x1aa   : > { %v4198_v7 = vpop.permute.xlu0 %632  ;;  %v4200_v13 = vpop.permute.xlu1 %630 }
 0x1ac   : > { %1093 = vrot.lane.b32.xlu0 %v1062_v15, %s3641_s30  ;;  %1091 = vrot.lane.b32.xlu1 %v1061_v19, %s3641_s30  ;;  %v1506_v19 = vmul.f32 %v1495_v48, %v3925_v23 }
 0x1ae   : > { %v4208_v44 = vpop.permute.xlu0 %636  ;;  %v4210_v21 = vpop.permute.xlu1 %634 }
 0x1b0   : > { %1097 = vrot.lane.b32.xlu0 %v1064_v40, %s3641_s30  ;;  %1095 = vrot.lane.b32.xlu1 %v1063_v26, %s3641_s30  ;;  %v1508_v40 = vmul.f32 %v3857_v50, %v3939_v29  ;;  %v3543_v26 = vld [vmem:[%s5447_s4 + $0x23] ss:$8 sm:$0x3] }
 0x1b2   : > { %v4220_v47 = vpop.permute.xlu0 %709  ;;  %v4222_v43 = vpop.permute.xlu1 %707 }
 0x1b4   : > { %1545 = vrot.lane.b32.xlu0 %v1510_v2, %s3642_s8  ;;  %1543 = vrot.lane.b32.xlu1 %v1509_v57, %s3642_s8  ;;  %v1505_v2 = vmul.f32 %v3857_v50, %v3928_v24  ;;  %v1507_v57 = vmul.f32 %v3859_v51, %v3936_v28 }
 0x1b6   : > { %v714_v6 = vpop.permute.xlu0 %713  ;;  %v712_v15 = vpop.permute.xlu1 %711 }
 0x1b8   : > { %1537 = vrot.lane.b32.xlu0 %v1506_v19, %s3642_s8  ;;  %1541 = vrot.lane.b32.xlu1 %v1508_v40, %s3642_s8  ;;  %v2383_v19 = vrot.slane %v3543_v26, %v3714_v8  ;;  %v2379_v40 = vrot.slane %v3543_v26, %v3716_v9  ;;  %v1500_v26 = vmul.f32 %v1495_v48, %v3890_v4 }
 0x1b9   : > { %v1499_v48 = vmul.f32 %v3857_v50, %v3893_v5 }
 0x1ba   : > { %v718_v58 = vpop.permute.xlu0 %717  ;;  %v716_v49 = vpop.permute.xlu1 %715 }
 0x1bc   : > { %1535 = vrot.lane.b32.xlu0 %v1505_v2, %s3642_s8  ;;  %1539 = vrot.lane.b32.xlu1 %v1507_v57, %s3642_s8 }
 0x1be   : > { %v722_v1 = vpop.permute.xlu0 %721  ;;  %v720_v0 = vpop.permute.xlu1 %719 }
 0x1c0   : > { %2386 = vrot.lane.b32.xlu0 %v2383_v19, %s3620_s15  ;;  %2384 = vrot.lane.b32.xlu1 %v2379_v40, %s3620_s15  ;;  %v1502_v19 = vmul.f32 %v3857_v50, %v3907_v14  ;;  %v733_v50 = vsel %vm731_vm1, %v4220_v47, %v712_v15  ;;  %s3643_s15 = smov 63   ;;  %v645_v15 = vsel %vm638_vm3, %v4198_v7, %v4210_v21 }
 0x1c1   : > { %v642_v7 = vsel %vm638_vm3, %v4180_v32, %v4178_v31  ;;  %v639_v31 = vsel %vm638_vm3, %v4156_v20, %v4154_v41  ;;  %v551_v20 = vsel %vm545_vm4, %v4126_v38, %v4137_v12  ;;  %v549_v12 = vsel %vm545_vm4, %v4118_v39, %v4116_v37 }
 0x1c2   : > { %v726_v63 = vpop.permute.xlu0 %725  ;;  %v724_v62 = vpop.permute.xlu1 %723 }
 0x1c4   : > { %1533 = vrot.lane.b32.xlu0 %v1504_v61, %s3642_s8  ;;  %1531 = vrot.lane.b32.xlu1 %v1503_v60, %s3642_s8  ;;  %v737_v60 = vsel %vm731_vm1, %v722_v1, %v724_v62  ;;  %v734_v62 = vsel %vm731_vm1, %v714_v6, %v716_v49  ;;  %v646_v6 = vsel %vm638_vm3, %v4210_v21, %v4208_v44 }
 0x1c5   : > { %v643_v44 = vsel %vm638_vm3, %v4190_v42, %v4188_v46 }
 0x1c6   : > { %v730_v2 = vpop.permute.xlu0 %729  ;;  %v728_v57 = vpop.permute.xlu1 %727 }
 0x1c7   : > { %v739_v40 = vsel %vm731_vm1, %v728_v57, %v730_v2  ;;  %v738_v56 = vsel %vm731_vm1, %v726_v63, %v728_v57  ;;  %v736_v2 = vsel %vm731_vm1, %v720_v0, %v722_v1  ;;  %v1501_v63 = vmul.f32 %v3859_v51, %v3902_v11 }
 0x1c8   : > { %1525 = vrot.lane.b32.xlu0 %v1500_v26, %s3642_s8  ;;  %1529 = vrot.lane.b32.xlu1 %v1502_v19, %s3642_s8  ;;  %v1417_v51 = vmul.f32 %v3863_v53, %v3948_v33  ;;  %v1402_v1 = vsel %vm1401_vm2, %v3861_v52, %v3863_v53  ;;  %vm1454_vm2 = vcmask 515072  }
 0x1c9   : > { %2069 = vmatprep.subr.mxu1 %v739_v40  ;;  %v1413_v19 = vmul.f32 %v1402_v1, %v3925_v23  ;;  %v1415_v40 = vmul.f32 %v3861_v52, %v3939_v29  ;;  %v1407_v37 = vmul.f32 %v1402_v1, %v3890_v4 }
 0x1ca   : > { %2070 = vmatpush1.msra.mxu1 %v738_v56  ;;  %v4259_v61 = vpop.permute.xlu0 %802  ;;  %v4262_v59 = vpop.permute.xlu1 %800  ;;  %v735_v56 = vsel %vm731_vm1, %v716_v49, %v718_v58  ;;  %v732_v58 = vsel %vm731_vm1, %v4222_v43, %v4220_v47  ;;  %v1416_v49 = vmul.f32 %v1402_v1, %v3951_v34  ;;  %v644_v43 = vsel %vm638_vm3, %v4188_v46, %v4200_v13 }
 0x1cb   : > { %5477 = vst [vmem:[#allocation13_spill] sm:$0xff] %v4259_v61  ;;  %5478 = vst [vmem:[#allocation14_spill] sm:$0xff] %v4262_v59  ;;  %2071 = vmatprep.subr.mxu1 %v737_v60  ;;  %v641_v13 = vsel %vm638_vm3, %v4168_v22, %v4180_v32  ;;  %v640_v46 = vsel %vm638_vm3, %v4154_v41, %v4170_v25  ;;  %v1412_v60 = vmul.f32 %v3861_v52, %v3928_v24  ;;  %v5498_v59 = vld [vmem:[#allocation7_spill] sm:$0xff] }
 0x1cc   : > { %2072 = vmatpush1.msra.mxu1 %v736_v2  ;;  %1523 = vrot.lane.b32.xlu0 %v1499_v48, %s3642_s8  ;;  %v1414_v22 = vmul.f32 %v3863_v53, %v3936_v28  ;;  %v553_v25 = vsel %vm545_vm4, %v4146_v16, %v4144_v45  ;;  %v552_v32 = vsel %vm545_vm4, %v4135_v10, %v4146_v16  ;;  %v449_v45 = vld [vmem:[%s5447_s4] ss:$8 sm:$0x3] }
 0x1cd   : > { %1527 = vrot.lane.b32.xlu1 %v1501_v63, %s3642_s8  ;;  %2073 = vmatprep.subr.mxu1 %v735_v56  ;;  %v1411_v2 = vmul.f32 %v3863_v53, %v3914_v17  ;;  %v550_v10 = vsel %vm545_vm4, %v4128_v3, %v4126_v38  ;;  %v1410_v16 = vmul.f32 %v1402_v1, %v3917_v18 }
 0x1ce   : > { %2074 = vmatpush1.msra.mxu1 %v734_v62  ;;  %v4273_v57 = vpop.permute.xlu0 %806  ;;  %v4277_v0 = vpop.permute.xlu1 %804  ;;  %v548_v63 = vsel %vm545_vm4, %v4107_v35, %v4118_v39  ;;  %v458_v56 = vrot.slane %v449_v45, %v3714_v8  ;;  %v547_v3 = vsel %vm545_vm4, %v4095_v27, %v4109_v36  ;;  %v546_v35 = vsel %vm545_vm4, %v4097_v30, %v4095_v27 }
 0x1cf   : > { %5479 = vst [vmem:[#allocation15_spill] sm:$0xff] %v4273_v57  ;;  %5480 = vst [vmem:[#allocation16_spill] sm:$0xff] %v4277_v0  ;;  %2075 = vmatprep.subr.mxu1 %v733_v50  ;;  %v454_v50 = vrot.slane %v449_v45, %v3716_v9  ;;  %v1409_v39 = vmul.f32 %v3861_v52, %v3907_v14  ;;  %v1406_v30 = vmul.f32 %v3861_v52, %v3893_v5 }
 0x1d0   : > { %2076 = vmatpush1.msra.mxu1 %v732_v58  ;;  %1452 = vrot.lane.b32.xlu0 %v1417_v51, %s3643_s15  ;;  %v468_v51 = vmul.f32 %v458_v56, %v3951_v34  ;;  %v466_v1 = vmul.f32 %v458_v56, %v3925_v23  ;;  %v1322_v45 = vmul.f32 %v3867_v55, %v3936_v28 }
 0x1d1   : > { %1450 = vrot.lane.b32.xlu1 %v1416_v49, %s3643_s15  ;;  %2077 = vmatprep.subr.mxu1 %v646_v6  ;;  %v467_v36 = vmul.f32 %v454_v50, %v3939_v29  ;;  %v465_v27 = vmul.f32 %v454_v50, %v3928_v24  ;;  %v1408_v6 = vmul.f32 %v3863_v53, %v3902_v11 }
 0x1d2   : > { %2078 = vmatpush1.msra.mxu1 %v645_v15  ;;  %v4295_v47 = vpop.permute.xlu0 %810  ;;  %v4300_v26 = vpop.permute.xlu1 %808  ;;  %v464_v15 = vmul.f32 %v458_v56, %v3917_v18  ;;  %v461_v53 = vmul.f32 %v454_v50, %v3893_v5  ;;  %v1844_v0 = vmul.f32 %v5498_v59, %v3939_v29 }
 0x1d3   : > { %5481 = vst [vmem:[#allocation17_spill] sm:$0xff] %v4295_v47  ;;  %5482 = vst [vmem:[#allocation18_spill] sm:$0xff] %v4300_v26  ;;  %2079 = vmatprep.subr.mxu1 %v644_v43  ;;  %v463_v43 = vmul.f32 %v454_v50, %v3907_v14  ;;  %v1841_v26 = vmul.f32 %v5498_v59, %v3928_v24 }
 0x1d4   : > { %2080 = vmatpush1.msra.mxu1 %v643_v44  ;;  %1444 = vrot.lane.b32.xlu0 %v1413_v19, %s3643_s15  ;;  %v462_v19 = vmul.f32 %v458_v56, %v3890_v4 }
 0x1d5   : > { %1448 = vrot.lane.b32.xlu1 %v1415_v40, %s3643_s15  ;;  %2081 = vmatprep.subr.mxu1 %v642_v7  ;;  %v1325_v40 = vmul.f32 %v3867_v55, %v3948_v33  ;;  %v1310_v7 = vsel %vm1309_vm5, %v3865_v54, %v3867_v55 }
 0x1d6   : > { %2082 = vmatpush1.msra.mxu1 %v641_v13  ;;  %v4316_v21 = vpop.permute.xlu0 %814  ;;  %v4321_v42 = vpop.permute.xlu1 %812  ;;  %v1324_v13 = vmul.f32 %v1310_v7, %v3951_v34  ;;  %v1318_v50 = vmul.f32 %v1310_v7, %v3917_v18 }
 0x1d7   : > { %5483 = vst [vmem:[#allocation19_spill] sm:$0xff] %v4316_v21  ;;  %5484 = vst [vmem:[#allocation20_spill] sm:$0xff] %v4321_v42  ;;  %2083 = vmatprep.subr.mxu1 %v640_v46 }
 0x1d8   : > { %2084 = vmatpush1.msra.mxu1 %v639_v31  ;;  %1442 = vrot.lane.b32.xlu0 %v1412_v60, %s3643_s15  ;;  %v1321_v31 = vmul.f32 %v1310_v7, %v3925_v23 }
 0x1d9   : > { %1446 = vrot.lane.b32.xlu1 %v1414_v22, %s3643_s15  ;;  %2085 = vmatprep.subr.mxu1 %v553_v25  ;;  %v1323_v22 = vmul.f32 %v3865_v54, %v3939_v29  ;;  %v3541_v25 = vld [vmem:[%s5447_s4 + $0x21] ss:$8 sm:$0x3] }
 0x1da   : > { %2086 = vmatpush1.msra.mxu1 %v552_v32  ;;  %v4338_v41 = vpop.permute.xlu0 %818  ;;  %v4343_v48 = vpop.permute.xlu1 %816 }
 0x1db   : > { %5485 = vst [vmem:[#allocation21_spill] sm:$0xff] %v4338_v41  ;;  %5486 = vst [vmem:[#allocation22_spill] sm:$0xff] %v4343_v48  ;;  %2087 = vmatprep.subr.mxu1 %v551_v20 }
 0x1dc   : > { %2088 = vmatpush1.msra.mxu1 %v550_v10  ;;  %1440 = vrot.lane.b32.xlu0 %v1411_v2, %s3643_s15  ;;  %v1320_v2 = vmul.f32 %v3865_v54, %v3928_v24  ;;  %v2261_v10 = vrot.slane %v3541_v25, %v3714_v8 }
 0x1dd   : > { %1438 = vrot.lane.b32.xlu1 %v1410_v16, %s3643_s15  ;;  %2089 = vmatprep.subr.mxu1 %v549_v12  ;;  %v2257_v16 = vrot.slane %v3541_v25, %v3716_v9  ;;  %v3540_v25 = vld [vmem:[%s5447_s4 + $0x20] ss:$8 sm:$0x3] }
 0x1de   : > { %2090 = vmatpush1.msra.mxu1 %v548_v63  ;;  %v4363_v38 = vpop.permute.xlu0 %822  ;;  %v4368_v62 = vpop.permute.xlu1 %820 }
 0x1df   : > { %5487 = vst [vmem:[#allocation23_spill] sm:$0xff] %v4363_v38  ;;  %5488 = vst [vmem:[#allocation24_spill] sm:$0xff] %v4368_v62  ;;  %2091 = vmatprep.subr.mxu1 %v547_v3 }
 0x1e0   : > { %2092 = vmatpush1.msra.mxu1 %v546_v35  ;;  %1432 = vrot.lane.b32.xlu0 %v1407_v37, %s3643_s15  ;;  %v1319_v37 = vmul.f32 %v3867_v55, %v3914_v17 }
 0x1e1   : > { %1436 = vrot.lane.b32.xlu1 %v1409_v39, %s3643_s15  ;;  %2093 = vmatprep.subr.mxu1 %v468_v51  ;;  %v1315_v51 = vmul.f32 %v1310_v7, %v3890_v4 }
 0x1e2   : > { %2094 = vmatpush1.msra.mxu1 %v467_v36  ;;  %v4382_v58 = vpop.permute.xlu0 %895  ;;  %v4384_v49 = vpop.permute.xlu1 %893  ;;  %v1317_v36 = vmul.f32 %v3865_v54, %v3907_v14 }
 0x1e3   : > { %5489 = vst [vmem:[#allocation25_spill] sm:$0xff] %v4382_v58  ;;  %5490 = vst [vmem:[#allocation26_spill] sm:$0xff] %v4384_v49  ;;  %2095 = vmatprep.subr.mxu1 %v466_v1 }
 0x1e4   : > { %2096 = vmatpush1.msra.mxu1 %v465_v27  ;;  %1430 = vrot.lane.b32.xlu0 %v1406_v30, %s3643_s15  ;;  %v1314_v30 = vmul.f32 %v3865_v54, %v3893_v5 }
 0x1e5   : > { %1434 = vrot.lane.b32.xlu1 %v1408_v6, %s3643_s15  ;;  %2097 = vmatprep.subr.mxu1 %v464_v15  ;;  %s3644_s15 = smov 82   ;;  %v1316_v6 = vmul.f32 %v3867_v55, %v3902_v11 }
 0x1e6   : > { %2098 = vmatpush1.msra.mxu1 %v463_v43  ;;  %v4396_v44 = vpop.permute.xlu0 %899  ;;  %v4398_v52 = vpop.permute.xlu1 %897 }
 0x1e7   : > { %5491 = vst [vmem:[#allocation27_spill] sm:$0xff] %v4396_v44  ;;  %5492 = vst [vmem:[#allocation28_spill] sm:$0xff] %v4398_v52  ;;  %2099 = vmatprep.subr.mxu1 %v462_v19  ;;  %v5495_v19 = vld [vmem:[#allocation5_spill] sm:$0xff] }
 0x1e8   : > { %2100 = vmatpush1.msra.mxu1 %v461_v53  ;;  %1360 = vrot.lane.b32.xlu0 %v1325_v40, %s3628_s23  ;;  %v1231_v53 = vmul.f32 %v5495_v19, %v3948_v33  ;;  %v5496_v40 = vld [vmem:[#allocation3_spill] sm:$0xff] }
 0x1e9   : > { %1358 = vrot.lane.b32.xlu1 %v1324_v13, %s3628_s23  ;;  %v1216_v7 = vsel %vm1215_vm6, %v5496_v40, %v5495_v19 }
 0x1ea   : > { %v4409_v46 = vpop.permute.xlu0 %903  ;;  %v4411_v60 = vpop.permute.xlu1 %901  ;;  %v1230_v54 = vmul.f32 %v1216_v7, %v3951_v34 }
 0x1eb   : > { %5493 = vst [vmem:[#allocation29_spill] sm:$0xff] %v4409_v46  ;;  %5494 = vst [vmem:[#allocation30_spill] sm:$0xff] %v4411_v60 }
 0x1ec   : > { %1352 = vrot.lane.b32.xlu0 %v1321_v31, %s3628_s23  ;;  %v1227_v31 = vmul.f32 %v1216_v7, %v3925_v23 }
 0x1ed   : > { %1356 = vrot.lane.b32.xlu1 %v1323_v22, %s3628_s23  ;;  %v1229_v22 = vmul.f32 %v5496_v40, %v3939_v29 }
 0x1ee   : > { %v4421_v32 = vpop.permute.xlu0 %907  ;;  %v4423_v20 = vpop.permute.xlu1 %905 }
 0x1f0   : > { %1350 = vrot.lane.b32.xlu0 %v1320_v2, %s3628_s23 }
 0x1f1   : > { %1354 = vrot.lane.b32.xlu1 %v1322_v45, %s3628_s23 }
 0x1f2   : > { %v4433_v12 = vpop.permute.xlu0 %911  ;;  %v4435_v63 = vpop.permute.xlu1 %909 }
 0x1f4   : > { %2264 = vrot.lane.b32.xlu0 %v2261_v10, %s3644_s15  ;;  %v1226_v10 = vmul.f32 %v5496_v40, %v3928_v24 }
 0x1f5   : > { %2262 = vrot.lane.b32.xlu1 %v2257_v16, %s3644_s15  ;;  %v1228_v16 = vmul.f32 %v5495_v19, %v3936_v28 }
 0x1f6   : > { %v4437_v56 = vpop.permute.xlu0 %915  ;;  %v4439_v3 = vpop.permute.xlu1 %913 }
 0x1f8   : > { %1348 = vrot.lane.b32.xlu0 %v1319_v37, %s3628_s23  ;;  %v2168_v37 = vrot.slane %v3540_v25, %v3714_v8 }
 0x1f9   : > { %1346 = vrot.lane.b32.xlu1 %v1318_v50, %s3628_s23  ;;  %v2164_v50 = vrot.slane %v3540_v25, %v3716_v9  ;;  %v1221_v25 = vmul.f32 %v1216_v7, %v3890_v4 }
 0x1fa   : > { %v4446_v35 = vpop.permute.xlu0 %988  ;;  %v4448_v39 = vpop.permute.xlu1 %986 }
 0x1fc   : > { %1340 = vrot.lane.b32.xlu0 %v1315_v51, %s3628_s23 }
 0x1fd   : > { %1344 = vrot.lane.b32.xlu1 %v1317_v36, %s3628_s23 }
 0x1fe   : > { %v4455_v1 = vpop.permute.xlu0 %992  ;;  %v4457_v27 = vpop.permute.xlu1 %990 }
 0x200   : > { %1338 = vrot.lane.b32.xlu0 %v1314_v30, %s3628_s23 }
 0x201   : > { %1342 = vrot.lane.b32.xlu1 %v1316_v6, %s3628_s23 }
 0x202   : > { %v4465_v15 = vpop.permute.xlu0 %996  ;;  %v4467_v43 = vpop.permute.xlu1 %994 }
 0x204   : > { %1266 = vrot.lane.b32.xlu0 %v1231_v53, %s3645_s12  ;;  %v1225_v53 = vmul.f32 %v5495_v19, %v3914_v17 }
 0x205   : > { %1264 = vrot.lane.b32.xlu1 %v1230_v54, %s3645_s12  ;;  %v1224_v54 = vmul.f32 %v1216_v7, %v3917_v18 }
 0x206   : > { %v4477_v55 = vpop.permute.xlu0 %1000  ;;  %v4479_v13 = vpop.permute.xlu1 %998 }
 0x208   : > { %1258 = vrot.lane.b32.xlu0 %v1227_v31, %s3645_s12 }
 0x209   : > { %1262 = vrot.lane.b32.xlu1 %v1229_v22, %s3645_s12 }
 0x20a   : > { %v4489_v2 = vpop.permute.xlu0 %1004  ;;  %v4491_v45 = vpop.permute.xlu1 %1002 }
 0x20c   : > { %1256 = vrot.lane.b32.xlu0 %v1226_v10, %s3645_s12  ;;  %v1223_v10 = vmul.f32 %v5496_v40, %v3907_v14 }
 0x20d   : > { %1260 = vrot.lane.b32.xlu1 %v1228_v16, %s3645_s12 }
 0x20e   : > { %v4501_v51 = vpop.permute.xlu0 %1008  ;;  %v4503_v36 = vpop.permute.xlu1 %1006 }
 0x210   : > { %2171 = vrot.lane.b32.xlu0 %v2168_v37, %s3646_s10 }
 0x211   : > { %2169 = vrot.lane.b32.xlu1 %v2164_v50, %s3646_s10  ;;  %v1220_v50 = vmul.f32 %v5496_v40, %v3893_v5 }
 0x212   : > { %v4505_v30 = vpop.permute.xlu0 %1081  ;;  %v4507_v6 = vpop.permute.xlu1 %1079 }
 0x214   : > { %1254 = vrot.lane.b32.xlu0 %v1225_v53, %s3645_s12  ;;  %v1222_v53 = vmul.f32 %v5495_v19, %v3902_v11 }
 0x215   : > { %1252 = vrot.lane.b32.xlu1 %v1224_v54, %s3645_s12 }
 0x216   : > { %v4514_v31 = vpop.permute.xlu0 %1085  ;;  %v4516_v22 = vpop.permute.xlu1 %1083 }
 0x218   : > { %1246 = vrot.lane.b32.xlu0 %v1221_v25, %s3645_s12  ;;  %v5497_v25 = vld [vmem:[#allocation6_spill] sm:$0xff] }
 0x219   : > { %1250 = vrot.lane.b32.xlu1 %v1223_v10, %s3645_s12  ;;  %v1846_v10 = vmul.f32 %v5497_v25, %v3948_v33  ;;  %v1831_v61 = vsel %vm1830_vm7, %v5498_v59, %v5497_v25  ;;  %v1843_v47 = vmul.f32 %v5497_v25, %v3936_v28  ;;  %vm1268_vm7 = vcmask 900096  }
 0x21a   : > { %v4523_v16 = vpop.permute.xlu0 %1089  ;;  %v4525_v37 = vpop.permute.xlu1 %1087  ;;  %v1845_v40 = vmul.f32 %v1831_v61, %v3951_v34 }
 0x21c   : > { %1244 = vrot.lane.b32.xlu0 %v1220_v50, %s3645_s12 }
 0x21d   : > { %1248 = vrot.lane.b32.xlu1 %v1222_v53, %s3645_s12  ;;  %v1842_v53 = vmul.f32 %v1831_v61, %v3925_v23 }
 0x21e   : > { %v4533_v7 = vpop.permute.xlu0 %1093  ;;  %v4535_v54 = vpop.permute.xlu1 %1091 }
 0x220   : > { %1881 = vrot.lane.b32.xlu0 %v1846_v10, %s3647_s11  ;;  %v3547_v10 = vld [vmem:[%s5447_s4 + $0x27] ss:$8 sm:$0x3] }
 0x221   : > { %1879 = vrot.lane.b32.xlu1 %v1845_v40, %s3647_s11 }
 0x222   : > { %v4544_v19 = vpop.permute.xlu0 %1097  ;;  %v4546_v50 = vpop.permute.xlu1 %1095 }
 0x224   : > { %1873 = vrot.lane.b32.xlu0 %v1842_v53, %s3647_s11  ;;  %v2699_v53 = vrot.slane %v3547_v10, %v3714_v8 }
 0x225   : > { %1877 = vrot.lane.b32.xlu1 %v1844_v0, %s3647_s11  ;;  %v2695_v0 = vrot.slane %v3547_v10, %v3716_v9 }
 0x226   : > { %v1546_v57 = vpop.permute.xlu0 %1545  ;;  %v1544_v40 = vpop.permute.xlu1 %1543 }
 0x227   : > { %v1555_v42 = vsel %vm1547_vm8, %v1544_v40, %v1546_v57 }
 0x228   : > { %1871 = vrot.lane.b32.xlu0 %v1841_v26, %s3647_s11  ;;  %1980 = vmatprep.subr.mxu0 %v1555_v42  ;;  %v1840_v26 = vmul.f32 %v5497_v25, %v3914_v17  ;;  %v1839_v42 = vmul.f32 %v1831_v61, %v3917_v18 }
 0x229   : > { %1875 = vrot.lane.b32.xlu1 %v1843_v47, %s3647_s11 }
 0x22a   : > { %v1538_v21 = vpop.permute.xlu0 %1537  ;;  %v1542_v48 = vpop.permute.xlu1 %1541 }
 0x22b   : > { %v1554_v41 = vsel %vm1547_vm8, %v1542_v48, %v1544_v40  ;;  %v1836_v40 = vmul.f32 %v1831_v61, %v3890_v4 }
 0x22c   : > { %2702 = vrot.lane.b32.xlu0 %v2699_v53, %s3624_s29  ;;  %1981 = vmatpush1.msra.mxu0 %v1554_v41  ;;  %v1838_v53 = vmul.f32 %v5498_v59, %v3907_v14 }
 0x22d   : > { %2700 = vrot.lane.b32.xlu1 %v2695_v0, %s3624_s29  ;;  %v1835_v0 = vmul.f32 %v5498_v59, %v3893_v5  ;;  %s3648_s29 = smov 54  }
 0x22e   : > { %v1536_v62 = vpop.permute.xlu0 %1535  ;;  %v1540_v57 = vpop.permute.xlu1 %1539 }
 0x22f   : > { %v1553_v47 = vsel %vm1547_vm8, %v1538_v21, %v1540_v57  ;;  %v1552_v10 = vsel %vm1547_vm8, %v1536_v62, %v1538_v21  ;;  %v1837_v57 = vmul.f32 %v5497_v25, %v3902_v11 }
 0x230   : > { %1869 = vrot.lane.b32.xlu0 %v1840_v26, %s3647_s11  ;;  %1982 = vmatprep.subr.mxu0 %v1553_v47  ;;  %v5499_v47 = vld [vmem:[#allocation8_spill] sm:$0xff] }
 0x231   : > { %1867 = vrot.lane.b32.xlu1 %v1839_v42, %s3647_s11  ;;  %1983 = vmatpush1.msra.mxu0 %v1552_v10  ;;  %v1753_v10 = vmul.f32 %v5499_v47, %v3948_v33 }
 0x232   : > { %v4575_v41 = vpop.permute.xlu0 %2386  ;;  %v4577_v48 = vpop.permute.xlu1 %2384 }
 0x234   : > { %1861 = vrot.lane.b32.xlu0 %v1836_v40, %s3647_s11  ;;  %v5500_v40 = vld [vmem:[#allocation9_spill] sm:$0xff] }
 0x235   : > { %1865 = vrot.lane.b32.xlu1 %v1838_v53, %s3647_s11  ;;  %v1738_v53 = vsel %vm1737_vm0, %v5500_v40, %v5499_v47  ;;  %vm2266_vm0 = vcmask 670720  }
 0x236   : > { %v1534_v21 = vpop.permute.xlu0 %1533  ;;  %v1532_v62 = vpop.permute.xlu1 %1531  ;;  %v1752_v59 = vmul.f32 %v1738_v53, %v3951_v34 }
 0x237   : > { %v1551_v26 = vsel %vm1547_vm8, %v1532_v62, %v1534_v21 }
 0x238   : > { %1859 = vrot.lane.b32.xlu0 %v1835_v0, %s3647_s11  ;;  %1984 = vmatprep.subr.mxu0 %v1551_v26  ;;  %v1749_v0 = vmul.f32 %v1738_v53, %v3925_v23  ;;  %v1751_v26 = vmul.f32 %v5500_v40, %v3939_v29 }
 0x239   : > { %1863 = vrot.lane.b32.xlu1 %v1837_v57, %s3647_s11 }
 0x23a   : > { %v1526_v61 = vpop.permute.xlu0 %1525  ;;  %v1530_v42 = vpop.permute.xlu1 %1529 }
 0x23b   : > { %v1550_v25 = vsel %vm1547_vm8, %v1530_v42, %v1532_v62  ;;  %v3546_v62 = vld [vmem:[%s5447_s4 + $0x26] ss:$8 sm:$0x3] }
 0x23c   : > { %1788 = vrot.lane.b32.xlu0 %v1753_v10, %s3648_s29  ;;  %1985 = vmatpush1.msra.mxu0 %v1550_v25  ;;  %v1748_v10 = vmul.f32 %v5500_v40, %v3928_v24  ;;  %v1750_v25 = vmul.f32 %v5499_v47, %v3936_v28 }
 0x23d   : > { %1786 = vrot.lane.b32.xlu1 %v1752_v59, %s3648_s29 }
 0x23e   : > { %v1524_v21 = vpop.permute.xlu0 %1523 }
 0x23f   : > { %v1528_v57 = vpop.permute.xlu1 %1527  ;;  %v1548_v38 = vsel %vm1547_vm8, %v1524_v21, %v1526_v61  ;;  %v2616_v21 = vrot.slane %v3546_v62, %v3716_v9 }
 0x240   : > { %1780 = vrot.lane.b32.xlu0 %v1749_v0, %s3648_s29  ;;  %v1549_v49 = vsel %vm1547_vm8, %v1526_v61, %v1528_v57  ;;  %vm1587_vm8 = vcmask 588800  }
 0x241   : > { %1784 = vrot.lane.b32.xlu1 %v1751_v26, %s3648_s29  ;;  %1986 = vmatprep.subr.mxu0 %v1549_v49  ;;  %v2620_v49 = vrot.slane %v3546_v62, %v3714_v8  ;;  %v3550_v26 = vld [vmem:[%s5447_s4 + $0x32] ss:$8 sm:$0x3]  ;;  %v1746_v62 = vmul.f32 %v1738_v53, %v3917_v18 }
 0x242   : > { %1987 = vmatpush1.msra.mxu0 %v1548_v38  ;;  %v1453_v42 = vpop.permute.xlu0 %1452 }
 0x243   : > { %v1451_v59 = vpop.permute.xlu1 %1450 }
 0x244   : > { %1778 = vrot.lane.b32.xlu0 %v1748_v10, %s3648_s29  ;;  %v1462_v61 = vsel %vm1454_vm2, %v1451_v59, %v1453_v42  ;;  %v1747_v10 = vmul.f32 %v5499_v47, %v3914_v17 }
 0x245   : > { %1782 = vrot.lane.b32.xlu1 %v1750_v25, %s3648_s29  ;;  %1988 = vmatprep.subr.mxu0 %v1462_v61 }
 0x246   : > { %v1445_v38 = vpop.permute.xlu0 %1444 }
 0x247   : > { %v1449_v0 = vpop.permute.xlu1 %1448 }
 0x248   : > { %2623 = vrot.lane.b32.xlu0 %v2620_v49, %s3623_s26  ;;  %v1461_v57 = vsel %vm1454_vm2, %v1449_v0, %v1451_v59  ;;  %v3101_v49 = vrot.slane %v3550_v26, %v3716_v9 }
 0x249   : > { %2621 = vrot.lane.b32.xlu1 %v2616_v21, %s3623_s26  ;;  %1989 = vmatpush1.msra.mxu0 %v1461_v57  ;;  %v1745_v57 = vmul.f32 %v5500_v40, %v3907_v14  ;;  %s3649_s26 = smov 55  }
 0x24a   : > { %v1443_v42 = vpop.permute.xlu0 %1442 }
 0x24b   : > { %v1447_v25 = vpop.permute.xlu1 %1446  ;;  %v1459_v61 = vsel %vm1454_vm2, %v1443_v42, %v1445_v38 }
 0x24c   : > { %1776 = vrot.lane.b32.xlu0 %v1747_v10, %s3648_s29  ;;  %v1460_v59 = vsel %vm1454_vm2, %v1445_v38, %v1447_v25  ;;  %v3105_v38 = vrot.slane %v3550_v26, %v3714_v8  ;;  %v1743_v10 = vmul.f32 %v1738_v53, %v3890_v4 }
 0x24d   : > { %1774 = vrot.lane.b32.xlu1 %v1746_v62, %s3648_s29  ;;  %1990 = vmatprep.subr.mxu0 %v1460_v59  ;;  %v1742_v59 = vmul.f32 %v5500_v40, %v3893_v5 }
 0x24e   : > { %1991 = vmatpush1.msra.mxu0 %v1459_v61  ;;  %v1441_v21 = vpop.permute.xlu0 %1440 }
 0x24f   : > { %v1439_v0 = vpop.permute.xlu1 %1438 }
 0x250   : > { %3106 = vrot.lane.b32.xlu0 %v3101_v49, %s3629_s27  ;;  %v1458_v58 = vsel %vm1454_vm2, %v1439_v0, %v1441_v21 }
 0x251   : > { %1772 = vrot.lane.b32.xlu1 %v1745_v57, %s3648_s29  ;;  %1992 = vmatprep.subr.mxu0 %v1458_v58  ;;  %v1744_v58 = vmul.f32 %v5499_v47, %v3902_v11 }
 0x252   : > { %v1433_v42 = vpop.permute.xlu0 %1432 }
 0x253   : > { %v1437_v25 = vpop.permute.xlu1 %1436 }
 0x254   : > { %1768 = vrot.lane.b32.xlu0 %v1743_v10, %s3648_s29  ;;  %v1457_v62 = vsel %vm1454_vm2, %v1437_v25, %v1439_v0 }
 0x255   : > { %3108 = vrot.lane.b32.xlu1 %v3105_v38, %s3629_s27  ;;  %1993 = vmatpush1.msra.mxu0 %v1457_v62 }
 0x256   : > { %v1431_v61 = vpop.permute.xlu0 %1430 }
 0x257   : > { %v1435_v49 = vpop.permute.xlu1 %1434  ;;  %v1455_v26 = vsel %vm1454_vm2, %v1431_v61, %v1433_v42 }
 0x258   : > { %1766 = vrot.lane.b32.xlu0 %v1742_v59, %s3648_s29  ;;  %v1456_v53 = vsel %vm1454_vm2, %v1433_v42, %v1435_v49  ;;  %v3545_v42 = vld [vmem:[%s5447_s4 + $0x25] ss:$8 sm:$0x3]  ;;  %vm1790_vm2 = vcmask 441344  }
 0x259   : > { %1770 = vrot.lane.b32.xlu1 %v1744_v58, %s3648_s29  ;;  %1994 = vmatprep.subr.mxu0 %v1456_v53  ;;  %v2541_v59 = vrot.slane %v3545_v42, %v3714_v8  ;;  %v2537_v49 = vrot.slane %v3545_v42, %v3716_v9  ;;  %v3549_v53 = vld [vmem:[%s5447_s4 + $0x31] ss:$8 sm:$0x3] }
 0x25a   : > { %1995 = vmatpush1.msra.mxu0 %v1455_v26  ;;  %v1361_v21 = vpop.permute.xlu0 %1360 }
 0x25b   : > { %v1359_v0 = vpop.permute.xlu1 %1358 }
 0x25c   : > { %1695 = vrot.lane.b32.xlu0 %v3948_v33, %s3649_s26  ;;  %v1369_v40 = vsel %vm1309_vm5, %v1359_v0, %v1361_v21 }
 0x25d   : > { %1693 = vrot.lane.b32.xlu1 %v3951_v34, %s3649_s26  ;;  %1996 = vmatprep.subr.mxu0 %v1369_v40 }
 0x25e   : > { %v1353_v47 = vpop.permute.xlu0 %1352 }
 0x25f   : > { %v1357_v57 = vpop.permute.xlu1 %1356 }
 0x260   : > { %1687 = vrot.lane.b32.xlu0 %v3925_v23, %s3649_s26  ;;  %v1368_v38 = vsel %vm1309_vm5, %v1357_v57, %v1359_v0 }
 0x261   : > { %1691 = vrot.lane.b32.xlu1 %v3939_v29, %s3649_s26  ;;  %1997 = vmatpush1.msra.mxu0 %v1368_v38 }
 0x262   : > { %v1351_v10 = vpop.permute.xlu0 %1350 }
 0x263   : > { %v1355_v25 = vpop.permute.xlu1 %1354  ;;  %v1366_v62 = vsel %vm1309_vm5, %v1351_v10, %v1353_v47  ;;  %v3026_v10 = vrot.slane %v3549_v53, %v3714_v8 }
 0x264   : > { %1685 = vrot.lane.b32.xlu0 %v3928_v24, %s3649_s26  ;;  %v1367_v61 = vsel %vm1309_vm5, %v1353_v47, %v1355_v25  ;;  %v3022_v47 = vrot.slane %v3549_v53, %v3716_v9 }
 0x265   : > { %1689 = vrot.lane.b32.xlu1 %v3936_v28, %s3649_s26  ;;  %1998 = vmatprep.subr.mxu0 %v1367_v61 }
 0x266   : > { %1999 = vmatpush1.msra.mxu0 %v1366_v62  ;;  %v4671_v58 = vpop.permute.xlu0 %2264 }
 0x267   : > { %v4673_v26 = vpop.permute.xlu1 %2262 }
 0x268   : > { %2544 = vrot.lane.b32.xlu0 %v2541_v59, %s3622_s21 }
 0x269   : > { %2542 = vrot.lane.b32.xlu1 %v2537_v49, %s3622_s21  ;;  %s3650_s21 = smov 56  }
 0x26a   : > { %v1349_v21 = vpop.permute.xlu0 %1348 }
 0x26b   : > { %v1347_v0 = vpop.permute.xlu1 %1346 }
 0x26c   : > { %1683 = vrot.lane.b32.xlu0 %v3914_v17, %s3649_s26  ;;  %v1365_v40 = vsel %vm1309_vm5, %v1347_v0, %v1349_v21 }
 0x26d   : > { %1681 = vrot.lane.b32.xlu1 %v3917_v18, %s3649_s26  ;;  %2000 = vmatprep.subr.mxu0 %v1365_v40  ;;  %v5501_v40 = vld [vmem:[#allocation10_spill] sm:$0xff] }
 0x26e   : > { %v1341_v57 = vpop.permute.xlu0 %1340 }
 0x26f   : > { %v1345_v38 = vpop.permute.xlu1 %1344 }
 0x270   : > { %3027 = vrot.lane.b32.xlu0 %v3022_v47, %s3630_s28  ;;  %v1364_v42 = vsel %vm1309_vm5, %v1345_v38, %v1347_v0  ;;  %v1603_v47 = vmul.f32 %v5501_v40, %v3948_v33 }
 0x271   : > { %1679 = vrot.lane.b32.xlu1 %v3907_v14, %s3649_s26  ;;  %2001 = vmatpush1.msra.mxu0 %v1364_v42 }
 0x272   : > { %v1339_v25 = vpop.permute.xlu0 %1338 }
 0x273   : > { %v1343_v62 = vpop.permute.xlu1 %1342  ;;  %v1362_v61 = vsel %vm1309_vm5, %v1339_v25, %v1341_v57 }
 0x274   : > { %1675 = vrot.lane.b32.xlu0 %v3890_v4, %s3649_s26  ;;  %v1363_v59 = vsel %vm1309_vm5, %v1341_v57, %v1343_v62  ;;  %v5502_v57 = vld [vmem:[#allocation11_spill] sm:$0xff]  ;;  %vm1883_vm5 = vcmask 392192  }
 0x275   : > { %3029 = vrot.lane.b32.xlu1 %v3026_v10, %s3630_s28  ;;  %2002 = vmatprep.subr.mxu0 %v1363_v59  ;;  %v1588_v38 = vsel %vm1587_vm8, %v5502_v57, %v5501_v40  ;;  %v1595_v44 = vmul.f32 %v5502_v57, %v3907_v14  ;;  %vm2173_vm8 = vcmask 662528  }
 0x276   : > { %2003 = vmatpush1.msra.mxu0 %v1362_v61  ;;  %v1267_v49 = vpop.permute.xlu0 %1266  ;;  %v1602_v10 = vmul.f32 %v1588_v38, %v3951_v34  ;;  %v1599_v61 = vmul.f32 %v1588_v38, %v3925_v23 }
 0x277   : > { %v1265_v21 = vpop.permute.xlu1 %1264 }
 0x278   : > { %1673 = vrot.lane.b32.xlu0 %v3893_v5, %s3649_s26  ;;  %v1276_v53 = vsel %vm1268_vm7, %v1265_v21, %v1267_v49  ;;  %v1601_v49 = vmul.f32 %v5502_v57, %v3939_v29 }
 0x279   : > { %1677 = vrot.lane.b32.xlu1 %v3902_v11, %s3649_s26  ;;  %2004 = vmatprep.subr.mxu0 %v1276_v53 }
 0x27a   : > { %v1259_v0 = vpop.permute.xlu0 %1258 }
 0x27b   : > { %v1263_v42 = vpop.permute.xlu1 %1262 }
 0x27c   : > { %1638 = vrot.lane.b32.xlu0 %v1603_v47, %s3650_s21  ;;  %v1275_v25 = vsel %vm1268_vm7, %v1263_v42, %v1265_v21  ;;  %v3544_v21 = vld [vmem:[%s5447_s4 + $0x24] ss:$8 sm:$0x3]  ;;  %v1598_v42 = vmul.f32 %v5502_v57, %v3928_v24 }
 0x27d   : > { %1636 = vrot.lane.b32.xlu1 %v1602_v10, %s3650_s21  ;;  %2005 = vmatpush1.msra.mxu0 %v1275_v25  ;;  %v1600_v25 = vmul.f32 %v5501_v40, %v3936_v28 }
 0x27e   : > { %v1257_v62 = vpop.permute.xlu0 %1256 }
 0x27f   : > { %v1261_v59 = vpop.permute.xlu1 %1260  ;;  %v1273_v53 = vsel %vm1268_vm7, %v1257_v62, %v1259_v0 }
 0x280   : > { %1630 = vrot.lane.b32.xlu0 %v1599_v61, %s3650_s21  ;;  %v1274_v52 = vsel %vm1268_vm7, %v1259_v0, %v1261_v59  ;;  %v2462_v0 = vrot.slane %v3544_v21, %v3714_v8 }
 0x281   : > { %1634 = vrot.lane.b32.xlu1 %v1601_v49, %s3650_s21  ;;  %2006 = vmatprep.subr.mxu0 %v1274_v52  ;;  %v2458_v52 = vrot.slane %v3544_v21, %v3716_v9  ;;  %v3548_v49 = vld [vmem:[%s5447_s4 + $0x30] ss:$8 sm:$0x3]  ;;  %v1596_v21 = vmul.f32 %v1588_v38, %v3917_v18 }
 0x282   : > { %2007 = vmatpush1.msra.mxu0 %v1273_v53  ;;  %v4719_v47 = vpop.permute.xlu0 %2171 }
 0x283   : > { %v4723_v10 = vpop.permute.xlu1 %2169 }
 0x284   : > { %1628 = vrot.lane.b32.xlu0 %v1598_v42, %s3650_s21  ;;  %v1597_v42 = vmul.f32 %v5501_v40, %v3914_v17 }
 0x285   : > { %1632 = vrot.lane.b32.xlu1 %v1600_v25, %s3650_s21 }
 0x286   : > { %v1255_v62 = vpop.permute.xlu0 %1254 }
 0x287   : > { %v1253_v61 = vpop.permute.xlu1 %1252 }
 0x288   : > { %2465 = vrot.lane.b32.xlu0 %v2462_v0, %s3621_s18  ;;  %v1272_v59 = vsel %vm1268_vm7, %v1253_v61, %v1255_v62  ;;  %v2943_v62 = vrot.slane %v3548_v49, %v3716_v9 }
 0x289   : > { %2463 = vrot.lane.b32.xlu1 %v2458_v52, %s3621_s18  ;;  %2008 = vmatprep.subr.mxu0 %v1272_v59 }
 0x28a   : > { %v1247_v53 = vpop.permute.xlu0 %1246 }
 0x28b   : > { %v1251_v25 = vpop.permute.xlu1 %1250 }
 0x28c   : > { %1626 = vrot.lane.b32.xlu0 %v1597_v42, %s3650_s21  ;;  %v1271_v0 = vsel %vm1268_vm7, %v1251_v25, %v1253_v61  ;;  %v2947_v61 = vrot.slane %v3548_v49, %v3714_v8  ;;  %v1593_v25 = vmul.f32 %v1588_v38, %v3890_v4  ;;  %v1594_v38 = vmul.f32 %v5501_v40, %v3902_v11 }
 0x28d   : > { %1624 = vrot.lane.b32.xlu1 %v1596_v21, %s3650_s21  ;;  %2009 = vmatpush1.msra.mxu0 %v1271_v0  ;;  %v2388_v49 = vsel %vm492_vm9, %v4577_v48, %v4575_v41 }
 0x28e   : > { %v1245_v52 = vpop.permute.xlu0 %1244 }
 0x28f   : > { %v1249_v59 = vpop.permute.xlu1 %1248  ;;  %v1269_v60 = vsel %vm1268_vm7, %v1245_v52, %v1247_v53 }
 0x290   : > { %2948 = vrot.lane.b32.xlu0 %v2943_v62, %s3625_s9  ;;  %v1270_v46 = vsel %vm1268_vm7, %v1247_v53, %v1249_v59  ;;  %v1909_v62 = vld [vmem:[%s5445_s2 + $0x18] sm:$0xff]  ;;  %v2400_v59 = vmul.f32 %v2388_v49, %v3948_v33 }
 0x291   : > { %1622 = vrot.lane.b32.xlu1 %v1595_v44, %s3650_s21  ;;  %2010 = vmatprep.subr.mxu0 %v1270_v46  ;;  %v1592_v46 = vmul.f32 %v5502_v57, %v3893_v5  ;;  %v2394_v57 = vmul.f32 0.0, %v4575_v41  ;;  %v2399_v41 = vmul.f32 %v4577_v48, %v3951_v34 }
 0x292   : > { %2011 = vmatpush1.msra.mxu0 %v1269_v60  ;;  %v1882_v42 = vpop.permute.xlu0 %1881  ;;  %2044 = vmatprep.mubr.f32.mxu0 %v1909_v62 }
 0x293   : > { %v1880_v21 = vpop.permute.xlu1 %1879 }
 0x294   : > { %1618 = vrot.lane.b32.xlu0 %v1593_v25, %s3650_s21  ;;  %v1891_v0 = vsel %vm1883_vm5, %v1880_v21, %v1882_v42 }
 0x295   : > { %2950 = vrot.lane.b32.xlu1 %v2947_v61, %s3625_s9  ;;  %2012 = vmatprep.subr.mxu0 %v1891_v0  ;;  %s3651_s9 = smov 46  }
 0x296   : > { %v1874_v44 = vpop.permute.xlu0 %1873 }
 0x297   : > { %v1878_v60 = vpop.permute.xlu1 %1877 }
 0x298   : > { %1616 = vrot.lane.b32.xlu0 %v1592_v46, %s3650_s21  ;;  %v1890_v53 = vsel %vm1883_vm5, %v1878_v60, %v1880_v21  ;;  %v2398_v21 = vmul.f32 %v2388_v49, %v3936_v28  ;;  %v2397_v60 = vmul.f32 %v4577_v48, %v3925_v23 }
 0x299   : > { %1620 = vrot.lane.b32.xlu1 %v1594_v38, %s3650_s21  ;;  %2013 = vmatpush2.msra.mxu0 %v1890_v53 }
 0x29a   : > { %v1872_v52 = vpop.permute.xlu0 %1871 }
 0x29b   : > { %v1876_v61 = vpop.permute.xlu1 %1875  ;;  %v1888_v42 = vsel %vm1883_vm5, %v1872_v52, %v1874_v44  ;;  %v2393_v52 = vmul.f32 %v2388_v49, %v3902_v11 }
 0x29c   : > { %2426 = vrot.lane.b32.xlu0 %v2400_v59, %s3635_s13  ;;  %v1889_v40 = vsel %vm1883_vm5, %v1874_v44, %v1876_v61  ;;  %v2396_v44 = vmul.f32 %v2388_v49, %v3914_v17  ;;  %v2392_v49 = vmul.f32 %v4577_v48, %v3890_v4 }
 0x29d   : > { %2414 = vrot.lane.b32.xlu1 %v2394_v57, %s3635_s13  ;;  %2014 = vmatprep.subr.mxu0 %v1889_v40  ;;  %v2395_v57 = vmul.f32 %v4577_v48, %v3917_v18  ;;  %v5503_v40 = vld [vmem:[#allocation12_spill] sm:$0xff] }
 0x29e   : > { %2015 = vmatpush2.msra.mxu0 %v1888_v42  ;;  %v4774_v25 = vpop.permute.xlu0 %2702  ;;  %v5504_v48 = vld [vmem:[#allocation4_spill] sm:$0xff] }
 0x29f   : > { %v4777_v0 = vpop.permute.xlu1 %2700 }
 0x2a0   : > { %2422 = vrot.lane.b32.xlu0 %v2398_v21, %s3635_s13  ;;  %v1065_v21 = vmul.f32 %v5503_v40, %v3951_v34  ;;  %v2282_v40 = vmul.f32 %v4671_v58, %v3948_v33 }
 0x2a1   : > { %2424 = vrot.lane.b32.xlu1 %v2399_v41, %s3635_s13 }
 0x2a2   : > { %v1870_v62 = vpop.permute.xlu0 %1869 }
 0x2a3   : > { %v1868_v46 = vpop.permute.xlu1 %1867 }
 0x2a4   : > { %2418 = vrot.lane.b32.xlu0 %v2396_v44, %s3635_s13  ;;  %v1887_v38 = vsel %vm1883_vm5, %v1868_v46, %v1870_v62  ;;  %v2267_v44 = vsel %vm2266_vm0, %v4673_v26, %v4671_v58  ;;  %vm2226_vm0 = vcmask 384000  }
 0x2a5   : > { %2420 = vrot.lane.b32.xlu1 %v2397_v60, %s3635_s13  ;;  %2016 = vmatprep.subr.mxu0 %v1887_v38  ;;  %v2281_v38 = vmul.f32 %v2267_v44, %v3951_v34 }
 0x2a6   : > { %v1862_v53 = vpop.permute.xlu0 %1861 }
 0x2a7   : > { %v1866_v59 = vpop.permute.xlu1 %1865 }
 0x2a8   : > { %2412 = vrot.lane.b32.xlu0 %v2393_v52, %s3635_s13  ;;  %v1886_v61 = vsel %vm1883_vm5, %v1866_v59, %v1868_v46  ;;  %v1066_v59 = vmul.f32 %v5504_v48, %v3948_v33  ;;  %v2275_v48 = vmul.f32 %v2267_v44, %v3917_v18 }
 0x2a9   : > { %2416 = vrot.lane.b32.xlu1 %v2395_v57, %s3635_s13  ;;  %2017 = vmatpush2.msra.mxu0 %v1886_v61  ;;  %v2280_v61 = vmul.f32 %v4673_v26, %v3939_v29 }
 0x2aa   : > { %v1860_v42 = vpop.permute.xlu0 %1859 }
 0x2ab   : > { %v1864_v41 = vpop.permute.xlu1 %1863  ;;  %v1884_v62 = vsel %vm1883_vm5, %v1860_v42, %v1862_v53 }
 0x2ac   : > { %1099 = vrot.lane.b32.xlu0 %v1065_v21, %s3641_s30  ;;  %v1885_v46 = vsel %vm1883_vm5, %v1862_v53, %v1864_v41  ;;  %vm1697_vm5 = vcmask 449536  }
 0x2ad   : > { %2410 = vrot.lane.b32.xlu1 %v2392_v49, %s3635_s13  ;;  %2018 = vmatprep.subr.mxu0 %v1885_v46  ;;  %v2279_v49 = vmul.f32 %v4671_v58, %v3936_v28  ;;  %v2278_v46 = vmul.f32 %v2267_v44, %v3925_v23  ;;  %s3652_s13 = smov 47  }
 0x2ae   : > { %2019 = vmatpush2.msra.mxu0 %v1884_v62  ;;  %v1789_v60 = vpop.permute.xlu0 %1788 }
 0x2af   : > { %v1787_v52 = vpop.permute.xlu1 %1786 }
 0x2b0   : > { %2315 = vrot.lane.b32.xlu0 %v2281_v38, %s3651_s9  ;;  %v1798_v57 = vsel %vm1790_vm2, %v1787_v52, %v1789_v60 }
 0x2b1   : > { %1101 = vrot.lane.b32.xlu1 %v1066_v59, %s3641_s30  ;;  %2020 = vmatprep.subr.mxu0 %v1798_v57  ;;  %v2277_v57 = vmul.f32 %v4673_v26, %v3928_v24 }
 0x2b2   : > { %v1781_v53 = vpop.permute.xlu0 %1780 }
 0x2b3   : > { %v1785_v42 = vpop.permute.xlu1 %1784 }
 0x2b4   : > { %2313 = vrot.lane.b32.xlu0 %v2280_v61, %s3651_s9  ;;  %v1797_v21 = vsel %vm1790_vm2, %v1785_v42, %v1787_v52 }
 0x2b5   : > { %2317 = vrot.lane.b32.xlu1 %v2282_v40, %s3651_s9  ;;  %2021 = vmatpush2.msra.mxu0 %v1797_v21  ;;  %v2276_v40 = vmul.f32 %v4671_v58, %v3914_v17 }
 0x2b6   : > { %v1779_v41 = vpop.permute.xlu0 %1778 }
 0x2b7   : > { %v1783_v62 = vpop.permute.xlu1 %1782  ;;  %v1795_v60 = vsel %vm1790_vm2, %v1779_v41, %v1781_v53 }
 0x2b8   : > { %2311 = vrot.lane.b32.xlu0 %v2279_v49, %s3651_s9  ;;  %v1796_v38 = vsel %vm1790_vm2, %v1781_v53, %v1783_v62  ;;  %v2274_v53 = vmul.f32 %v4673_v26, %v3907_v14  ;;  %v2273_v49 = vmul.f32 %v4671_v58, %v3902_v11  ;;  %v2271_v58 = vmul.f32 %v4673_v26, %v3893_v5 }
 0x2b9   : > { %2309 = vrot.lane.b32.xlu1 %v2278_v46, %s3651_s9  ;;  %2022 = vmatprep.subr.mxu0 %v1796_v38  ;;  %v2272_v46 = vmul.f32 %v2267_v44, %v3890_v4 }
 0x2ba   : > { %2023 = vmatpush2.msra.mxu0 %v1795_v60  ;;  %v4825_v52 = vpop.permute.xlu0 %2623  ;;  %v2174_v60 = vsel %vm2173_vm8, %v4723_v10, %v4719_v47 }
 0x2bb   : > { %v4828_v59 = vpop.permute.xlu1 %2621 }
 0x2bc   : > { %2303 = vrot.lane.b32.xlu0 %v2275_v48, %s3651_s9 }
 0x2bd   : > { %2307 = vrot.lane.b32.xlu1 %v2277_v57, %s3651_s9  ;;  %v2188_v57 = vmul.f32 %v2174_v60, %v3951_v34 }
 0x2be   : > { %v1777_v61 = vpop.permute.xlu0 %1776 }
 0x2bf   : > { %v1775_v42 = vpop.permute.xlu1 %1774 }
 0x2c0   : > { %2301 = vrot.lane.b32.xlu0 %v2274_v53, %s3651_s9  ;;  %v1794_v21 = vsel %vm1790_vm2, %v1775_v42, %v1777_v61  ;;  %v2187_v53 = vmul.f32 %v4723_v10, %v3939_v29 }
 0x2c1   : > { %2305 = vrot.lane.b32.xlu1 %v2276_v40, %s3651_s9  ;;  %2024 = vmatprep.subr.mxu0 %v1794_v21  ;;  %v2189_v40 = vmul.f32 %v4719_v47, %v3948_v33 }
 0x2c2   : > { %v4841_v41 = vpop.permute.xlu0 %3106 }
 0x2c3   : > { %v1773_v62 = vpop.permute.xlu1 %1772 }
 0x2c4   : > { %2299 = vrot.lane.b32.xlu0 %v2273_v49, %s3651_s9  ;;  %v1793_v38 = vsel %vm1790_vm2, %v1773_v62, %v1775_v42  ;;  %v2186_v62 = vmul.f32 %v4719_v47, %v3936_v28 }
 0x2c5   : > { %2297 = vrot.lane.b32.xlu1 %v2272_v46, %s3651_s9  ;;  %2025 = vmatpush2.msra.mxu0 %v1793_v38  ;;  %v2185_v46 = vmul.f32 %v2174_v60, %v3925_v23 }
 0x2c6   : > { %v1769_v48 = vpop.permute.xlu0 %1768 }
 0x2c7   : > { %v4852_v61 = vpop.permute.xlu1 %3108 }
 0x2c8   : > { %2222 = vrot.lane.b32.xlu0 %v2188_v57, %s3652_s13  ;;  %v2182_v57 = vmul.f32 %v2174_v60, %v3917_v18 }
 0x2c9   : > { %2295 = vrot.lane.b32.xlu1 %v2271_v58, %s3651_s9 }
 0x2ca   : > { %v1767_v44 = vpop.permute.xlu0 %1766 }
 0x2cb   : > { %v1771_v42 = vpop.permute.xlu1 %1770  ;;  %v1791_v21 = vsel %vm1790_vm2, %v1767_v44, %v1769_v48  ;;  %v2184_v44 = vmul.f32 %v4723_v10, %v3928_v24 }
 0x2cc   : > { %2220 = vrot.lane.b32.xlu0 %v2187_v53, %s3652_s13  ;;  %v1792_v49 = vsel %vm1790_vm2, %v1769_v48, %v1771_v42 }
 0x2cd   : > { %2224 = vrot.lane.b32.xlu1 %v2189_v40, %s3652_s13  ;;  %2026 = vmatprep.subr.mxu0 %v1792_v49  ;;  %v2181_v40 = vmul.f32 %v4723_v10, %v3907_v14  ;;  %v2183_v49 = vmul.f32 %v4719_v47, %v3914_v17 }
 0x2ce   : > { %2027 = vmatpush2.msra.mxu0 %v1791_v21  ;;  %v1696_v26 = vpop.permute.xlu0 %1695 }
 0x2cf   : > { %v1694_v29 = vpop.permute.xlu1 %1693 }
 0x2d0   : > { %2218 = vrot.lane.b32.xlu0 %v2186_v62, %s3652_s13  ;;  %v1705_v38 = vsel %vm1697_vm5, %v1694_v29, %v1696_v26 }
 0x2d1   : > { %2216 = vrot.lane.b32.xlu1 %v2185_v46, %s3652_s13  ;;  %2028 = vmatprep.subr.mxu0 %v1705_v38  ;;  %v2179_v46 = vmul.f32 %v2174_v60, %v3890_v4  ;;  %v2710_v38 = vmul.f32 0.0, %v4774_v25 }
 0x2d2   : > { %v1688_v48 = vpop.permute.xlu0 %1687 }
 0x2d3   : > { %v1692_v58 = vpop.permute.xlu1 %1691 }
 0x2d4   : > { %2210 = vrot.lane.b32.xlu0 %v2182_v57, %s3652_s13  ;;  %v1704_v53 = vsel %vm1697_vm5, %v1692_v58, %v1694_v29  ;;  %v2180_v29 = vmul.f32 %v4719_v47, %v3902_v11  ;;  %v2178_v58 = vmul.f32 %v4723_v10, %v3893_v5  ;;  %v2704_v47 = vsel %vm864_vm13, %v4777_v0, %v4774_v25 }
 0x2d5   : > { %2214 = vrot.lane.b32.xlu1 %v2184_v44, %s3652_s13  ;;  %2029 = vmatpush2.msra.mxu0 %v1704_v53  ;;  %v2715_v53 = vmul.f32 %v4777_v0, %v3951_v34  ;;  %v2713_v25 = vmul.f32 %v4777_v0, %v3925_v23  ;;  %vm1640_vm13 = vcmask 457728  }
 0x2d6   : > { %v1686_v42 = vpop.permute.xlu0 %1685 }
 0x2d7   : > { %v1690_v21 = vpop.permute.xlu1 %1689  ;;  %v1702_v26 = vsel %vm1697_vm5, %v1686_v42, %v1688_v48 }
 0x2d8   : > { %2208 = vrot.lane.b32.xlu0 %v2181_v40, %s3652_s13  ;;  %v1703_v24 = vsel %vm1697_vm5, %v1688_v48, %v1690_v21  ;;  %v2716_v40 = vmul.f32 %v2704_v47, %v3948_v33 }
 0x2d9   : > { %2212 = vrot.lane.b32.xlu1 %v2183_v49, %s3652_s13  ;;  %2030 = vmatprep.subr.mxu0 %v1703_v24  ;;  %v2714_v49 = vmul.f32 %v2704_v47, %v3936_v28  ;;  %v2711_v24 = vmul.f32 %v4777_v0, %v3917_v18 }
 0x2da   : > { %2031 = vmatpush2.msra.mxu0 %v1702_v26  ;;  %v4886_v62 = vpop.permute.xlu0 %2544 }
 0x2db   : > { %v4890_v14 = vpop.permute.xlu1 %2542 }
 0x2dc   : > { %2206 = vrot.lane.b32.xlu0 %v2180_v29, %s3652_s13 }
 0x2dd   : > { %2204 = vrot.lane.b32.xlu1 %v2179_v46, %s3652_s13  ;;  %v2712_v46 = vmul.f32 %v2704_v47, %v3914_v17 }
 0x2de   : > { %v1684_v48 = vpop.permute.xlu0 %1683 }
 0x2df   : > { %v1682_v57 = vpop.permute.xlu1 %1681 }
 0x2e0   : > { %2730 = vrot.lane.b32.xlu0 %v2710_v38, %s3639_s20  ;;  %v1701_v44 = vsel %vm1697_vm5, %v1682_v57, %v1684_v48 }
 0x2e1   : > { %2202 = vrot.lane.b32.xlu1 %v2178_v58, %s3652_s13  ;;  %2032 = vmatprep.subr.mxu0 %v1701_v44  ;;  %v2708_v58 = vmul.f32 %v4777_v0, %v3890_v4 }
 0x2e2   : > { %v4904_v60 = vpop.permute.xlu0 %3027 }
 0x2e3   : > { %v1680_v42 = vpop.permute.xlu1 %1679 }
 0x2e4   : > { %2740 = vrot.lane.b32.xlu0 %v2715_v53, %s3639_s20  ;;  %v1700_v5 = vsel %vm1697_vm5, %v1680_v42, %v1682_v57  ;;  %v2709_v53 = vmul.f32 %v2704_v47, %v3902_v11  ;;  %v2625_v42 = vsel %vm771_vm12, %v4828_v59, %v4825_v52  ;;  %vm2319_vm12 = vcmask 375808  }
 0x2e5   : > { %2742 = vrot.lane.b32.xlu1 %v2716_v40, %s3639_s20  ;;  %2033 = vmatpush2.msra.mxu0 %v1700_v5 }
 0x2e6   : > { %v1676_v10 = vpop.permute.xlu0 %1675 }
 0x2e7   : > { %v4914_v21 = vpop.permute.xlu1 %3029 }
 0x2e8   : > { %2736 = vrot.lane.b32.xlu0 %v2713_v25, %s3639_s20  ;;  %v2631_v25 = vmul.f32 0.0, %v4825_v52  ;;  %v4947_v52 = vsel %vm1215_vm6, %v4841_v41, %v4852_v61  ;;  %vm824_vm6 = vcmask 973824  }
 0x2e9   : > { %2738 = vrot.lane.b32.xlu1 %v2714_v49, %s3639_s20  ;;  %v1129_v49 = vld [vmem:[%s5445_s2 + $0x8] sm:$0xff] }
 0x2ea   : > { %v1674_v26 = vpop.permute.xlu0 %1673  ;;  %2133 = vmatprep.mubr.f32.mxu1 %v1129_v49 }
 0x2eb   : > { %v1678_v29 = vpop.permute.xlu1 %1677  ;;  %v1698_v38 = vsel %vm1697_vm5, %v1674_v26, %v1676_v10 }
 0x2ec   : > { %2732 = vrot.lane.b32.xlu0 %v2711_v24, %s3639_s20  ;;  %v1699_v48 = vsel %vm1697_vm5, %v1676_v10, %v1678_v29  ;;  %v2637_v10 = vmul.f32 %v2625_v42, %v3948_v33  ;;  %v2635_v24 = vmul.f32 %v2625_v42, %v3936_v28 }
 0x2ed   : > { %2734 = vrot.lane.b32.xlu1 %v2712_v46, %s3639_s20  ;;  %2034 = vmatprep.subr.mxu0 %v1699_v48  ;;  %v2636_v46 = vmul.f32 %v4828_v59, %v3951_v34 }
 0x2ee   : > { %2035 = vmatpush2.msra.mxu0 %v1698_v38  ;;  %v1639_v57 = vpop.permute.xlu0 %1638 }
 0x2ef   : > { %v1637_v44 = vpop.permute.xlu1 %1636 }
 0x2f0   : > { %2726 = vrot.lane.b32.xlu0 %v2708_v58, %s3639_s20  ;;  %v1648_v40 = vsel %vm1640_vm13, %v1637_v44, %v1639_v57  ;;  %v3122_v58 = vmul.f32 %v4947_v52, %v3948_v33 }
 0x2f1   : > { %2728 = vrot.lane.b32.xlu1 %v2709_v53, %s3639_s20  ;;  %2036 = vmatprep.subr.mxu0 %v1648_v40 }
 0x2f2   : > { %v1631_v5 = vpop.permute.xlu0 %1630 }
 0x2f3   : > { %v1635_v0 = vpop.permute.xlu1 %1634 }
 0x2f4   : > { %2663 = vrot.lane.b32.xlu0 %v2637_v10, %s3638_s17  ;;  %v1647_v47 = vsel %vm1640_vm13, %v1635_v0, %v1637_v44  ;;  %v3116_v44 = vmul.f32 0.0, %v4852_v61 }
 0x2f5   : > { %2651 = vrot.lane.b32.xlu1 %v2631_v25, %s3638_s17  ;;  %2037 = vmatpush2.msra.mxu0 %v1647_v47  ;;  %v2634_v25 = vmul.f32 %v4828_v59, %v3925_v23  ;;  %v3120_v47 = vmul.f32 %v4947_v52, %v3936_v28 }
 0x2f6   : > { %v1629_v26 = vpop.permute.xlu0 %1628 }
 0x2f7   : > { %v1633_v29 = vpop.permute.xlu1 %1632  ;;  %v1645_v38 = vsel %vm1640_vm13, %v1629_v26, %v1631_v5  ;;  %v2633_v26 = vmul.f32 %v2625_v42, %v3914_v17 }
 0x2f8   : > { %2659 = vrot.lane.b32.xlu0 %v2635_v24, %s3638_s17  ;;  %v1646_v48 = vsel %vm1640_vm13, %v1631_v5, %v1633_v29  ;;  %v3121_v5 = vmul.f32 %v4841_v41, %v3951_v34 }
 0x2f9   : > { %2661 = vrot.lane.b32.xlu1 %v2636_v46, %s3638_s17  ;;  %2038 = vmatprep.subr.mxu0 %v1646_v48  ;;  %v3119_v46 = vmul.f32 %v4841_v41, %v3925_v23  ;;  %v2632_v48 = vmul.f32 %v4828_v59, %v3917_v18 }
 0x2fa   : > { %2039 = vmatpush2.msra.mxu0 %v1645_v38  ;;  %v4955_v57 = vpop.permute.xlu0 %2465 }
 0x2fb   : > { %v4960_v53 = vpop.permute.xlu1 %2463 }
 0x2fc   : > { %3148 = vrot.lane.b32.xlu0 %v3122_v58, %s3645_s12 }
 0x2fd   : > { %3136 = vrot.lane.b32.xlu1 %v3116_v44, %s3645_s12  ;;  %v3118_v44 = vmul.f32 %v4947_v52, %v3914_v17 }
 0x2fe   : > { %v1627_v40 = vpop.permute.xlu0 %1626 }
 0x2ff   : > { %v1625_v10 = vpop.permute.xlu1 %1624 }
 0x300   : > { %3146 = vrot.lane.b32.xlu0 %v3121_v5, %s3645_s12  ;;  %v1644_v0 = vsel %vm1640_vm13, %v1625_v10, %v1627_v40  ;;  %v2630_v5 = vmul.f32 %v2625_v42, %v3902_v11  ;;  %v2629_v42 = vmul.f32 %v4828_v59, %v3890_v4 }
 0x301   : > { %2657 = vrot.lane.b32.xlu1 %v2634_v25, %s3638_s17  ;;  %2040 = vmatprep.subr.mxu0 %v1644_v0  ;;  %v1908_v0 = vld [vmem:[%s5445_s2 + $0x10] sm:$0xff] }
 0x302   : > { %v4971_v61 = vpop.permute.xlu0 %2948 }
 0x303   : > { %v1623_v49 = vpop.permute.xlu1 %1622 }
 0x304   : > { %3144 = vrot.lane.b32.xlu0 %v3120_v47, %s3645_s12  ;;  %v1643_v24 = vsel %vm1640_vm13, %v1623_v49, %v1625_v10  ;;  %v3117_v49 = vmul.f32 %v4841_v41, %v3917_v18 }
 0x305   : > { %2655 = vrot.lane.b32.xlu1 %v2633_v26, %s3638_s17  ;;  %2041 = vmatpush2.msra.mxu0 %v1643_v24  ;;  %v5004_v24 = vsel %vm678_vm11, %v4890_v14, %v4886_v62  ;;  %vm1103_vm11 = vcmask 908288  }
 0x306   : > { %v1619_v29 = vpop.permute.xlu0 %1618 }
 0x307   : > { %v4981_v38 = vpop.permute.xlu1 %2950 }
 0x308   : > { %3142 = vrot.lane.b32.xlu0 %v3119_v46, %s3645_s12 }
 0x309   : > { %2653 = vrot.lane.b32.xlu1 %v2632_v48, %s3638_s17  ;;  %v2558_v48 = vmul.f32 %v5004_v24, %v3948_v33 }
 0x30a   : > { %v1617_v58 = vpop.permute.xlu0 %1616 }
 0x30b   : > { %v1621_v40 = vpop.permute.xlu1 %1620  ;;  %v1641_v10 = vsel %vm1640_vm13, %v1617_v58, %v1619_v29  ;;  %v2552_v58 = vmul.f32 0.0, %v4886_v62 }
 0x30c   : > { %3140 = vrot.lane.b32.xlu0 %v3118_v44, %s3645_s12  ;;  %v1642_v25 = vsel %vm1640_vm13, %v1619_v29, %v1621_v40 }
 0x30d   : > { %2649 = vrot.lane.b32.xlu1 %v2630_v5, %s3638_s17  ;;  %2042 = vmatprep.subr.mxu0 %v1642_v25 }
 0x30e   : > { %2043 = vmatpush2.msra.mxu0 %v1641_v10  ;;  %v2427_v47 = vpop.permute.xlu0 %2426  ;;  %v2557_v10 = vmul.f32 %v4890_v14, %v3951_v34 }
 0x30f   : > { %v2415_v26 = vpop.permute.xlu1 %2414  ;;  %2045 = vmatmul.mubr.f32.vlgmr.msra.gmra.mxu0 %v1908_v0  ;;  %v3115_v0 = vmul.f32 %v4947_v52, %v3902_v11 }
 0x310   : > { %3138 = vrot.lane.b32.xlu0 %v3117_v49, %s3645_s12  ;;  %v2435_v29 = vsel %vm545_vm4, %v2427_v47, %v2415_v26 }
 0x311   : > { %2647 = vrot.lane.b32.xlu1 %v2629_v42, %s3638_s17  ;;  %2840 = vmatprep.subr.mxu0 %v2435_v29  ;;  %v2556_v42 = vmul.f32 %v5004_v24, %v3936_v28  ;;  %v5029_v29 = vsel %vm1050_vm15, %v4904_v60, %v4914_v21  ;;  %vm1010_vm15 = vcmask 916480  }
 0x312   : > { %v2423_v46 = vpop.permute.xlu0 %2422 }
 0x313   : > { %v2425_v59 = vpop.permute.xlu1 %2424  ;;  %v2433_v44 = vsel %vm545_vm4, %v2423_v46, %v2415_v26 }
 0x314   : > { %v2434_v40 = vsel %vm545_vm4, %v2425_v59, %v2427_v47  ;;  %2584 = vrot.lane.b32.xlu0 %v2558_v48, %s3637_s16  ;;  %v3114_v48 = vmul.f32 %v4841_v41, %v3890_v4 }
 0x315   : > { %2572 = vrot.lane.b32.xlu1 %v2552_v58, %s3637_s16  ;;  %2841 = vmatpush1.msra.mxu0 %v2434_v40  ;;  %v3542_v58 = vld [vmem:[%s5447_s4 + $0x22] ss:$8 sm:$0x3]  ;;  %v3043_v40 = vmul.f32 %v5029_v29, %v3948_v33 }
 0x316   : > { %2842 = vmatprep.subr.mxu0 %v2433_v44  ;;  %v2419_v5 = vpop.permute.xlu0 %2418  ;;  %v2354_v41 = vrot.slane %v3542_v58, %v3714_v8 }
 0x317   : > { %v2421_v25 = vpop.permute.xlu1 %2420  ;;  %v2431_v62 = vsel %vm545_vm4, %v2419_v5, %v2415_v26 }
 0x318   : > { %v2432_v49 = vsel %vm545_vm4, %v2421_v25, %v2423_v46  ;;  %2582 = vrot.lane.b32.xlu0 %v2557_v10, %s3637_s16  ;;  %v2350_v25 = vrot.slane %v3542_v58, %v3716_v9  ;;  %v2362_v8 = vmul.f32 %v2354_v41, %v3936_v28 }
 0x319   : > { %3134 = vrot.lane.b32.xlu1 %v3115_v0, %s3645_s12  ;;  %2843 = vmatpush1.msra.mxu0 %v2432_v49 }
 0x31a   : > { %2844 = vmatprep.subr.mxu0 %v2431_v62  ;;  %v2413_v47 = vpop.permute.xlu0 %2412  ;;  %v2363_v62 = vmul.f32 %v2350_v25, %v3951_v34 }
 0x31b   : > { %v2417_v52 = vpop.permute.xlu1 %2416  ;;  %v2429_v46 = vsel %vm545_vm4, %v2413_v47, %v2415_v26  ;;  %v3037_v26 = vmul.f32 0.0, %v4914_v21  ;;  %v3042_v21 = vmul.f32 %v4904_v60, %v3951_v34 }
 0x31c   : > { %v2430_v59 = vsel %vm545_vm4, %v2417_v52, %v2419_v5  ;;  %2580 = vrot.lane.b32.xlu0 %v2556_v42, %s3637_s16  ;;  %v2364_v5 = vmul.f32 %v2354_v41, %v3948_v33  ;;  %v2361_v52 = vmul.f32 %v2350_v25, %v3925_v23 }
 0x31d   : > { %3132 = vrot.lane.b32.xlu1 %v3114_v48, %s3645_s12  ;;  %2845 = vmatpush1.msra.mxu0 %v2430_v59  ;;  %v1109_v59 = vsel %vm1103_vm11, %v4533_v7, %v4546_v50  ;;  %v1107_v50 = vsel %vm1103_vm11, %v4525_v37, %v4523_v16  ;;  %v1104_v16 = vsel %vm1103_vm11, %v4507_v6, %v4505_v30  ;;  %s5418_s12 = scalar_lea.vmem %s5448_s5, %s3813_s19  ;;  %s3559_s19 = sshll.u32 %s5524_s25, 5 }
 0x31e   : > { %2846 = vmatprep.subr.mxu0 %v2429_v46  ;;  %v1100_v44 = vpop.permute.xlu0 %1099  ;;  %v2360_v46 = vmul.f32 %v2354_v41, %v3914_v17  ;;  %s298_s10 = scalar_lea.vmem %s5449_s6, %s3559_s19 }
 0x31f   : > { %v2411_v10 = vpop.permute.xlu1 %2410  ;;  %v1110_v48 = vsel %vm1103_vm11, %v4544_v19, %v1100_v44  ;;  %v2358_v19 = vmul.f32 %v2354_v41, %v3902_v11 }
 0x320   : > { %v2428_v0 = vsel %vm545_vm4, %v2411_v10, %v2413_v47  ;;  %3069 = vrot.lane.b32.xlu0 %v3043_v40, %s3641_s30  ;;  %v2555_v47 = vmul.f32 %v4890_v14, %v3925_v23  ;;  %v2359_v40 = vmul.f32 %v2350_v25, %v3917_v18  ;;  %v1108_v10 = vsel %vm1103_vm11, %v4535_v54, %v4533_v7 }
 0x321   : > { %3057 = vrot.lane.b32.xlu1 %v3037_v26, %s3641_s30  ;;  %2847 = vmatpush1.msra.mxu0 %v2428_v0  ;;  %v3041_v0 = vmul.f32 %v5029_v29, %v3936_v28  ;;  %v1106_v54 = vsel %vm1103_vm11, %v4514_v31, %v4525_v37  ;;  %v3040_v31 = vmul.f32 %v4904_v60, %v3925_v23  ;;  %vm917_vm4 = vcmask 965632  }
 0x322   : > { %2848 = vmatprep.subr.mxu0 %v2364_v5  ;;  %v2316_v49 = vpop.permute.xlu0 %2315  ;;  %v2357_v5 = vmul.f32 %v2350_v25, %v3890_v4  ;;  %v2553_v25 = vmul.f32 %v4890_v14, %v3917_v18 }
 0x323   : > { %2849 = vmatpush1.msra.mxu0 %v2363_v62  ;;  %v1102_v9 = vpop.permute.xlu1 %1101  ;;  %v1105_v62 = vsel %vm1103_vm11, %v4505_v30, %v4516_v22  ;;  %v1018_v30 = vsel %vm1010_vm15, %v4503_v36, %v4501_v51  ;;  %v1017_v22 = vsel %vm1010_vm15, %v4489_v2, %v4503_v36  ;;  %v1015_v51 = vsel %vm1010_vm15, %v4479_v13, %v4477_v55 }
 0x324   : > { %2850 = vmatprep.subr.mxu0 %v2362_v8  ;;  %3067 = vrot.lane.b32.xlu0 %v3042_v21, %s3641_s30  ;;  %v1111_v42 = vsel %vm1103_vm11, %v1100_v44, %v1102_v9  ;;  %v2554_v44 = vmul.f32 %v5004_v24, %v3914_v17  ;;  %v1016_v9 = vsel %vm1010_vm15, %v4477_v55, %v4491_v45 }
 0x325   : > { %2578 = vrot.lane.b32.xlu1 %v2555_v47, %s3637_s16  ;;  %2101 = vmatprep.subr.mxu1 %v1111_v42  ;;  %v2551_v42 = vmul.f32 %v5004_v24, %v3902_v11  ;;  %v1014_v2 = vsel %vm1010_vm15, %v4467_v43, %v4465_v15  ;;  %v1013_v36 = vsel %vm1010_vm15, %v4455_v1, %v4467_v43 }
 0x326   : > { %2851 = vmatpush1.msra.mxu0 %v2361_v52  ;;  %2102 = vmatpush2.msra.mxu1 %v1110_v48  ;;  %v2314_v58 = vpop.permute.xlu0 %2313  ;;  %v3039_v52 = vmul.f32 %v5029_v29, %v3914_v17  ;;  %v1012_v13 = vsel %vm1010_vm15, %v4446_v35, %v4457_v27  ;;  %v2550_v24 = vmul.f32 %v4890_v14, %v3890_v4 }
 0x327   : > { %2852 = vmatprep.subr.mxu0 %v2360_v46  ;;  %2103 = vmatprep.subr.mxu1 %v1109_v59  ;;  %v2318_v26 = vpop.permute.xlu1 %2317  ;;  %v2326_v21 = vsel %vm2319_vm12, %v2314_v58, %v2316_v49  ;;  %v1011_v46 = vsel %vm1010_vm15, %v4448_v39, %v4446_v35  ;;  %v3038_v1 = vmul.f32 %v4904_v60, %v3917_v18  ;;  %v2473_v58 = vmul.f32 0.0, %v4955_v57 }
 0x328   : > { %2853 = vmatpush1.msra.mxu0 %v2359_v40  ;;  %2104 = vmatpush2.msra.mxu1 %v1108_v10  ;;  %v2327_v7 = vsel %vm2319_vm12, %v2316_v49, %v2318_v26  ;;  %v925_v27 = vsel %vm917_vm4, %v4439_v3, %v4437_v56  ;;  %v5142_v14 = vsel %vm585_vm10, %v4960_v53, %v4955_v57 }
 0x329   : > { %2854 = vmatprep.subr.mxu0 %v2358_v19  ;;  %2576 = vrot.lane.b32.xlu1 %v2554_v44, %s3637_s16  ;;  %v924_v35 = vsel %vm917_vm4, %v4433_v12, %v4439_v3  ;;  %v923_v56 = vsel %vm917_vm4, %v4421_v32, %v4435_v63  ;;  %v922_v40 = vsel %vm917_vm4, %v4423_v20, %v4421_v32  ;;  %v5505_v12 = vld [vmem:[#allocation29_spill] sm:$0xff]  ;;  %v5506_v3 = vld [vmem:[#allocation30_spill] sm:$0xff]  ;;  %v5507_v63 = vld [vmem:[#allocation27_spill] sm:$0xff] }
 0x32a   : > { %3065 = vrot.lane.b32.xlu0 %v3041_v0, %s3641_s30  ;;  %2105 = vmatprep.subr.mxu1 %v1107_v50  ;;  %v2312_v41 = vpop.permute.xlu0 %2311  ;;  %v2479_v26 = vmul.f32 %v5142_v14, %v3948_v33  ;;  %v921_v57 = vsel %vm917_vm4, %v5506_v3, %v5505_v12  ;;  %v920_v19 = vsel %vm917_vm4, %v5507_v63, %v5506_v3  ;;  %v5508_v20 = vld [vmem:[#allocation28_spill] sm:$0xff]  ;;  %v5509_v44 = vld [vmem:[#allocation25_spill] sm:$0xff]  ;;  %v1130_v3 = vld [vmem:[%s5445_s2 + $0x38] sm:$0xff] }
 0x32b   : > { %2855 = vmatpush1.msra.mxu0 %v2357_v5  ;;  %2106 = vmatpush2.msra.mxu1 %v1106_v54  ;;  %v2310_v8 = vpop.permute.xlu1 %2309  ;;  %v919_v0 = vsel %vm917_vm4, %v5509_v44, %v5508_v20  ;;  %v3036_v5 = vmul.f32 %v5029_v29, %v3902_v11  ;;  %v5513_v29 = vld [vmem:[#allocation21_spill] sm:$0xff]  ;;  %v2476_v12 = vmul.f32 %v4960_v53, %v3925_v23  ;;  %v1133_v63 = vld [vmem:[%s5445_s2 + $0x78] sm:$0xff] }
 0x32c   : > { %2856 = vmatprep.subr.mxu0 %v2327_v7  ;;  %2107 = vmatprep.subr.mxu1 %v1105_v62  ;;  %v2325_v37 = vsel %vm2319_vm12, %v2310_v8, %v2312_v41  ;;  %v5510_v7 = vld [vmem:[#allocation26_spill] sm:$0xff]  ;;  %v2478_v41 = vmul.f32 %v4960_v53, %v3951_v34  ;;  %v5511_v62 = vld [vmem:[#allocation23_spill] sm:$0xff] }
 0x32d   : > { %2857 = vmatpush1.msra.mxu0 %v2326_v21  ;;  %2108 = vmatpush2.msra.mxu1 %v1104_v16  ;;  %v918_v54 = vsel %vm917_vm4, %v5510_v7, %v5509_v44  ;;  %v1915_v7 = vld [vmem:[%s5445_s2 + $0xc0] sm:$0xff] }
 0x32e   : > { %2574 = vrot.lane.b32.xlu1 %v2553_v25, %s3637_s16  ;;  %3063 = vrot.lane.b32.xlu0 %v3040_v31, %s3641_s30  ;;  %v2304_v6 = vpop.permute.xlu0 %2303 }
 0x32f   : > { %2109 = vmatprep.subr.mxu1 %v1018_v30  ;;  %2858 = vmatprep.subr.mxu0 %v2325_v37  ;;  %v2308_v49 = vpop.permute.xlu1 %2307  ;;  %v5514_v37 = vld [vmem:[#allocation22_spill] sm:$0xff]  ;;  %v5515_v30 = vld [vmem:[#allocation19_spill] sm:$0xff] }
 0x330   : > { %2110 = vmatpush2.msra.mxu1 %v1017_v22  ;;  %v2324_v47 = vsel %vm2319_vm12, %v2308_v49, %v2310_v8  ;;  %v5512_v8 = vld [vmem:[#allocation24_spill] sm:$0xff]  ;;  %v3035_v22 = vmul.f32 %v4904_v60, %v3890_v4  ;;  %v5517_v60 = vld [vmem:[#allocation17_spill] sm:$0xff] }
 0x331   : > { %2111 = vmatprep.subr.mxu1 %v1016_v9  ;;  %2859 = vmatpush1.msra.mxu0 %v2324_v47  ;;  %v832_v16 = vsel %vm824_vm6, %v5512_v8, %v5511_v62  ;;  %v831_v21 = vsel %vm824_vm6, %v5513_v29, %v5512_v8  ;;  %v5516_v47 = vld [vmem:[#allocation20_spill] sm:$0xff]  ;;  %v2474_v62 = vmul.f32 %v4960_v53, %v3917_v18 }
 0x332   : > { %2112 = vmatpush2.msra.mxu1 %v1015_v51  ;;  %2570 = vrot.lane.b32.xlu1 %v2551_v42, %s3637_s16  ;;  %v2302_v45 = vpop.permute.xlu0 %2301  ;;  %v829_v42 = vsel %vm824_vm6, %v5516_v47, %v5515_v30  ;;  %v2477_v51 = vmul.f32 %v5142_v14, %v3936_v28  ;;  %v1134_v29 = vld [vmem:[%s5445_s2 + $0xa8] sm:$0xff] }
 0x333   : > { %3061 = vrot.lane.b32.xlu0 %v3039_v52, %s3641_s30  ;;  %2113 = vmatprep.subr.mxu1 %v1014_v2  ;;  %v2306_v55 = vpop.permute.xlu1 %2305  ;;  %v2322_v15 = vsel %vm2319_vm12, %v2302_v45, %v2304_v6  ;;  %v5200_v52 = vsel %vm957_vm14, %v4971_v61, %v4981_v38  ;;  %v5518_v2 = vld [vmem:[#allocation18_spill] sm:$0xff]  ;;  %vm3202_vm14 = vcmask 785408  }
 0x334   : > { %2114 = vmatpush2.msra.mxu1 %v1013_v36  ;;  %v2323_v48 = vsel %vm2319_vm12, %v2304_v6, %v2306_v55  ;;  %v830_v6 = vsel %vm824_vm6, %v5515_v30, %v5514_v37  ;;  %v828_v45 = vsel %vm824_vm6, %v5518_v2, %v5517_v60  ;;  %v5519_v55 = vld [vmem:[#allocation15_spill] sm:$0xff] }
 0x335   : > { %2115 = vmatprep.subr.mxu1 %v1012_v13  ;;  %2860 = vmatprep.subr.mxu0 %v2323_v48  ;;  %v827_v13 = vsel %vm824_vm6, %v5519_v55, %v5518_v2  ;;  %v2958_v48 = vmul.f32 0.0, %v4981_v38  ;;  %v2964_v38 = vmul.f32 %v5200_v52, %v3948_v33  ;;  %v1910_v33 = vld [vmem:[%s5445_s2 + $0x48] sm:$0xff] }
 0x336   : > { %2116 = vmatpush2.msra.mxu1 %v1011_v46  ;;  %2568 = vrot.lane.b32.xlu1 %v2550_v24, %s3637_s16  ;;  %v2300_v43 = vpop.permute.xlu0 %2299  ;;  %v5521_v46 = vld [vmem:[#allocation13_spill] sm:$0xff] }
 0x337   : > { %3059 = vrot.lane.b32.xlu0 %v3038_v1, %s3641_s30  ;;  %2117 = vmatprep.subr.mxu1 %v925_v27  ;;  %v2298_v39 = vpop.permute.xlu1 %2297 }
 0x338   : > { %2118 = vmatpush2.msra.mxu1 %v924_v35  ;;  %2861 = vmatpush1.msra.mxu0 %v2322_v15  ;;  %v2321_v59 = vsel %vm2319_vm12, %v2298_v39, %v2300_v43  ;;  %v5520_v15 = vld [vmem:[#allocation16_spill] sm:$0xff]  ;;  %v1128_v43 = vld [vmem:[%s5445_s2] sm:$0xff]  ;;  %v5522_v35 = vld [vmem:[#allocation14_spill] sm:$0xff] }
 0x339   : > { %2119 = vmatprep.subr.mxu1 %v923_v56  ;;  %2862 = vmatprep.subr.mxu0 %v2321_v59  ;;  %v826_v1 = vsel %vm824_vm6, %v5521_v46, %v5520_v15  ;;  %v1131_v56 = vld [vmem:[%s5445_s2 + $0x40] sm:$0xff] }
 0x33a   : > { %2120 = vmatpush2.msra.mxu1 %v922_v40  ;;  %2493 = vrot.lane.b32.xlu1 %v2473_v58, %s3636_s14  ;;  %v2223_v10 = vpop.permute.xlu0 %2222  ;;  %v1911_v58 = vld [vmem:[%s5445_s2 + $0x50] sm:$0xff] }
 0x33b   : > { %2505 = vrot.lane.b32.xlu0 %v2479_v26, %s3636_s14  ;;  %2121 = vmatprep.subr.mxu1 %v921_v57  ;;  %v2296_v32 = vpop.permute.xlu1 %2295  ;;  %v2963_v57 = vmul.f32 %v4971_v61, %v3951_v34  ;;  %v2475_v34 = vmul.f32 %v5142_v14, %v3914_v17 }
 0x33c   : > { %2122 = vmatpush2.msra.mxu1 %v920_v19  ;;  %v2320_v50 = vsel %vm2319_vm12, %v2296_v32, %v2298_v39  ;;  %v825_v39 = vsel %vm824_vm6, %v5522_v35, %v5521_v46  ;;  %2050 = vmatprep.mubr.f32.mxu0 %v1911_v58 }
 0x33d   : > { %2123 = vmatprep.subr.mxu1 %v919_v0  ;;  %2863 = vmatpush1.msra.mxu0 %v2320_v50  ;;  %v1912_v0 = vld [vmem:[%s5445_s2 + $0x80] sm:$0xff]  ;;  %v2962_v50 = vmul.f32 %v5200_v52, %v3936_v28 }
 0x33e   : > { %2124 = vmatpush2.msra.mxu1 %v918_v54  ;;  %3055 = vrot.lane.b32.xlu1 %v3036_v5, %s3641_s30  ;;  %v2221_v25 = vpop.permute.xlu0 %2220  ;;  %v1132_v5 = vld [vmem:[%s5445_s2 + $0x70] sm:$0xff] }
 0x33f   : > { %2503 = vrot.lane.b32.xlu0 %v2478_v41, %s3636_s14  ;;  %2125 = vmatprep.subr.mxu1 %v832_v16  ;;  %v2225_v31 = vpop.permute.xlu1 %2224  ;;  %v2233_v9 = vsel %vm2226_vm0, %v2221_v25, %v2223_v10  ;;  %v1135_v41 = vld [vmem:[%s5445_s2 + $0xb0] sm:$0xff]  ;;  %v1914_v16 = vld [vmem:[%s5445_s2 + $0xb8] sm:$0xff]  ;;  %v2961_v25 = vmul.f32 %v4971_v61, %v3925_v23  ;;  %v2472_v23 = vmul.f32 %v5142_v14, %v3902_v11 }
 0x340   : > { %2126 = vmatpush2.msra.mxu1 %v831_v21  ;;  %v2234_v49 = vsel %vm2226_vm0, %v2223_v10, %v2225_v31  ;;  %v1913_v10 = vld [vmem:[%s5445_s2 + $0x88] sm:$0xff]  ;;  %2051 = vmatmul.mubr.f32.gmra.mxu0 %v1910_v33  ;;  %v2471_v14 = vmul.f32 %v4960_v53, %v3890_v4 }
 0x341   : > { %2127 = vmatprep.subr.mxu1 %v830_v6  ;;  %2864 = vmatprep.subr.mxu0 %v2234_v49  ;;  %v2769_v21 = vld [vmem:[%s5445_s2 + $0x28] sm:$0xff]  ;;  %v2960_v6 = vmul.f32 %v5200_v52, %v3914_v17  ;;  %v2959_v17 = vmul.f32 %v4971_v61, %v3917_v18 }
 0x342   : > { %2128 = vmatpush2.msra.mxu1 %v829_v42  ;;  %3053 = vrot.lane.b32.xlu1 %v3035_v22, %s3641_s30  ;;  %v2219_v36 = vpop.permute.xlu0 %2218  ;;  %v3653_v22 = vmov 0.0  }
 0x343   : > { %2501 = vrot.lane.b32.xlu0 %v2477_v51, %s3636_s14  ;;  %2129 = vmatprep.subr.mxu1 %v828_v45  ;;  %v2217_v24 = vpop.permute.xlu1 %2216  ;;  %v2957_v45 = vmul.f32 %v5200_v52, %v3902_v11 }
 0x344   : > { %2130 = vmatpush2.msra.mxu1 %v827_v13  ;;  %2865 = vmatpush1.msra.mxu0 %v2233_v9  ;;  %v2232_v27 = vsel %vm2226_vm0, %v2217_v24, %v2219_v36  ;;  %v2956_v36 = vmul.f32 %v4971_v61, %v3890_v4  ;;  %v3312_v4 = vld [vmem:[%s5446_s3] sm:$0xff] }
 0x345   : > { %2131 = vmatprep.subr.mxu1 %v826_v1  ;;  %2866 = vmatprep.subr.mxu0 %v2232_v27 }
 0x346   : > { %2132 = vmatpush2.msra.mxu1 %v825_v39  ;;  %2978 = vrot.lane.b32.xlu1 %v2958_v48, %s3640_s22  ;;  %v2211_v59 = vpop.permute.xlu0 %2210  ;;  %v3314_v48 = vld [vmem:[%s5446_s3 + $0x10] sm:$0xff] }
 0x347   : > { %2990 = vrot.lane.b32.xlu0 %v2964_v38, %s3640_s22  ;;  %v2215_v40 = vpop.permute.xlu1 %2214  ;;  %2134 = vmatmul.mubr.f32.vlgmr.msra.gmra.mxu1 %v1128_v43  ;;  %v3315_v43 = vld [vmem:[%s5446_s3 + $0x18] sm:$0xff] }
 0x348   : > { %v2231_v26 = vsel %vm2226_vm0, %v2215_v40, %v2217_v24  ;;  %2139 = vmatprep.mubr.f32.mxu1 %v1131_v56  ;;  %2056 = vmatprep.mubr.f32.mxu0 %v1913_v10  ;;  %v3313_v24 = vld [vmem:[%s5446_s3 + $0x8] sm:$0xff] }
 0x349   : > { %2867 = vmatpush1.msra.mxu0 %v2231_v26 }
 0x34a   : > { %2499 = vrot.lane.b32.xlu1 %v2476_v12, %s3636_s14  ;;  %v2209_v19 = vpop.permute.xlu0 %2208  ;;  %2057 = vmatmul.mubr.f32.gmra.mxu0 %v1912_v0 }
 0x34b   : > { %2988 = vrot.lane.b32.xlu0 %v2963_v57, %s3640_s22  ;;  %v2229_v32 = vsel %vm2226_vm0, %v2209_v19, %v2211_v59  ;;  %v2213_v20 = vpop.permute.xlu1 %2212  ;;  %2140 = vmatmul.mubr.f32.gmra.mxu1 %v1130_v3 }
 0x34c   : > { %v2230_v44 = vsel %vm2226_vm0, %v2211_v59, %v2213_v20  ;;  %2145 = vmatprep.mubr.f32.mxu1 %v1133_v63  ;;  %2062 = vmatprep.mubr.f32.mxu0 %v1915_v7 }
 0x34d   : > { %2868 = vmatprep.subr.mxu0 %v2230_v44 }
 0x34e   : > { %2497 = vrot.lane.b32.xlu1 %v2475_v34, %s3636_s14  ;;  %2869 = vmatpush1.msra.mxu0 %v2229_v32  ;;  %v2207_v54 = vpop.permute.xlu0 %2206 }
 0x34f   : > { %2986 = vrot.lane.b32.xlu0 %v2962_v50, %s3640_s22  ;;  %v2205_v28 = vpop.permute.xlu1 %2204  ;;  %2146 = vmatmul.mubr.f32.gmra.mxu1 %v1132_v5 }
 0x350   : > { %v2228_v8 = vsel %vm2226_vm0, %v2205_v28, %v2207_v54  ;;  %2151 = vmatprep.mubr.f32.mxu1 %v1135_v41  ;;  %2063 = vmatmul.mubr.f32.gmra.mxu0 %v1914_v16 }
 0x351   : > { %2870 = vmatprep.subr.mxu0 %v2228_v8  ;;  %2904 = vmatprep.mubr.f32.mxu0 %v2769_v21 }
 0x352   : > { %2495 = vrot.lane.b32.xlu1 %v2474_v62, %s3636_s14  ;;  %v2731_v31 = vpop.permute.xlu0 %2730 }
 0x353   : > { %2984 = vrot.lane.b32.xlu0 %v2961_v25, %s3640_s22  ;;  %v2203_v37 = vpop.permute.xlu1 %2202  ;;  %2152 = vmatmul.mubr.f32.gmra.mxu1 %v1134_v29 }
 0x354   : > { %v2227_v30 = vsel %vm2226_vm0, %v2203_v37, %v2205_v28  ;;  %3279 = vmatprep.mubr.f32.mxu1 %v3653_v22 }
 0x355   : > { %2871 = vmatpush1.msra.mxu0 %v2227_v30 }
 0x356   : > { %2491 = vrot.lane.b32.xlu1 %v2472_v23, %s3636_s14  ;;  %v2741_v49 = vpop.permute.xlu0 %2740 }
 0x357   : > { %2982 = vrot.lane.b32.xlu0 %v2960_v6, %s3640_s22  ;;  %v2743_v9 = vpop.permute.xlu1 %2742 }
 0x358   : > { %v2750_v47 = vsel %vm917_vm4, %v2741_v49, %v2743_v9  ;;  %v2751_v42 = vsel %vm917_vm4, %v2743_v9, %v2731_v31 }
 0x359   : > { %2872 = vmatprep.subr.mxu0 %v2751_v42 }
 0x35a   : > { %2489 = vrot.lane.b32.xlu1 %v2471_v14, %s3636_s14  ;;  %2873 = vmatpush2.msra.mxu0 %v2750_v47  ;;  %v2737_v51 = vpop.permute.xlu0 %2736 }
 0x35b   : > { %2980 = vrot.lane.b32.xlu0 %v2959_v17, %s3640_s22  ;;  %v2739_v60 = vpop.permute.xlu1 %2738 }
 0x35c   : > { %v2748_v2 = vsel %vm917_vm4, %v2737_v51, %v2739_v60  ;;  %v2749_v53 = vsel %vm917_vm4, %v2739_v60, %v2731_v31 }
 0x35d   : > { %2874 = vmatprep.subr.mxu0 %v2749_v53 }
 0x35e   : > { %2976 = vrot.lane.b32.xlu1 %v2957_v45, %s3640_s22  ;;  %2875 = vmatpush2.msra.mxu0 %v2748_v2  ;;  %v2733_v18 = vpop.permute.xlu0 %2732 }
 0x35f   : > { %2974 = vrot.lane.b32.xlu0 %v2956_v36, %s3640_s22  ;;  %v2735_v55 = vpop.permute.xlu1 %2734 }
 0x360   : > { %v2746_v13 = vsel %vm917_vm4, %v2733_v18, %v2735_v55  ;;  %v2747_v11 = vsel %vm917_vm4, %v2735_v55, %v2731_v31 }
 0x361   : > { %2876 = vmatprep.subr.mxu0 %v2747_v11 }
 0x362   : > { %2877 = vmatpush2.msra.mxu0 %v2746_v13  ;;  %v2727_v61 = vpop.permute.xlu0 %2726  ;;  %3318 = vperm.xlu1 %3609, %v3312_v4  }
 0x363   : > { %3323 = vperm.xlu0 %3608, %v3313_v24   ;;  %v2729_v52 = vpop.permute.xlu1 %2728 }
 0x364   : > { %v2744_v15 = vsel %vm917_vm4, %v2727_v61, %v2729_v52  ;;  %v2745_v46 = vsel %vm917_vm4, %v2729_v52, %v2731_v31 }
 0x365   : > { %2878 = vmatprep.subr.mxu0 %v2745_v46 }
 0x366   : > { %2879 = vmatpush2.msra.mxu0 %v2744_v15  ;;  %v2664_v1 = vpop.permute.xlu0 %2663  ;;  %3328 = vperm.xlu1 %3609, %v3314_v48  }
 0x367   : > { %v2652_v27 = vpop.permute.xlu1 %2651 }
 0x368   : > { %v2672_v35 = vsel %vm824_vm6, %v2664_v1, %v2652_v27 }
 0x369   : > { %2880 = vmatprep.subr.mxu0 %v2672_v35 }
 0x36a   : > { %v2660_v39 = vpop.permute.xlu0 %2659  ;;  %3333 = vperm.xlu1 %3609, %v3315_v43  }
 0x36b   : > { %v2662_v38 = vpop.permute.xlu1 %2661  ;;  %v2670_v58 = vsel %vm824_vm6, %v2660_v39, %v2652_v27 }
 0x36c   : > { %v2671_v56 = vsel %vm824_vm6, %v2662_v38, %v2664_v1 }
 0x36d   : > { %2881 = vmatpush2.msra.mxu0 %v2671_v56 }
 0x36e   : > { %2882 = vmatprep.subr.mxu0 %v2670_v58  ;;  %v3149_v59 = vpop.permute.xlu0 %3148 }
 0x36f   : > { %v3137_v40 = vpop.permute.xlu1 %3136 }
 0x370   : > { %v3157_v33 = vsel %vm1268_vm7, %v3149_v59, %v3137_v40 }
 0x371   : > { %3223 = vmatprep.subr.mxu1 %v3157_v33 }
 0x372   : > { %v3147_v26 = vpop.permute.xlu0 %3146 }
 0x373   : > { %v3156_v12 = vsel %vm1268_vm7, %v3147_v26, %v3149_v59  ;;  %v2658_v3 = vpop.permute.xlu1 %2657 }
 0x374   : > { %v2669_v57 = vsel %vm824_vm6, %v2658_v3, %v2660_v39  ;;  %3224 = vmatpush1.msra.mxu1 %v3156_v12 }
 0x375   : > { %2883 = vmatpush2.msra.mxu0 %v2669_v57 }
 0x376   : > { %v3145_v10 = vpop.permute.xlu0 %3144 }
 0x377   : > { %v2656_v63 = vpop.permute.xlu1 %2655  ;;  %v3155_v19 = vsel %vm1268_vm7, %v3145_v10, %v3137_v40 }
 0x378   : > { %v2668_v32 = vsel %vm824_vm6, %v2656_v63, %v2652_v27  ;;  %3225 = vmatprep.subr.mxu1 %v3155_v19 }
 0x379   : > { %2884 = vmatprep.subr.mxu0 %v2668_v32 }
 0x37a   : > { %v3143_v20 = vpop.permute.xlu0 %3142 }
 0x37b   : > { %v3154_v34 = vsel %vm1268_vm7, %v3143_v20, %v3145_v10  ;;  %v2654_v44 = vpop.permute.xlu1 %2653 }
 0x37c   : > { %v2667_v0 = vsel %vm824_vm6, %v2654_v44, %v2656_v63  ;;  %3226 = vmatpush1.msra.mxu1 %v3154_v34 }
 0x37d   : > { %2885 = vmatpush2.msra.mxu0 %v2667_v0 }
 0x37e   : > { %v3141_v50 = vpop.permute.xlu0 %3140 }
 0x37f   : > { %v2650_v5 = vpop.permute.xlu1 %2649  ;;  %v3153_v7 = vsel %vm1268_vm7, %v3141_v50, %v3137_v40 }
 0x380   : > { %v2666_v54 = vsel %vm824_vm6, %v2650_v5, %v2652_v27  ;;  %3227 = vmatprep.subr.mxu1 %v3153_v7 }
 0x381   : > { %2886 = vmatprep.subr.mxu0 %v2666_v54 }
 0x382   : > { %v3139_v41 = vpop.permute.xlu0 %3138 }
 0x383   : > { %v3152_v28 = vsel %vm1268_vm7, %v3139_v41, %v3141_v50  ;;  %v2648_v62 = vpop.permute.xlu1 %2647 }
 0x384   : > { %v2665_v8 = vsel %vm824_vm6, %v2648_v62, %v2650_v5  ;;  %3228 = vmatpush1.msra.mxu1 %v3152_v28 }
 0x385   : > { %2887 = vmatpush2.msra.mxu0 %v2665_v8 }
 0x386   : > { %v2585_v16 = vpop.permute.xlu0 %2584 }
 0x387   : > { %v2573_v25 = vpop.permute.xlu1 %2572 }
 0x388   : > { %v2593_v29 = vsel %vm731_vm1, %v2585_v16, %v2573_v25 }
 0x389   : > { %2888 = vmatprep.subr.mxu0 %v2593_v29  ;;  %v2768_v29 = vld [vmem:[%s5445_s2 + $0x20] sm:$0xff] }
 0x38a   : > { %v2583_v21 = vpop.permute.xlu0 %2582 }
 0x38b   : > { %v2592_v31 = vsel %vm731_vm1, %v2583_v21, %v2585_v16  ;;  %v3135_v37 = vpop.permute.xlu1 %3134 }
 0x38c   : > { %2889 = vmatpush2.msra.mxu0 %v2592_v31  ;;  %v3151_v30 = vsel %vm1268_vm7, %v3135_v37, %v3137_v40 }
 0x38d   : > { %3229 = vmatprep.subr.mxu1 %v3151_v30 }
 0x38e   : > { %v2581_v23 = vpop.permute.xlu0 %2580 }
 0x38f   : > { %v3133_v6 = vpop.permute.xlu1 %3132  ;;  %v2591_v49 = vsel %vm731_vm1, %v2581_v23, %v2573_v25 }
 0x390   : > { %v3150_v9 = vsel %vm1268_vm7, %v3133_v6, %v3135_v37  ;;  %2890 = vmatprep.subr.mxu0 %v2591_v49  ;;  %v2771_v37 = vld [vmem:[%s5445_s2 + $0x60] sm:$0xff]  ;;  %v2770_v6 = vld [vmem:[%s5445_s2 + $0x58] sm:$0xff] }
 0x391   : > { %3230 = vmatpush1.msra.mxu1 %v3150_v9 }
 0x392   : > { %v3070_v47 = vpop.permute.xlu0 %3069 }
 0x393   : > { %v3058_v14 = vpop.permute.xlu1 %3057 }
 0x394   : > { %v3078_v42 = vsel %vm1103_vm11, %v3070_v47, %v3058_v14 }
 0x395   : > { %3231 = vmatprep.subr.mxu1 %v3078_v42 }
 0x396   : > { %v3068_v17 = vpop.permute.xlu0 %3067 }
 0x397   : > { %v3077_v51 = vsel %vm1103_vm11, %v3068_v17, %v3070_v47  ;;  %v2579_v60 = vpop.permute.xlu1 %2578  ;;  %v3174_v47 = vld [vmem:[%s5445_s2 + $0x30] sm:$0xff] }
 0x398   : > { %v2590_v2 = vsel %vm731_vm1, %v2579_v60, %v2581_v23  ;;  %3232 = vmatpush1.msra.mxu1 %v3077_v51  ;;  %v2772_v17 = vld [vmem:[%s5445_s2 + $0x90] sm:$0xff]  ;;  %v3175_v51 = vld [vmem:[%s5445_s2 + $0x68] sm:$0xff] }
 0x399   : > { %2891 = vmatpush2.msra.mxu0 %v2590_v2  ;;  %v2775_v60 = vld [vmem:[%s5445_s2 + $0xd0] sm:$0xff]  ;;  %v2774_v2 = vld [vmem:[%s5445_s2 + $0xc8] sm:$0xff] }
 0x39b   : > { %v2577_v45 = vpop.permute.xlu1 %2576 }
 0x39c   : > { %v3066_v53 = vpop.permute.xlu0 %3065  ;;  %v2589_v36 = vsel %vm731_vm1, %v2577_v45, %v2573_v25 }
 0x39d   : > { %2892 = vmatprep.subr.mxu0 %v2589_v36  ;;  %v3076_v18 = vsel %vm1103_vm11, %v3066_v53, %v3058_v14 }
 0x39e   : > { %3233 = vmatprep.subr.mxu1 %v3076_v18 }
 0x3a0   : > { %v3064_v55 = vpop.permute.xlu0 %3063  ;;  %v2575_v13 = vpop.permute.xlu1 %2574 }
 0x3a1   : > { %v3075_v24 = vsel %vm1103_vm11, %v3064_v55, %v3066_v53  ;;  %v2588_v11 = vsel %vm731_vm1, %v2575_v13, %v2577_v45  ;;  %v3176_v45 = vld [vmem:[%s5445_s2 + $0xa0] sm:$0xff]  ;;  %v3177_v53 = vld [vmem:[%s5445_s2 + $0xd8] sm:$0xff] }
 0x3a2   : > { %2893 = vmatpush2.msra.mxu0 %v2588_v11  ;;  %3234 = vmatpush1.msra.mxu1 %v3075_v24 }
 0x3a4   : > { %v2571_v4 = vpop.permute.xlu1 %2570 }
 0x3a5   : > { %v3062_v61 = vpop.permute.xlu0 %3061  ;;  %v2587_v52 = vsel %vm731_vm1, %v2571_v4, %v2573_v25 }
 0x3a6   : > { %2894 = vmatprep.subr.mxu0 %v2587_v52  ;;  %v3074_v48 = vsel %vm1103_vm11, %v3062_v61, %v3058_v14 }
 0x3a7   : > { %3235 = vmatprep.subr.mxu1 %v3074_v48 }
 0x3a8   : > { %v2569_v15 = vpop.permute.xlu1 %2568 }
 0x3a9   : > { %v3060_v46 = vpop.permute.xlu0 %3059  ;;  %v2586_v1 = vsel %vm731_vm1, %v2569_v15, %v2571_v4 }
 0x3aa   : > { %v3073_v27 = vsel %vm1103_vm11, %v3060_v46, %v3062_v61  ;;  %2895 = vmatpush2.msra.mxu0 %v2586_v1 }
 0x3ab   : > { %3236 = vmatpush1.msra.mxu1 %v3073_v27 }
 0x3ac   : > { %v2494_v43 = vpop.permute.xlu1 %2493 }
 0x3ad   : > { %v2506_v35 = vpop.permute.xlu0 %2505 }
 0x3ae   : > { %v2514_v39 = vsel %vm638_vm3, %v2506_v35, %v2494_v43 }
 0x3af   : > { %2896 = vmatprep.subr.mxu0 %v2514_v39 }
 0x3b0   : > { %v3056_v38 = vpop.permute.xlu1 %3055 }
 0x3b1   : > { %v2504_v58 = vpop.permute.xlu0 %2503  ;;  %v3072_v56 = vsel %vm1103_vm11, %v3056_v38, %v3058_v14  ;;  %v2773_v14 = vld [vmem:[%s5445_s2 + $0x98] sm:$0xff] }
 0x3b2   : > { %v2513_v59 = vsel %vm638_vm3, %v2504_v58, %v2506_v35  ;;  %3237 = vmatprep.subr.mxu1 %v3072_v56 }
 0x3b3   : > { %2897 = vmatpush2.msra.mxu0 %v2513_v59 }
 0x3b4   : > { %v3054_v40 = vpop.permute.xlu1 %3053 }
 0x3b5   : > { %v2502_v33 = vpop.permute.xlu0 %2501  ;;  %v3071_v26 = vsel %vm1103_vm11, %v3054_v40, %v3056_v38 }
 0x3b6   : > { %v2512_v12 = vsel %vm638_vm3, %v2502_v33, %v2494_v43  ;;  %3238 = vmatpush1.msra.mxu1 %v3071_v26 }
 0x3b7   : > { %2898 = vmatprep.subr.mxu0 %v2512_v12 }
 0x3b8   : > { %v2979_v3 = vpop.permute.xlu1 %2978 }
 0x3b9   : > { %v2991_v57 = vpop.permute.xlu0 %2990 }
 0x3ba   : > { %v2999_v10 = vsel %vm1010_vm15, %v2991_v57, %v2979_v3 }
 0x3bb   : > { %3239 = vmatprep.subr.mxu1 %v2999_v10 }
 0x3bc   : > { %v2500_v63 = vpop.permute.xlu1 %2499 }
 0x3bd   : > { %v2989_v19 = vpop.permute.xlu0 %2988  ;;  %v2511_v32 = vsel %vm638_vm3, %v2500_v63, %v2502_v33 }
 0x3be   : > { %v2998_v20 = vsel %vm1010_vm15, %v2989_v19, %v2991_v57  ;;  %2899 = vmatpush2.msra.mxu0 %v2511_v32 }
 0x3bf   : > { %3240 = vmatpush1.msra.mxu1 %v2998_v20 }
 0x3c0   : > { %v2498_v34 = vpop.permute.xlu1 %2497 }
 0x3c1   : > { %v2987_v44 = vpop.permute.xlu0 %2986  ;;  %v2510_v0 = vsel %vm638_vm3, %v2498_v34, %v2494_v43 }
 0x3c2   : > { %2900 = vmatprep.subr.mxu0 %v2510_v0  ;;  %v2997_v50 = vsel %vm1010_vm15, %v2987_v44, %v2979_v3 }
 0x3c3   : > { %3241 = vmatprep.subr.mxu1 %v2997_v50 }
 0x3c4   : > { %v2496_v5 = vpop.permute.xlu1 %2495 }
 0x3c5   : > { %v2985_v7 = vpop.permute.xlu0 %2984  ;;  %v2509_v54 = vsel %vm638_vm3, %v2496_v5, %v2498_v34 }
 0x3c6   : > { %v2996_v41 = vsel %vm1010_vm15, %v2985_v7, %v2987_v44  ;;  %2901 = vmatpush2.msra.mxu0 %v2509_v54 }
 0x3c7   : > { %3242 = vmatpush1.msra.mxu1 %v2996_v41 }
 0x3c8   : > { %v2492_v28 = vpop.permute.xlu1 %2491 }
 0x3c9   : > { %v2983_v62 = vpop.permute.xlu0 %2982  ;;  %v2508_v8 = vsel %vm638_vm3, %v2492_v28, %v2494_v43 }
 0x3ca   : > { %2902 = vmatprep.subr.mxu0 %v2508_v8  ;;  %v2995_v16 = vsel %vm1010_vm15, %v2983_v62, %v2979_v3 }
 0x3cb   : > { %3243 = vmatprep.subr.mxu1 %v2995_v16 }
 0x3cc   : > { %v2490_v25 = vpop.permute.xlu1 %2489 }
 0x3cd   : > { %v2981_v21 = vpop.permute.xlu0 %2980  ;;  %v2507_v31 = vsel %vm638_vm3, %v2490_v25, %v2492_v28 }
 0x3ce   : > { %v2994_v30 = vsel %vm1010_vm15, %v2981_v21, %v2983_v62  ;;  %2903 = vmatpush2.msra.mxu0 %v2507_v31 }
 0x3cf   : > { %3244 = vmatpush1.msra.mxu1 %v2994_v30  ;;  %2905 = vmatmul.mubr.f32.vlgmr.msra.gmra.mxu0 %v2768_v29  ;;  %v2046_v36 = vpop.f32.mrf.mxu0 }
 0x3d0   : > { %v2977_v23 = vpop.permute.xlu1 %2976  ;;  %2910 = vmatprep.mubr.f32.mxu0 %v2771_v37 }
 0x3d1   : > { %v2975_v49 = vpop.permute.xlu0 %2974  ;;  %v2993_v9 = vsel %vm1010_vm15, %v2977_v23, %v2979_v3  ;;  %v2048_v18 = vpop.f32.mrf.mxu0 }
 0x3d2   : > { %v2992_v42 = vsel %vm1010_vm15, %v2975_v49, %v2977_v23  ;;  %3245 = vmatprep.subr.mxu1 %v2993_v9 }
 0x3d3   : > { %2911 = vmatmul.mubr.f32.gmra.mxu0 %v2770_v6  ;;  %3246 = vmatpush1.msra.mxu1 %v2992_v42 }
 0x3d4   : > { %3551 = vmatmul.mubr.msk.f32.vlgmr.msra.gmra.mxu1 %vm3202_vm14, %v3174_v47  ;;  %2916 = vmatprep.mubr.f32.mxu0 %v2773_v14 }
 0x3d5   : > { %3285 = vmatprep.mubr.f32.mxu1 %v3653_v22 }
 0x3d7   : > { %2917 = vmatmul.mubr.f32.gmra.mxu0 %v2772_v17 }
 0x3d8   : > { %3552 = vmatmul.mubr.msk.f32.gmra.mxu1 %vm3202_vm14, %v3175_v51  ;;  %2922 = vmatprep.mubr.f32.mxu0 %v2775_v60 }
 0x3d9   : > { %3291 = vmatprep.mubr.f32.mxu1 %v3653_v22 }
 0x3db   : > { %2923 = vmatmul.mubr.f32.gmra.mxu0 %v2774_v2 }
 0x3dc   : > { %3553 = vmatmul.mubr.msk.f32.gmra.mxu1 %vm3202_vm14, %v3176_v45 }
 0x3dd   : > { %3297 = vmatprep.mubr.f32.mxu1 %v3653_v22  ;;  %v3319_v57 = vpop.permute.xlu1 %3318 }
 0x3de   : > { %v3324_v41 = vpop.permute.xlu0 %3323 }
 0x3e0   : > { %3554 = vmatmul.mubr.msk.f32.gmra.mxu1 %vm3202_vm14, %v3177_v53 }
 0x3e1   : > { %v3329_v31 = vpop.permute.xlu1 %3328 }
 0x400   : > { %v2052_v55 = vpop.f32.mrf.mxu0 }
 0x402   : > { %v2054_v24 = vpop.f32.mrf.mxu0 }
 0x407   : > { %v2135_v13 = vpop.f32.mrf.mxu1 }
 0x408   : > { %v2136_v35 = vadd.f32 %v2135_v13, %v2046_v36  ;;  %v3334_v13 = vpop.permute.xlu1 %3333 }
 0x409   : > { %v2137_v11 = vpop.f32.mrf.mxu1 }
 0x40a   : > { %v2058_v61 = vpop.f32.mrf.mxu0  ;;  %v2138_v58 = vadd.f32 %v2137_v11, %v2048_v18 }
 0x40b   : > { %v2141_v4 = vpop.f32.mrf.mxu1 }
 0x40c   : > { %v2060_v48 = vpop.f32.mrf.mxu0  ;;  %v2142_v33 = vadd.f32 %v2141_v4, %v2052_v55 }
 0x40d   : > { %v2143_v52 = vpop.f32.mrf.mxu1 }
 0x40e   : > { %v2144_v63 = vadd.f32 %v2143_v52, %v2054_v24 }
 0x40f   : > { %v2147_v15 = vpop.f32.mrf.mxu1 }
 0x410   : > { %v2064_v46 = vpop.f32.mrf.mxu0  ;;  %v2148_v0 = vadd.f32 %v2147_v15, %v2058_v61 }
 0x411   : > { %v2149_v22 = vpop.f32.mrf.mxu1 }
 0x412   : > { %v2066_v1 = vpop.f32.mrf.mxu0  ;;  %v2150_v28 = vadd.f32 %v2149_v22, %v2060_v48 }
 0x413   : > { %v2153_v27 = vpop.f32.mrf.mxu1 }
 0x414   : > { %v2154_v30 = vadd.f32 %v2153_v27, %v2064_v46 }
 0x415   : > { %v2155_v38 = vpop.f32.mrf.mxu1 }
 0x416   : > { %v2156_v9 = vadd.f32 %v2155_v38, %v2066_v1 }
 0x48f   : > { %v2906_v43 = vpop.f32.mrf.mxu0 }
 0x490   : > { %v2929_v56 = vadd.f32 %v2906_v43, %v2136_v35 }
 0x491   : > { %v2908_v39 = vpop.f32.mrf.mxu0 }
 0x492   : > { %v2930_v26 = vadd.f32 %v2908_v39, %v2138_v58 }
 0x493   : > { %v2912_v59 = vpop.f32.mrf.mxu0 }
 0x494   : > { %v3281_v40 = vpop.f32.mrf.mxu1  ;;  %v2931_v19 = vadd.f32 %v2912_v59, %v2142_v33 }
 0x495   : > { %v3304_v12 = vadd.f32 %v3281_v40, %v2929_v56  ;;  %v2914_v3 = vpop.f32.mrf.mxu0 }
 0x496   : > { %v3283_v10 = vpop.f32.mrf.mxu1  ;;  %v2932_v50 = vadd.f32 %v2914_v3, %v2144_v63 }
 0x497   : > { %v3336_v32 = vadd.f32 %v3319_v57, %v3304_v12  ;;  %v3305_v20 = vadd.f32 %v3283_v10, %v2930_v26  ;;  %v2918_v34 = vpop.f32.mrf.mxu0 }
 0x498   : > { %v3287_v44 = vpop.f32.mrf.mxu1  ;;  %v2933_v8 = vadd.f32 %v2918_v34, %v2148_v0 }
 0x499   : > { %3344 = vst [vmem:[%s5418_s12] sm:$0xff] %v3336_v32  ;;  %v3337_v5 = vadd.f32 %v3319_v57, %v3305_v20  ;;  %v3306_v7 = vadd.f32 %v3287_v44, %v2931_v19  ;;  %v2920_v54 = vpop.f32.mrf.mxu0  ;;  %v3364_v53 = vmul.f32 %v3336_v32, %v3336_v32 }
 0x49a   : > { %v3289_v62 = vpop.f32.mrf.mxu1  ;;  %v2934_v23 = vadd.f32 %v2920_v54, %v2150_v28 }
 0x49b   : > { %3345 = vst [vmem:[%s5418_s12 + $0x8] sm:$0xff] %v3337_v5  ;;  %v3338_v16 = vadd.f32 %v3324_v41, %v3306_v7  ;;  %v3307_v25 = vadd.f32 %v3289_v62, %v2932_v50  ;;  %v2924_v29 = vpop.f32.mrf.mxu0  ;;  %v3352_v21 = vadd.f32 %v3337_v5, %v3336_v32  ;;  %v3365_v42 = vmul.f32 %v3337_v5, %v3337_v5 }
 0x49c   : > { %v3293_v37 = vpop.f32.mrf.mxu1  ;;  %v2935_v17 = vadd.f32 %v2924_v29, %v2154_v30 }
 0x49d   : > { %3346 = vst [vmem:[%s5418_s12 + $0x10] sm:$0xff] %v3338_v16  ;;  %v3339_v6 = vadd.f32 %v3324_v41, %v3307_v25  ;;  %v3308_v49 = vadd.f32 %v3293_v37, %v2933_v8  ;;  %3353 = vadd.xlane.f32.xlu0 %v3352_v21  ;;  %v2926_v47 = vpop.f32.mrf.mxu0  ;;  %v3372_v11 = vadd.f32 %v3365_v42, %v3364_v53 }
 0x49e   : > { %v3295_v14 = vpop.f32.mrf.mxu1  ;;  %v2936_v36 = vadd.f32 %v2926_v47, %v2156_v9  ;;  %v3366_v43 = vmul.f32 %v3338_v16, %v3338_v16 }
 0x49f   : > { %3347 = vst [vmem:[%s5418_s12 + $0x18] sm:$0xff] %v3339_v6  ;;  %v3340_v51 = vadd.f32 %v3329_v31, %v3308_v49  ;;  %v3309_v60 = vadd.f32 %v3295_v14, %v2934_v23  ;;  %v3355_v2 = vadd.f32 %v3339_v6, %v3338_v16  ;;  %v3367_v27 = vmul.f32 %v3339_v6, %v3339_v6 }
 0x4a0   : > { %v3299_v45 = vpop.f32.mrf.mxu1 }
 0x4a1   : > { %3348 = vst [vmem:[%s5418_s12 + $0x20] sm:$0xff] %v3340_v51  ;;  %v3341_v18 = vadd.f32 %v3329_v31, %v3309_v60  ;;  %v3310_v55 = vadd.f32 %v3299_v45, %v2935_v17  ;;  %3356 = vadd.xlane.f32.xlu1 %v3355_v2  ;;  %v3368_v46 = vmul.f32 %v3340_v51, %v3340_v51 }
 0x4a2   : > { %v3301_v24 = vpop.f32.mrf.mxu1  ;;  %v3375_v35 = vadd.f32 %v3367_v27, %v3366_v43 }
 0x4a3   : > { %3349 = vst [vmem:[%s5418_s12 + $0x28] sm:$0xff] %v3341_v18  ;;  %v3342_v4 = vadd.f32 %v3334_v13, %v3310_v55  ;;  %v3311_v61 = vadd.f32 %v3301_v24, %v2936_v36  ;;  %v3358_v52 = vadd.f32 %v3341_v18, %v3340_v51  ;;  %v3369_v48 = vmul.f32 %v3341_v18, %v3341_v18 }
 0x4a5   : > { %3350 = vst [vmem:[%s5418_s12 + $0x30] sm:$0xff] %v3342_v4  ;;  %v3343_v15 = vadd.f32 %v3334_v13, %v3311_v61  ;;  %3373 = vadd.xlane.f32.xlu1 %v3372_v11  ;;  %3359 = vadd.xlane.f32.xlu0 %v3358_v52  ;;  %v3378_v22 = vadd.f32 %v3369_v48, %v3368_v46 }
 0x4a6   : > { %v3370_v38 = vmul.f32 %v3342_v4, %v3342_v4 }
 0x4a7   : > { %3351 = vst [vmem:[%s5418_s12 + $0x38] sm:$0xff] %v3343_v15  ;;  %v3361_v1 = vadd.f32 %v3343_v15, %v3342_v4  ;;  %v3371_v39 = vmul.f32 %v3343_v15, %v3343_v15 }
 0x4a9   : > { %3379 = vadd.xlane.f32.xlu1 %v3378_v22  ;;  %3362 = vadd.xlane.f32.xlu0 %v3361_v1  ;;  %v3381_v58 = vadd.f32 %v3371_v39, %v3370_v38 }
 0x4ad   : > { %3376 = vadd.xlane.f32.xlu0 %v3375_v35 }
 0x4b1   : > { %3382 = vadd.xlane.f32.xlu0 %v3381_v58 }
 0x526   : > { %v3354_v56 = vpop.xlane.xlu0 %3353 }
 0x52a   : > { %v3357_v59 = vpop.xlane.xlu1 %3356 }
 0x52e   : > { %v3360_v40 = vpop.xlane.xlu0 %3359  ;;  %v3374_v33 = vpop.xlane.xlu1 %3373 }
 0x52f   : > { %v3384_v26 = vsel %vm492_vm9, %v3354_v56, %v3374_v33 }
 0x530   : > { %3388 = vst.msk [vmem:[%s298_s10] sm:$0xff] %vm585_vm10, %v3384_v26 }
 0x532   : > { %v3363_v12 = vpop.xlane.xlu0 %3362  ;;  %v3380_v3 = vpop.xlane.xlu1 %3379 }
 0x533   : > { %v3386_v57 = vsel %vm492_vm9, %v3360_v40, %v3380_v3 }
 0x534   : > { %3390 = vst.msk [vmem:[%s298_s10 + $0x10] sm:$0xff] %vm585_vm10, %v3386_v57 }
 0x536   : > { %v3377_v10 = vpop.xlane.xlu0 %3376 }
 0x537   : > { %v3385_v63 = vsel %vm492_vm9, %v3357_v59, %v3377_v10 }
 0x538   : > { %3389 = vst.msk [vmem:[%s298_s10 + $0x8] sm:$0xff] %vm585_vm10, %v3385_v63 }
 0x53a   : > { %v3383_v19 = vpop.xlane.xlu0 %3382 }
 0x53b   : > { %v3387_v32 = vsel %vm492_vm9, %v3363_v12, %v3383_v19 }
 0x53c   : > { %3391 = vst.msk [vmem:[%s298_s10 + $0x18] sm:$0xff] %vm585_vm10, %v3387_v32 }
 0x53d PF: > { %s18_s24 = sadd.s32 1, %s3616_s24  }
 0x53e   : > { %p15_p4 = scmp.ge.s32.totalorder %s18_s24, 4  }
 0x540   :  { %17 = sbr.rel (!%p15_p4) target bundleno = 1 (0x1), region = 120 }

// kernel: midblock_forward.5
= control target key start
LH: loop header
LB: loop body
LE: loop exit
PB: predicated region body
PF: predicated region fallthrough
CT: control target
= control target key end

     0   :  { %s3489_s18 = smov 0   ;;  %s5154_s0 = inlined_call_operand.vmem [shape: f32[2,32,256], index: 0, kind: input, shape index: {}]   ;;  %s5155_s1 = inlined_call_operand.vmem [shape: f32[32,864], index: 1, kind: input, shape index: {}]   ;;  %s5156_s2 = inlined_call_operand.vmem [shape: f32[32,1], index: 2, kind: input, shape index: {}]   ;;  %s5157_s3 = inlined_call_operand.vmem [shape: f32[27,256], index: 3, kind: input, shape index: {}]   ;;  %s5158_s4 = inlined_call_operand.vmem [shape: f32[2,32,256], index: 4, kind: output, shape index: {0}]   ;;  %s5159_s5 = inlined_call_operand.vmem [shape: f32[2,32,2], index: 5, kind: output, shape index: {1}]  }
   0x1 LB: > { %s3326_s19 = sadd.s32 4294967295, %s3422_s18   ;;  %p3330_p0 = scmp.ge.s32.totalorder %s3422_s18, 1  ;;  %s3422_s18 = sphi %s3489_s18, %s16_s18  }
   0x2   : > { %p190_p1 = scmp.lt.s32.totalorder %s3422_s18, 3 }
   0x4   : > { %p191_p2 = pnand %p3330_p0, %p190_p1 }
   0x6   : > { %194 = sbr.rel (%p191_p2) target bundleno = 1595 (0x63b), region = 36 }
   0xb   : > { %p223_p3 = scmp.lt.s32.totalorder %s3326_s19, 1  ;;  %s3424_s24 = smov 73   ;;  %v297_v2 = vlaneseq  ;;  %v3337_v12 = vld [vmem:[%s5157_s3 + $0x1] ss:$8 sm:$0x3]  ;;  %vm270_vm0 = vcmask 596992  }
   0xc   : > { %v3338_v15 = vld [vmem:[%s5157_s3 + $0x2] ss:$8 sm:$0x3]  ;;  %s3425_s29 = smov 1   ;;  %s3426_s7 = smov 2   ;;  %vm338_vm1 = vcmask 7168  }
   0xd   : > { %s5203_s19 = smov (!%p223_p3, %s3326_s19), 1  ;;  %v298_v5 = vshrl.u32 %v297_v2, 7  ;;  %v3339_v18 = vld [vmem:[%s5157_s3 + $0x3] ss:$8 sm:$0x3]  ;;  %s3427_s10 = smov 8  }
   0xe   : > { %s3368_s20 = sshll.u32 %s5203_s19, 6  ;;  %v3340_v21 = vld [vmem:[%s5157_s3 + $0x4] ss:$8 sm:$0x3]  ;;  %s3428_s11 = smov 9   ;;  %vm431_vm2 = vcmask 15360  }
   0xf   : > { %s227_s23 = scalar_lea.vmem %s5154_s0, %s3368_s20  ;;  %v3505_v8 = vsub.s32 1, %v298_v5  ;;  %v3507_v9 = vsub.s32 0, %v298_v5  ;;  %s3429_s12 = smov 127   ;;  %vm524_vm3 = vcmask 64512   ;;  %vm617_vm4 = vcmask 72704  }
  0x10   : > { %v240_v0 = vld [vmem:[%s227_s23 + $0x10] sm:$0xff]  ;;  %v238_v1 = vld [vmem:[%s227_s23] sm:$0xff]  ;;  %v241_v3 = vld [vmem:[%s227_s23 + $0x18] sm:$0xff]  ;;  %s3430_s13 = smov 126   ;;  %s3431_s14 = smov 120   ;;  %vm577_vm5 = vcmask 982016  }
  0x11   : > { %258 = vrot.lane.b32.xlu1 %v240_v0, %s3424_s24  ;;  %254 = vrot.lane.b32.xlu0 %v238_v1, %s3424_s24  ;;  %v239_v4 = vld [vmem:[%s227_s23 + $0x8] sm:$0xff]  ;;  %v242_v7 = vld [vmem:[%s227_s23 + $0x20] sm:$0xff]  ;;  %v333_v13 = vrot.slane %v3337_v12, %v3505_v8  ;;  %v329_v14 = vrot.slane %v3337_v12, %v3507_v9  ;;  %v426_v16 = vrot.slane %v3338_v15, %v3505_v8  ;;  %s3432_s15 = smov 119   ;;  %s3433_s21 = smov 10   ;;  %vm484_vm6 = vcmask 1031168  }
  0x12   : > { %v243_v6 = vld [vmem:[%s227_s23 + $0x28] sm:$0xff]  ;;  %v245_v10 = vld [vmem:[%s227_s23 + $0x38] sm:$0xff]  ;;  %v244_v11 = vld [vmem:[%s227_s23 + $0x30] sm:$0xff]  ;;  %v422_v17 = vrot.slane %v3338_v15, %v3507_v9  ;;  %v519_v19 = vrot.slane %v3339_v18, %v3505_v8  ;;  %v515_v20 = vrot.slane %v3339_v18, %v3507_v9  ;;  %v612_v22 = vrot.slane %v3340_v21, %v3505_v8  ;;  %s3434_s22 = smov 118   ;;  %s3435_s27 = smov 16  }
  0x13   : > { %v608_v23 = vrot.slane %v3340_v21, %v3507_v9  ;;  %vm710_vm7 = vcmask 80896   ;;  %vm391_vm8 = vcmask 1039360   ;;  %vm803_vm9 = vcmask 130048   ;;  %s3436_s28 = smov 112   ;;  %s3437_s8 = smov 66  }
  0x14   : > { %s3438_s17 = smov 65   ;;  %s3439_s30 = smov 64   ;;  %vm896_vm10 = vcmask 138240   ;;  %vm1340_vm11 = vcmask 539648   ;;  %vm1247_vm12 = vcmask 531456   ;;  %vm1155_vm13 = vcmask 523264  }
  0x15   : > { %260 = vrot.lane.b32.xlu1 %v241_v3, %s3424_s24  ;;  %256 = vrot.lane.b32.xlu0 %v239_v4, %s3424_s24  ;;  %s3440_s9 = smov 17   ;;  %s3441_s16 = smov 18   ;;  %vm1061_vm14 = vcmask 146432   ;;  %vm1676_vm15 = vcmask 654336  }
  0x16   : > { %s3443_s25 = smov 111   ;;  %s3446_s26 = smov 62  }
  0x19   : > { %264 = vrot.lane.b32.xlu1 %v243_v6, %s3424_s24  ;;  %262 = vrot.lane.b32.xlu0 %v242_v7, %s3424_s24 }
  0x1d   : > { %268 = vrot.lane.b32.xlu1 %v245_v10, %s3424_s24  ;;  %266 = vrot.lane.b32.xlu0 %v244_v11, %s3424_s24  ;;  %s3442_s24 = smov 80  }
  0x21   : > { %336 = vrot.lane.b32.xlu1 %v333_v13, %s3425_s29  ;;  %334 = vrot.lane.b32.xlu0 %v329_v14, %s3425_s29 }
  0x25   : > { %429 = vrot.lane.b32.xlu1 %v426_v16, %s3426_s7  ;;  %427 = vrot.lane.b32.xlu0 %v422_v17, %s3426_s7 }
  0x29   : > { %522 = vrot.lane.b32.xlu1 %v519_v19, %s3427_s10  ;;  %520 = vrot.lane.b32.xlu0 %v515_v20, %s3427_s10 }
  0x2d   : > { %615 = vrot.lane.b32.xlu1 %v612_v22, %s3428_s11  ;;  %613 = vrot.lane.b32.xlu0 %v608_v23, %s3428_s11 }
  0x83   : > { %v3537_v24 = vpop.permute.xlu1 %258  ;;  %v3539_v25 = vpop.permute.xlu0 %254 }
  0x84   : > { %v3555_v32 = vsel %vm270_vm0, 0.0, %v3537_v24  ;;  %v3559_v33 = vsel %vm270_vm0, 0.0, %v3539_v25 }
  0x87   : > { %v3541_v26 = vpop.permute.xlu1 %260  ;;  %v3543_v27 = vpop.permute.xlu0 %256 }
  0x88   : > { %v3573_v38 = vsel %vm270_vm0, %v3541_v26, 0.0  ;;  %v3577_v39 = vsel %vm270_vm0, %v3543_v27, 0.0  ;;  %v3685_v19 = vsel %vm270_vm0, %v3537_v24, %v3541_v26  ;;  %v3690_v20 = vsel %vm270_vm0, %v3539_v25, %v3543_v27 }
  0x8b   : > { %v3545_v28 = vpop.permute.xlu1 %264  ;;  %v3547_v29 = vpop.permute.xlu0 %262 }
  0x8c   : > { %v3587_v42 = vsel %vm270_vm0, 0.0, %v3547_v29  ;;  %v3605_v47 = vsel %vm270_vm0, %v3545_v28, 0.0  ;;  %v3699_v23 = vsel %vm270_vm0, %v3547_v29, %v3545_v28 }
  0x8f   : > { %v3549_v30 = vpop.permute.xlu1 %268  ;;  %v3551_v31 = vpop.permute.xlu0 %266 }
  0x90   : > { %v3591_v43 = vsel %vm270_vm0, 0.0, %v3551_v31  ;;  %v3599_v46 = vsel %vm270_vm0, %v3549_v30, 0.0  ;;  %v3704_v24 = vsel %vm270_vm0, %v3551_v31, %v3549_v30  ;;  %vm1393_vm0 = vcmask 506880  }
  0x93   : > { %v3561_v34 = vpop.permute.xlu0 %334  ;;  %v3567_v37 = vpop.permute.xlu1 %336 }
  0x94   : > { %v346_v35 = vmul.f32 %v3561_v34, %v3555_v32  ;;  %v343_v36 = vmul.f32 %v3561_v34, %v3559_v33  ;;  %v348_v40 = vmul.f32 %v3567_v37, %v3573_v38  ;;  %v345_v41 = vmul.f32 %v3567_v37, %v3577_v39 }
  0x95   : > { %v352_v44 = vmul.f32 %v3561_v34, %v3591_v43  ;;  %v349_v45 = vmul.f32 %v3561_v34, %v3587_v42  ;;  %v354_v48 = vmul.f32 %v3567_v37, %v3599_v46  ;;  %v351_v49 = vmul.f32 %v3567_v37, %v3605_v47 }
  0x96   : > { %373 = vrot.lane.b32.xlu1 %v346_v35, %s3429_s12  ;;  %367 = vrot.lane.b32.xlu0 %v343_v36, %s3429_s12  ;;  %v339_v18 = vsel %vm338_vm1, %v3561_v34, %v3567_v37 }
  0x97   : > { %v3611_v50 = vpop.permute.xlu0 %427  ;;  %v3619_v53 = vpop.permute.xlu1 %429  ;;  %v344_v21 = vmul.f32 %v339_v18, %v3690_v20  ;;  %v347_v22 = vmul.f32 %v339_v18, %v3685_v19  ;;  %v350_v25 = vmul.f32 %v339_v18, %v3699_v23  ;;  %v353_v26 = vmul.f32 %v339_v18, %v3704_v24 }
  0x98   : > { %v439_v51 = vmul.f32 %v3611_v50, %v3555_v32  ;;  %v436_v52 = vmul.f32 %v3611_v50, %v3559_v33  ;;  %v441_v54 = vmul.f32 %v3619_v53, %v3573_v38  ;;  %v438_v55 = vmul.f32 %v3619_v53, %v3577_v39 }
  0x99   : > { %v445_v56 = vmul.f32 %v3611_v50, %v3591_v43  ;;  %v442_v57 = vmul.f32 %v3611_v50, %v3587_v42  ;;  %v447_v58 = vmul.f32 %v3619_v53, %v3599_v46  ;;  %v444_v59 = vmul.f32 %v3619_v53, %v3605_v47 }
  0x9a   : > { %377 = vrot.lane.b32.xlu1 %v348_v40, %s3429_s12  ;;  %371 = vrot.lane.b32.xlu0 %v345_v41, %s3429_s12  ;;  %v432_v27 = vsel %vm431_vm2, %v3611_v50, %v3619_v53 }
  0x9b   : > { %v3639_v60 = vpop.permute.xlu0 %520  ;;  %v523_v63 = vpop.permute.xlu1 %522  ;;  %v437_v28 = vmul.f32 %v432_v27, %v3690_v20  ;;  %v440_v29 = vmul.f32 %v432_v27, %v3685_v19  ;;  %v443_v30 = vmul.f32 %v432_v27, %v3699_v23  ;;  %v446_v31 = vmul.f32 %v432_v27, %v3704_v24 }
  0x9c   : > { %v532_v61 = vmul.f32 %v3639_v60, %v3555_v32  ;;  %v529_v62 = vmul.f32 %v3639_v60, %v3559_v33  ;;  %v534_v0 = vmul.f32 %v523_v63, %v3573_v38  ;;  %v531_v1 = vmul.f32 %v523_v63, %v3577_v39 }
  0x9d   : > { %v538_v2 = vmul.f32 %v3639_v60, %v3591_v43  ;;  %v535_v3 = vmul.f32 %v3639_v60, %v3587_v42  ;;  %v540_v4 = vmul.f32 %v523_v63, %v3599_v46  ;;  %v537_v5 = vmul.f32 %v523_v63, %v3605_v47 }
  0x9e   : > { %385 = vrot.lane.b32.xlu1 %v352_v44, %s3429_s12  ;;  %379 = vrot.lane.b32.xlu0 %v349_v45, %s3429_s12  ;;  %v525_v34 = vsel %vm524_vm3, %v3639_v60, %v523_v63 }
  0x9f   : > { %v614_v6 = vpop.permute.xlu0 %613  ;;  %v616_v11 = vpop.permute.xlu1 %615  ;;  %v530_v35 = vmul.f32 %v525_v34, %v3690_v20  ;;  %v533_v36 = vmul.f32 %v525_v34, %v3685_v19  ;;  %v536_v37 = vmul.f32 %v525_v34, %v3699_v23  ;;  %v539_v40 = vmul.f32 %v525_v34, %v3704_v24 }
  0xa0   : > { %v625_v7 = vmul.f32 %v614_v6, %v3555_v32  ;;  %v622_v10 = vmul.f32 %v614_v6, %v3559_v33  ;;  %v627_v12 = vmul.f32 %v616_v11, %v3573_v38  ;;  %v624_v13 = vmul.f32 %v616_v11, %v3577_v39 }
  0xa1   : > { %v631_v14 = vmul.f32 %v614_v6, %v3591_v43  ;;  %v628_v15 = vmul.f32 %v614_v6, %v3587_v42  ;;  %v633_v16 = vmul.f32 %v616_v11, %v3599_v46  ;;  %v630_v17 = vmul.f32 %v616_v11, %v3605_v47 }
  0xa2   : > { %389 = vrot.lane.b32.xlu1 %v354_v48, %s3429_s12  ;;  %383 = vrot.lane.b32.xlu0 %v351_v49, %s3429_s12  ;;  %v618_v41 = vsel %vm617_vm4, %v614_v6, %v616_v11  ;;  %v3341_v48 = vld [vmem:[%s5157_s3 + $0x5] ss:$8 sm:$0x3] }
  0xa3   : > { %v626_v44 = vmul.f32 %v618_v41, %v3685_v19  ;;  %v623_v45 = vmul.f32 %v618_v41, %v3690_v20  ;;  %v632_v49 = vmul.f32 %v618_v41, %v3704_v24  ;;  %v629_v50 = vmul.f32 %v618_v41, %v3699_v23 }
  0xa6   : > { %466 = vrot.lane.b32.xlu1 %v439_v51, %s3430_s13  ;;  %460 = vrot.lane.b32.xlu0 %v436_v52, %s3430_s13  ;;  %v701_v51 = vrot.slane %v3341_v48, %v3507_v9  ;;  %v705_v52 = vrot.slane %v3341_v48, %v3505_v8 }
  0xaa   : > { %470 = vrot.lane.b32.xlu1 %v441_v54, %s3430_s13  ;;  %464 = vrot.lane.b32.xlu0 %v438_v55, %s3430_s13 }
  0xae   : > { %478 = vrot.lane.b32.xlu1 %v445_v56, %s3430_s13  ;;  %472 = vrot.lane.b32.xlu0 %v442_v57, %s3430_s13 }
  0xb2   : > { %482 = vrot.lane.b32.xlu1 %v447_v58, %s3430_s13  ;;  %476 = vrot.lane.b32.xlu0 %v444_v59, %s3430_s13 }
  0xb6   : > { %559 = vrot.lane.b32.xlu1 %v532_v61, %s3431_s14  ;;  %553 = vrot.lane.b32.xlu0 %v529_v62, %s3431_s14 }
  0xba   : > { %563 = vrot.lane.b32.xlu1 %v534_v0, %s3431_s14  ;;  %557 = vrot.lane.b32.xlu0 %v531_v1, %s3431_s14 }
  0xbe   : > { %571 = vrot.lane.b32.xlu1 %v538_v2, %s3431_s14  ;;  %565 = vrot.lane.b32.xlu0 %v535_v3, %s3431_s14 }
  0xc2   : > { %575 = vrot.lane.b32.xlu1 %v540_v4, %s3431_s14  ;;  %569 = vrot.lane.b32.xlu0 %v537_v5, %s3431_s14 }
  0xc6   : > { %652 = vrot.lane.b32.xlu1 %v625_v7, %s3432_s15  ;;  %646 = vrot.lane.b32.xlu0 %v622_v10, %s3432_s15 }
  0xca   : > { %656 = vrot.lane.b32.xlu1 %v627_v12, %s3432_s15  ;;  %650 = vrot.lane.b32.xlu0 %v624_v13, %s3432_s15 }
  0xce   : > { %664 = vrot.lane.b32.xlu1 %v631_v14, %s3432_s15  ;;  %658 = vrot.lane.b32.xlu0 %v628_v15, %s3432_s15 }
  0xd2   : > { %668 = vrot.lane.b32.xlu1 %v633_v16, %s3432_s15  ;;  %662 = vrot.lane.b32.xlu0 %v630_v17, %s3432_s15 }
  0xd6   : > { %369 = vrot.lane.b32.xlu1 %v344_v21, %s3429_s12  ;;  %375 = vrot.lane.b32.xlu0 %v347_v22, %s3429_s12 }
  0xda   : > { %381 = vrot.lane.b32.xlu1 %v350_v25, %s3429_s12  ;;  %387 = vrot.lane.b32.xlu0 %v353_v26, %s3429_s12 }
  0xde   : > { %462 = vrot.lane.b32.xlu1 %v437_v28, %s3430_s13  ;;  %468 = vrot.lane.b32.xlu0 %v440_v29, %s3430_s13 }
  0xe2   : > { %474 = vrot.lane.b32.xlu1 %v443_v30, %s3430_s13  ;;  %480 = vrot.lane.b32.xlu0 %v446_v31, %s3430_s13 }
  0xe6   : > { %555 = vrot.lane.b32.xlu1 %v530_v35, %s3431_s14  ;;  %561 = vrot.lane.b32.xlu0 %v533_v36, %s3431_s14 }
  0xea   : > { %567 = vrot.lane.b32.xlu1 %v536_v37, %s3431_s14  ;;  %573 = vrot.lane.b32.xlu0 %v539_v40, %s3431_s14 }
  0xee   : > { %654 = vrot.lane.b32.xlu0 %v626_v44, %s3432_s15  ;;  %648 = vrot.lane.b32.xlu1 %v623_v45, %s3432_s15 }
  0xf2   : > { %666 = vrot.lane.b32.xlu0 %v632_v49, %s3432_s15  ;;  %660 = vrot.lane.b32.xlu1 %v629_v50, %s3432_s15 }
  0xf6   : > { %706 = vrot.lane.b32.xlu0 %v701_v51, %s3433_s21  ;;  %708 = vrot.lane.b32.xlu1 %v705_v52, %s3433_s21 }
 0x108   : > { %v3747_v53 = vpop.permute.xlu1 %373  ;;  %v3749_v54 = vpop.permute.xlu0 %367 }
 0x10c   : > { %v3751_v55 = vpop.permute.xlu1 %377  ;;  %v3753_v56 = vpop.permute.xlu0 %371 }
 0x110   : > { %v3755_v57 = vpop.permute.xlu1 %385  ;;  %v3757_v58 = vpop.permute.xlu0 %379 }
 0x114   : > { %v3759_v59 = vpop.permute.xlu1 %389  ;;  %v3761_v60 = vpop.permute.xlu0 %383 }
 0x118   : > { %v3763_v61 = vpop.permute.xlu1 %466  ;;  %v3765_v62 = vpop.permute.xlu0 %460 }
 0x11c   : > { %v3767_v63 = vpop.permute.xlu1 %470  ;;  %v3769_v0 = vpop.permute.xlu0 %464 }
 0x120   : > { %v479_v1 = vpop.permute.xlu1 %478  ;;  %v3771_v2 = vpop.permute.xlu0 %472 }
 0x124   : > { %v483_v3 = vpop.permute.xlu1 %482  ;;  %v477_v4 = vpop.permute.xlu0 %476 }
 0x128   : > { %v560_v5 = vpop.permute.xlu1 %559  ;;  %v554_v6 = vpop.permute.xlu0 %553 }
 0x12c   : > { %v564_v7 = vpop.permute.xlu1 %563  ;;  %v558_v10 = vpop.permute.xlu0 %557 }
 0x130   : > { %v572_v11 = vpop.permute.xlu1 %571  ;;  %v566_v12 = vpop.permute.xlu0 %565 }
 0x134   : > { %v576_v13 = vpop.permute.xlu1 %575  ;;  %v570_v14 = vpop.permute.xlu0 %569 }
 0x138   : > { %v3773_v15 = vpop.permute.xlu1 %652  ;;  %v3775_v16 = vpop.permute.xlu0 %646 }
 0x139   : > { %5166 = vst [vmem:[#allocation3_spill] sm:$0xff] %v3773_v15  ;;  %5167 = vst [vmem:[#allocation4_spill] sm:$0xff] %v3775_v16 }
 0x13c   : > { %v3777_v17 = vpop.permute.xlu1 %656  ;;  %v3779_v18 = vpop.permute.xlu0 %650 }
 0x13d   : > { %5168 = vst [vmem:[#allocation5_spill] sm:$0xff] %v3777_v17  ;;  %5169 = vst [vmem:[#allocation6_spill] sm:$0xff] %v3779_v18 }
 0x140   : > { %v3781_v21 = vpop.permute.xlu1 %664  ;;  %v3783_v22 = vpop.permute.xlu0 %658 }
 0x141   : > { %5170 = vst [vmem:[#allocation7_spill] sm:$0xff] %v3781_v21  ;;  %5171 = vst [vmem:[#allocation8_spill] sm:$0xff] %v3783_v22 }
 0x144   : > { %v3785_v25 = vpop.permute.xlu1 %668  ;;  %v3787_v26 = vpop.permute.xlu0 %662 }
 0x145   : > { %5172 = vst [vmem:[#allocation9_spill] sm:$0xff] %v3785_v25  ;;  %5173 = vst [vmem:[#allocation10_spill] sm:$0xff] %v3787_v26 }
 0x148   : > { %v3789_v27 = vpop.permute.xlu1 %369  ;;  %v3791_v28 = vpop.permute.xlu0 %375 }
 0x14c   : > { %v3793_v29 = vpop.permute.xlu1 %381  ;;  %v388_v30 = vpop.permute.xlu0 %387 }
 0x150   : > { %v463_v31 = vpop.permute.xlu1 %462  ;;  %v469_v34 = vpop.permute.xlu0 %468 }
 0x154   : > { %v475_v35 = vpop.permute.xlu1 %474  ;;  %v481_v36 = vpop.permute.xlu0 %480 }
 0x158   : > { %v556_v37 = vpop.permute.xlu1 %555  ;;  %v562_v40 = vpop.permute.xlu0 %561 }
 0x159   : > { %v581_v16 = vsel %vm577_vm5, %v562_v40, %v564_v7  ;;  %v580_v18 = vsel %vm577_vm5, %v560_v5, %v562_v40  ;;  %v491_v7 = vsel %vm484_vm6, %v479_v1, %v481_v36  ;;  %v490_v5 = vsel %vm484_vm6, %v475_v35, %v477_v4 }
 0x15a   : > { %v487_v4 = vsel %vm484_vm6, %v3763_v61, %v469_v34  ;;  %v399_v61 = vsel %vm391_vm8, %v388_v30, %v3759_v59  ;;  %v396_v59 = vsel %vm391_vm8, %v3757_v58, %v3793_v29 }
 0x15c   : > { %v568_v41 = vpop.permute.xlu1 %567  ;;  %v574_v44 = vpop.permute.xlu0 %573 }
 0x15d   : > { %v585_v45 = vsel %vm577_vm5, %v574_v44, %v576_v13  ;;  %v584_v48 = vsel %vm577_vm5, %v572_v11, %v574_v44  ;;  %v583_v49 = vsel %vm577_vm5, %v568_v41, %v570_v14  ;;  %v582_v52 = vsel %vm577_vm5, %v566_v12, %v568_v41 }
 0x15e   : > { %1915 = vmatprep.subr.mxu1 %v585_v45  ;;  %v579_v11 = vsel %vm577_vm5, %v556_v37, %v558_v10  ;;  %v578_v44 = vsel %vm577_vm5, %v554_v6, %v556_v37  ;;  %v492_v12 = vsel %vm484_vm6, %v481_v36, %v483_v3  ;;  %v488_v6 = vsel %vm484_vm6, %v469_v34, %v3767_v63 }
 0x15f   : > { %1916 = vmatpush1.msra.mxu1 %v584_v48  ;;  %v486_v63 = vsel %vm484_vm6, %v463_v31, %v3769_v0 }
 0x160   : > { %v3798_v50 = vpop.permute.xlu1 %648  ;;  %1917 = vmatprep.subr.mxu1 %v583_v49  ;;  %v3800_v51 = vpop.permute.xlu0 %654 }
 0x161   : > { %5174 = vst [vmem:[#allocation11_spill] sm:$0xff] %v3798_v50  ;;  %5175 = vst [vmem:[#allocation12_spill] sm:$0xff] %v3800_v51  ;;  %1918 = vmatpush1.msra.mxu1 %v582_v52 }
 0x162   : > { %1919 = vmatprep.subr.mxu1 %v581_v16 }
 0x163   : > { %1920 = vmatpush1.msra.mxu1 %v580_v18  ;;  %v489_v18 = vsel %vm484_vm6, %v3771_v2, %v475_v35  ;;  %v485_v2 = vsel %vm484_vm6, %v3765_v62, %v463_v31  ;;  %v398_v35 = vsel %vm391_vm8, %v3755_v57, %v388_v30  ;;  %v397_v62 = vsel %vm391_vm8, %v3793_v29, %v3761_v60  ;;  %v295_v57 = vld [vmem:[%s5157_s3] ss:$8 sm:$0x3] }
 0x164   : > { %v3806_v13 = vpop.permute.xlu1 %660  ;;  %1921 = vmatprep.subr.mxu1 %v579_v11  ;;  %v3808_v14 = vpop.permute.xlu0 %666  ;;  %v395_v30 = vsel %vm391_vm8, %v3791_v28, %v3751_v55  ;;  %v394_v60 = vsel %vm391_vm8, %v3747_v53, %v3791_v28  ;;  %v304_v29 = vrot.slane %v295_v57, %v3505_v8  ;;  %v393_v55 = vsel %vm391_vm8, %v3789_v27, %v3753_v56 }
 0x165   : > { %5176 = vst [vmem:[#allocation13_spill] sm:$0xff] %v3806_v13  ;;  %5177 = vst [vmem:[#allocation14_spill] sm:$0xff] %v3808_v14  ;;  %1922 = vmatpush1.msra.mxu1 %v578_v44  ;;  %v300_v37 = vrot.slane %v295_v57, %v3507_v9  ;;  %v392_v53 = vsel %vm391_vm8, %v3749_v54, %v3789_v27 }
 0x166   : > { %1923 = vmatprep.subr.mxu1 %v492_v12  ;;  %v314_v28 = vmul.f32 %v304_v29, %v3704_v24  ;;  %v312_v45 = vmul.f32 %v304_v29, %v3699_v23  ;;  %v310_v54 = vmul.f32 %v304_v29, %v3685_v19  ;;  %v308_v52 = vmul.f32 %v304_v29, %v3690_v20  ;;  %v3342_v12 = vld [vmem:[%s5157_s3 + $0x6] ss:$8 sm:$0x3] }
 0x167   : > { %1924 = vmatpush1.msra.mxu1 %v491_v7  ;;  %v313_v40 = vmul.f32 %v300_v37, %v3591_v43  ;;  %v311_v48 = vmul.f32 %v300_v37, %v3587_v42  ;;  %v309_v27 = vmul.f32 %v300_v37, %v3555_v32  ;;  %v307_v44 = vmul.f32 %v300_v37, %v3559_v33 }
 0x168   : > { %v3814_v16 = vpop.permute.xlu1 %708  ;;  %1925 = vmatprep.subr.mxu1 %v490_v5  ;;  %v707_v10 = vpop.permute.xlu0 %706 }
 0x169   : > { %1926 = vmatpush1.msra.mxu1 %v489_v18  ;;  %v715_v3 = vmul.f32 %v707_v10, %v3559_v33  ;;  %v3823_v1 = vsel %vm710_vm7, %v707_v10, %v3814_v16  ;;  %v717_v34 = vmul.f32 %v3814_v16, %v3577_v39  ;;  %v718_v0 = vmul.f32 %v707_v10, %v3555_v32 }
 0x16a   : > { %1927 = vmatprep.subr.mxu1 %v488_v6  ;;  %v716_v36 = vmul.f32 %v3823_v1, %v3690_v20  ;;  %v719_v31 = vmul.f32 %v3823_v1, %v3685_v19  ;;  %v720_v58 = vmul.f32 %v3814_v16, %v3573_v38  ;;  %v721_v41 = vmul.f32 %v707_v10, %v3587_v42 }
 0x16b   : > { %1928 = vmatpush1.msra.mxu1 %v487_v4  ;;  %739 = vrot.lane.b32.xlu0 %v715_v3, %s3434_s22  ;;  %v722_v56 = vmul.f32 %v3823_v1, %v3699_v23  ;;  %v723_v49 = vmul.f32 %v3814_v16, %v3605_v47  ;;  %v724_v11 = vmul.f32 %v707_v10, %v3591_v43 }
 0x16c   : > { %1929 = vmatprep.subr.mxu1 %v486_v63  ;;  %741 = vrot.lane.b32.xlu1 %v716_v36, %s3434_s22  ;;  %v725_v7 = vmul.f32 %v3823_v1, %v3704_v24  ;;  %v726_v5 = vmul.f32 %v3814_v16, %v3599_v46  ;;  %v794_v10 = vrot.slane %v3342_v12, %v3507_v9 }
 0x16d   : > { %1930 = vmatpush1.msra.mxu1 %v485_v2  ;;  %v798_v18 = vrot.slane %v3342_v12, %v3505_v8  ;;  %v3343_v12 = vld [vmem:[%s5157_s3 + $0x7] ss:$8 sm:$0x3] }
 0x16e   : > { %1931 = vmatprep.subr.mxu1 %v399_v61 }
 0x16f   : > { %1932 = vmatpush1.msra.mxu1 %v398_v35  ;;  %743 = vrot.lane.b32.xlu0 %v717_v34, %s3434_s22 }
 0x170   : > { %1933 = vmatprep.subr.mxu1 %v397_v62  ;;  %745 = vrot.lane.b32.xlu1 %v718_v0, %s3434_s22 }
 0x171   : > { %1934 = vmatpush1.msra.mxu1 %v396_v59 }
 0x172   : > { %1935 = vmatprep.subr.mxu1 %v395_v30 }
 0x173   : > { %1936 = vmatpush1.msra.mxu1 %v394_v60  ;;  %747 = vrot.lane.b32.xlu0 %v719_v31, %s3434_s22 }
 0x174   : > { %1937 = vmatprep.subr.mxu1 %v393_v55  ;;  %749 = vrot.lane.b32.xlu1 %v720_v58, %s3434_s22  ;;  %v3347_v55 = vld [vmem:[%s5157_s3 + $0x13] ss:$8 sm:$0x3] }
 0x175   : > { %1938 = vmatpush1.msra.mxu1 %v392_v53 }
 0x176   : > { %1939 = vmatprep.subr.mxu1 %v314_v28  ;;  %v1331_v28 = vrot.slane %v3347_v55, %v3507_v9 }
 0x177   : > { %1940 = vmatpush1.msra.mxu1 %v313_v40  ;;  %751 = vrot.lane.b32.xlu0 %v721_v41, %s3434_s22  ;;  %v1335_v40 = vrot.slane %v3347_v55, %v3505_v8  ;;  %v3346_v41 = vld [vmem:[%s5157_s3 + $0x12] ss:$8 sm:$0x3] }
 0x178   : > { %1941 = vmatprep.subr.mxu1 %v312_v45  ;;  %753 = vrot.lane.b32.xlu1 %v722_v56, %s3434_s22 }
 0x179   : > { %1942 = vmatpush1.msra.mxu1 %v311_v48  ;;  %v1238_v48 = vrot.slane %v3346_v41, %v3507_v9 }
 0x17a   : > { %1943 = vmatprep.subr.mxu1 %v310_v54  ;;  %v1242_v54 = vrot.slane %v3346_v41, %v3505_v8 }
 0x17b   : > { %1944 = vmatpush1.msra.mxu1 %v309_v27  ;;  %755 = vrot.lane.b32.xlu0 %v723_v49, %s3434_s22  ;;  %v3345_v27 = vld [vmem:[%s5157_s3 + $0x11] ss:$8 sm:$0x3] }
 0x17c   : > { %1945 = vmatprep.subr.mxu1 %v308_v52  ;;  %757 = vrot.lane.b32.xlu1 %v724_v11, %s3434_s22  ;;  %v1146_v11 = vrot.slane %v3345_v27, %v3507_v9 }
 0x17d   : > { %1946 = vmatpush1.msra.mxu1 %v307_v44  ;;  %v1150_v44 = vrot.slane %v3345_v27, %v3505_v8 }
 0x17f   : > { %759 = vrot.lane.b32.xlu0 %v725_v7, %s3434_s22  ;;  %v3344_v7 = vld [vmem:[%s5157_s3 + $0x10] ss:$8 sm:$0x3] }
 0x180   : > { %761 = vrot.lane.b32.xlu1 %v726_v5, %s3434_s22 }
 0x183   : > { %799 = vrot.lane.b32.xlu0 %v794_v10, %s3435_s27  ;;  %v887_v10 = vrot.slane %v3343_v12, %v3507_v9 }
 0x184   : > { %801 = vrot.lane.b32.xlu1 %v798_v18, %s3435_s27  ;;  %v1052_v18 = vrot.slane %v3344_v7, %v3507_v9 }
 0x1dd   : > { %v3904_v6 = vpop.permute.xlu0 %739 }
 0x1de   : > { %5178 = vst [vmem:[#allocation15_spill] sm:$0xff] %v3904_v6  ;;  %v3906_v3 = vpop.permute.xlu1 %741 }
 0x1df   : > { %5179 = vst [vmem:[#allocation16_spill] sm:$0xff] %v3906_v3 }
 0x1e1   : > { %v3908_v1 = vpop.permute.xlu0 %743 }
 0x1e2   : > { %5180 = vst [vmem:[#allocation17_spill] sm:$0xff] %v3908_v1  ;;  %v3910_v16 = vpop.permute.xlu1 %745 }
 0x1e3   : > { %5181 = vst [vmem:[#allocation18_spill] sm:$0xff] %v3910_v16 }
 0x1e5   : > { %v3912_v4 = vpop.permute.xlu0 %747 }
 0x1e6   : > { %5182 = vst [vmem:[#allocation19_spill] sm:$0xff] %v3912_v4  ;;  %v3914_v36 = vpop.permute.xlu1 %749 }
 0x1e7   : > { %5183 = vst [vmem:[#allocation20_spill] sm:$0xff] %v3914_v36 }
 0x1e9   : > { %v3916_v63 = vpop.permute.xlu0 %751 }
 0x1ea   : > { %v3918_v2 = vpop.permute.xlu1 %753 }
 0x1ed   : > { %v3920_v61 = vpop.permute.xlu0 %755 }
 0x1ee   : > { %v3922_v34 = vpop.permute.xlu1 %757 }
 0x1f1   : > { %v3924_v35 = vpop.permute.xlu0 %759 }
 0x1f2   : > { %v3926_v0 = vpop.permute.xlu1 %761 }
 0x1f5   : > { %v800_v62 = vpop.permute.xlu0 %799 }
 0x1f6   : > { %v802_v59 = vpop.permute.xlu1 %801  ;;  %v808_v57 = vmul.f32 %v800_v62, %v3559_v33  ;;  %v811_v58 = vmul.f32 %v800_v62, %v3555_v32  ;;  %v814_v53 = vmul.f32 %v800_v62, %v3587_v42  ;;  %v817_v49 = vmul.f32 %v800_v62, %v3591_v43 }
 0x1f7   : > { %v804_v30 = vsel %vm803_vm9, %v800_v62, %v802_v59  ;;  %v810_v60 = vmul.f32 %v802_v59, %v3577_v39  ;;  %v813_v37 = vmul.f32 %v802_v59, %v3573_v38  ;;  %v816_v56 = vmul.f32 %v802_v59, %v3605_v47 }
 0x1f8   : > { %832 = vrot.lane.b32.xlu0 %v808_v57, %s3436_s28  ;;  %v809_v31 = vmul.f32 %v804_v30, %v3690_v20  ;;  %v812_v29 = vmul.f32 %v804_v30, %v3685_v19  ;;  %v815_v45 = vmul.f32 %v804_v30, %v3699_v23  ;;  %v818_v52 = vmul.f32 %v804_v30, %v3704_v24 }
 0x1f9   : > { %v819_v5 = vmul.f32 %v802_v59, %v3599_v46  ;;  %v1056_v62 = vrot.slane %v3344_v7, %v3505_v8  ;;  %v891_v57 = vrot.slane %v3343_v12, %v3505_v8  ;;  %v3350_v59 = vld [vmem:[%s5157_s3 + $0x17] ss:$8 sm:$0x3] }
 0x1fa   : > { %834 = vrot.lane.b32.xlu1 %v809_v31, %s3436_s28  ;;  %v1667_v30 = vrot.slane %v3350_v59, %v3507_v9 }
 0x1fc   : > { %836 = vrot.lane.b32.xlu0 %v810_v60, %s3436_s28 }
 0x1fe   : > { %838 = vrot.lane.b32.xlu1 %v811_v58, %s3436_s28 }
 0x200   : > { %840 = vrot.lane.b32.xlu0 %v812_v29, %s3436_s28 }
 0x202   : > { %842 = vrot.lane.b32.xlu1 %v813_v37, %s3436_s28 }
 0x204   : > { %844 = vrot.lane.b32.xlu0 %v814_v53, %s3436_s28 }
 0x206   : > { %1336 = vrot.lane.b32.xlu1 %v1331_v28, %s3437_s8 }
 0x208   : > { %1338 = vrot.lane.b32.xlu0 %v1335_v40, %s3437_s8  ;;  %s3444_s8 = smov 74  }
 0x20a   : > { %846 = vrot.lane.b32.xlu1 %v815_v45, %s3436_s28 }
 0x20c   : > { %848 = vrot.lane.b32.xlu0 %v816_v56, %s3436_s28 }
 0x20e   : > { %1243 = vrot.lane.b32.xlu1 %v1238_v48, %s3438_s17 }
 0x210   : > { %1245 = vrot.lane.b32.xlu0 %v1242_v54, %s3438_s17 }
 0x212   : > { %850 = vrot.lane.b32.xlu1 %v817_v49, %s3436_s28 }
 0x214   : > { %852 = vrot.lane.b32.xlu0 %v818_v52, %s3436_s28 }
 0x216   : > { %1151 = vrot.lane.b32.xlu1 %v1146_v11, %s3439_s30 }
 0x218   : > { %1153 = vrot.lane.b32.xlu0 %v1150_v44, %s3439_s30 }
 0x21a   : > { %854 = vrot.lane.b32.xlu1 %v819_v5, %s3436_s28  ;;  %v1671_v5 = vrot.slane %v3350_v59, %v3505_v8 }
 0x21c   : > { %892 = vrot.lane.b32.xlu0 %v887_v10, %s3440_s9 }
 0x21e   : > { %1057 = vrot.lane.b32.xlu1 %v1052_v18, %s3441_s16 }
 0x220   : > { %1059 = vrot.lane.b32.xlu0 %v1056_v62, %s3441_s16  ;;  %v3349_v62 = vld [vmem:[%s5157_s3 + $0x16] ss:$8 sm:$0x3] }
 0x221   : > { %v1574_v59 = vrot.slane %v3349_v62, %v3507_v9 }
 0x222   : > { %894 = vrot.lane.b32.xlu1 %v891_v57, %s3440_s9 }
 0x226   : > { %1672 = vrot.lane.b32.xlu1 %v1667_v30, %s3442_s24 }
 0x26a   : > { %v3988_v31 = vpop.permute.xlu0 %832 }
 0x26c   : > { %v3990_v60 = vpop.permute.xlu1 %834 }
 0x26e   : > { %v3992_v58 = vpop.permute.xlu0 %836 }
 0x270   : > { %v3994_v29 = vpop.permute.xlu1 %838 }
 0x272   : > { %v3996_v55 = vpop.permute.xlu0 %840 }
 0x274   : > { %v3998_v37 = vpop.permute.xlu1 %842 }
 0x276   : > { %v4000_v53 = vpop.permute.xlu0 %844 }
 0x278   : > { %v4002_v28 = vpop.permute.xlu1 %1336 }
 0x27a   : > { %v4004_v40 = vpop.permute.xlu0 %1338 }
 0x27c   : > { %v4006_v41 = vpop.permute.xlu1 %846 }
 0x27e   : > { %v4008_v45 = vpop.permute.xlu0 %848 }
 0x280   : > { %v4010_v56 = vpop.permute.xlu1 %1243 }
 0x282   : > { %v4012_v48 = vpop.permute.xlu0 %1245 }
 0x284   : > { %v4014_v54 = vpop.permute.xlu1 %850 }
 0x286   : > { %v4016_v27 = vpop.permute.xlu0 %852 }
 0x288   : > { %v4018_v49 = vpop.permute.xlu1 %1151 }
 0x28a   : > { %v4020_v52 = vpop.permute.xlu0 %1153 }
 0x28c   : > { %v4022_v11 = vpop.permute.xlu1 %854 }
 0x28e   : > { %v893_v44 = vpop.permute.xlu0 %892 }
 0x28f   : > { %v901_v12 = vmul.f32 %v893_v44, %v3559_v33  ;;  %v907_v15 = vmul.f32 %v893_v44, %v3587_v42 }
 0x290   : > { %v4025_v7 = vpop.permute.xlu1 %1057 }
 0x291   : > { %925 = vrot.lane.b32.xlu0 %v901_v12, %s3443_s25  ;;  %v1578_v12 = vrot.slane %v3349_v62, %v3505_v8  ;;  %v3348_v62 = vld [vmem:[%s5157_s3 + $0x14] ss:$8 sm:$0x3] }
 0x294   : > { %v4029_v10 = vpop.permute.xlu1 %894 }
 0x295   : > { %1674 = vrot.lane.b32.xlu0 %v1671_v5, %s3442_s24  ;;  %v4033_v18 = vsel %vm896_vm10, %v893_v44, %v4029_v10  ;;  %v903_v30 = vmul.f32 %v4029_v10, %v3577_v39  ;;  %v904_v5 = vmul.f32 %v893_v44, %v3555_v32  ;;  %s3445_s24 = smov 72  }
 0x296   : > { %v902_v57 = vmul.f32 %v4033_v18, %v3690_v20  ;;  %v905_v50 = vmul.f32 %v4033_v18, %v3685_v19 }
 0x298   : > { %927 = vrot.lane.b32.xlu1 %v902_v57, %s3443_s25  ;;  %v906_v57 = vmul.f32 %v4029_v10, %v3573_v38 }
 0x299   : > { %929 = vrot.lane.b32.xlu0 %v903_v30, %s3443_s25  ;;  %v908_v30 = vmul.f32 %v4033_v18, %v3699_v23 }
 0x29c   : > { %1579 = vrot.lane.b32.xlu1 %v1574_v59, %s3444_s8  ;;  %v909_v59 = vmul.f32 %v4029_v10, %v3605_v47 }
 0x29d   : > { %1581 = vrot.lane.b32.xlu0 %v1578_v12, %s3444_s8  ;;  %v1428_v12 = vrot.slane %v3348_v62, %v3505_v8  ;;  %s3450_s8 = smov 81  }
 0x2a0   : > { %931 = vrot.lane.b32.xlu1 %v904_v5, %s3443_s25  ;;  %v910_v5 = vmul.f32 %v893_v44, %v3591_v43  ;;  %v3354_v44 = vld [vmem:[%s5157_s3 + $0x23] ss:$8 sm:$0x3] }
 0x2a1   : > { %933 = vrot.lane.b32.xlu0 %v905_v50, %s3443_s25  ;;  %v1424_v50 = vrot.slane %v3348_v62, %v3507_v9  ;;  %v1354_v62 = vmul.f32 %v4002_v28, %v3591_v43 }
 0x2a4   : > { %935 = vrot.lane.b32.xlu1 %v906_v57, %s3443_s25 }
 0x2a5   : > { %937 = vrot.lane.b32.xlu0 %v907_v15, %s3443_s25  ;;  %v1341_v15 = vsel %vm1340_vm11, %v4002_v28, %v4004_v40  ;;  %vm1583_vm11 = vcmask 605184  }
 0x2a6   : > { %v1355_v57 = vmul.f32 %v1341_v15, %v3704_v24 }
 0x2a8   : > { %939 = vrot.lane.b32.xlu1 %v908_v30, %s3443_s25  ;;  %v1356_v30 = vmul.f32 %v4004_v40, %v3599_v46 }
 0x2a9   : > { %941 = vrot.lane.b32.xlu0 %v909_v59, %s3443_s25  ;;  %v1352_v59 = vmul.f32 %v1341_v15, %v3699_v23 }
 0x2ac   : > { %1429 = vrot.lane.b32.xlu1 %v1424_v50, %s3445_s24  ;;  %v1353_v50 = vmul.f32 %v4004_v40, %v3605_v47 }
 0x2ad   : > { %1431 = vrot.lane.b32.xlu0 %v1428_v12, %s3445_s24  ;;  %v2225_v12 = vrot.slane %v3354_v44, %v3507_v9  ;;  %s3448_s24 = smov 82  }
 0x2b0   : > { %943 = vrot.lane.b32.xlu1 %v910_v5, %s3443_s25  ;;  %v1351_v5 = vmul.f32 %v4002_v28, %v3587_v42 }
 0x2b1   : > { %1389 = vrot.lane.b32.xlu0 %v1355_v57, %s3446_s26  ;;  %v2229_v57 = vrot.slane %v3354_v44, %v3505_v8  ;;  %v1346_v44 = vmul.f32 %v1341_v15, %v3690_v20 }
 0x2b4   : > { %1391 = vrot.lane.b32.xlu1 %v1356_v30, %s3446_s26  ;;  %v1349_v30 = vmul.f32 %v1341_v15, %v3685_v19  ;;  %v1263_v15 = vmul.f32 %v4012_v48, %v3599_v46 }
 0x2b5   : > { %1387 = vrot.lane.b32.xlu0 %v1354_v62, %s3446_s26  ;;  %v1350_v62 = vmul.f32 %v4004_v40, %v3573_v38 }
 0x2b8   : > { %1383 = vrot.lane.b32.xlu1 %v1352_v59, %s3446_s26  ;;  %v1348_v59 = vmul.f32 %v4002_v28, %v3555_v32 }
 0x2b9   : > { %1385 = vrot.lane.b32.xlu0 %v1353_v50, %s3446_s26  ;;  %v1347_v50 = vmul.f32 %v4004_v40, %v3577_v39  ;;  %v1261_v40 = vmul.f32 %v4010_v56, %v3591_v43 }
 0x2bc   : > { %1381 = vrot.lane.b32.xlu1 %v1351_v5, %s3446_s26  ;;  %v1345_v5 = vmul.f32 %v4002_v28, %v3559_v33  ;;  %v1258_v28 = vmul.f32 %v4010_v56, %v3587_v42 }
 0x2bd   : > { %2230 = vrot.lane.b32.xlu0 %v2225_v12, %s3425_s29  ;;  %v1248_v12 = vsel %vm1247_vm12, %v4010_v56, %v4012_v48  ;;  %vm1300_vm12 = vcmask 515072  }
 0x2c0   : > { %2232 = vrot.lane.b32.xlu1 %v2229_v57, %s3425_s29  ;;  %v1262_v57 = vmul.f32 %v1248_v12, %v3704_v24  ;;  %s3447_s29 = smov 63  }
 0x2c1   : > { %1377 = vrot.lane.b32.xlu0 %v1349_v30, %s3446_s26  ;;  %v1259_v30 = vmul.f32 %v1248_v12, %v3699_v23 }
 0x2c4   : > { %1379 = vrot.lane.b32.xlu1 %v1350_v62, %s3446_s26  ;;  %v1260_v62 = vmul.f32 %v4012_v48, %v3605_v47 }
 0x2c5   : > { %1375 = vrot.lane.b32.xlu0 %v1348_v59, %s3446_s26  ;;  %v1256_v59 = vmul.f32 %v1248_v12, %v3685_v19 }
 0x2c8   : > { %1371 = vrot.lane.b32.xlu1 %v1346_v44, %s3446_s26  ;;  %v1257_v44 = vmul.f32 %v4012_v48, %v3573_v38 }
 0x2c9   : > { %1373 = vrot.lane.b32.xlu0 %v1347_v50, %s3446_s26  ;;  %v1255_v50 = vmul.f32 %v4010_v56, %v3555_v32 }
 0x2cc   : > { %1369 = vrot.lane.b32.xlu1 %v1345_v5, %s3446_s26  ;;  %v1253_v5 = vmul.f32 %v1248_v12, %v3690_v20  ;;  %v1171_v12 = vmul.f32 %v4020_v52, %v3599_v46  ;;  %s3449_s26 = smov 110  }
 0x2cd   : > { %1296 = vrot.lane.b32.xlu0 %v1262_v57, %s3447_s29  ;;  %v1254_v57 = vmul.f32 %v4012_v48, %v3577_v39  ;;  %v1169_v48 = vmul.f32 %v4018_v49, %v3591_v43 }
 0x2d0   : > { %1298 = vrot.lane.b32.xlu1 %v1263_v15, %s3447_s29  ;;  %v1156_v15 = vsel %vm1155_vm13, %v4018_v49, %v4020_v52 }
 0x2d1   : > { %1294 = vrot.lane.b32.xlu0 %v1261_v40, %s3447_s29  ;;  %v1252_v40 = vmul.f32 %v4010_v56, %v3559_v33  ;;  %v3352_v56 = vld [vmem:[%s5157_s3 + $0x21] ss:$8 sm:$0x3] }
 0x2d4   : > { %1290 = vrot.lane.b32.xlu1 %v1259_v30, %s3447_s29  ;;  %v1170_v30 = vmul.f32 %v1156_v15, %v3704_v24 }
 0x2d5   : > { %1292 = vrot.lane.b32.xlu0 %v1260_v62, %s3447_s29  ;;  %v1167_v62 = vmul.f32 %v1156_v15, %v3699_v23 }
 0x2d8   : > { %1288 = vrot.lane.b32.xlu1 %v1258_v28, %s3447_s29  ;;  %v1168_v28 = vmul.f32 %v4020_v52, %v3605_v47 }
 0x2d9   : > { %1284 = vrot.lane.b32.xlu0 %v1256_v59, %s3447_s29  ;;  %v2103_v59 = vrot.slane %v3352_v56, %v3507_v9 }
 0x2dc   : > { %1286 = vrot.lane.b32.xlu1 %v1257_v44, %s3447_s29  ;;  %v1166_v44 = vmul.f32 %v4018_v49, %v3587_v42 }
 0x2dd   : > { %1282 = vrot.lane.b32.xlu0 %v1255_v50, %s3447_s29  ;;  %v2107_v50 = vrot.slane %v3352_v56, %v3505_v8  ;;  %v1160_v56 = vmul.f32 %v4018_v49, %v3559_v33 }
 0x2e0   : > { %1278 = vrot.lane.b32.xlu1 %v1253_v5, %s3447_s29  ;;  %v1164_v5 = vmul.f32 %v1156_v15, %v3685_v19 }
 0x2e1   : > { %1280 = vrot.lane.b32.xlu0 %v1254_v57, %s3447_s29  ;;  %v1165_v57 = vmul.f32 %v4020_v52, %v3573_v38 }
 0x2e4   : > { %1276 = vrot.lane.b32.xlu1 %v1252_v40, %s3447_s29  ;;  %v1163_v40 = vmul.f32 %v4018_v49, %v3555_v32  ;;  %s3451_s29 = smov 48  }
 0x2e5   : > { %1204 = vrot.lane.b32.xlu0 %v1170_v30, %s3439_s30  ;;  %v1060_v30 = vpop.permute.xlu0 %1059 }
 0x2e6   : > { %v1071_v51 = vmul.f32 %v1060_v30, %v3573_v38 }
 0x2e8   : > { %1206 = vrot.lane.b32.xlu1 %v1171_v12, %s3439_s30  ;;  %v1161_v12 = vmul.f32 %v1156_v15, %v3690_v20  ;;  %v1077_v15 = vmul.f32 %v1060_v30, %v3599_v46 }
 0x2e9   : > { %1202 = vrot.lane.b32.xlu0 %v1169_v48, %s3439_s30  ;;  %v1162_v48 = vmul.f32 %v4020_v52, %v3577_v39 }
 0x2ec   : > { %1198 = vrot.lane.b32.xlu1 %v1167_v62, %s3439_s30  ;;  %v1062_v62 = vsel %vm1061_vm14, %v4025_v7, %v1060_v30 }
 0x2ed   : > { %1200 = vrot.lane.b32.xlu0 %v1168_v28, %s3439_s30  ;;  %v1076_v28 = vmul.f32 %v1062_v62, %v3704_v24  ;;  %v1073_v49 = vmul.f32 %v1062_v62, %v3699_v23 }
 0x2f0   : > { %1196 = vrot.lane.b32.xlu1 %v1166_v44, %s3439_s30  ;;  %v4183_v44 = vpop.permute.xlu1 %1672 }
 0x2f1   : > { %2108 = vrot.lane.b32.xlu0 %v2103_v59, %s3448_s24  ;;  %v1075_v59 = vmul.f32 %v4025_v7, %v3591_v43  ;;  %v1690_v26 = vmul.f32 %v4183_v44, %v3591_v43  ;;  %v1687_v25 = vmul.f32 %v4183_v44, %v3587_v42 }
 0x2f4   : > { %2110 = vrot.lane.b32.xlu1 %v2107_v50, %s3448_s24  ;;  %v3351_v50 = vld [vmem:[%s5157_s3 + $0x20] ss:$8 sm:$0x3] }
 0x2f5   : > { %1192 = vrot.lane.b32.xlu0 %v1164_v5, %s3439_s30 }
 0x2f8   : > { %1194 = vrot.lane.b32.xlu1 %v1165_v57, %s3439_s30  ;;  %v1074_v57 = vmul.f32 %v1060_v30, %v3605_v47 }
 0x2f9   : > { %1190 = vrot.lane.b32.xlu0 %v1163_v40, %s3439_s30  ;;  %v2010_v40 = vrot.slane %v3351_v50, %v3507_v9 }
 0x2fc   : > { %1186 = vrot.lane.b32.xlu1 %v1161_v12, %s3439_s30 }
 0x2fd   : > { %1188 = vrot.lane.b32.xlu0 %v1162_v48, %s3439_s30  ;;  %v1072_v48 = vmul.f32 %v4025_v7, %v3587_v42 }
 0x300   : > { %1184 = vrot.lane.b32.xlu1 %v1160_v56, %s3439_s30 }
 0x301   : > { %1110 = vrot.lane.b32.xlu0 %v1076_v28, %s3449_s26  ;;  %v2014_v28 = vrot.slane %v3351_v50, %v3505_v8  ;;  %v1069_v50 = vmul.f32 %v4025_v7, %v3555_v32 }
 0x303   : > { %v4177_v52 = vpop.permute.xlu0 %925 }
 0x304   : > { %1112 = vrot.lane.b32.xlu1 %v1077_v15, %s3449_s26 }
 0x305   : > { %1108 = vrot.lane.b32.xlu0 %v1075_v59, %s3449_s26 }
 0x307   : > { %v4189_v5 = vpop.permute.xlu0 %1674 }
 0x308   : > { %1104 = vrot.lane.b32.xlu1 %v1073_v49, %s3449_s26  ;;  %v1070_v49 = vmul.f32 %v1062_v62, %v3685_v19  ;;  %v1677_v22 = vsel %vm1676_vm15, %v4183_v44, %v4189_v5  ;;  %v1689_v14 = vmul.f32 %v4189_v5, %v3605_v47  ;;  %vm1433_vm15 = vcmask 588800  }
 0x309   : > { %1106 = vrot.lane.b32.xlu0 %v1074_v57, %s3449_s26  ;;  %v1685_v4 = vmul.f32 %v1677_v22, %v3685_v19 }
 0x30a   : > { %v4195_v12 = vpop.permute.xlu1 %927 }
 0x30b   : > { %v4199_v56 = vpop.permute.xlu0 %929 }
 0x30c   : > { %1102 = vrot.lane.b32.xlu1 %v1072_v48, %s3449_s26  ;;  %v1067_v48 = vmul.f32 %v1062_v62, %v3690_v20  ;;  %v1691_v62 = vmul.f32 %v1677_v22, %v3704_v24 }
 0x30d   : > { %2015 = vrot.lane.b32.xlu0 %v2010_v40, %s3450_s8 }
 0x30e   : > { %v4203_v15 = vpop.permute.xlu1 %1579 }
 0x30f   : > { %v4205_v59 = vpop.permute.xlu0 %1581 }
 0x310   : > { %2017 = vrot.lane.b32.xlu1 %v2014_v28, %s3450_s8 }
 0x311   : > { %1098 = vrot.lane.b32.xlu0 %v1070_v49, %s3449_s26  ;;  %v1068_v49 = vmul.f32 %v1060_v30, %v3577_v39 }
 0x312   : > { %v4209_v57 = vpop.permute.xlu1 %931 }
 0x313   : > { %v4212_v17 = vpop.permute.xlu0 %933 }
 0x314   : > { %1100 = vrot.lane.b32.xlu1 %v1071_v51, %s3449_s26  ;;  %v1066_v51 = vmul.f32 %v4025_v7, %v3559_v33 }
 0x315   : > { %1096 = vrot.lane.b32.xlu0 %v1069_v50, %s3449_s26 }
 0x316   : > { %v4218_v40 = vpop.permute.xlu1 %935 }
 0x317   : > { %v4221_v28 = vpop.permute.xlu0 %937 }
 0x318   : > { %1092 = vrot.lane.b32.xlu1 %v1067_v48, %s3449_s26  ;;  %v1692_v48 = vmul.f32 %v4189_v5, %v3599_v46 }
 0x319   : > { %1094 = vrot.lane.b32.xlu0 %v1068_v49, %s3449_s26 }
 0x31a   : > { %v4228_v13 = vpop.permute.xlu1 %939 }
 0x31b   : > { %v4232_v50 = vpop.permute.xlu0 %941 }
 0x31c   : > { %1090 = vrot.lane.b32.xlu1 %v1066_v51, %s3449_s26  ;;  %v1688_v51 = vmul.f32 %v1677_v22, %v3699_v23 }
 0x31d   : > { %1725 = vrot.lane.b32.xlu0 %v1691_v62, %s3451_s29  ;;  %v3358_v62 = vld [vmem:[%s5157_s3 + $0x27] ss:$8 sm:$0x3] }
 0x31e   : > { %v4237_v30 = vpop.permute.xlu1 %1429  ;;  %v2545_v16 = vrot.slane %v3358_v62, %v3505_v8 }
 0x31f   : > { %v4241_v49 = vpop.permute.xlu0 %1431 }
 0x320   : > { %1727 = vrot.lane.b32.xlu1 %v1692_v48, %s3451_s29  ;;  %v2541_v48 = vrot.slane %v3358_v62, %v3507_v9  ;;  %v1683_v62 = vmul.f32 %v4189_v5, %v3577_v39 }
 0x321   : > { %1723 = vrot.lane.b32.xlu0 %v1690_v26, %s3451_s29 }
 0x322   : > { %v4247_v7 = vpop.permute.xlu1 %943 }
 0x323   : > { %v1390_v21 = vpop.permute.xlu0 %1389 }
 0x324   : > { %1719 = vrot.lane.b32.xlu1 %v1688_v51, %s3451_s29 }
 0x325   : > { %1721 = vrot.lane.b32.xlu0 %v1689_v14, %s3451_s29 }
 0x326   : > { %v1392_v26 = vpop.permute.xlu1 %1391 }
 0x327   : > { %v1388_v6 = vpop.permute.xlu0 %1387  ;;  %v1401_v3 = vsel %vm1393_vm0, %v1390_v21, %v1392_v26 }
 0x328   : > { %1717 = vrot.lane.b32.xlu1 %v1687_v25, %s3451_s29  ;;  %1826 = vmatprep.subr.mxu0 %v1401_v3  ;;  %v1400_v1 = vsel %vm1393_vm0, %v1388_v6, %v1390_v21  ;;  %v1686_v21 = vmul.f32 %v4189_v5, %v3573_v38 }
 0x329   : > { %2546 = vrot.lane.b32.xlu0 %v2541_v48, %s3433_s21  ;;  %1827 = vmatpush1.msra.mxu0 %v1400_v1  ;;  %v1684_v1 = vmul.f32 %v4183_v44, %v3555_v32  ;;  %v4286_v48 = vsel %vm1583_vm11, %v4203_v15, %v4205_v59  ;;  %vm2112_vm11 = vcmask 670720  }
 0x32a   : > { %v1384_v14 = vpop.permute.xlu1 %1383 }
 0x32b   : > { %v1386_v51 = vpop.permute.xlu0 %1385 }
 0x32c   : > { %2548 = vrot.lane.b32.xlu1 %v2545_v16, %s3433_s21  ;;  %v1399_v36 = vsel %vm1393_vm0, %v1384_v14, %v1386_v51  ;;  %s3452_s21 = smov 54  }
 0x32d   : > { %1713 = vrot.lane.b32.xlu0 %v1685_v4, %s3451_s29  ;;  %1828 = vmatprep.subr.mxu0 %v1399_v36  ;;  %v1682_v4 = vmul.f32 %v1677_v22, %v3690_v20  ;;  %v1598_v22 = vmul.f32 %v4286_v48, %v3704_v24 }
 0x32e   : > { %v1382_v25 = vpop.permute.xlu1 %1381 }
 0x32f   : > { %v4271_v6 = vpop.permute.xlu0 %2230  ;;  %v1398_v3 = vsel %vm1393_vm0, %v1382_v25, %v1384_v14  ;;  %v1681_v14 = vmul.f32 %v4183_v44, %v3559_v33 }
 0x330   : > { %1715 = vrot.lane.b32.xlu1 %v1686_v21, %s3451_s29  ;;  %1829 = vmatpush1.msra.mxu0 %v1398_v3  ;;  %v1599_v3 = vmul.f32 %v4205_v59, %v3599_v46 }
 0x331   : > { %1711 = vrot.lane.b32.xlu0 %v1684_v1, %s3451_s29  ;;  %v1597_v1 = vmul.f32 %v4203_v15, %v3591_v43 }
 0x332   : > { %v4278_v16 = vpop.permute.xlu1 %2232 }
 0x333   : > { %v1378_v36 = vpop.permute.xlu0 %1377 }
 0x334   : > { %1707 = vrot.lane.b32.xlu1 %v1682_v4, %s3451_s29 }
 0x335   : > { %1709 = vrot.lane.b32.xlu0 %v1683_v62, %s3451_s29  ;;  %v1595_v62 = vmul.f32 %v4286_v48, %v3699_v23 }
 0x336   : > { %v1380_v26 = vpop.permute.xlu1 %1379 }
 0x337   : > { %v1376_v51 = vpop.permute.xlu0 %1375  ;;  %v1397_v25 = vsel %vm1393_vm0, %v1378_v36, %v1380_v26  ;;  %v3357_v26 = vld [vmem:[%s5157_s3 + $0x26] ss:$8 sm:$0x3] }
 0x338   : > { %1705 = vrot.lane.b32.xlu1 %v1681_v14, %s3451_s29  ;;  %1830 = vmatprep.subr.mxu0 %v1397_v25  ;;  %v1396_v5 = vsel %vm1393_vm0, %v1376_v51, %v1378_v36  ;;  %v1596_v25 = vmul.f32 %v4205_v59, %v3605_v47 }
 0x339   : > { %1632 = vrot.lane.b32.xlu0 %v1598_v22, %s3452_s21  ;;  %1831 = vmatpush1.msra.mxu0 %v1396_v5  ;;  %v2462_v22 = vrot.slane %v3357_v26, %v3507_v9 }
 0x33a   : > { %v1372_v21 = vpop.permute.xlu1 %1371 }
 0x33b   : > { %v1374_v44 = vpop.permute.xlu0 %1373 }
 0x33c   : > { %1634 = vrot.lane.b32.xlu1 %v1599_v3, %s3452_s21  ;;  %v1395_v4 = vsel %vm1393_vm0, %v1372_v21, %v1374_v44  ;;  %v1594_v3 = vmul.f32 %v4203_v15, %v3587_v42 }
 0x33d   : > { %1630 = vrot.lane.b32.xlu0 %v1597_v1, %s3452_s21  ;;  %1832 = vmatprep.subr.mxu0 %v1395_v4  ;;  %v2466_v4 = vrot.slane %v3357_v26, %v3505_v8 }
 0x33e   : > { %v1370_v36 = vpop.permute.xlu1 %1369 }
 0x33f   : > { %v1297_v14 = vpop.permute.xlu0 %1296  ;;  %v1394_v51 = vsel %vm1393_vm0, %v1370_v36, %v1372_v21  ;;  %vm1114_vm0 = vcmask 900096  }
 0x340   : > { %1626 = vrot.lane.b32.xlu1 %v1595_v62, %s3452_s21  ;;  %1833 = vmatpush1.msra.mxu0 %v1394_v51  ;;  %v1592_v51 = vmul.f32 %v4286_v48, %v3685_v19 }
 0x341   : > { %1628 = vrot.lane.b32.xlu0 %v1596_v25, %s3452_s21 }
 0x342   : > { %v1299_v5 = vpop.permute.xlu1 %1298 }
 0x343   : > { %v1295_v44 = vpop.permute.xlu0 %1294  ;;  %v1308_v1 = vsel %vm1300_vm12, %v1297_v14, %v1299_v5 }
 0x344   : > { %1624 = vrot.lane.b32.xlu1 %v1594_v3, %s3452_s21  ;;  %1834 = vmatprep.subr.mxu0 %v1308_v1  ;;  %v1307_v21 = vsel %vm1300_vm12, %v1295_v44, %v1297_v14  ;;  %v3361_v14 = vld [vmem:[%s5157_s3 + $0x32] ss:$8 sm:$0x3]  ;;  %v1591_v44 = vmul.f32 %v4203_v15, %v3555_v32 }
 0x345   : > { %2467 = vrot.lane.b32.xlu0 %v2462_v22, %s3428_s11  ;;  %1835 = vmatpush1.msra.mxu0 %v1307_v21  ;;  %v1593_v22 = vmul.f32 %v4205_v59, %v3573_v38  ;;  %v2947_v1 = vrot.slane %v3361_v14, %v3507_v9  ;;  %v2951_v21 = vrot.slane %v3361_v14, %v3505_v8 }
 0x346   : > { %v1291_v36 = vpop.permute.xlu1 %1290  ;;  %v1590_v14 = vmul.f32 %v4205_v59, %v3577_v39 }
 0x347   : > { %v1293_v62 = vpop.permute.xlu0 %1292 }
 0x348   : > { %2469 = vrot.lane.b32.xlu1 %v2466_v4, %s3428_s11  ;;  %v1306_v25 = vsel %vm1300_vm12, %v1291_v36, %v1293_v62  ;;  %s3453_s11 = smov 55  }
 0x349   : > { %1620 = vrot.lane.b32.xlu0 %v1592_v51, %s3452_s21  ;;  %1836 = vmatprep.subr.mxu0 %v1306_v25 }
 0x34a   : > { %v1289_v26 = vpop.permute.xlu1 %1288 }
 0x34b   : > { %v1285_v5 = vpop.permute.xlu0 %1284  ;;  %v1305_v3 = vsel %vm1300_vm12, %v1289_v26, %v1291_v36  ;;  %v1589_v26 = vmul.f32 %v4286_v48, %v3690_v20 }
 0x34c   : > { %1622 = vrot.lane.b32.xlu1 %v1593_v22, %s3452_s21  ;;  %1837 = vmatpush1.msra.mxu0 %v1305_v3 }
 0x34d   : > { %1618 = vrot.lane.b32.xlu0 %v1591_v44, %s3452_s21 }
 0x34e   : > { %v1287_v4 = vpop.permute.xlu1 %1286 }
 0x34f   : > { %v1283_v62 = vpop.permute.xlu0 %1282  ;;  %v1304_v51 = vsel %vm1300_vm12, %v1285_v5, %v1287_v4 }
 0x350   : > { %2952 = vrot.lane.b32.xlu1 %v2947_v1, %s3441_s16  ;;  %1838 = vmatprep.subr.mxu0 %v1304_v51  ;;  %v1303_v36 = vsel %vm1300_vm12, %v1283_v62, %v1285_v5  ;;  %v1588_v5 = vmul.f32 %v4203_v15, %v3559_v33  ;;  %v3356_v51 = vld [vmem:[%s5157_s3 + $0x25] ss:$8 sm:$0x3] }
 0x351   : > { %2954 = vrot.lane.b32.xlu0 %v2951_v21, %s3441_s16  ;;  %1839 = vmatpush1.msra.mxu0 %v1303_v36 }
 0x352   : > { %v1279_v25 = vpop.permute.xlu1 %1278 }
 0x353   : > { %v1281_v22 = vpop.permute.xlu0 %1280 }
 0x354   : > { %1614 = vrot.lane.b32.xlu1 %v1589_v26, %s3452_s21  ;;  %v1302_v3 = vsel %vm1300_vm12, %v1279_v25, %v1281_v22  ;;  %v2383_v26 = vrot.slane %v3356_v51, %v3507_v9 }
 0x355   : > { %1616 = vrot.lane.b32.xlu0 %v1590_v14, %s3452_s21  ;;  %1840 = vmatprep.subr.mxu0 %v1302_v3 }
 0x356   : > { %v1277_v44 = vpop.permute.xlu1 %1276 }
 0x357   : > { %v1205_v1 = vpop.permute.xlu0 %1204  ;;  %v1301_v21 = vsel %vm1300_vm12, %v1277_v44, %v1279_v25  ;;  %v2387_v44 = vrot.slane %v3356_v51, %v3505_v8  ;;  %vm1636_vm12 = vcmask 441344  }
 0x358   : > { %1612 = vrot.lane.b32.xlu1 %v1588_v5, %s3452_s21  ;;  %1841 = vmatpush1.msra.mxu0 %v1301_v21  ;;  %v3360_v21 = vld [vmem:[%s5157_s3 + $0x31] ss:$8 sm:$0x3] }
 0x359   : > { %1539 = vrot.lane.b32.xlu0 %v3704_v24, %s3453_s11  ;;  %v2872_v51 = vrot.slane %v3360_v21, %v3505_v8 }
 0x35a   : > { %v1207_v59 = vpop.permute.xlu1 %1206 }
 0x35b   : > { %v1203_v48 = vpop.permute.xlu0 %1202  ;;  %v1215_v4 = vsel %vm1155_vm13, %v1205_v1, %v1207_v59 }
 0x35c   : > { %1541 = vrot.lane.b32.xlu1 %v3599_v46, %s3453_s11  ;;  %1842 = vmatprep.subr.mxu0 %v1215_v4  ;;  %v1214_v15 = vsel %vm1155_vm13, %v1203_v48, %v1205_v1 }
 0x35d   : > { %1537 = vrot.lane.b32.xlu0 %v3591_v43, %s3453_s11  ;;  %1843 = vmatpush1.msra.mxu0 %v1214_v15 }
 0x35e   : > { %v1199_v62 = vpop.permute.xlu1 %1198 }
 0x35f   : > { %v1201_v36 = vpop.permute.xlu0 %1200 }
 0x360   : > { %1533 = vrot.lane.b32.xlu1 %v3699_v23, %s3453_s11  ;;  %v1213_v25 = vsel %vm1155_vm13, %v1199_v62, %v1201_v36 }
 0x361   : > { %1535 = vrot.lane.b32.xlu0 %v3605_v47, %s3453_s11  ;;  %1844 = vmatprep.subr.mxu0 %v1213_v25 }
 0x362   : > { %v1197_v22 = vpop.permute.xlu1 %1196 }
 0x363   : > { %v4371_v14 = vpop.permute.xlu0 %2108  ;;  %v1212_v3 = vsel %vm1155_vm13, %v1197_v22, %v1199_v62  ;;  %v2868_v62 = vrot.slane %v3360_v21, %v3507_v9 }
 0x364   : > { %1531 = vrot.lane.b32.xlu1 %v3587_v42, %s3453_s11  ;;  %1845 = vmatpush1.msra.mxu0 %v1212_v3 }
 0x365   : > { %2388 = vrot.lane.b32.xlu0 %v2383_v26, %s3427_s10 }
 0x366   : > { %v4378_v5 = vpop.permute.xlu1 %2110 }
 0x367   : > { %v1193_v1 = vpop.permute.xlu0 %1192 }
 0x368   : > { %2390 = vrot.lane.b32.xlu1 %v2387_v44, %s3427_s10  ;;  %s3454_s10 = smov 56  }
 0x369   : > { %1527 = vrot.lane.b32.xlu0 %v3685_v19, %s3453_s11 }
 0x36a   : > { %v1195_v59 = vpop.permute.xlu1 %1194 }
 0x36b   : > { %v1191_v48 = vpop.permute.xlu0 %1190  ;;  %v1211_v4 = vsel %vm1155_vm13, %v1193_v1, %v1195_v59 }
 0x36c   : > { %1529 = vrot.lane.b32.xlu1 %v3573_v38, %s3453_s11  ;;  %1846 = vmatprep.subr.mxu0 %v1211_v4  ;;  %v1210_v15 = vsel %vm1155_vm13, %v1191_v48, %v1193_v1  ;;  %v4402_v1 = vsel %vm1433_vm15, %v4237_v30, %v4241_v49  ;;  %vm2019_vm15 = vcmask 662528  }
 0x36d   : > { %1525 = vrot.lane.b32.xlu0 %v3555_v32, %s3453_s11  ;;  %1847 = vmatpush1.msra.mxu0 %v1210_v15  ;;  %v1448_v4 = vmul.f32 %v4402_v1, %v3704_v24 }
 0x36e   : > { %v1187_v36 = vpop.permute.xlu1 %1186 }
 0x36f   : > { %v1189_v25 = vpop.permute.xlu0 %1188 }
 0x370   : > { %2873 = vrot.lane.b32.xlu1 %v2868_v62, %s3440_s9  ;;  %v1209_v26 = vsel %vm1155_vm13, %v1187_v36, %v1189_v25  ;;  %v1447_v25 = vmul.f32 %v4237_v30, %v3591_v43 }
 0x371   : > { %2875 = vrot.lane.b32.xlu0 %v2872_v51, %s3440_s9  ;;  %1848 = vmatprep.subr.mxu0 %v1209_v26  ;;  %v1449_v51 = vmul.f32 %v4241_v49, %v3599_v46 }
 0x372   : > { %v1185_v22 = vpop.permute.xlu1 %1184 }
 0x373   : > { %v1111_v3 = vpop.permute.xlu0 %1110  ;;  %v1208_v44 = vsel %vm1155_vm13, %v1185_v22, %v1187_v36  ;;  %vm1729_vm13 = vcmask 392192  }
 0x374   : > { %1521 = vrot.lane.b32.xlu1 %v3690_v20, %s3453_s11  ;;  %1849 = vmatpush1.msra.mxu0 %v1208_v44  ;;  %v3355_v44 = vld [vmem:[%s5157_s3 + $0x24] ss:$8 sm:$0x3] }
 0x375   : > { %1523 = vrot.lane.b32.xlu0 %v3577_v39, %s3453_s11 }
 0x376   : > { %v1113_v21 = vpop.permute.xlu1 %1112 }
 0x377   : > { %v1109_v59 = vpop.permute.xlu0 %1108  ;;  %v1122_v48 = vsel %vm1114_vm0, %v1111_v3, %v1113_v21 }
 0x378   : > { %1519 = vrot.lane.b32.xlu1 %v3559_v33, %s3453_s11  ;;  %1850 = vmatprep.subr.mxu0 %v1122_v48  ;;  %v1121_v15 = vsel %vm1114_vm0, %v1109_v59, %v1111_v3  ;;  %v1445_v3 = vmul.f32 %v4402_v1, %v3699_v23  ;;  %v1446_v48 = vmul.f32 %v4241_v49, %v3605_v47 }
 0x379   : > { %1482 = vrot.lane.b32.xlu0 %v1448_v4, %s3454_s10  ;;  %1851 = vmatpush1.msra.mxu0 %v1121_v15  ;;  %v2304_v4 = vrot.slane %v3355_v44, %v3507_v9 }
 0x37a   : > { %v1105_v62 = vpop.permute.xlu1 %1104 }
 0x37b   : > { %v1107_v36 = vpop.permute.xlu0 %1106 }
 0x37c   : > { %1484 = vrot.lane.b32.xlu1 %v1449_v51, %s3454_s10  ;;  %v1120_v26 = vsel %vm1114_vm0, %v1105_v62, %v1107_v36  ;;  %v1444_v51 = vmul.f32 %v4237_v30, %v3587_v42 }
 0x37d   : > { %1480 = vrot.lane.b32.xlu0 %v1447_v25, %s3454_s10  ;;  %1852 = vmatprep.subr.mxu0 %v1120_v26 }
 0x37e   : > { %v1103_v22 = vpop.permute.xlu1 %1102 }
 0x37f   : > { %v4425_v21 = vpop.permute.xlu0 %2015  ;;  %v1119_v59 = vsel %vm1114_vm0, %v1103_v22, %v1105_v62  ;;  %v2308_v62 = vrot.slane %v3355_v44, %v3505_v8  ;;  %v3359_v44 = vld [vmem:[%s5157_s3 + $0x30] ss:$8 sm:$0x3] }
 0x380   : > { %1476 = vrot.lane.b32.xlu1 %v1445_v3, %s3454_s10  ;;  %1853 = vmatpush1.msra.mxu0 %v1119_v59  ;;  %v1442_v3 = vmul.f32 %v4402_v1, %v3685_v19 }
 0x381   : > { %1478 = vrot.lane.b32.xlu0 %v1446_v48, %s3454_s10 }
 0x382   : > { %v4433_v15 = vpop.permute.xlu1 %2017 }
 0x383   : > { %v1099_v36 = vpop.permute.xlu0 %1098 }
 0x384   : > { %1474 = vrot.lane.b32.xlu1 %v1444_v51, %s3454_s10 }
 0x385   : > { %2309 = vrot.lane.b32.xlu0 %v2304_v4, %s3426_s7  ;;  %v1443_v4 = vmul.f32 %v4241_v49, %v3573_v38 }
 0x386   : > { %v1101_v25 = vpop.permute.xlu1 %1100 }
 0x387   : > { %v1097_v26 = vpop.permute.xlu0 %1096  ;;  %v1118_v22 = vsel %vm1114_vm0, %v1099_v36, %v1101_v25  ;;  %v1441_v25 = vmul.f32 %v4237_v30, %v3555_v32 }
 0x388   : > { %2311 = vrot.lane.b32.xlu1 %v2308_v62, %s3426_s7  ;;  %1854 = vmatprep.subr.mxu0 %v1118_v22  ;;  %v1117_v59 = vsel %vm1114_vm0, %v1097_v26, %v1099_v36  ;;  %v2789_v36 = vrot.slane %v3359_v44, %v3507_v9  ;;  %v2793_v26 = vrot.slane %v3359_v44, %v3505_v8 }
 0x389   : > { %1470 = vrot.lane.b32.xlu0 %v1442_v3, %s3454_s10  ;;  %1855 = vmatpush1.msra.mxu0 %v1117_v59 }
 0x38a   : > { %v1093_v48 = vpop.permute.xlu1 %1092 }
 0x38b   : > { %v1095_v51 = vpop.permute.xlu0 %1094 }
 0x38c   : > { %1472 = vrot.lane.b32.xlu1 %v1443_v4, %s3454_s10  ;;  %v1116_v62 = vsel %vm1114_vm0, %v1093_v48, %v1095_v51  ;;  %v1755_v4 = vld [vmem:[%s5155_s1 + $0x18] sm:$0xff] }
 0x38d   : > { %1468 = vrot.lane.b32.xlu0 %v1441_v25, %s3454_s10  ;;  %1856 = vmatprep.subr.mxu0 %v1116_v62  ;;  %v1439_v25 = vmul.f32 %v4402_v1, %v3690_v20  ;;  %v2234_v1 = vsel %vm338_vm1, %v4271_v6, %v4278_v16 }
 0x38e   : > { %v1091_v22 = vpop.permute.xlu1 %1090  ;;  %1890 = vmatprep.mubr.f32.mxu0 %v1755_v4 }
 0x38f   : > { %v1726_v3 = vpop.permute.xlu0 %1725  ;;  %v1115_v59 = vsel %vm1114_vm0, %v1091_v22, %v1093_v48  ;;  %v1440_v48 = vmul.f32 %v4241_v49, %v3577_v39  ;;  %v1438_v22 = vmul.f32 %v4237_v30, %v3559_v33 }
 0x390   : > { %2794 = vrot.lane.b32.xlu1 %v2789_v36, %s3435_s27  ;;  %1857 = vmatpush1.msra.mxu0 %v1115_v59  ;;  %v2240_v59 = vmul.f32 0.0, %v4278_v16 }
 0x391   : > { %2796 = vrot.lane.b32.xlu0 %v2793_v26, %s3435_s27  ;;  %s3456_s27 = smov 47  }
 0x392   : > { %v1728_v51 = vpop.permute.xlu1 %1727 }
 0x393   : > { %v1724_v44 = vpop.permute.xlu0 %1723  ;;  %v1737_v62 = vsel %vm1729_vm13, %v1726_v3, %v1728_v51  ;;  %v2246_v51 = vmul.f32 %v2234_v1, %v3599_v46 }
 0x394   : > { %1464 = vrot.lane.b32.xlu1 %v1439_v25, %s3454_s10  ;;  %1858 = vmatprep.subr.mxu0 %v1737_v62  ;;  %v1736_v36 = vsel %vm1729_vm13, %v1724_v44, %v1726_v3  ;;  %v2245_v44 = vmul.f32 %v4271_v6, %v3704_v24  ;;  %v2244_v62 = vmul.f32 %v2234_v1, %v3605_v47 }
 0x395   : > { %1466 = vrot.lane.b32.xlu0 %v1440_v48, %s3454_s10  ;;  %1859 = vmatpush2.msra.mxu0 %v1736_v36  ;;  %v2243_v36 = vmul.f32 %v4271_v6, %v3699_v23 }
 0x396   : > { %v1720_v26 = vpop.permute.xlu1 %1719 }
 0x397   : > { %v1722_v4 = vpop.permute.xlu0 %1721 }
 0x398   : > { %1462 = vrot.lane.b32.xlu1 %v1438_v22, %s3454_s10  ;;  %v1735_v49 = vsel %vm1729_vm13, %v1720_v26, %v1722_v4  ;;  %v2242_v22 = vmul.f32 %v2234_v1, %v3573_v38 }
 0x399   : > { %2260 = vrot.lane.b32.xlu0 %v2240_v59, %s3429_s12  ;;  %1860 = vmatprep.subr.mxu0 %v1735_v49  ;;  %v2241_v49 = vmul.f32 %v4271_v6, %v3685_v19 }
 0x39a   : > { %v1718_v3 = vpop.permute.xlu1 %1717 }
 0x39b   : > { %v4482_v25 = vpop.permute.xlu0 %2546  ;;  %v1734_v30 = vsel %vm1729_vm13, %v1718_v3, %v1720_v26 }
 0x39c   : > { %2272 = vrot.lane.b32.xlu1 %v2246_v51, %s3429_s12  ;;  %1861 = vmatpush2.msra.mxu0 %v1734_v30  ;;  %v2239_v30 = vmul.f32 %v2234_v1, %v3577_v39  ;;  %v912_v1 = vmul.f32 %v4029_v10, %v3599_v46 }
 0x39d   : > { %2270 = vrot.lane.b32.xlu0 %v2245_v44, %s3429_s12 }
 0x39e   : > { %v4489_v16 = vpop.permute.xlu1 %2548 }
 0x39f   : > { %v1714_v48 = vpop.permute.xlu0 %1713 }
 0x3a0   : > { %2268 = vrot.lane.b32.xlu1 %v2244_v62, %s3429_s12  ;;  %v2238_v62 = vmul.f32 %v4271_v6, %v3690_v20  ;;  %v2113_v6 = vsel %vm2112_vm11, %v4371_v14, %v4378_v5  ;;  %vm2072_vm11 = vcmask 384000  }
 0x3a1   : > { %2266 = vrot.lane.b32.xlu0 %v2243_v36, %s3429_s12 }
 0x3a2   : > { %v1716_v26 = vpop.permute.xlu1 %1715 }
 0x3a3   : > { %v1712_v59 = vpop.permute.xlu0 %1711  ;;  %v1733_v4 = vsel %vm1729_vm13, %v1714_v48, %v1716_v26 }
 0x3a4   : > { %2264 = vrot.lane.b32.xlu1 %v2242_v22, %s3429_s12  ;;  %1862 = vmatprep.subr.mxu0 %v1733_v4  ;;  %v1732_v3 = vsel %vm1729_vm13, %v1712_v59, %v1714_v48  ;;  %v911_v48 = vmul.f32 %v4033_v18, %v3704_v24 }
 0x3a5   : > { %2262 = vrot.lane.b32.xlu0 %v2241_v49, %s3429_s12  ;;  %1863 = vmatpush2.msra.mxu0 %v1732_v3  ;;  %v2127_v49 = vmul.f32 %v2113_v6, %v3704_v24 }
 0x3a6   : > { %v1708_v51 = vpop.permute.xlu1 %1707 }
 0x3a7   : > { %v1710_v44 = vpop.permute.xlu0 %1709 }
 0x3a8   : > { %2258 = vrot.lane.b32.xlu1 %v2239_v30, %s3429_s12  ;;  %v1731_v36 = vsel %vm1729_vm13, %v1708_v51, %v1710_v44  ;;  %v2126_v44 = vmul.f32 %v4371_v14, %v3591_v43 }
 0x3a9   : > { %2256 = vrot.lane.b32.xlu0 %v2238_v62, %s3429_s12  ;;  %1864 = vmatprep.subr.mxu0 %v1731_v36  ;;  %s3455_s12 = smov 46   ;;  %v2124_v36 = vmul.f32 %v2113_v6, %v3699_v23 }
 0x3aa   : > { %v1706_v26 = vpop.permute.xlu1 %1705 }
 0x3ab   : > { %v1633_v22 = vpop.permute.xlu0 %1632  ;;  %v1730_v59 = vsel %vm1729_vm13, %v1706_v26, %v1708_v51  ;;  %v2128_v51 = vmul.f32 %v4378_v5, %v3599_v46  ;;  %vm1543_vm13 = vcmask 449536  }
 0x3ac   : > { %945 = vrot.lane.b32.xlu1 %v911_v48, %s3443_s25  ;;  %1865 = vmatpush2.msra.mxu0 %v1730_v59 }
 0x3ad   : > { %947 = vrot.lane.b32.xlu0 %v912_v1, %s3443_s25 }
 0x3ae   : > { %v1635_v4 = vpop.permute.xlu1 %1634 }
 0x3af   : > { %v1631_v3 = vpop.permute.xlu0 %1630  ;;  %v1644_v18 = vsel %vm1636_vm12, %v1633_v22, %v1635_v4  ;;  %v2123_v4 = vmul.f32 %v4371_v14, %v3587_v42 }
 0x3b0   : > { %2161 = vrot.lane.b32.xlu1 %v2127_v49, %s3455_s12  ;;  %1866 = vmatprep.subr.mxu0 %v1644_v18  ;;  %v1643_v10 = vsel %vm1636_vm12, %v1631_v3, %v1633_v22  ;;  %v2125_v22 = vmul.f32 %v4378_v5, %v3605_v47  ;;  %v2121_v3 = vmul.f32 %v2113_v6, %v3685_v19 }
 0x3b1   : > { %2163 = vrot.lane.b32.xlu0 %v2128_v51, %s3455_s12  ;;  %1867 = vmatpush2.msra.mxu0 %v1643_v10  ;;  %v2122_v51 = vmul.f32 %v4378_v5, %v3573_v38 }
 0x3b2   : > { %v1627_v30 = vpop.permute.xlu1 %1626 }
 0x3b3   : > { %v1629_v62 = vpop.permute.xlu0 %1628 }
 0x3b4   : > { %2159 = vrot.lane.b32.xlu1 %v2126_v44, %s3455_s12  ;;  %v1642_v26 = vsel %vm1636_vm12, %v1627_v30, %v1629_v62 }
 0x3b5   : > { %2155 = vrot.lane.b32.xlu0 %v2124_v36, %s3455_s12  ;;  %1868 = vmatprep.subr.mxu0 %v1642_v26  ;;  %v2118_v36 = vmul.f32 %v2113_v6, %v3690_v20  ;;  %v2020_v6 = vsel %vm2019_vm15, %v4425_v21, %v4433_v15 }
 0x3b6   : > { %v1625_v48 = vpop.permute.xlu1 %1624 }
 0x3b7   : > { %v4533_v59 = vpop.permute.xlu0 %2467  ;;  %v1641_v1 = vsel %vm1636_vm12, %v1625_v48, %v1627_v30  ;;  %v2120_v30 = vmul.f32 %v4371_v14, %v3555_v32 }
 0x3b8   : > { %2157 = vrot.lane.b32.xlu1 %v2125_v22, %s3455_s12  ;;  %1869 = vmatpush2.msra.mxu0 %v1641_v1  ;;  %v2119_v22 = vmul.f32 %v4378_v5, %v3577_v39 }
 0x3b9   : > { %2153 = vrot.lane.b32.xlu0 %v2123_v4, %s3455_s12  ;;  %v2117_v4 = vmul.f32 %v4371_v14, %v3559_v33 }
 0x3ba   : > { %v4540_v49 = vpop.permute.xlu1 %2469 }
 0x3bb   : > { %v1621_v18 = vpop.permute.xlu0 %1620 }
 0x3bc   : > { %2149 = vrot.lane.b32.xlu1 %v2121_v3, %s3455_s12 }
 0x3bd   : > { %2151 = vrot.lane.b32.xlu0 %v2122_v51, %s3455_s12 }
 0x3be   : > { %v1623_v10 = vpop.permute.xlu1 %1622 }
 0x3bf   : > { %v1619_v44 = vpop.permute.xlu0 %1618  ;;  %v1640_v62 = vsel %vm1636_vm12, %v1621_v18, %v1623_v10  ;;  %v2035_v10 = vmul.f32 %v4433_v15, %v3599_v46 }
 0x3c0   : > { %2147 = vrot.lane.b32.xlu1 %v2120_v30, %s3455_s12  ;;  %1870 = vmatprep.subr.mxu0 %v1640_v62  ;;  %v1639_v26 = vsel %vm1636_vm12, %v1619_v44, %v1621_v18  ;;  %v2034_v18 = vmul.f32 %v2020_v6, %v3704_v24  ;;  %v2033_v30 = vmul.f32 %v4425_v21, %v3591_v43 }
 0x3c1   : > { %2143 = vrot.lane.b32.xlu0 %v2118_v36, %s3455_s12  ;;  %1871 = vmatpush2.msra.mxu0 %v1639_v26  ;;  %v2031_v36 = vmul.f32 %v2020_v6, %v3699_v23  ;;  %v2030_v43 = vmul.f32 %v4425_v21, %v3587_v42 }
 0x3c2   : > { %v4554_v48 = vpop.permute.xlu1 %2952 }
 0x3c3   : > { %v4558_v1 = vpop.permute.xlu0 %2954 }
 0x3c4   : > { %2145 = vrot.lane.b32.xlu1 %v2119_v22, %s3455_s12  ;;  %v2032_v22 = vmul.f32 %v4433_v15, %v3605_v47 }
 0x3c5   : > { %2141 = vrot.lane.b32.xlu0 %v2117_v4, %s3455_s12 }
 0x3c6   : > { %v1615_v3 = vpop.permute.xlu1 %1614 }
 0x3c7   : > { %v1617_v51 = vpop.permute.xlu0 %1616 }
 0x3c8   : > { %2068 = vrot.lane.b32.xlu1 %v2034_v18, %s3456_s27  ;;  %v1638_v5 = vsel %vm1636_vm12, %v1615_v3, %v1617_v51 }
 0x3c9   : > { %2070 = vrot.lane.b32.xlu0 %v2035_v10, %s3456_s27  ;;  %1872 = vmatprep.subr.mxu0 %v1638_v5  ;;  %v2028_v10 = vmul.f32 %v2020_v6, %v3685_v19 }
 0x3ca   : > { %v1613_v14 = vpop.permute.xlu1 %1612 }
 0x3cb   : > { %v1540_v44 = vpop.permute.xlu0 %1539  ;;  %v1637_v62 = vsel %vm1636_vm12, %v1613_v14, %v1615_v3  ;;  %v2029_v14 = vmul.f32 %v4433_v15, %v3573_v38 }
 0x3cc   : > { %2066 = vrot.lane.b32.xlu1 %v2033_v30, %s3456_s27  ;;  %1873 = vmatpush2.msra.mxu0 %v1637_v62 }
 0x3cd   : > { %2062 = vrot.lane.b32.xlu0 %v2031_v36, %s3456_s27 }
 0x3ce   : > { %v1542_v26 = vpop.permute.xlu1 %1541 }
 0x3cf   : > { %v1538_v4 = vpop.permute.xlu0 %1537  ;;  %v1551_v18 = vsel %vm1543_vm13, %v1540_v44, %v1542_v26  ;;  %v2025_v26 = vmul.f32 %v2020_v6, %v3690_v20  ;;  %v2556_v6 = vmul.f32 0.0, %v4489_v16 }
 0x3d0   : > { %2064 = vrot.lane.b32.xlu1 %v2032_v22, %s3456_s27  ;;  %1874 = vmatprep.subr.mxu0 %v1551_v18  ;;  %v1550_v3 = vsel %vm1543_vm13, %v1538_v4, %v1540_v44  ;;  %v2027_v44 = vmul.f32 %v4425_v21, %v3555_v32  ;;  %v2026_v4 = vmul.f32 %v4433_v15, %v3577_v39 }
 0x3d1   : > { %2060 = vrot.lane.b32.xlu0 %v2030_v43, %s3456_s27  ;;  %1875 = vmatpush2.msra.mxu0 %v1550_v3  ;;  %v2024_v32 = vmul.f32 %v4425_v21, %v3559_v33  ;;  %v2550_v43 = vsel %vm710_vm7, %v4482_v25, %v4489_v16  ;;  %vm1486_vm7 = vcmask 457728  }
 0x3d2   : > { %v1534_v51 = vpop.permute.xlu1 %1533  ;;  %v2562_v15 = vmul.f32 %v2550_v43, %v3599_v46 }
 0x3d3   : > { %v1536_v5 = vpop.permute.xlu0 %1535 }
 0x3d4   : > { %2056 = vrot.lane.b32.xlu1 %v2028_v10, %s3456_s27  ;;  %v1549_v30 = vsel %vm1543_vm13, %v1534_v51, %v1536_v5  ;;  %v2561_v5 = vmul.f32 %v4482_v25, %v3704_v24 }
 0x3d5   : > { %2058 = vrot.lane.b32.xlu0 %v2029_v14, %s3456_s27  ;;  %1876 = vmatprep.subr.mxu0 %v1549_v30  ;;  %v2560_v14 = vmul.f32 %v2550_v43, %v3605_v47 }
 0x3d6   : > { %v1532_v42 = vpop.permute.xlu1 %1531 }
 0x3d7   : > { %v4594_v62 = vpop.permute.xlu0 %2388  ;;  %v1548_v36 = vsel %vm1543_vm13, %v1532_v42, %v1534_v51  ;;  %v2559_v42 = vmul.f32 %v4482_v25, %v3699_v23 }
 0x3d8   : > { %2054 = vrot.lane.b32.xlu1 %v2027_v44, %s3456_s27  ;;  %1877 = vmatpush2.msra.mxu0 %v1548_v36  ;;  %v2558_v36 = vmul.f32 %v2550_v43, %v3573_v38 }
 0x3d9   : > { %2050 = vrot.lane.b32.xlu0 %v2025_v26, %s3456_s27 }
 0x3da   : > { %v4600_v22 = vpop.permute.xlu1 %2390 }
 0x3db   : > { %v1528_v18 = vpop.permute.xlu0 %1527 }
 0x3dc   : > { %2052 = vrot.lane.b32.xlu1 %v2026_v4, %s3456_s27 }
 0x3dd   : > { %2048 = vrot.lane.b32.xlu0 %v2024_v32, %s3456_s27 }
 0x3de   : > { %v1530_v3 = vpop.permute.xlu1 %1529 }
 0x3df   : > { %v1526_v51 = vpop.permute.xlu0 %1525  ;;  %v1547_v10 = vsel %vm1543_vm13, %v1528_v18, %v1530_v3  ;;  %v2555_v3 = vmul.f32 %v2550_v43, %v3577_v39 }
 0x3e0   : > { %2576 = vrot.lane.b32.xlu1 %v2556_v6, %s3434_s22  ;;  %1878 = vmatprep.subr.mxu0 %v1547_v10  ;;  %v1546_v33 = vsel %vm1543_vm13, %v1526_v51, %v1528_v18  ;;  %v2557_v18 = vmul.f32 %v4482_v25, %v3685_v19  ;;  %v2554_v10 = vmul.f32 %v4482_v25, %v3690_v20 }
 0x3e1   : > { %2588 = vrot.lane.b32.xlu0 %v2562_v15, %s3434_s22  ;;  %1879 = vmatpush2.msra.mxu0 %v1546_v33  ;;  %v2471_v15 = vsel %vm617_vm4, %v4533_v59, %v4540_v49  ;;  %v2477_v33 = vmul.f32 0.0, %v4540_v49  ;;  %v975_v49 = vld [vmem:[%s5155_s1 + $0x8] sm:$0xff]  ;;  %vm2165_vm4 = vcmask 375808  }
 0x3e2   : > { %v4617_v21 = vpop.permute.xlu1 %2873  ;;  %v2483_v25 = vmul.f32 %v2471_v15, %v3599_v46  ;;  %1979 = vmatprep.mubr.f32.mxu1 %v975_v49 }
 0x3e3   : > { %v4621_v16 = vpop.permute.xlu0 %2875 }
 0x3e4   : > { %2586 = vrot.lane.b32.xlu1 %v2561_v5, %s3434_s22 }
 0x3e5   : > { %2584 = vrot.lane.b32.xlu0 %v2560_v14, %s3434_s22 }
 0x3e6   : > { %v1522_v30 = vpop.permute.xlu1 %1521 }
 0x3e7   : > { %v1524_v44 = vpop.permute.xlu0 %1523 }
 0x3e8   : > { %2582 = vrot.lane.b32.xlu1 %v2559_v42, %s3434_s22  ;;  %v1545_v26 = vsel %vm1543_vm13, %v1522_v30, %v1524_v44  ;;  %v2482_v44 = vmul.f32 %v4533_v59, %v3704_v24 }
 0x3e9   : > { %2580 = vrot.lane.b32.xlu0 %v2558_v36, %s3434_s22  ;;  %1880 = vmatprep.subr.mxu0 %v1545_v26 }
 0x3ea   : > { %v1520_v4 = vpop.permute.xlu1 %1519 }
 0x3eb   : > { %v1483_v32 = vpop.permute.xlu0 %1482  ;;  %v1544_v6 = vsel %vm1543_vm13, %v1520_v4, %v1522_v30  ;;  %v2481_v4 = vmul.f32 %v2471_v15, %v3605_v47 }
 0x3ec   : > { %2578 = vrot.lane.b32.xlu1 %v2557_v18, %s3434_s22  ;;  %1881 = vmatpush2.msra.mxu0 %v1544_v6  ;;  %v4661_v18 = vsel %vm1061_vm14, %v4554_v48, %v4558_v1  ;;  %vm670_vm14 = vcmask 973824  }
 0x3ed   : > { %2574 = vrot.lane.b32.xlu0 %v2555_v3, %s3434_s22  ;;  %v2966_v49 = vmul.f32 %v4661_v18, %v3605_v47 }
 0x3ee   : > { %v1485_v51 = vpop.permute.xlu1 %1484 }
 0x3ef   : > { %v1481_v5 = vpop.permute.xlu0 %1480  ;;  %v1494_v14 = vsel %vm1486_vm7, %v1483_v32, %v1485_v51 }
 0x3f0   : > { %2572 = vrot.lane.b32.xlu1 %v2554_v10, %s3434_s22  ;;  %1882 = vmatprep.subr.mxu0 %v1494_v14  ;;  %v1493_v43 = vsel %vm1486_vm7, %v1481_v5, %v1483_v32  ;;  %v2962_v32 = vmul.f32 0.0, %v4558_v1  ;;  %v2968_v10 = vmul.f32 %v4661_v18, %v3599_v46  ;;  %v2480_v5 = vmul.f32 %v4533_v59, %v3699_v23  ;;  %s5129_s22 = scalar_lea.vmem %s5158_s4, %s3368_s20  ;;  %s3370_s20 = sshll.u32 %s5203_s19, 5 }
 0x3f1   : > { %2497 = vrot.lane.b32.xlu0 %v2477_v33, %s3432_s15  ;;  %1883 = vmatpush2.msra.mxu0 %v1493_v43  ;;  %v2967_v14 = vmul.f32 %v4554_v48, %v3704_v24  ;;  %s237_s29 = scalar_lea.vmem %s5159_s5, %s3370_s20 }
 0x3f2   : > { %v1477_v30 = vpop.permute.xlu1 %1476 }
 0x3f3   : > { %v1479_v42 = vpop.permute.xlu0 %1478 }
 0x3f4   : > { %2509 = vrot.lane.b32.xlu1 %v2483_v25, %s3432_s15  ;;  %v1492_v36 = vsel %vm1486_vm7, %v1477_v30, %v1479_v42  ;;  %v2479_v25 = vmul.f32 %v2471_v15, %v3573_v38 }
 0x3f5   : > { %2507 = vrot.lane.b32.xlu0 %v2482_v44, %s3432_s15  ;;  %1884 = vmatprep.subr.mxu0 %v1492_v36 }
 0x3f6   : > { %v1475_v26 = vpop.permute.xlu1 %1474 }
 0x3f7   : > { %v4664_v6 = vpop.permute.xlu0 %2309  ;;  %v1491_v3 = vsel %vm1486_vm7, %v1475_v26, %v1477_v30  ;;  %v2478_v26 = vmul.f32 %v4533_v59, %v3685_v19 }
 0x3f8   : > { %2505 = vrot.lane.b32.xlu1 %v2481_v4, %s3432_s15  ;;  %1885 = vmatpush2.msra.mxu0 %v1491_v3 }
 0x3f9   : > { %2982 = vrot.lane.b32.xlu0 %v2962_v32, %s3449_s26  ;;  %v2965_v32 = vmul.f32 %v4554_v48, %v3699_v23 }
 0x3fa   : > { %v4669_v51 = vpop.permute.xlu1 %2311 }
 0x3fb   : > { %v1471_v33 = vpop.permute.xlu0 %1470 }
 0x3fc   : > { %2994 = vrot.lane.b32.xlu1 %v2968_v10, %s3449_s26  ;;  %v2476_v10 = vmul.f32 %v2471_v15, %v3577_v39  ;;  %v2475_v15 = vmul.f32 %v4533_v59, %v3690_v20 }
 0x3fd   : > { %2503 = vrot.lane.b32.xlu0 %v2480_v5, %s3432_s15 }
 0x3fe   : > { %v1473_v1 = vpop.permute.xlu1 %1472 }
 0x3ff   : > { %v1469_v43 = vpop.permute.xlu0 %1468  ;;  %v1490_v30 = vsel %vm1486_vm7, %v1471_v33, %v1473_v1  ;;  %v2964_v1 = vmul.f32 %v4661_v18, %v3573_v38 }
 0x400   : > { %2992 = vrot.lane.b32.xlu1 %v2967_v14, %s3449_s26  ;;  %1886 = vmatprep.subr.mxu0 %v1490_v30  ;;  %v1489_v42 = vsel %vm1486_vm7, %v1469_v43, %v1471_v33  ;;  %v1754_v14 = vld [vmem:[%s5155_s1 + $0x10] sm:$0xff] }
 0x401   : > { %2501 = vrot.lane.b32.xlu0 %v2479_v25, %s3432_s15  ;;  %1887 = vmatpush2.msra.mxu0 %v1489_v42  ;;  %v2963_v42 = vmul.f32 %v4554_v48, %v3685_v19 }
 0x402   : > { %v4684_v44 = vpop.permute.xlu1 %2794 }
 0x403   : > { %v4688_v36 = vpop.permute.xlu0 %2796 }
 0x404   : > { %2990 = vrot.lane.b32.xlu1 %v2966_v49, %s3449_s26  ;;  %v4715_v49 = vsel %vm524_vm3, %v4594_v62, %v4600_v22  ;;  %vm949_vm3 = vcmask 908288  }
 0x405   : > { %2499 = vrot.lane.b32.xlu0 %v2478_v26, %s3432_s15  ;;  %v2398_v26 = vmul.f32 0.0, %v4600_v22  ;;  %v2961_v22 = vmul.f32 %v4661_v18, %v3577_v39  ;;  %v3353_v18 = vld [vmem:[%s5157_s3 + $0x22] ss:$8 sm:$0x3] }
 0x406   : > { %v1465_v4 = vpop.permute.xlu1 %1464 }
 0x407   : > { %v1467_v3 = vpop.permute.xlu0 %1466 }
 0x408   : > { %2988 = vrot.lane.b32.xlu1 %v2965_v32, %s3449_s26  ;;  %v1488_v33 = vsel %vm1486_vm7, %v1465_v4, %v1467_v3 }
 0x409   : > { %2495 = vrot.lane.b32.xlu0 %v2476_v10, %s3432_s15  ;;  %1888 = vmatprep.subr.mxu0 %v1488_v33  ;;  %v2404_v10 = vmul.f32 %v4715_v49, %v3599_v46 }
 0x40a   : > { %v1463_v5 = vpop.permute.xlu1 %1462 }
 0x40b   : > { %v2261_v43 = vpop.permute.xlu0 %2260  ;;  %v1487_v30 = vsel %vm1486_vm7, %v1463_v5, %v1465_v4 }
 0x40c   : > { %2986 = vrot.lane.b32.xlu1 %v2964_v1, %s3449_s26  ;;  %1889 = vmatpush2.msra.mxu0 %v1487_v30  ;;  %v2403_v30 = vmul.f32 %v4594_v62, %v3704_v24 }
 0x40d   : > { %2493 = vrot.lane.b32.xlu0 %v2475_v15, %s3432_s15  ;;  %1891 = vmatmul.mubr.f32.vlgmr.msra.gmra.mxu0 %v1754_v14 }
 0x40e   : > { %v2273_v25 = vpop.permute.xlu1 %2272 }
 0x40f   : > { %v2271_v4 = vpop.permute.xlu0 %2270  ;;  %v2281_v59 = vsel %vm391_vm8, %v2273_v25, %v2261_v43 }
 0x410   : > { %v2280_v32 = vsel %vm391_vm8, %v2271_v4, %v2273_v25  ;;  %2984 = vrot.lane.b32.xlu1 %v2963_v42, %s3449_s26  ;;  %2686 = vmatprep.subr.mxu0 %v2281_v59  ;;  %v2960_v42 = vmul.f32 %v4554_v48, %v3690_v20  ;;  %v2402_v59 = vmul.f32 %v4715_v49, %v3605_v47 }
 0x411   : > { %2418 = vrot.lane.b32.xlu0 %v2398_v26, %s3431_s14  ;;  %2687 = vmatpush1.msra.mxu0 %v2280_v32  ;;  %v2200_v32 = vrot.slane %v3353_v18, %v3505_v8  ;;  %v4747_v48 = vsel %vm896_vm10, %v4617_v21, %v4621_v16  ;;  %vm763_vm10 = vcmask 965632  }
 0x412   : > { %v2269_v3 = vpop.permute.xlu1 %2268 }
 0x413   : > { %v2267_v33 = vpop.permute.xlu0 %2266  ;;  %v2279_v5 = vsel %vm391_vm8, %v2269_v3, %v2261_v43 }
 0x414   : > { %v2278_v1 = vsel %vm391_vm8, %v2267_v33, %v2269_v3  ;;  %2430 = vrot.lane.b32.xlu1 %v2404_v10, %s3431_s14  ;;  %2688 = vmatprep.subr.mxu0 %v2279_v5  ;;  %v2883_v3 = vmul.f32 0.0, %v4621_v16  ;;  %v2196_v5 = vrot.slane %v3353_v18, %v3507_v9  ;;  %v2889_v16 = vmul.f32 %v4747_v48, %v3599_v46 }
 0x415   : > { %2980 = vrot.lane.b32.xlu0 %v2961_v22, %s3449_s26  ;;  %2689 = vmatpush1.msra.mxu0 %v2278_v1  ;;  %v2210_v1 = vmul.f32 %v2200_v32, %v3599_v46  ;;  %v2206_v18 = vmul.f32 %v2200_v32, %v3573_v38 }
 0x416   : > { %v2265_v14 = vpop.permute.xlu1 %2264  ;;  %v2209_v8 = vmul.f32 %v2196_v5, %v3704_v24 }
 0x417   : > { %v2263_v15 = vpop.permute.xlu0 %2262  ;;  %v2277_v25 = vsel %vm391_vm8, %v2265_v14, %v2261_v43 }
 0x418   : > { %v2276_v26 = vsel %vm391_vm8, %v2263_v15, %v2265_v14  ;;  %2428 = vrot.lane.b32.xlu1 %v2403_v30, %s3431_s14  ;;  %2690 = vmatprep.subr.mxu0 %v2277_v25  ;;  %v2401_v30 = vmul.f32 %v4594_v62, %v3699_v23  ;;  %v2207_v25 = vmul.f32 %v2196_v5, %v3699_v23 }
 0x419   : > { %2978 = vrot.lane.b32.xlu0 %v2960_v42, %s3449_s26  ;;  %2691 = vmatpush1.msra.mxu0 %v2276_v26 }
 0x41a   : > { %v2259_v4 = vpop.permute.xlu1 %2258 }
 0x41b   : > { %v2257_v10 = vpop.permute.xlu0 %2256  ;;  %v2275_v33 = vsel %vm391_vm8, %v2259_v4, %v2261_v43  ;;  %v2208_v43 = vmul.f32 %v2200_v32, %v3605_v47 }
 0x41c   : > { %v2274_v22 = vsel %vm391_vm8, %v2257_v10, %v2259_v4  ;;  %2426 = vrot.lane.b32.xlu1 %v2402_v59, %s3431_s14  ;;  %2692 = vmatprep.subr.mxu0 %v2275_v33  ;;  %v955_v4 = vsel %vm949_vm3, %v4228_v13, %v4232_v50  ;;  %v2205_v59 = vmul.f32 %v2196_v5, %v3685_v19  ;;  %vm856_vm8 = vcmask 916480  }
 0x41d   : > { %2903 = vrot.lane.b32.xlu0 %v2883_v3, %s3443_s25  ;;  %2693 = vmatpush1.msra.mxu0 %v2274_v22  ;;  %v2888_v3 = vmul.f32 %v4617_v21, %v3704_v24  ;;  %v954_v33 = vsel %vm949_vm3, %v4221_v28, %v4228_v13  ;;  %v2400_v50 = vmul.f32 %v4715_v49, %v3573_v38 }
 0x41e   : > { %2694 = vmatprep.subr.mxu0 %v2210_v1  ;;  %v946_v14 = vpop.permute.xlu1 %945  ;;  %v953_v22 = vsel %vm949_vm3, %v4212_v17, %v4218_v40  ;;  %v2203_v1 = vmul.f32 %v2196_v5, %v3690_v20  ;;  %v952_v13 = vsel %vm949_vm3, %v4209_v57, %v4212_v17  ;;  %v951_v40 = vsel %vm949_vm3, %v4195_v12, %v4199_v56 }
 0x41f   : > { %v948_v9 = vpop.permute.xlu0 %947  ;;  %2695 = vmatpush1.msra.mxu0 %v2209_v8  ;;  %v956_v42 = vsel %vm949_vm3, %v4247_v7, %v946_v14  ;;  %v2204_v7 = vmul.f32 %v2200_v32, %v3577_v39  ;;  %v2887_v5 = vmul.f32 %v4747_v48, %v3605_v47  ;;  %v2399_v17 = vmul.f32 %v4594_v62, %v3685_v19 }
 0x420   : > { %2915 = vrot.lane.b32.xlu1 %v2889_v16, %s3443_s25  ;;  %2696 = vmatprep.subr.mxu0 %v2208_v43  ;;  %v957_v15 = vsel %vm949_vm3, %v946_v14, %v948_v9  ;;  %v950_v16 = vsel %vm949_vm3, %v4177_v52, %v4195_v12  ;;  %v864_v56 = vsel %vm856_vm8, %v4016_v27, %v4022_v11 }
 0x421   : > { %2424 = vrot.lane.b32.xlu0 %v2401_v30, %s3431_s14  ;;  %1947 = vmatprep.subr.mxu1 %v957_v15  ;;  %v863_v52 = vsel %vm856_vm8, %v4014_v54, %v4016_v27  ;;  %v2886_v43 = vmul.f32 %v4617_v21, %v3699_v23  ;;  %v862_v15 = vsel %vm856_vm8, %v4006_v41, %v4008_v45 }
 0x422   : > { %2697 = vmatpush1.msra.mxu0 %v2207_v25  ;;  %1948 = vmatpush2.msra.mxu1 %v956_v42  ;;  %v2162_v26 = vpop.permute.xlu1 %2161  ;;  %v2397_v11 = vmul.f32 %v4715_v49, %v3577_v39  ;;  %v861_v54 = vsel %vm856_vm8, %v4000_v53, %v4006_v41  ;;  %v860_v27 = vsel %vm856_vm8, %v3996_v55, %v3998_v37 }
 0x423   : > { %2698 = vmatprep.subr.mxu0 %v2206_v18  ;;  %v2164_v10 = vpop.permute.xlu0 %2163  ;;  %1949 = vmatprep.subr.mxu1 %v955_v4  ;;  %v859_v45 = vsel %vm856_vm8, %v3994_v29, %v3996_v55  ;;  %v2885_v42 = vmul.f32 %v4747_v48, %v3573_v38  ;;  %v858_v53 = vsel %vm856_vm8, %v3990_v60, %v3992_v58 }
 0x424   : > { %2699 = vmatpush1.msra.mxu0 %v2205_v59  ;;  %2913 = vrot.lane.b32.xlu1 %v2888_v3, %s3443_s25  ;;  %v2173_v32 = vsel %vm2165_vm4, %v2162_v26, %v2164_v10  ;;  %v2396_v41 = vmul.f32 %v4594_v62, %v3690_v20  ;;  %v857_v29 = vsel %vm856_vm8, %v3988_v31, %v3990_v60  ;;  %v5185_v59 = vld [vmem:[#allocation19_spill] sm:$0xff]  ;;  %v5186_v10 = vld [vmem:[#allocation18_spill] sm:$0xff] }
 0x425   : > { %1950 = vmatpush2.msra.mxu1 %v954_v33  ;;  %2700 = vmatprep.subr.mxu0 %v2204_v7  ;;  %v771_v58 = vsel %vm763_vm10, %v3924_v35, %v3926_v0  ;;  %v770_v62 = vsel %vm763_vm10, %v3922_v34, %v3924_v35  ;;  %v2884_v31 = vmul.f32 %v4617_v21, %v3685_v19  ;;  %v2319_v0 = vmul.f32 0.0, %v4669_v51  ;;  %v5184_v35 = vld [vmem:[#allocation20_spill] sm:$0xff] }
 0x426   : > { %2422 = vrot.lane.b32.xlu0 %v2400_v50, %s3431_s14  ;;  %1951 = vmatprep.subr.mxu1 %v953_v22  ;;  %v2160_v28 = vpop.permute.xlu1 %2159  ;;  %v4855_v60 = vsel %vm431_vm2, %v4664_v6, %v4669_v51  ;;  %v769_v4 = vsel %vm763_vm10, %v3918_v2, %v3920_v61  ;;  %v768_v34 = vsel %vm763_vm10, %v3916_v63, %v3918_v2  ;;  %v5187_v2 = vld [vmem:[#allocation17_spill] sm:$0xff]  ;;  %v5188_v22 = vld [vmem:[#allocation16_spill] sm:$0xff] }
 0x427   : > { %2701 = vmatpush1.msra.mxu0 %v2203_v1  ;;  %1952 = vmatpush2.msra.mxu1 %v952_v13  ;;  %v2172_v8 = vsel %vm2165_vm4, %v2160_v28, %v2162_v26  ;;  %v2156_v14 = vpop.permute.xlu0 %2155  ;;  %v767_v51 = vsel %vm763_vm10, %v5185_v59, %v5184_v35  ;;  %v766_v61 = vsel %vm763_vm10, %v5186_v10, %v5185_v59  ;;  %v5189_v13 = vld [vmem:[#allocation15_spill] sm:$0xff]  ;;  %v1759_v10 = vld [vmem:[%s5155_s1 + $0x88] sm:$0xff] }
 0x428   : > { %2702 = vmatprep.subr.mxu0 %v2173_v32  ;;  %1953 = vmatprep.subr.mxu1 %v951_v40  ;;  %v2325_v33 = vmul.f32 %v4855_v60, %v3599_v46  ;;  %v765_v1 = vsel %vm763_vm10, %v5188_v22, %v5187_v2  ;;  %v2882_v32 = vmul.f32 %v4747_v48, %v3577_v39  ;;  %v5192_v48 = vld [vmem:[#allocation7_spill] sm:$0xff] }
 0x429   : > { %2911 = vrot.lane.b32.xlu1 %v2887_v5, %s3443_s25  ;;  %1954 = vmatpush2.msra.mxu1 %v950_v16  ;;  %v764_v28 = vsel %vm763_vm10, %v5189_v13, %v5188_v22  ;;  %v977_v59 = vld [vmem:[%s5155_s1 + $0x40] sm:$0xff]  ;;  %v2321_v22 = vmul.f32 %v4855_v60, %v3573_v38 }
 0x42a   : > { %2703 = vmatpush1.msra.mxu0 %v2172_v8  ;;  %2420 = vrot.lane.b32.xlu0 %v2399_v17, %s3431_s14  ;;  %v2158_v57 = vpop.permute.xlu1 %2157  ;;  %v5190_v8 = vld [vmem:[#allocation9_spill] sm:$0xff]  ;;  %v1761_v2 = vld [vmem:[%s5155_s1 + $0xc0] sm:$0xff] }
 0x42b   : > { %1955 = vmatprep.subr.mxu1 %v864_v56  ;;  %v2154_v12 = vpop.permute.xlu0 %2153  ;;  %v2171_v9 = vsel %vm2165_vm4, %v2156_v14, %v2158_v57  ;;  %v2324_v56 = vmul.f32 %v4664_v6, %v3704_v24  ;;  %v5193_v57 = vld [vmem:[#allocation10_spill] sm:$0xff] }
 0x42c   : > { %1956 = vmatpush2.msra.mxu1 %v863_v52  ;;  %v2170_v30 = vsel %vm2165_vm4, %v2154_v12, %v2156_v14  ;;  %2704 = vmatprep.subr.mxu0 %v2171_v9  ;;  %v5191_v14 = vld [vmem:[#allocation14_spill] sm:$0xff]  ;;  %v5194_v52 = vld [vmem:[#allocation13_spill] sm:$0xff] }
 0x42d   : > { %1957 = vmatprep.subr.mxu1 %v862_v15  ;;  %2909 = vrot.lane.b32.xlu1 %v2886_v43, %s3443_s25  ;;  %v678_v40 = vsel %vm670_vm14, %v5191_v14, %v5190_v8  ;;  %v677_v16 = vsel %vm670_vm14, %v5192_v48, %v5191_v14  ;;  %v676_v12 = vsel %vm670_vm14, %v5194_v52, %v5193_v57 }
 0x42e   : > { %1958 = vmatpush2.msra.mxu1 %v861_v54  ;;  %2416 = vrot.lane.b32.xlu0 %v2397_v11, %s3431_s14  ;;  %v2150_v25 = vpop.permute.xlu1 %2149  ;;  %v2881_v43 = vmul.f32 %v4617_v21, %v3690_v20  ;;  %v5196_v11 = vld [vmem:[#allocation5_spill] sm:$0xff]  ;;  %v5197_v54 = vld [vmem:[#allocation12_spill] sm:$0xff]  ;;  %v5198_v21 = vld [vmem:[#allocation3_spill] sm:$0xff]  ;;  %v2320_v48 = vmul.f32 %v4664_v6, %v3685_v19 }
 0x42f   : > { %1959 = vmatprep.subr.mxu1 %v860_v27  ;;  %2705 = vmatpush1.msra.mxu0 %v2170_v30  ;;  %v2152_v49 = vpop.permute.xlu0 %2151  ;;  %v5195_v30 = vld [vmem:[#allocation8_spill] sm:$0xff]  ;;  %v674_v27 = vsel %vm670_vm14, %v5197_v54, %v5196_v11 }
 0x430   : > { %1960 = vmatpush2.msra.mxu1 %v859_v45  ;;  %v2169_v37 = vsel %vm2165_vm4, %v2150_v25, %v2152_v49  ;;  %v675_v15 = vsel %vm670_vm14, %v5195_v30, %v5194_v52  ;;  %v673_v45 = vsel %vm670_vm14, %v5198_v21, %v5197_v54 }
 0x431   : > { %1961 = vmatprep.subr.mxu1 %v858_v53  ;;  %2907 = vrot.lane.b32.xlu1 %v2885_v42, %s3443_s25  ;;  %v2323_v53 = vmul.f32 %v4855_v60, %v3605_v47 }
 0x432   : > { %1962 = vmatpush2.msra.mxu1 %v857_v29  ;;  %2414 = vrot.lane.b32.xlu0 %v2396_v41, %s3431_s14  ;;  %v2148_v55 = vpop.permute.xlu1 %2147  ;;  %v4917_v41 = vsel %vm803_vm9, %v4684_v44, %v4688_v36  ;;  %v5199_v29 = vld [vmem:[#allocation6_spill] sm:$0xff] }
 0x433   : > { %1963 = vmatprep.subr.mxu1 %v771_v58  ;;  %2706 = vmatprep.subr.mxu0 %v2169_v37  ;;  %v2168_v18 = vsel %vm2165_vm4, %v2148_v55, %v2150_v25  ;;  %v2144_v26 = vpop.permute.xlu0 %2143  ;;  %v2804_v37 = vmul.f32 0.0, %v4688_v36  ;;  %v5200_v58 = vld [vmem:[#allocation11_spill] sm:$0xff] }
 0x434   : > { %1964 = vmatpush2.msra.mxu1 %v770_v62  ;;  %2707 = vmatpush1.msra.mxu0 %v2168_v18  ;;  %v672_v55 = vsel %vm670_vm14, %v5200_v58, %v5199_v29  ;;  %v974_v62 = vld [vmem:[%s5155_s1] sm:$0xff]  ;;  %v1757_v18 = vld [vmem:[%s5155_s1 + $0x50] sm:$0xff] }
 0x435   : > { %1965 = vmatprep.subr.mxu1 %v769_v4  ;;  %2905 = vrot.lane.b32.xlu1 %v2884_v31, %s3443_s25  ;;  %v1756_v31 = vld [vmem:[%s5155_s1 + $0x48] sm:$0xff] }
 0x436   : > { %1966 = vmatpush2.msra.mxu1 %v768_v34  ;;  %2339 = vrot.lane.b32.xlu0 %v2319_v0, %s3430_s13  ;;  %v2146_v3 = vpop.permute.xlu1 %2145  ;;  %v2810_v34 = vmul.f32 %v4917_v41, %v3599_v46  ;;  %v976_v46 = vld [vmem:[%s5155_s1 + $0x38] sm:$0xff] }
 0x437   : > { %1967 = vmatprep.subr.mxu1 %v767_v51  ;;  %v2142_v7 = vpop.permute.xlu0 %2141  ;;  %v2167_v50 = vsel %vm2165_vm4, %v2144_v26, %v2146_v3  ;;  %1896 = vmatprep.mubr.f32.mxu0 %v1757_v18  ;;  %v2322_v3 = vmul.f32 %v4664_v6, %v3699_v23 }
 0x438   : > { %1968 = vmatpush2.msra.mxu1 %v766_v61  ;;  %v2166_v63 = vsel %vm2165_vm4, %v2142_v7, %v2144_v26  ;;  %2708 = vmatprep.subr.mxu0 %v2167_v50  ;;  %v5201_v26 = vld [vmem:[#allocation4_spill] sm:$0xff]  ;;  %v1758_v61 = vld [vmem:[%s5155_s1 + $0x80] sm:$0xff]  ;;  %v979_v7 = vld [vmem:[%s5155_s1 + $0x78] sm:$0xff] }
 0x439   : > { %1969 = vmatprep.subr.mxu1 %v765_v1  ;;  %2351 = vrot.lane.b32.xlu1 %v2325_v33, %s3430_s13  ;;  %v671_v36 = vsel %vm670_vm14, %v5201_v26, %v5200_v58  ;;  %v3458_v58 = vmov 0  }
 0x43a   : > { %1970 = vmatpush2.msra.mxu1 %v764_v28  ;;  %2901 = vrot.lane.b32.xlu0 %v2882_v32, %s3443_s25  ;;  %v2069_v5 = vpop.permute.xlu1 %2068  ;;  %v978_v32 = vld [vmem:[%s5155_s1 + $0x70] sm:$0xff]  ;;  %v1760_v28 = vld [vmem:[%s5155_s1 + $0xb8] sm:$0xff] }
 0x43b   : > { %1971 = vmatprep.subr.mxu1 %v678_v40  ;;  %2709 = vmatpush1.msra.mxu0 %v2166_v63  ;;  %v2071_v17 = vpop.permute.xlu0 %2070  ;;  %v2809_v63 = vmul.f32 %v4684_v44, %v3704_v24  ;;  %v981_v24 = vld [vmem:[%s5155_s1 + $0xb0] sm:$0xff]  ;;  %v2808_v40 = vmul.f32 %v4917_v41, %v3605_v47 }
 0x43c   : > { %1972 = vmatpush2.msra.mxu1 %v677_v16  ;;  %v2080_v9 = vsel %vm2072_vm11, %v2069_v5, %v2071_v17  ;;  %1897 = vmatmul.mubr.f32.gmra.mxu0 %v1756_v31  ;;  %v980_v16 = vld [vmem:[%s5155_s1 + $0xa8] sm:$0xff] }
 0x43d   : > { %1973 = vmatprep.subr.mxu1 %v676_v12  ;;  %2349 = vrot.lane.b32.xlu1 %v2324_v56, %s3430_s13  ;;  %v2807_v56 = vmul.f32 %v4684_v44, %v3699_v23  ;;  %v2318_v12 = vmul.f32 %v4855_v60, %v3577_v39  ;;  %v2806_v23 = vmul.f32 %v4917_v41, %v3573_v38 }
 0x43e   : > { %1974 = vmatpush2.msra.mxu1 %v675_v15  ;;  %2899 = vrot.lane.b32.xlu0 %v2881_v43, %s3443_s25  ;;  %v2067_v25 = vpop.permute.xlu1 %2066  ;;  %v2317_v15 = vmul.f32 %v4664_v6, %v3690_v20  ;;  %v2803_v38 = vmul.f32 %v4917_v41, %v3577_v39  ;;  %v3159_v41 = vld [vmem:[%s5156_s2 + $0x8] sm:$0xff] }
 0x43f   : > { %1975 = vmatprep.subr.mxu1 %v674_v27  ;;  %2710 = vmatprep.subr.mxu0 %v2080_v9  ;;  %v2079_v49 = vsel %vm2072_vm11, %v2067_v25, %v2069_v5  ;;  %v2063_v42 = vpop.permute.xlu0 %2062  ;;  %v2615_v5 = vld [vmem:[%s5155_s1 + $0x28] sm:$0xff]  ;;  %v3457_v9 = vmov 0.0   ;;  %v2805_v25 = vmul.f32 %v4684_v44, %v3685_v19 }
 0x440   : > { %1976 = vmatpush2.msra.mxu1 %v673_v45  ;;  %2711 = vmatpush1.msra.mxu0 %v2079_v49 }
 0x441   : > { %1977 = vmatprep.subr.mxu1 %v672_v55  ;;  %2347 = vrot.lane.b32.xlu1 %v2323_v53, %s3430_s13  ;;  %v3158_v53 = vld [vmem:[%s5156_s2] sm:$0xff] }
 0x442   : > { %1978 = vmatpush2.msra.mxu1 %v671_v36  ;;  %2824 = vrot.lane.b32.xlu0 %v2804_v37, %s3436_s28  ;;  %v2065_v0 = vpop.permute.xlu1 %2064 }
 0x443   : > { %v2061_v4 = vpop.permute.xlu0 %2060  ;;  %v2078_v35 = vsel %vm2072_vm11, %v2063_v42, %v2065_v0  ;;  %1980 = vmatmul.mubr.f32.vlgmr.msra.gmra.mxu1 %v974_v62  ;;  %1902 = vmatprep.mubr.f32.mxu0 %v1759_v10  ;;  %v3160_v62 = vld [vmem:[%s5156_s2 + $0x10] sm:$0xff] }
 0x444   : > { %v2077_v51 = vsel %vm2072_vm11, %v2061_v4, %v2063_v42  ;;  %2712 = vmatprep.subr.mxu0 %v2078_v35  ;;  %1985 = vmatprep.mubr.f32.mxu1 %v977_v59  ;;  %v2802_v42 = vmul.f32 %v4684_v44, %v3690_v20  ;;  %v3161_v44 = vld [vmem:[%s5156_s2 + $0x18] sm:$0xff] }
 0x445   : > { %2836 = vrot.lane.b32.xlu1 %v2810_v34, %s3436_s28  ;;  %2713 = vmatpush1.msra.mxu0 %v2077_v51 }
 0x446   : > { %2345 = vrot.lane.b32.xlu0 %v2322_v3, %s3430_s13  ;;  %v2057_v33 = vpop.permute.xlu1 %2056  ;;  %1903 = vmatmul.mubr.f32.gmra.mxu0 %v1758_v61 }
 0x447   : > { %v2059_v50 = vpop.permute.xlu0 %2058  ;;  %1986 = vmatmul.mubr.f32.gmra.mxu1 %v976_v46  ;;  %1908 = vmatprep.mubr.f32.mxu0 %v1761_v2 }
 0x448   : > { %v2076_v1 = vsel %vm2072_vm11, %v2057_v33, %v2059_v50  ;;  %1991 = vmatprep.mubr.f32.mxu1 %v979_v7  ;;  %3414 = vset.pattern.permute.xlu0 %v3458_v58 }
 0x449   : > { %2834 = vrot.lane.b32.xlu1 %v2809_v63, %s3436_s28  ;;  %2714 = vmatprep.subr.mxu0 %v2076_v1 }
 0x44a   : > { %2343 = vrot.lane.b32.xlu0 %v2321_v22, %s3430_s13  ;;  %v2055_v13 = vpop.permute.xlu1 %2054  ;;  %1909 = vmatmul.mubr.f32.gmra.mxu0 %v1760_v28 }
 0x44b   : > { %v2075_v8 = vsel %vm2072_vm11, %v2055_v13, %v2057_v33  ;;  %v2051_v14 = vpop.permute.xlu0 %2050  ;;  %1992 = vmatmul.mubr.f32.gmra.mxu1 %v978_v32  ;;  %2750 = vmatprep.mubr.f32.mxu0 %v2615_v5 }
 0x44c   : > { %2715 = vmatpush1.msra.mxu0 %v2075_v8  ;;  %1997 = vmatprep.mubr.f32.mxu1 %v981_v24 }
 0x44d   : > { %2832 = vrot.lane.b32.xlu1 %v2808_v40, %s3436_s28 }
 0x44e   : > { %2341 = vrot.lane.b32.xlu0 %v2320_v48, %s3430_s13  ;;  %v2053_v47 = vpop.permute.xlu1 %2052  ;;  %3415 = vset.pattern.permute.xlu1 %v3458_v58 }
 0x44f   : > { %v2049_v17 = vpop.permute.xlu0 %2048  ;;  %v2074_v57 = vsel %vm2072_vm11, %v2051_v14, %v2053_v47  ;;  %1998 = vmatmul.mubr.f32.gmra.mxu1 %v980_v16 }
 0x450   : > { %v2073_v52 = vsel %vm2072_vm11, %v2049_v17, %v2051_v14  ;;  %2716 = vmatprep.subr.mxu0 %v2074_v57  ;;  %3125 = vmatprep.mubr.f32.mxu1 %v3457_v9 }
 0x451   : > { %2830 = vrot.lane.b32.xlu1 %v2807_v56, %s3436_s28  ;;  %2717 = vmatpush1.msra.mxu0 %v2073_v52 }
 0x452   : > { %2337 = vrot.lane.b32.xlu0 %v2318_v12, %s3430_s13  ;;  %v2577_v43 = vpop.permute.xlu1 %2576 }
 0x453   : > { %v2589_v30 = vpop.permute.xlu0 %2588 }
 0x454   : > { %v2597_v11 = vsel %vm763_vm10, %v2589_v30, %v2577_v43 }
 0x455   : > { %2828 = vrot.lane.b32.xlu1 %v2806_v23, %s3436_s28  ;;  %2718 = vmatprep.subr.mxu0 %v2597_v11 }
 0x456   : > { %2335 = vrot.lane.b32.xlu0 %v2317_v15, %s3430_s13  ;;  %v2587_v60 = vpop.permute.xlu1 %2586 }
 0x457   : > { %v2596_v54 = vsel %vm763_vm10, %v2587_v60, %v2589_v30  ;;  %v2585_v27 = vpop.permute.xlu0 %2584 }
 0x458   : > { %2719 = vmatpush2.msra.mxu0 %v2596_v54  ;;  %v2595_v6 = vsel %vm763_vm10, %v2585_v27, %v2577_v43 }
 0x459   : > { %2826 = vrot.lane.b32.xlu1 %v2805_v25, %s3436_s28  ;;  %2720 = vmatprep.subr.mxu0 %v2595_v6 }
 0x45a   : > { %2822 = vrot.lane.b32.xlu0 %v2803_v38, %s3436_s28  ;;  %v2583_v21 = vpop.permute.xlu1 %2582 }
 0x45b   : > { %v2594_v45 = vsel %vm763_vm10, %v2583_v21, %v2585_v27  ;;  %v2581_v49 = vpop.permute.xlu0 %2580 }
 0x45c   : > { %2721 = vmatpush2.msra.mxu0 %v2594_v45  ;;  %v2593_v19 = vsel %vm763_vm10, %v2581_v49, %v2577_v43 }
 0x45d   : > { %2820 = vrot.lane.b32.xlu1 %v2802_v42, %s3436_s28  ;;  %2722 = vmatprep.subr.mxu0 %v2593_v19 }
 0x45e   : > { %v2579_v39 = vpop.permute.xlu1 %2578  ;;  %3164 = vperm.xlu0 %3414, %v3158_v53  }
 0x45f   : > { %v2592_v37 = vsel %vm763_vm10, %v2579_v39, %v2581_v49  ;;  %v2575_v29 = vpop.permute.xlu0 %2574 }
 0x460   : > { %2723 = vmatpush2.msra.mxu0 %v2592_v37  ;;  %v2591_v20 = vsel %vm763_vm10, %v2575_v29, %v2577_v43 }
 0x461   : > { %2724 = vmatprep.subr.mxu0 %v2591_v20  ;;  %3169 = vperm.xlu1 %3415, %v3159_v41  }
 0x462   : > { %v2573_v55 = vpop.permute.xlu1 %2572  ;;  %3179 = vperm.xlu0 %3414, %v3161_v44  }
 0x463   : > { %v2590_v18 = vsel %vm763_vm10, %v2573_v55, %v2575_v29  ;;  %v2498_v26 = vpop.permute.xlu0 %2497 }
 0x464   : > { %2725 = vmatpush2.msra.mxu0 %v2590_v18 }
 0x465   : > { %3174 = vperm.xlu1 %3415, %v3160_v62  }
 0x466   : > { %v2510_v36 = vpop.permute.xlu1 %2509 }
 0x467   : > { %v2508_v31 = vpop.permute.xlu0 %2507  ;;  %v2518_v0 = vsel %vm670_vm14, %v2510_v36, %v2498_v26 }
 0x468   : > { %v2517_v4 = vsel %vm670_vm14, %v2508_v31, %v2510_v36  ;;  %2726 = vmatprep.subr.mxu0 %v2518_v0 }
 0x469   : > { %2727 = vmatpush2.msra.mxu0 %v2517_v4 }
 0x46a   : > { %v2506_v34 = vpop.permute.xlu1 %2505 }
 0x46b   : > { %v2983_v35 = vpop.permute.xlu0 %2982  ;;  %v2516_v59 = vsel %vm670_vm14, %v2506_v34, %v2498_v26 }
 0x46c   : > { %2728 = vmatprep.subr.mxu0 %v2516_v59 }
 0x46e   : > { %v2995_v51 = vpop.permute.xlu1 %2994 }
 0x46f   : > { %v2504_v3 = vpop.permute.xlu0 %2503  ;;  %v3003_v10 = vsel %vm1114_vm0, %v2995_v51, %v2983_v35 }
 0x470   : > { %v2515_v46 = vsel %vm670_vm14, %v2504_v3, %v2506_v34  ;;  %3069 = vmatprep.subr.mxu1 %v3003_v10 }
 0x471   : > { %2729 = vmatpush2.msra.mxu0 %v2515_v46 }
 0x472   : > { %v2993_v61 = vpop.permute.xlu1 %2992 }
 0x473   : > { %v3002_v7 = vsel %vm1114_vm0, %v2993_v61, %v2995_v51  ;;  %v2502_v33 = vpop.permute.xlu0 %2501 }
 0x474   : > { %3070 = vmatpush1.msra.mxu1 %v3002_v7  ;;  %v2514_v50 = vsel %vm670_vm14, %v2502_v33, %v2498_v26 }
 0x475   : > { %2730 = vmatprep.subr.mxu0 %v2514_v50 }
 0x476   : > { %v2991_v63 = vpop.permute.xlu1 %2990 }
 0x477   : > { %v2500_v2 = vpop.permute.xlu0 %2499  ;;  %v3001_v22 = vsel %vm1114_vm0, %v2991_v63, %v2983_v35 }
 0x478   : > { %v2513_v1 = vsel %vm670_vm14, %v2500_v2, %v2502_v33  ;;  %3071 = vmatprep.subr.mxu1 %v3001_v22 }
 0x479   : > { %2731 = vmatpush2.msra.mxu0 %v2513_v1 }
 0x47a   : > { %v2989_v32 = vpop.permute.xlu1 %2988 }
 0x47b   : > { %v3000_v24 = vsel %vm1114_vm0, %v2989_v32, %v2991_v63  ;;  %v2496_v13 = vpop.permute.xlu0 %2495 }
 0x47c   : > { %3072 = vmatpush1.msra.mxu1 %v3000_v24  ;;  %v2512_v28 = vsel %vm670_vm14, %v2496_v13, %v2498_v26 }
 0x47d   : > { %2732 = vmatprep.subr.mxu0 %v2512_v28 }
 0x47e   : > { %v2987_v8 = vpop.permute.xlu1 %2986 }
 0x47f   : > { %v2494_v14 = vpop.permute.xlu0 %2493  ;;  %v2999_v40 = vsel %vm1114_vm0, %v2987_v8, %v2983_v35 }
 0x480   : > { %v2511_v5 = vsel %vm670_vm14, %v2494_v14, %v2496_v13  ;;  %3073 = vmatprep.subr.mxu1 %v2999_v40 }
 0x481   : > { %2733 = vmatpush2.msra.mxu0 %v2511_v5 }
 0x482   : > { %v2985_v48 = vpop.permute.xlu1 %2984 }
 0x483   : > { %v2998_v16 = vsel %vm1114_vm0, %v2985_v48, %v2987_v8  ;;  %v2419_v47 = vpop.permute.xlu0 %2418 }
 0x484   : > { %3074 = vmatpush1.msra.mxu1 %v2998_v16 }
 0x486   : > { %v2431_v17 = vpop.permute.xlu1 %2430 }
 0x487   : > { %v2981_v56 = vpop.permute.xlu0 %2980  ;;  %v2439_v57 = vsel %vm577_vm5, %v2431_v17, %v2419_v47 }
 0x488   : > { %2734 = vmatprep.subr.mxu0 %v2439_v57  ;;  %v2997_v52 = vsel %vm1114_vm0, %v2981_v56, %v2983_v35 }
 0x489   : > { %3075 = vmatprep.subr.mxu1 %v2997_v52  ;;  %v2617_v52 = vld [vmem:[%s5155_s1 + $0x60] sm:$0xff] }
 0x48a   : > { %v2429_v12 = vpop.permute.xlu1 %2428 }
 0x48b   : > { %v2438_v43 = vsel %vm577_vm5, %v2429_v12, %v2431_v17  ;;  %v2979_v30 = vpop.permute.xlu0 %2978 }
 0x48c   : > { %v2996_v23 = vsel %vm1114_vm0, %v2979_v30, %v2981_v56  ;;  %2735 = vmatpush2.msra.mxu0 %v2438_v43  ;;  %v2614_v56 = vld [vmem:[%s5155_s1 + $0x20] sm:$0xff] }
 0x48d   : > { %3076 = vmatpush1.msra.mxu1 %v2996_v23  ;;  %v2616_v23 = vld [vmem:[%s5155_s1 + $0x58] sm:$0xff] }
 0x48e   : > { %v2427_v15 = vpop.permute.xlu1 %2426 }
 0x48f   : > { %v2904_v11 = vpop.permute.xlu0 %2903  ;;  %v2437_v60 = vsel %vm577_vm5, %v2427_v15, %v2419_v47 }
 0x490   : > { %2736 = vmatprep.subr.mxu0 %v2437_v60 }
 0x492   : > { %v2916_v54 = vpop.permute.xlu1 %2915 }
 0x493   : > { %v2425_v27 = vpop.permute.xlu0 %2424  ;;  %v2924_v25 = vsel %vm949_vm3, %v2916_v54, %v2904_v11 }
 0x494   : > { %v2436_v38 = vsel %vm577_vm5, %v2425_v27, %v2427_v15  ;;  %3077 = vmatprep.subr.mxu1 %v2924_v25  ;;  %v2618_v25 = vld [vmem:[%s5155_s1 + $0x90] sm:$0xff] }
 0x495   : > { %2737 = vmatpush2.msra.mxu0 %v2436_v38  ;;  %v2621_v38 = vld [vmem:[%s5155_s1 + $0xd0] sm:$0xff] }
 0x496   : > { %v2914_v6 = vpop.permute.xlu1 %2913 }
 0x497   : > { %v2923_v21 = vsel %vm949_vm3, %v2914_v6, %v2916_v54  ;;  %v3020_v54 = vld [vmem:[%s5155_s1 + $0x30] sm:$0xff]  ;;  %v3021_v6 = vld [vmem:[%s5155_s1 + $0x68] sm:$0xff] }
 0x498   : > { %v2423_v45 = vpop.permute.xlu0 %2422  ;;  %3078 = vmatpush1.msra.mxu1 %v2923_v21  ;;  %v2620_v21 = vld [vmem:[%s5155_s1 + $0xc8] sm:$0xff] }
 0x499   : > { %v2435_v49 = vsel %vm577_vm5, %v2423_v45, %v2419_v47 }
 0x49a   : > { %2738 = vmatprep.subr.mxu0 %v2435_v49  ;;  %v3023_v49 = vld [vmem:[%s5155_s1 + $0xd8] sm:$0xff] }
 0x49b   : > { %v2912_v42 = vpop.permute.xlu1 %2911 }
 0x49c   : > { %v2421_v19 = vpop.permute.xlu0 %2420  ;;  %v2922_v39 = vsel %vm949_vm3, %v2912_v42, %v2904_v11 }
 0x49d   : > { %v2434_v53 = vsel %vm577_vm5, %v2421_v19, %v2423_v45  ;;  %3079 = vmatprep.subr.mxu1 %v2922_v39  ;;  %v3022_v45 = vld [vmem:[%s5155_s1 + $0xa0] sm:$0xff] }
 0x49e   : > { %2739 = vmatpush2.msra.mxu0 %v2434_v53 }
 0x49f   : > { %v2910_v41 = vpop.permute.xlu1 %2909 }
 0x4a0   : > { %v2921_v37 = vsel %vm949_vm3, %v2910_v41, %v2912_v42  ;;  %v2417_v29 = vpop.permute.xlu0 %2416 }
 0x4a1   : > { %3080 = vmatpush1.msra.mxu1 %v2921_v37  ;;  %v2433_v58 = vsel %vm577_vm5, %v2417_v29, %v2419_v47 }
 0x4a2   : > { %2740 = vmatprep.subr.mxu0 %v2433_v58 }
 0x4a3   : > { %v2908_v20 = vpop.permute.xlu1 %2907 }
 0x4a4   : > { %v2415_v44 = vpop.permute.xlu0 %2414  ;;  %v2920_v55 = vsel %vm949_vm3, %v2908_v20, %v2904_v11 }
 0x4a5   : > { %v2432_v62 = vsel %vm577_vm5, %v2415_v44, %v2417_v29  ;;  %3081 = vmatprep.subr.mxu1 %v2920_v55  ;;  %vm3048_vm5 = vcmask 785408  }
 0x4a6   : > { %2741 = vmatpush2.msra.mxu0 %v2432_v62 }
 0x4a7   : > { %v2906_v18 = vpop.permute.xlu1 %2905 }
 0x4a8   : > { %v2919_v26 = vsel %vm949_vm3, %v2906_v18, %v2908_v20  ;;  %v2340_v36 = vpop.permute.xlu0 %2339 }
 0x4a9   : > { %3082 = vmatpush1.msra.mxu1 %v2919_v26 }
 0x4ab   : > { %v2352_v31 = vpop.permute.xlu1 %2351 }
 0x4ac   : > { %v2902_v0 = vpop.permute.xlu0 %2901  ;;  %v2360_v4 = vsel %vm484_vm6, %v2352_v31, %v2340_v36 }
 0x4ad   : > { %2742 = vmatprep.subr.mxu0 %v2360_v4  ;;  %v2918_v34 = vsel %vm949_vm3, %v2902_v0, %v2904_v11  ;;  %v2619_v11 = vld [vmem:[%s5155_s1 + $0x98] sm:$0xff] }
 0x4ae   : > { %3083 = vmatprep.subr.mxu1 %v2918_v34 }
 0x4af   : > { %v2350_v35 = vpop.permute.xlu1 %2349 }
 0x4b0   : > { %v2359_v59 = vsel %vm484_vm6, %v2350_v35, %v2352_v31  ;;  %v2900_v51 = vpop.permute.xlu0 %2899 }
 0x4b1   : > { %v2917_v3 = vsel %vm949_vm3, %v2900_v51, %v2902_v0  ;;  %2743 = vmatpush2.msra.mxu0 %v2359_v59 }
 0x4b2   : > { %3084 = vmatpush1.msra.mxu1 %v2917_v3 }
 0x4b3   : > { %v2348_v10 = vpop.permute.xlu1 %2347 }
 0x4b4   : > { %v2825_v46 = vpop.permute.xlu0 %2824  ;;  %v2358_v61 = vsel %vm484_vm6, %v2348_v10, %v2340_v36 }
 0x4b5   : > { %2744 = vmatprep.subr.mxu0 %v2358_v61 }
 0x4b7   : > { %v2837_v7 = vpop.permute.xlu1 %2836 }
 0x4b8   : > { %v2346_v33 = vpop.permute.xlu0 %2345  ;;  %v2845_v50 = vsel %vm856_vm8, %v2837_v7, %v2825_v46 }
 0x4b9   : > { %v2357_v63 = vsel %vm484_vm6, %v2346_v33, %v2348_v10  ;;  %3085 = vmatprep.subr.mxu1 %v2845_v50 }
 0x4ba   : > { %2745 = vmatpush2.msra.mxu0 %v2357_v63 }
 0x4bb   : > { %v2835_v2 = vpop.permute.xlu1 %2834 }
 0x4bc   : > { %v2844_v22 = vsel %vm856_vm8, %v2835_v2, %v2837_v7  ;;  %v2344_v1 = vpop.permute.xlu0 %2343 }
 0x4bd   : > { %3086 = vmatpush1.msra.mxu1 %v2844_v22  ;;  %v2356_v32 = vsel %vm484_vm6, %v2344_v1, %v2340_v36 }
 0x4be   : > { %2746 = vmatprep.subr.mxu0 %v2356_v32 }
 0x4bf   : > { %v2833_v24 = vpop.permute.xlu1 %2832 }
 0x4c0   : > { %v2342_v13 = vpop.permute.xlu0 %2341  ;;  %v2843_v28 = vsel %vm856_vm8, %v2833_v24, %v2825_v46 }
 0x4c1   : > { %v2355_v8 = vsel %vm484_vm6, %v2342_v13, %v2344_v1  ;;  %3087 = vmatprep.subr.mxu1 %v2843_v28 }
 0x4c2   : > { %2747 = vmatpush2.msra.mxu0 %v2355_v8 }
 0x4c3   : > { %v2831_v14 = vpop.permute.xlu1 %2830 }
 0x4c4   : > { %v2842_v40 = vsel %vm856_vm8, %v2831_v14, %v2833_v24  ;;  %v2338_v5 = vpop.permute.xlu0 %2337 }
 0x4c5   : > { %3088 = vmatpush1.msra.mxu1 %v2842_v40  ;;  %v2354_v48 = vsel %vm484_vm6, %v2338_v5, %v2340_v36 }
 0x4c6   : > { %2748 = vmatprep.subr.mxu0 %v2354_v48 }
 0x4c7   : > { %v2829_v16 = vpop.permute.xlu1 %2828 }
 0x4c8   : > { %v2336_v47 = vpop.permute.xlu0 %2335  ;;  %v2841_v17 = vsel %vm856_vm8, %v2829_v16, %v2825_v46 }
 0x4c9   : > { %v2353_v57 = vsel %vm484_vm6, %v2336_v47, %v2338_v5  ;;  %3089 = vmatprep.subr.mxu1 %v2841_v17 }
 0x4ca   : > { %2749 = vmatpush2.msra.mxu0 %v2353_v57 }
 0x4cb   : > { %2751 = vmatmul.mubr.f32.vlgmr.msra.gmra.mxu0 %v2614_v56  ;;  %v2827_v12 = vpop.permute.xlu1 %2826 }
 0x4cc   : > { %v2840_v43 = vsel %vm856_vm8, %v2827_v12, %v2829_v16  ;;  %v2823_v30 = vpop.permute.xlu0 %2822  ;;  %2756 = vmatprep.mubr.f32.mxu0 %v2617_v52 }
 0x4cd   : > { %3090 = vmatpush1.msra.mxu1 %v2840_v43  ;;  %v2839_v15 = vsel %vm856_vm8, %v2823_v30, %v2825_v46  ;;  %v1892_v42 = vpop.f32.mrf.mxu0 }
 0x4ce   : > { %3091 = vmatprep.subr.mxu1 %v2839_v15 }
 0x4cf   : > { %2757 = vmatmul.mubr.f32.gmra.mxu0 %v2616_v23  ;;  %v2821_v60 = vpop.permute.xlu1 %2820  ;;  %v1894_v19 = vpop.f32.mrf.mxu0 }
 0x4d0   : > { %v2838_v27 = vsel %vm856_vm8, %v2821_v60, %v2823_v30  ;;  %2762 = vmatprep.mubr.f32.mxu0 %v2619_v11 }
 0x4d1   : > { %3092 = vmatpush1.msra.mxu1 %v2838_v27 }
 0x4d2   : > { %3362 = vmatmul.mubr.msk.f32.vlgmr.msra.gmra.mxu1 %vm3048_vm5, %v3020_v54 }
 0x4d3   : > { %2763 = vmatmul.mubr.f32.gmra.mxu0 %v2618_v25  ;;  %3131 = vmatprep.mubr.f32.mxu1 %v3457_v9 }
 0x4d4   : > { %2768 = vmatprep.mubr.f32.mxu0 %v2621_v38 }
 0x4d6   : > { %3363 = vmatmul.mubr.msk.f32.gmra.mxu1 %vm3048_vm5, %v3021_v6 }
 0x4d7   : > { %2769 = vmatmul.mubr.f32.gmra.mxu0 %v2620_v21  ;;  %3137 = vmatprep.mubr.f32.mxu1 %v3457_v9 }
 0x4d9   : > { %v3165_v10 = vpop.permute.xlu0 %3164 }
 0x4da   : > { %3364 = vmatmul.mubr.msk.f32.gmra.mxu1 %vm3048_vm5, %v3022_v45 }
 0x4db   : > { %3143 = vmatprep.mubr.f32.mxu1 %v3457_v9 }
 0x4dc   : > { %v3170_v63 = vpop.permute.xlu1 %3169 }
 0x4de   : > { %3365 = vmatmul.mubr.msk.f32.gmra.mxu1 %vm3048_vm5, %v3023_v49 }
 0x4e0   : > { %v3175_v12 = vpop.permute.xlu1 %3174 }
 0x4fc   : > { %v1898_v39 = vpop.f32.mrf.mxu0 }
 0x4fe   : > { %v1900_v41 = vpop.f32.mrf.mxu0 }
 0x503   : > { %v1981_v53 = vpop.f32.mrf.mxu1 }
 0x504   : > { %v1982_v0 = vadd.f32 %v1981_v53, %v1892_v42 }
 0x505   : > { %v1983_v37 = vpop.f32.mrf.mxu1 }
 0x506   : > { %v1904_v29 = vpop.f32.mrf.mxu0  ;;  %v1984_v35 = vadd.f32 %v1983_v37, %v1894_v19  ;;  %v3180_v19 = vpop.permute.xlu0 %3179 }
 0x507   : > { %v1987_v58 = vpop.f32.mrf.mxu1 }
 0x508   : > { %v1906_v20 = vpop.f32.mrf.mxu0  ;;  %v1988_v46 = vadd.f32 %v1987_v58, %v1898_v39 }
 0x509   : > { %v1989_v44 = vpop.f32.mrf.mxu1 }
 0x50a   : > { %v1910_v55 = vpop.f32.mrf.mxu0  ;;  %v1990_v2 = vadd.f32 %v1989_v44, %v1900_v41 }
 0x50b   : > { %v1993_v62 = vpop.f32.mrf.mxu1 }
 0x50c   : > { %v1912_v18 = vpop.f32.mrf.mxu0  ;;  %v1994_v28 = vadd.f32 %v1993_v62, %v1904_v29 }
 0x50d   : > { %v1995_v9 = vpop.f32.mrf.mxu1 }
 0x50e   : > { %v1996_v5 = vadd.f32 %v1995_v9, %v1906_v20 }
 0x50f   : > { %v1999_v36 = vpop.f32.mrf.mxu1 }
 0x510   : > { %v2000_v43 = vadd.f32 %v1999_v36, %v1910_v55 }
 0x511   : > { %v2001_v34 = vpop.f32.mrf.mxu1 }
 0x512   : > { %v2002_v11 = vadd.f32 %v2001_v34, %v1912_v18 }
 0x58b   : > { %v2752_v26 = vpop.f32.mrf.mxu0 }
 0x58c   : > { %v2775_v59 = vadd.f32 %v2752_v26, %v1982_v0 }
 0x58d   : > { %v2754_v31 = vpop.f32.mrf.mxu0 }
 0x58e   : > { %v2776_v61 = vadd.f32 %v2754_v31, %v1984_v35 }
 0x58f   : > { %v2758_v4 = vpop.f32.mrf.mxu0 }
 0x590   : > { %v2777_v22 = vadd.f32 %v2758_v4, %v1988_v46 }
 0x591   : > { %v2760_v51 = vpop.f32.mrf.mxu0 }
 0x592   : > { %v3127_v3 = vpop.f32.mrf.mxu1  ;;  %v2778_v8 = vadd.f32 %v2760_v51, %v1990_v2 }
 0x593   : > { %v3150_v7 = vadd.f32 %v3127_v3, %v2775_v59  ;;  %v2764_v33 = vpop.f32.mrf.mxu0 }
 0x594   : > { %v3129_v50 = vpop.f32.mrf.mxu1  ;;  %v2779_v47 = vadd.f32 %v2764_v33, %v1994_v28 }
 0x595   : > { %v3182_v1 = vadd.f32 %v3165_v10, %v3150_v7  ;;  %v3151_v32 = vadd.f32 %v3129_v50, %v2776_v61  ;;  %v2766_v24 = vpop.f32.mrf.mxu0 }
 0x596   : > { %v3133_v13 = vpop.f32.mrf.mxu1  ;;  %v2780_v30 = vadd.f32 %v2766_v24, %v1996_v5 }
 0x597   : > { %3190 = vst [vmem:[%s5129_s22] sm:$0xff] %v3182_v1  ;;  %v3183_v14 = vadd.f32 %v3165_v10, %v3151_v32  ;;  %v3152_v40 = vadd.f32 %v3133_v13, %v2777_v22  ;;  %v2770_v48 = vpop.f32.mrf.mxu0  ;;  %v3210_v20 = vmul.f32 %v3182_v1, %v3182_v1 }
 0x598   : > { %v3135_v16 = vpop.f32.mrf.mxu1  ;;  %v2781_v27 = vadd.f32 %v2770_v48, %v2000_v43 }
 0x599   : > { %3191 = vst [vmem:[%s5129_s22 + $0x8] sm:$0xff] %v3183_v14  ;;  %v3153_v17 = vadd.f32 %v3135_v16, %v2778_v8  ;;  %v3184_v56 = vadd.f32 %v3170_v63, %v3152_v40  ;;  %v3198_v57 = vadd.f32 %v3183_v14, %v3182_v1  ;;  %v2772_v60 = vpop.f32.mrf.mxu0  ;;  %v3211_v29 = vmul.f32 %v3183_v14, %v3183_v14 }
 0x59a   : > { %v3139_v52 = vpop.f32.mrf.mxu1  ;;  %v2782_v45 = vadd.f32 %v2772_v60, %v2002_v11 }
 0x59b   : > { %v3185_v23 = vadd.f32 %v3170_v63, %v3153_v17  ;;  %3192 = vst [vmem:[%s5129_s22 + $0x10] sm:$0xff] %v3184_v56  ;;  %v3154_v15 = vadd.f32 %v3139_v52, %v2779_v47  ;;  %3199 = vadd.xlane.f32.xlu1 %v3198_v57  ;;  %v3218_v55 = vadd.f32 %v3211_v29, %v3210_v20 }
 0x59c   : > { %v3141_v54 = vpop.f32.mrf.mxu1  ;;  %v3212_v9 = vmul.f32 %v3184_v56, %v3184_v56 }
 0x59d   : > { %3193 = vst [vmem:[%s5129_s22 + $0x18] sm:$0xff] %v3185_v23  ;;  %v3155_v25 = vadd.f32 %v3141_v54, %v2780_v30  ;;  %v3186_v38 = vadd.f32 %v3175_v12, %v3154_v15  ;;  %v3201_v6 = vadd.f32 %v3185_v23, %v3184_v56  ;;  %v3213_v62 = vmul.f32 %v3185_v23, %v3185_v23 }
 0x59e   : > { %v3145_v21 = vpop.f32.mrf.mxu1 }
 0x59f   : > { %v3187_v49 = vadd.f32 %v3175_v12, %v3155_v25  ;;  %3194 = vst [vmem:[%s5129_s22 + $0x20] sm:$0xff] %v3186_v38  ;;  %v3156_v42 = vadd.f32 %v3145_v21, %v2781_v27  ;;  %3202 = vadd.xlane.f32.xlu0 %v3201_v6  ;;  %v3214_v26 = vmul.f32 %v3186_v38, %v3186_v38 }
 0x5a0   : > { %v3147_v39 = vpop.f32.mrf.mxu1  ;;  %v3221_v36 = vadd.f32 %v3213_v62, %v3212_v9 }
 0x5a1   : > { %3195 = vst [vmem:[%s5129_s22 + $0x28] sm:$0xff] %v3187_v49  ;;  %v3188_v53 = vadd.f32 %v3180_v19, %v3156_v42  ;;  %v3157_v41 = vadd.f32 %v3147_v39, %v2782_v45  ;;  %v3204_v37 = vadd.f32 %v3187_v49, %v3186_v38  ;;  %v3215_v18 = vmul.f32 %v3187_v49, %v3187_v49 }
 0x5a3   : > { %3196 = vst [vmem:[%s5129_s22 + $0x30] sm:$0xff] %v3188_v53  ;;  %v3189_v58 = vadd.f32 %v3180_v19, %v3157_v41  ;;  %3205 = vadd.xlane.f32.xlu0 %v3204_v37  ;;  %v3224_v31 = vadd.f32 %v3215_v18, %v3214_v26  ;;  %v3216_v4 = vmul.f32 %v3188_v53, %v3188_v53 }
 0x5a5   : > { %3197 = vst [vmem:[%s5129_s22 + $0x38] sm:$0xff] %v3189_v58  ;;  %v3207_v44 = vadd.f32 %v3189_v58, %v3188_v53  ;;  %v3217_v0 = vmul.f32 %v3189_v58, %v3189_v58 }
 0x5a7   : > { %3208 = vadd.xlane.f32.xlu1 %v3207_v44  ;;  %3219 = vadd.xlane.f32.xlu0 %v3218_v55  ;;  %v3227_v34 = vadd.f32 %v3217_v0, %v3216_v4 }
 0x5ab   : > { %3222 = vadd.xlane.f32.xlu1 %v3221_v36  ;;  %3225 = vadd.xlane.f32.xlu0 %v3224_v31 }
 0x5af   : > { %3228 = vadd.xlane.f32.xlu1 %v3227_v34 }
 0x624   : > { %v3200_v59 = vpop.xlane.xlu1 %3199 }
 0x628   : > { %v3203_v35 = vpop.xlane.xlu0 %3202 }
 0x62c   : > { %v3206_v51 = vpop.xlane.xlu0 %3205 }
 0x630   : > { %v3220_v3 = vpop.xlane.xlu0 %3219  ;;  %v3209_v10 = vpop.xlane.xlu1 %3208 }
 0x631   : > { %v3230_v46 = vsel %vm338_vm1, %v3200_v59, %v3220_v3 }
 0x632   : > { %3234 = vst.msk [vmem:[%s237_s29] sm:$0xff] %vm431_vm2, %v3230_v46 }
 0x634   : > { %v3226_v61 = vpop.xlane.xlu0 %3225  ;;  %v3223_v7 = vpop.xlane.xlu1 %3222 }
 0x635   : > { %v3232_v33 = vsel %vm338_vm1, %v3206_v51, %v3226_v61  ;;  %v3231_v50 = vsel %vm338_vm1, %v3203_v35, %v3223_v7 }
 0x636   : > { %3236 = vst.msk [vmem:[%s237_s29 + $0x10] sm:$0xff] %vm431_vm2, %v3232_v33  ;;  %3235 = vst.msk [vmem:[%s237_s29 + $0x8] sm:$0xff] %vm431_vm2, %v3231_v50 }
 0x638   : > { %v3229_v63 = vpop.xlane.xlu1 %3228 }
 0x639   : > { %v3233_v2 = vsel %vm338_vm1, %v3209_v10, %v3229_v63 }
 0x63a   : > { %3237 = vst.msk [vmem:[%s237_s29 + $0x18] sm:$0xff] %vm431_vm2, %v3233_v2 }
 0x63b PF: > { %s16_s18 = sadd.s32 1, %s3422_s18  }
 0x63c   : > { %p13_p4 = scmp.ge.s32.totalorder %s16_s18, 4  }
 0x63e   :  { %15 = sbr.rel (!%p13_p4) target bundleno = 1 (0x1), region = 104 }

</bundles_post_ra>
